<compile_context>
chip_gen: v7x
topology: tpu7x:2x2x1
jax: 0.10.0
libtpu: 0.0.40
codegen_flags: <defaults>
</compile_context>

<pallas_src>
from functools import partial

import jax
import jax.numpy as jnp
from jax.experimental import pallas as pl
from jax.experimental.pallas import tpu as pltpu

N_PIECES = 16   # PiecewiseLin(16)
N_FUNCS = 16    # Count owns 16 PiecewiseLin modules
LANE = 128
SUBLANE = 8
MAX_TILE_ROWS = 512   # <= 512*128*4B*16 funcs ≈ 4 MiB per out buffer (fits v7x 64 MiB VMEM)


# ----------------------------- Pallas kernel ------------------------------ #
def _piecewise_lin_all_kernel(w_ref, x_ref, o_ref, *, n, n_funcs):
    """Evaluate all `n_funcs` PiecewiseLin tables on one lane-dense block.

    w_ref : SMEM (n_funcs, n+1) float32 raw (unnormalized) weights
    x_ref : VMEM (tile_rows, 128) float32 input in [0, 1]
    o_ref : VMEM (n_funcs, tile_rows, 128) float32 output
    """
    # Shared vector prologue (computed once for all 16 tables).
    x = x_ref[...]
    y = jnp.float32(n) * x
    idx = y.astype(jnp.int32)                 # trunc toward zero == torch .long()
    f = y - idx.astype(jnp.float32)           # == torch .frac() for y >= 0
    idx_c = jnp.minimum(idx, n)               # .clamp(max=n)

    for t in range(n_funcs):
        # --- scalar table math in SMEM (free filler on the scalar slots) ---
        # w = |weight|; w = w / w.sum(); csum = cumsum(w)
        wa = [jnp.abs(w_ref[t, k]) for k in range(n + 1)]
        total = wa[0]
        for k in range(1, n + 1):
            total = total + wa[k]
        inv_total = 1.0 / total               # matches reference (no zero guard)
        wn = [wa[k] * inv_total for k in range(n + 1)]
        cs = [wn[0]]
        for k in range(1, n + 1):
            cs.append(cs[-1] + wn[k])
        # w[(idx + 1).clamp(max=n)] gathered with the SAME selector as csum:
        # when idx_c == k the reference reads wn[min(k + 1, n)].
        wn_next = [wn[min(k + 1, n)] for k in range(n + 1)]

        # --- fused gather: one compare + two selects per table entry ------
        cs_acc = jnp.zeros_like(x)
        w_acc = jnp.zeros_like(x)
        for k in range(n + 1):
            sel = idx_c == k
            cs_acc = jnp.where(sel, cs[k], cs_acc)
            w_acc = jnp.where(sel, wn_next[k], w_acc)
        # `f *` hoisted out of the loop: single FMA-style epilogue.
        o_ref[t, :, :] = cs_acc + f * w_acc


# ------------------------------- wrapper ----------------------------------- #
def piecewise_lin_all(weights, x):
    """Apply all 16 PiecewiseLin tables to `x` in ONE pallas_call.

    weights : (16, 17) raw weights
    x       : arbitrary-shape float array with values in [0, 1]
    returns : (16,) + x.shape, float32
    """
    assert weights.shape == (N_FUNCS, N_PIECES + 1)
    orig_shape = x.shape

    # Flatten and pad to a lane-dense (rows, 128) slab, rows a multiple of 8.
    flat = x.reshape(-1).astype(jnp.float32)
    n_el = flat.shape[0]
    padded = pl.cdiv(n_el, LANE * SUBLANE) * LANE * SUBLANE
    flat = jnp.pad(flat, (0, padded - n_el))
    rows = padded // LANE
    x2 = flat.reshape(rows, LANE)

    # Row tiling: single tile for small inputs, 512-row tiles for large ones.
    if rows <= MAX_TILE_ROWS:
        tile_rows = rows
    else:
        new_rows = pl.cdiv(rows, MAX_TILE_ROWS) * MAX_TILE_ROWS
        if new_rows != rows:
            x2 = jnp.pad(x2, ((0, new_rows - rows), (0, 0)))
            rows = new_rows
        tile_rows = MAX_TILE_ROWS
    grid = (rows // tile_rows,)

    out = pl.pallas_call(
        partial(_piecewise_lin_all_kernel, n=N_PIECES, n_funcs=N_FUNCS),
        out_shape=jax.ShapeDtypeStruct((N_FUNCS, rows, LANE), jnp.float32),
        grid_spec=pltpu.PrefetchScalarGridSpec(
            num_scalar_prefetch=0,
            grid=grid,
            in_specs=[
                # (16, 17) weight table, whole array in SMEM for every step.
                pl.BlockSpec(memory_space=pltpu.MemorySpace.SMEM),
                # lane-dense input tile
                pl.BlockSpec((tile_rows, LANE), lambda i: (i, 0)),
            ],
            out_specs=pl.BlockSpec((N_FUNCS, tile_rows, LANE), lambda i: (0, i, 0)),
        ),
        compiler_params=pltpu.CompilerParams(
            dimension_semantics=("parallel",)),
    )(weights.astype(jnp.float32), x2)

    out = out.reshape(N_FUNCS, rows * LANE)[:, :n_el]
    return out.reshape((N_FUNCS,) + orig_shape)


# ------------------------- pure-JAX reference ------------------------------ #
def piecewise_lin_ref(weight, x):
    n = N_PIECES
    w = jnp.abs(weight)
    w = w / jnp.sum(w)
    csum = jnp.cumsum(w)
    y = n * x
    idx = y.astype(jnp.int32)
    f = y - idx.astype(jnp.float32)
    return csum[jnp.minimum(idx, n)] + f * w[jnp.minimum(idx + 1, n)]


# ------------------------------ Count module ------------------------------- #
def init_count_params(object_num):
    # 16 PiecewiseLin(16) modules; each weight is ones(17) with weight[0] = 0
    # (deterministic, exactly as in PiecewiseLin.__init__).  Stored stacked.
    w = jnp.ones((N_PIECES + 1,), jnp.float32).at[0].set(0.0)
    return {"object_num": object_num,
            "linear_function": jnp.broadcast_to(w, (N_FUNCS, N_PIECES + 1))}


def count_forward(params, boxes, attention):
    # layout: boxes (B, 4, object_num), attention (B, object_num)
    A = attention
    # TODO(synk): the reference Count.forward body is truncated after `A = attention`;
    # the remaining counting logic is not given, so only this assignment is reproduced.
    return A


# ---------------------------------- main ----------------------------------- #
if __name__ == "__main__":
    key = jax.random.PRNGKey(0)
    object_num = 10
    B = 2

    kb, ka, kw = jax.random.split(key, 3)
    boxes = jax.random.uniform(kb, (B, 4, object_num), dtype=jnp.float32)
    attention = jax.random.uniform(ka, (B, object_num), dtype=jnp.float32)  # in [0, 1)

    params = init_count_params(object_num)

    # Count.forward as given in the reference: A = attention.
    A = count_forward(params, boxes, attention)

    # 1) default-initialized weights (ones with w[0] = 0), all 16 tables in one call.
    W0 = params["linear_function"]
    out0 = jax.block_until_ready(piecewise_lin_all(W0, A))
    ref0 = jnp.stack([piecewise_lin_ref(W0[t], A) for t in range(N_FUNCS)])
    assert jnp.allclose(out0, ref0, atol=1e-5), (out0, ref0)

    # 2) non-trivial random weights, to exercise the gather/interpolation path.
    W1 = jax.random.uniform(kw, (N_FUNCS, N_PIECES + 1), dtype=jnp.float32,
                            minval=0.1, maxval=2.0)
    out1 = jax.block_until_ready(piecewise_lin_all(W1, A))
    ref1 = jnp.stack([piecewise_lin_ref(W1[t], A) for t in range(N_FUNCS)])
    assert jnp.allclose(out1, ref1, atol=1e-5), (out1, ref1)

    print("KERNEL_OK")
</pallas_src>

<mosaic_0001>
module attributes {stable_mosaic.version = 11 : i64} {
  func.func @_piecewise_lin_all_kernel(%arg0: i32, %arg1: memref<16x17xf32, #tpu.memory_space<smem>>, %arg2: memref<8x128xf32, #tpu.memory_space<vmem>>, %arg3: memref<16x8x128xf32, #tpu.memory_space<vmem>>) attributes {dimension_semantics = [#tpu.dimension_semantics<parallel>], iteration_bounds = array<i64: 1>, scalar_prefetch = 0 : i64, scratch_operands = 0 : i64, tpu.core_type = #tpu.core_type<tc>, window_params = [{transform_indices = @transform_0, window_bounds = array<i64: 16, 17>}, {transform_indices = @transform_1, window_bounds = array<i64: 8, 128>}, {transform_indices = @transform_2, window_bounds = array<i64: 16, 8, 128>}]} {
    %c0 = arith.constant 0 : index
    %c0_0 = arith.constant 0 : index
    %0 = vector.load %arg2[%c0, %c0_0] : memref<8x128xf32, #tpu.memory_space<vmem>>, vector<8x128xf32>
    %cst = arith.constant 1.600000e+01 : f32
    %1 = vector.broadcast %cst : f32 to vector<8x128xf32>
    %2 = arith.mulf %1, %0 : vector<8x128xf32>
    %3 = arith.fptosi %2 : vector<8x128xf32> to vector<8x128xi32>
    %4 = arith.sitofp %3 : vector<8x128xi32> to vector<8x128xf32>
    %5 = arith.subf %2, %4 : vector<8x128xf32>
    %c16_i32 = arith.constant 16 : i32
    %6 = vector.broadcast %c16_i32 : i32 to vector<8x128xi32>
    %7 = arith.minsi %3, %6 : vector<8x128xi32>
    %c0_1 = arith.constant 0 : index
    %c0_2 = arith.constant 0 : index
    %8 = memref.load %arg1[%c0_1, %c0_2] : memref<16x17xf32, #tpu.memory_space<smem>>
    %9 = math.absf %8 : f32
    %c0_3 = arith.constant 0 : index
    %c1 = arith.constant 1 : index
    %10 = memref.load %arg1[%c0_3, %c1] : memref<16x17xf32, #tpu.memory_space<smem>>
    %11 = math.absf %10 : f32
    %c0_4 = arith.constant 0 : index
    %c2 = arith.constant 2 : index
    %12 = memref.load %arg1[%c0_4, %c2] : memref<16x17xf32, #tpu.memory_space<smem>>
    %13 = math.absf %12 : f32
    %c0_5 = arith.constant 0 : index
    %c3 = arith.constant 3 : index
    %14 = memref.load %arg1[%c0_5, %c3] : memref<16x17xf32, #tpu.memory_space<smem>>
    %15 = math.absf %14 : f32
    %c0_6 = arith.constant 0 : index
    %c4 = arith.constant 4 : index
    %16 = memref.load %arg1[%c0_6, %c4] : memref<16x17xf32, #tpu.memory_space<smem>>
    %17 = math.absf %16 : f32
    %c0_7 = arith.constant 0 : index
    %c5 = arith.constant 5 : index
    %18 = memref.load %arg1[%c0_7, %c5] : memref<16x17xf32, #tpu.memory_space<smem>>
    %19 = math.absf %18 : f32
    %c0_8 = arith.constant 0 : index
    %c6 = arith.constant 6 : index
    %20 = memref.load %arg1[%c0_8, %c6] : memref<16x17xf32, #tpu.memory_space<smem>>
    %21 = math.absf %20 : f32
    %c0_9 = arith.constant 0 : index
    %c7 = arith.constant 7 : index
    %22 = memref.load %arg1[%c0_9, %c7] : memref<16x17xf32, #tpu.memory_space<smem>>
    %23 = math.absf %22 : f32
    %c0_10 = arith.constant 0 : index
    %c8 = arith.constant 8 : index
    %24 = memref.load %arg1[%c0_10, %c8] : memref<16x17xf32, #tpu.memory_space<smem>>
    %25 = math.absf %24 : f32
    %c0_11 = arith.constant 0 : index
    %c9 = arith.constant 9 : index
    %26 = memref.load %arg1[%c0_11, %c9] : memref<16x17xf32, #tpu.memory_space<smem>>
    %27 = math.absf %26 : f32
    %c0_12 = arith.constant 0 : index
    %c10 = arith.constant 10 : index
    %28 = memref.load %arg1[%c0_12, %c10] : memref<16x17xf32, #tpu.memory_space<smem>>
    %29 = math.absf %28 : f32
    %c0_13 = arith.constant 0 : index
    %c11 = arith.constant 11 : index
    %30 = memref.load %arg1[%c0_13, %c11] : memref<16x17xf32, #tpu.memory_space<smem>>
    %31 = math.absf %30 : f32
    %c0_14 = arith.constant 0 : index
    %c12 = arith.constant 12 : index
    %32 = memref.load %arg1[%c0_14, %c12] : memref<16x17xf32, #tpu.memory_space<smem>>
    %33 = math.absf %32 : f32
    %c0_15 = arith.constant 0 : index
    %c13 = arith.constant 13 : index
    %34 = memref.load %arg1[%c0_15, %c13] : memref<16x17xf32, #tpu.memory_space<smem>>
    %35 = math.absf %34 : f32
    %c0_16 = arith.constant 0 : index
    %c14 = arith.constant 14 : index
    %36 = memref.load %arg1[%c0_16, %c14] : memref<16x17xf32, #tpu.memory_space<smem>>
    %37 = math.absf %36 : f32
    %c0_17 = arith.constant 0 : index
    %c15 = arith.constant 15 : index
    %38 = memref.load %arg1[%c0_17, %c15] : memref<16x17xf32, #tpu.memory_space<smem>>
    %39 = math.absf %38 : f32
    %c0_18 = arith.constant 0 : index
    %c16 = arith.constant 16 : index
    %40 = memref.load %arg1[%c0_18, %c16] : memref<16x17xf32, #tpu.memory_space<smem>>
    %41 = math.absf %40 : f32
    %42 = arith.addf %9, %11 : f32
    %43 = arith.addf %42, %13 : f32
    %44 = arith.addf %43, %15 : f32
    %45 = arith.addf %44, %17 : f32
    %46 = arith.addf %45, %19 : f32
    %47 = arith.addf %46, %21 : f32
    %48 = arith.addf %47, %23 : f32
    %49 = arith.addf %48, %25 : f32
    %50 = arith.addf %49, %27 : f32
    %51 = arith.addf %50, %29 : f32
    %52 = arith.addf %51, %31 : f32
    %53 = arith.addf %52, %33 : f32
    %54 = arith.addf %53, %35 : f32
    %55 = arith.addf %54, %37 : f32
    %56 = arith.addf %55, %39 : f32
    %57 = arith.addf %56, %41 : f32
    %cst_19 = arith.constant 1.000000e+00 : f32
    %58 = arith.divf %cst_19, %57 : f32
    %59 = arith.mulf %9, %58 : f32
    %60 = arith.mulf %11, %58 : f32
    %61 = arith.mulf %13, %58 : f32
    %62 = arith.mulf %15, %58 : f32
    %63 = arith.mulf %17, %58 : f32
    %64 = arith.mulf %19, %58 : f32
    %65 = arith.mulf %21, %58 : f32
    %66 = arith.mulf %23, %58 : f32
    %67 = arith.mulf %25, %58 : f32
    %68 = arith.mulf %27, %58 : f32
    %69 = arith.mulf %29, %58 : f32
    %70 = arith.mulf %31, %58 : f32
    %71 = arith.mulf %33, %58 : f32
    %72 = arith.mulf %35, %58 : f32
    %73 = arith.mulf %37, %58 : f32
    %74 = arith.mulf %39, %58 : f32
    %75 = arith.mulf %41, %58 : f32
    %76 = arith.addf %59, %60 : f32
    %77 = arith.addf %76, %61 : f32
    %78 = arith.addf %77, %62 : f32
    %79 = arith.addf %78, %63 : f32
    %80 = arith.addf %79, %64 : f32
    %81 = arith.addf %80, %65 : f32
    %82 = arith.addf %81, %66 : f32
    %83 = arith.addf %82, %67 : f32
    %84 = arith.addf %83, %68 : f32
    %85 = arith.addf %84, %69 : f32
    %86 = arith.addf %85, %70 : f32
    %87 = arith.addf %86, %71 : f32
    %88 = arith.addf %87, %72 : f32
    %89 = arith.addf %88, %73 : f32
    %90 = arith.addf %89, %74 : f32
    %91 = arith.addf %90, %75 : f32
    %cst_20 = arith.constant 0.000000e+00 : f32
    %92 = vector.broadcast %cst_20 : f32 to vector<8x128xf32>
    %cst_21 = arith.constant 0.000000e+00 : f32
    %93 = vector.broadcast %cst_21 : f32 to vector<8x128xf32>
    %c0_i32 = arith.constant 0 : i32
    %94 = vector.broadcast %c0_i32 : i32 to vector<8x128xi32>
    %95 = arith.cmpi eq, %7, %94 : vector<8x128xi32>
    %96 = vector.broadcast %59 : f32 to vector<8x128xf32>
    %97 = arith.select %95, %96, %92 : vector<8x128xi1>, vector<8x128xf32>
    %98 = vector.broadcast %60 : f32 to vector<8x128xf32>
    %99 = arith.select %95, %98, %93 : vector<8x128xi1>, vector<8x128xf32>
    %c1_i32 = arith.constant 1 : i32
    %100 = vector.broadcast %c1_i32 : i32 to vector<8x128xi32>
    %101 = arith.cmpi eq, %7, %100 : vector<8x128xi32>
    %102 = vector.broadcast %76 : f32 to vector<8x128xf32>
    %103 = arith.select %101, %102, %97 : vector<8x128xi1>, vector<8x128xf32>
    %104 = vector.broadcast %61 : f32 to vector<8x128xf32>
    %105 = arith.select %101, %104, %99 : vector<8x128xi1>, vector<8x128xf32>
    %c2_i32 = arith.constant 2 : i32
    %106 = vector.broadcast %c2_i32 : i32 to vector<8x128xi32>
    %107 = arith.cmpi eq, %7, %106 : vector<8x128xi32>
    %108 = vector.broadcast %77 : f32 to vector<8x128xf32>
    %109 = arith.select %107, %108, %103 : vector<8x128xi1>, vector<8x128xf32>
    %110 = vector.broadcast %62 : f32 to vector<8x128xf32>
    %111 = arith.select %107, %110, %105 : vector<8x128xi1>, vector<8x128xf32>
    %c3_i32 = arith.constant 3 : i32
    %112 = vector.broadcast %c3_i32 : i32 to vector<8x128xi32>
    %113 = arith.cmpi eq, %7, %112 : vector<8x128xi32>
    %114 = vector.broadcast %78 : f32 to vector<8x128xf32>
    %115 = arith.select %113, %114, %109 : vector<8x128xi1>, vector<8x128xf32>
    %116 = vector.broadcast %63 : f32 to vector<8x128xf32>
    %117 = arith.select %113, %116, %111 : vector<8x128xi1>, vector<8x128xf32>
    %c4_i32 = arith.constant 4 : i32
    %118 = vector.broadcast %c4_i32 : i32 to vector<8x128xi32>
    %119 = arith.cmpi eq, %7, %118 : vector<8x128xi32>
    %120 = vector.broadcast %79 : f32 to vector<8x128xf32>
    %121 = arith.select %119, %120, %115 : vector<8x128xi1>, vector<8x128xf32>
    %122 = vector.broadcast %64 : f32 to vector<8x128xf32>
    %123 = arith.select %119, %122, %117 : vector<8x128xi1>, vector<8x128xf32>
    %c5_i32 = arith.constant 5 : i32
    %124 = vector.broadcast %c5_i32 : i32 to vector<8x128xi32>
    %125 = arith.cmpi eq, %7, %124 : vector<8x128xi32>
    %126 = vector.broadcast %80 : f32 to vector<8x128xf32>
    %127 = arith.select %125, %126, %121 : vector<8x128xi1>, vector<8x128xf32>
    %128 = vector.broadcast %65 : f32 to vector<8x128xf32>
    %129 = arith.select %125, %128, %123 : vector<8x128xi1>, vector<8x128xf32>
    %c6_i32 = arith.constant 6 : i32
    %130 = vector.broadcast %c6_i32 : i32 to vector<8x128xi32>
    %131 = arith.cmpi eq, %7, %130 : vector<8x128xi32>
    %132 = vector.broadcast %81 : f32 to vector<8x128xf32>
    %133 = arith.select %131, %132, %127 : vector<8x128xi1>, vector<8x128xf32>
    %134 = vector.broadcast %66 : f32 to vector<8x128xf32>
    %135 = arith.select %131, %134, %129 : vector<8x128xi1>, vector<8x128xf32>
    %c7_i32 = arith.constant 7 : i32
    %136 = vector.broadcast %c7_i32 : i32 to vector<8x128xi32>
    %137 = arith.cmpi eq, %7, %136 : vector<8x128xi32>
    %138 = vector.broadcast %82 : f32 to vector<8x128xf32>
    %139 = arith.select %137, %138, %133 : vector<8x128xi1>, vector<8x128xf32>
    %140 = vector.broadcast %67 : f32 to vector<8x128xf32>
    %141 = arith.select %137, %140, %135 : vector<8x128xi1>, vector<8x128xf32>
    %c8_i32 = arith.constant 8 : i32
    %142 = vector.broadcast %c8_i32 : i32 to vector<8x128xi32>
    %143 = arith.cmpi eq, %7, %142 : vector<8x128xi32>
    %144 = vector.broadcast %83 : f32 to vector<8x128xf32>
    %145 = arith.select %143, %144, %139 : vector<8x128xi1>, vector<8x128xf32>
    %146 = vector.broadcast %68 : f32 to vector<8x128xf32>
    %147 = arith.select %143, %146, %141 : vector<8x128xi1>, vector<8x128xf32>
    %c9_i32 = arith.constant 9 : i32
    %148 = vector.broadcast %c9_i32 : i32 to vector<8x128xi32>
    %149 = arith.cmpi eq, %7, %148 : vector<8x128xi32>
    %150 = vector.broadcast %84 : f32 to vector<8x128xf32>
    %151 = arith.select %149, %150, %145 : vector<8x128xi1>, vector<8x128xf32>
    %152 = vector.broadcast %69 : f32 to vector<8x128xf32>
    %153 = arith.select %149, %152, %147 : vector<8x128xi1>, vector<8x128xf32>
    %c10_i32 = arith.constant 10 : i32
    %154 = vector.broadcast %c10_i32 : i32 to vector<8x128xi32>
    %155 = arith.cmpi eq, %7, %154 : vector<8x128xi32>
    %156 = vector.broadcast %85 : f32 to vector<8x128xf32>
    %157 = arith.select %155, %156, %151 : vector<8x128xi1>, vector<8x128xf32>
    %158 = vector.broadcast %70 : f32 to vector<8x128xf32>
    %159 = arith.select %155, %158, %153 : vector<8x128xi1>, vector<8x128xf32>
    %c11_i32 = arith.constant 11 : i32
    %160 = vector.broadcast %c11_i32 : i32 to vector<8x128xi32>
    %161 = arith.cmpi eq, %7, %160 : vector<8x128xi32>
    %162 = vector.broadcast %86 : f32 to vector<8x128xf32>
    %163 = arith.select %161, %162, %157 : vector<8x128xi1>, vector<8x128xf32>
    %164 = vector.broadcast %71 : f32 to vector<8x128xf32>
    %165 = arith.select %161, %164, %159 : vector<8x128xi1>, vector<8x128xf32>
    %c12_i32 = arith.constant 12 : i32
    %166 = vector.broadcast %c12_i32 : i32 to vector<8x128xi32>
    %167 = arith.cmpi eq, %7, %166 : vector<8x128xi32>
    %168 = vector.broadcast %87 : f32 to vector<8x128xf32>
    %169 = arith.select %167, %168, %163 : vector<8x128xi1>, vector<8x128xf32>
    %170 = vector.broadcast %72 : f32 to vector<8x128xf32>
    %171 = arith.select %167, %170, %165 : vector<8x128xi1>, vector<8x128xf32>
    %c13_i32 = arith.constant 13 : i32
    %172 = vector.broadcast %c13_i32 : i32 to vector<8x128xi32>
    %173 = arith.cmpi eq, %7, %172 : vector<8x128xi32>
    %174 = vector.broadcast %88 : f32 to vector<8x128xf32>
    %175 = arith.select %173, %174, %169 : vector<8x128xi1>, vector<8x128xf32>
    %176 = vector.broadcast %73 : f32 to vector<8x128xf32>
    %177 = arith.select %173, %176, %171 : vector<8x128xi1>, vector<8x128xf32>
    %c14_i32 = arith.constant 14 : i32
    %178 = vector.broadcast %c14_i32 : i32 to vector<8x128xi32>
    %179 = arith.cmpi eq, %7, %178 : vector<8x128xi32>
    %180 = vector.broadcast %89 : f32 to vector<8x128xf32>
    %181 = arith.select %179, %180, %175 : vector<8x128xi1>, vector<8x128xf32>
    %182 = vector.broadcast %74 : f32 to vector<8x128xf32>
    %183 = arith.select %179, %182, %177 : vector<8x128xi1>, vector<8x128xf32>
    %c15_i32 = arith.constant 15 : i32
    %184 = vector.broadcast %c15_i32 : i32 to vector<8x128xi32>
    %185 = arith.cmpi eq, %7, %184 : vector<8x128xi32>
    %186 = vector.broadcast %90 : f32 to vector<8x128xf32>
    %187 = arith.select %185, %186, %181 : vector<8x128xi1>, vector<8x128xf32>
    %188 = vector.broadcast %75 : f32 to vector<8x128xf32>
    %189 = arith.select %185, %188, %183 : vector<8x128xi1>, vector<8x128xf32>
    %c16_i32_22 = arith.constant 16 : i32
    %190 = vector.broadcast %c16_i32_22 : i32 to vector<8x128xi32>
    %191 = arith.cmpi eq, %7, %190 : vector<8x128xi32>
    %192 = vector.broadcast %91 : f32 to vector<8x128xf32>
    %193 = arith.select %191, %192, %187 : vector<8x128xi1>, vector<8x128xf32>
    %194 = vector.broadcast %75 : f32 to vector<8x128xf32>
    %195 = arith.select %191, %194, %189 : vector<8x128xi1>, vector<8x128xf32>
    %196 = arith.mulf %5, %195 : vector<8x128xf32>
    %197 = arith.addf %193, %196 : vector<8x128xf32>
    %c0_23 = arith.constant 0 : index
    %c0_24 = arith.constant 0 : index
    %c0_25 = arith.constant 0 : index
    %198 = vector.load %arg3[%c0_23, %c0_24, %c0_25] : memref<16x8x128xf32, #tpu.memory_space<vmem>>, vector<1x8x128xf32>
    %199 = vector.shape_cast %198 : vector<1x8x128xf32> to vector<8x128xf32>
    %200 = vector.shape_cast %197 : vector<8x128xf32> to vector<1x8x128xf32>
    tpu.vector_store %arg3[%c0_23, %c0_24, %c0_25], %200 {strides = array<i32>} : memref<16x8x128xf32, #tpu.memory_space<vmem>>, vector<1x8x128xf32>,
    %c1_26 = arith.constant 1 : index
    %c0_27 = arith.constant 0 : index
    %201 = memref.load %arg1[%c1_26, %c0_27] : memref<16x17xf32, #tpu.memory_space<smem>>
    %202 = math.absf %201 : f32
    %c1_28 = arith.constant 1 : index
    %c1_29 = arith.constant 1 : index
    %203 = memref.load %arg1[%c1_28, %c1_29] : memref<16x17xf32, #tpu.memory_space<smem>>
    %204 = math.absf %203 : f32
    %c1_30 = arith.constant 1 : index
    %c2_31 = arith.constant 2 : index
    %205 = memref.load %arg1[%c1_30, %c2_31] : memref<16x17xf32, #tpu.memory_space<smem>>
    %206 = math.absf %205 : f32
    %c1_32 = arith.constant 1 : index
    %c3_33 = arith.constant 3 : index
    %207 = memref.load %arg1[%c1_32, %c3_33] : memref<16x17xf32, #tpu.memory_space<smem>>
    %208 = math.absf %207 : f32
    %c1_34 = arith.constant 1 : index
    %c4_35 = arith.constant 4 : index
    %209 = memref.load %arg1[%c1_34, %c4_35] : memref<16x17xf32, #tpu.memory_space<smem>>
    %210 = math.absf %209 : f32
    %c1_36 = arith.constant 1 : index
    %c5_37 = arith.constant 5 : index
    %211 = memref.load %arg1[%c1_36, %c5_37] : memref<16x17xf32, #tpu.memory_space<smem>>
    %212 = math.absf %211 : f32
    %c1_38 = arith.constant 1 : index
    %c6_39 = arith.constant 6 : index
    %213 = memref.load %arg1[%c1_38, %c6_39] : memref<16x17xf32, #tpu.memory_space<smem>>
    %214 = math.absf %213 : f32
    %c1_40 = arith.constant 1 : index
    %c7_41 = arith.constant 7 : index
    %215 = memref.load %arg1[%c1_40, %c7_41] : memref<16x17xf32, #tpu.memory_space<smem>>
    %216 = math.absf %215 : f32
    %c1_42 = arith.constant 1 : index
    %c8_43 = arith.constant 8 : index
    %217 = memref.load %arg1[%c1_42, %c8_43] : memref<16x17xf32, #tpu.memory_space<smem>>
    %218 = math.absf %217 : f32
    %c1_44 = arith.constant 1 : index
    %c9_45 = arith.constant 9 : index
    %219 = memref.load %arg1[%c1_44, %c9_45] : memref<16x17xf32, #tpu.memory_space<smem>>
    %220 = math.absf %219 : f32
    %c1_46 = arith.constant 1 : index
    %c10_47 = arith.constant 10 : index
    %221 = memref.load %arg1[%c1_46, %c10_47] : memref<16x17xf32, #tpu.memory_space<smem>>
    %222 = math.absf %221 : f32
    %c1_48 = arith.constant 1 : index
    %c11_49 = arith.constant 11 : index
    %223 = memref.load %arg1[%c1_48, %c11_49] : memref<16x17xf32, #tpu.memory_space<smem>>
    %224 = math.absf %223 : f32
    %c1_50 = arith.constant 1 : index
    %c12_51 = arith.constant 12 : index
    %225 = memref.load %arg1[%c1_50, %c12_51] : memref<16x17xf32, #tpu.memory_space<smem>>
    %226 = math.absf %225 : f32
    %c1_52 = arith.constant 1 : index
    %c13_53 = arith.constant 13 : index
    %227 = memref.load %arg1[%c1_52, %c13_53] : memref<16x17xf32, #tpu.memory_space<smem>>
    %228 = math.absf %227 : f32
    %c1_54 = arith.constant 1 : index
    %c14_55 = arith.constant 14 : index
    %229 = memref.load %arg1[%c1_54, %c14_55] : memref<16x17xf32, #tpu.memory_space<smem>>
    %230 = math.absf %229 : f32
    %c1_56 = arith.constant 1 : index
    %c15_57 = arith.constant 15 : index
    %231 = memref.load %arg1[%c1_56, %c15_57] : memref<16x17xf32, #tpu.memory_space<smem>>
    %232 = math.absf %231 : f32
    %c1_58 = arith.constant 1 : index
    %c16_59 = arith.constant 16 : index
    %233 = memref.load %arg1[%c1_58, %c16_59] : memref<16x17xf32, #tpu.memory_space<smem>>
    %234 = math.absf %233 : f32
    %235 = arith.addf %202, %204 : f32
    %236 = arith.addf %235, %206 : f32
    %237 = arith.addf %236, %208 : f32
    %238 = arith.addf %237, %210 : f32
    %239 = arith.addf %238, %212 : f32
    %240 = arith.addf %239, %214 : f32
    %241 = arith.addf %240, %216 : f32
    %242 = arith.addf %241, %218 : f32
    %243 = arith.addf %242, %220 : f32
    %244 = arith.addf %243, %222 : f32
    %245 = arith.addf %244, %224 : f32
    %246 = arith.addf %245, %226 : f32
    %247 = arith.addf %246, %228 : f32
    %248 = arith.addf %247, %230 : f32
    %249 = arith.addf %248, %232 : f32
    %250 = arith.addf %249, %234 : f32
    %cst_60 = arith.constant 1.000000e+00 : f32
    %251 = arith.divf %cst_60, %250 : f32
    %252 = arith.mulf %202, %251 : f32
    %253 = arith.mulf %204, %251 : f32
    %254 = arith.mulf %206, %251 : f32
    %255 = arith.mulf %208, %251 : f32
    %256 = arith.mulf %210, %251 : f32
    %257 = arith.mulf %212, %251 : f32
    %258 = arith.mulf %214, %251 : f32
    %259 = arith.mulf %216, %251 : f32
    %260 = arith.mulf %218, %251 : f32
    %261 = arith.mulf %220, %251 : f32
    %262 = arith.mulf %222, %251 : f32
    %263 = arith.mulf %224, %251 : f32
    %264 = arith.mulf %226, %251 : f32
    %265 = arith.mulf %228, %251 : f32
    %266 = arith.mulf %230, %251 : f32
    %267 = arith.mulf %232, %251 : f32
    %268 = arith.mulf %234, %251 : f32
    %269 = arith.addf %252, %253 : f32
    %270 = arith.addf %269, %254 : f32
    %271 = arith.addf %270, %255 : f32
    %272 = arith.addf %271, %256 : f32
    %273 = arith.addf %272, %257 : f32
    %274 = arith.addf %273, %258 : f32
    %275 = arith.addf %274, %259 : f32
    %276 = arith.addf %275, %260 : f32
    %277 = arith.addf %276, %261 : f32
    %278 = arith.addf %277, %262 : f32
    %279 = arith.addf %278, %263 : f32
    %280 = arith.addf %279, %264 : f32
    %281 = arith.addf %280, %265 : f32
    %282 = arith.addf %281, %266 : f32
    %283 = arith.addf %282, %267 : f32
    %284 = arith.addf %283, %268 : f32
    %cst_61 = arith.constant 0.000000e+00 : f32
    %285 = vector.broadcast %cst_61 : f32 to vector<8x128xf32>
    %cst_62 = arith.constant 0.000000e+00 : f32
    %286 = vector.broadcast %cst_62 : f32 to vector<8x128xf32>
    %c0_i32_63 = arith.constant 0 : i32
    %287 = vector.broadcast %c0_i32_63 : i32 to vector<8x128xi32>
    %288 = arith.cmpi eq, %7, %287 : vector<8x128xi32>
    %289 = vector.broadcast %252 : f32 to vector<8x128xf32>
    %290 = arith.select %288, %289, %285 : vector<8x128xi1>, vector<8x128xf32>
    %291 = vector.broadcast %253 : f32 to vector<8x128xf32>
    %292 = arith.select %288, %291, %286 : vector<8x128xi1>, vector<8x128xf32>
    %c1_i32_64 = arith.constant 1 : i32
    %293 = vector.broadcast %c1_i32_64 : i32 to vector<8x128xi32>
    %294 = arith.cmpi eq, %7, %293 : vector<8x128xi32>
    %295 = vector.broadcast %269 : f32 to vector<8x128xf32>
    %296 = arith.select %294, %295, %290 : vector<8x128xi1>, vector<8x128xf32>
    %297 = vector.broadcast %254 : f32 to vector<8x128xf32>
    %298 = arith.select %294, %297, %292 : vector<8x128xi1>, vector<8x128xf32>
    %c2_i32_65 = arith.constant 2 : i32
    %299 = vector.broadcast %c2_i32_65 : i32 to vector<8x128xi32>
    %300 = arith.cmpi eq, %7, %299 : vector<8x128xi32>
    %301 = vector.broadcast %270 : f32 to vector<8x128xf32>
    %302 = arith.select %300, %301, %296 : vector<8x128xi1>, vector<8x128xf32>
    %303 = vector.broadcast %255 : f32 to vector<8x128xf32>
    %304 = arith.select %300, %303, %298 : vector<8x128xi1>, vector<8x128xf32>
    %c3_i32_66 = arith.constant 3 : i32
    %305 = vector.broadcast %c3_i32_66 : i32 to vector<8x128xi32>
    %306 = arith.cmpi eq, %7, %305 : vector<8x128xi32>
    %307 = vector.broadcast %271 : f32 to vector<8x128xf32>
    %308 = arith.select %306, %307, %302 : vector<8x128xi1>, vector<8x128xf32>
    %309 = vector.broadcast %256 : f32 to vector<8x128xf32>
    %310 = arith.select %306, %309, %304 : vector<8x128xi1>, vector<8x128xf32>
    %c4_i32_67 = arith.constant 4 : i32
    %311 = vector.broadcast %c4_i32_67 : i32 to vector<8x128xi32>
    %312 = arith.cmpi eq, %7, %311 : vector<8x128xi32>
    %313 = vector.broadcast %272 : f32 to vector<8x128xf32>
    %314 = arith.select %312, %313, %308 : vector<8x128xi1>, vector<8x128xf32>
    %315 = vector.broadcast %257 : f32 to vector<8x128xf32>
    %316 = arith.select %312, %315, %310 : vector<8x128xi1>, vector<8x128xf32>
    %c5_i32_68 = arith.constant 5 : i32
    %317 = vector.broadcast %c5_i32_68 : i32 to vector<8x128xi32>
    %318 = arith.cmpi eq, %7, %317 : vector<8x128xi32>
    %319 = vector.broadcast %273 : f32 to vector<8x128xf32>
    %320 = arith.select %318, %319, %314 : vector<8x128xi1>, vector<8x128xf32>
    %321 = vector.broadcast %258 : f32 to vector<8x128xf32>
    %322 = arith.select %318, %321, %316 : vector<8x128xi1>, vector<8x128xf32>
    %c6_i32_69 = arith.constant 6 : i32
    %323 = vector.broadcast %c6_i32_69 : i32 to vector<8x128xi32>
    %324 = arith.cmpi eq, %7, %323 : vector<8x128xi32>
    %325 = vector.broadcast %274 : f32 to vector<8x128xf32>
    %326 = arith.select %324, %325, %320 : vector<8x128xi1>, vector<8x128xf32>
    %327 = vector.broadcast %259 : f32 to vector<8x128xf32>
    %328 = arith.select %324, %327, %322 : vector<8x128xi1>, vector<8x128xf32>
    %c7_i32_70 = arith.constant 7 : i32
    %329 = vector.broadcast %c7_i32_70 : i32 to vector<8x128xi32>
    %330 = arith.cmpi eq, %7, %329 : vector<8x128xi32>
    %331 = vector.broadcast %275 : f32 to vector<8x128xf32>
    %332 = arith.select %330, %331, %326 : vector<8x128xi1>, vector<8x128xf32>
    %333 = vector.broadcast %260 : f32 to vector<8x128xf32>
    %334 = arith.select %330, %333, %328 : vector<8x128xi1>, vector<8x128xf32>
    %c8_i32_71 = arith.constant 8 : i32
    %335 = vector.broadcast %c8_i32_71 : i32 to vector<8x128xi32>
    %336 = arith.cmpi eq, %7, %335 : vector<8x128xi32>
    %337 = vector.broadcast %276 : f32 to vector<8x128xf32>
    %338 = arith.select %336, %337, %332 : vector<8x128xi1>, vector<8x128xf32>
    %339 = vector.broadcast %261 : f32 to vector<8x128xf32>
    %340 = arith.select %336, %339, %334 : vector<8x128xi1>, vector<8x128xf32>
    %c9_i32_72 = arith.constant 9 : i32
    %341 = vector.broadcast %c9_i32_72 : i32 to vector<8x128xi32>
    %342 = arith.cmpi eq, %7, %341 : vector<8x128xi32>
    %343 = vector.broadcast %277 : f32 to vector<8x128xf32>
    %344 = arith.select %342, %343, %338 : vector<8x128xi1>, vector<8x128xf32>
    %345 = vector.broadcast %262 : f32 to vector<8x128xf32>
    %346 = arith.select %342, %345, %340 : vector<8x128xi1>, vector<8x128xf32>
    %c10_i32_73 = arith.constant 10 : i32
    %347 = vector.broadcast %c10_i32_73 : i32 to vector<8x128xi32>
    %348 = arith.cmpi eq, %7, %347 : vector<8x128xi32>
    %349 = vector.broadcast %278 : f32 to vector<8x128xf32>
    %350 = arith.select %348, %349, %344 : vector<8x128xi1>, vector<8x128xf32>
    %351 = vector.broadcast %263 : f32 to vector<8x128xf32>
    %352 = arith.select %348, %351, %346 : vector<8x128xi1>, vector<8x128xf32>
    %c11_i32_74 = arith.constant 11 : i32
    %353 = vector.broadcast %c11_i32_74 : i32 to vector<8x128xi32>
    %354 = arith.cmpi eq, %7, %353 : vector<8x128xi32>
    %355 = vector.broadcast %279 : f32 to vector<8x128xf32>
    %356 = arith.select %354, %355, %350 : vector<8x128xi1>, vector<8x128xf32>
    %357 = vector.broadcast %264 : f32 to vector<8x128xf32>
    %358 = arith.select %354, %357, %352 : vector<8x128xi1>, vector<8x128xf32>
    %c12_i32_75 = arith.constant 12 : i32
    %359 = vector.broadcast %c12_i32_75 : i32 to vector<8x128xi32>
    %360 = arith.cmpi eq, %7, %359 : vector<8x128xi32>
    %361 = vector.broadcast %280 : f32 to vector<8x128xf32>
    %362 = arith.select %360, %361, %356 : vector<8x128xi1>, vector<8x128xf32>
    %363 = vector.broadcast %265 : f32 to vector<8x128xf32>
    %364 = arith.select %360, %363, %358 : vector<8x128xi1>, vector<8x128xf32>
    %c13_i32_76 = arith.constant 13 : i32
    %365 = vector.broadcast %c13_i32_76 : i32 to vector<8x128xi32>
    %366 = arith.cmpi eq, %7, %365 : vector<8x128xi32>
    %367 = vector.broadcast %281 : f32 to vector<8x128xf32>
    %368 = arith.select %366, %367, %362 : vector<8x128xi1>, vector<8x128xf32>
    %369 = vector.broadcast %266 : f32 to vector<8x128xf32>
    %370 = arith.select %366, %369, %364 : vector<8x128xi1>, vector<8x128xf32>
    %c14_i32_77 = arith.constant 14 : i32
    %371 = vector.broadcast %c14_i32_77 : i32 to vector<8x128xi32>
    %372 = arith.cmpi eq, %7, %371 : vector<8x128xi32>
    %373 = vector.broadcast %282 : f32 to vector<8x128xf32>
    %374 = arith.select %372, %373, %368 : vector<8x128xi1>, vector<8x128xf32>
    %375 = vector.broadcast %267 : f32 to vector<8x128xf32>
    %376 = arith.select %372, %375, %370 : vector<8x128xi1>, vector<8x128xf32>
    %c15_i32_78 = arith.constant 15 : i32
    %377 = vector.broadcast %c15_i32_78 : i32 to vector<8x128xi32>
    %378 = arith.cmpi eq, %7, %377 : vector<8x128xi32>
    %379 = vector.broadcast %283 : f32 to vector<8x128xf32>
    %380 = arith.select %378, %379, %374 : vector<8x128xi1>, vector<8x128xf32>
    %381 = vector.broadcast %268 : f32 to vector<8x128xf32>
    %382 = arith.select %378, %381, %376 : vector<8x128xi1>, vector<8x128xf32>
    %c16_i32_79 = arith.constant 16 : i32
    %383 = vector.broadcast %c16_i32_79 : i32 to vector<8x128xi32>
    %384 = arith.cmpi eq, %7, %383 : vector<8x128xi32>
    %385 = vector.broadcast %284 : f32 to vector<8x128xf32>
    %386 = arith.select %384, %385, %380 : vector<8x128xi1>, vector<8x128xf32>
    %387 = vector.broadcast %268 : f32 to vector<8x128xf32>
    %388 = arith.select %384, %387, %382 : vector<8x128xi1>, vector<8x128xf32>
    %389 = arith.mulf %5, %388 : vector<8x128xf32>
    %390 = arith.addf %386, %389 : vector<8x128xf32>
    %c1_80 = arith.constant 1 : index
    %c0_81 = arith.constant 0 : index
    %c0_82 = arith.constant 0 : index
    %391 = vector.load %arg3[%c1_80, %c0_81, %c0_82] : memref<16x8x128xf32, #tpu.memory_space<vmem>>, vector<1x8x128xf32>
    %392 = vector.shape_cast %391 : vector<1x8x128xf32> to vector<8x128xf32>
    %393 = vector.shape_cast %390 : vector<8x128xf32> to vector<1x8x128xf32>
    tpu.vector_store %arg3[%c1_80, %c0_81, %c0_82], %393 {strides = array<i32>} : memref<16x8x128xf32, #tpu.memory_space<vmem>>, vector<1x8x128xf32>,
    %c2_83 = arith.constant 2 : index
    %c0_84 = arith.constant 0 : index
    %394 = memref.load %arg1[%c2_83, %c0_84] : memref<16x17xf32, #tpu.memory_space<smem>>
    %395 = math.absf %394 : f32
    %c2_85 = arith.constant 2 : index
    %c1_86 = arith.constant 1 : index
    %396 = memref.load %arg1[%c2_85, %c1_86] : memref<16x17xf32, #tpu.memory_space<smem>>
    %397 = math.absf %396 : f32
    %c2_87 = arith.constant 2 : index
    %c2_88 = arith.constant 2 : index
    %398 = memref.load %arg1[%c2_87, %c2_88] : memref<16x17xf32, #tpu.memory_space<smem>>
    %399 = math.absf %398 : f32
    %c2_89 = arith.constant 2 : index
    %c3_90 = arith.constant 3 : index
    %400 = memref.load %arg1[%c2_89, %c3_90] : memref<16x17xf32, #tpu.memory_space<smem>>
    %401 = math.absf %400 : f32
    %c2_91 = arith.constant 2 : index
    %c4_92 = arith.constant 4 : index
    %402 = memref.load %arg1[%c2_91, %c4_92] : memref<16x17xf32, #tpu.memory_space<smem>>
    %403 = math.absf %402 : f32
    %c2_93 = arith.constant 2 : index
    %c5_94 = arith.constant 5 : index
    %404 = memref.load %arg1[%c2_93, %c5_94] : memref<16x17xf32, #tpu.memory_space<smem>>
    %405 = math.absf %404 : f32
    %c2_95 = arith.constant 2 : index
    %c6_96 = arith.constant 6 : index
    %406 = memref.load %arg1[%c2_95, %c6_96] : memref<16x17xf32, #tpu.memory_space<smem>>
    %407 = math.absf %406 : f32
    %c2_97 = arith.constant 2 : index
    %c7_98 = arith.constant 7 : index
    %408 = memref.load %arg1[%c2_97, %c7_98] : memref<16x17xf32, #tpu.memory_space<smem>>
    %409 = math.absf %408 : f32
    %c2_99 = arith.constant 2 : index
    %c8_100 = arith.constant 8 : index
    %410 = memref.load %arg1[%c2_99, %c8_100] : memref<16x17xf32, #tpu.memory_space<smem>>
    %411 = math.absf %410 : f32
    %c2_101 = arith.constant 2 : index
    %c9_102 = arith.constant 9 : index
    %412 = memref.load %arg1[%c2_101, %c9_102] : memref<16x17xf32, #tpu.memory_space<smem>>
    %413 = math.absf %412 : f32
    %c2_103 = arith.constant 2 : index
    %c10_104 = arith.constant 10 : index
    %414 = memref.load %arg1[%c2_103, %c10_104] : memref<16x17xf32, #tpu.memory_space<smem>>
    %415 = math.absf %414 : f32
    %c2_105 = arith.constant 2 : index
    %c11_106 = arith.constant 11 : index
    %416 = memref.load %arg1[%c2_105, %c11_106] : memref<16x17xf32, #tpu.memory_space<smem>>
    %417 = math.absf %416 : f32
    %c2_107 = arith.constant 2 : index
    %c12_108 = arith.constant 12 : index
    %418 = memref.load %arg1[%c2_107, %c12_108] : memref<16x17xf32, #tpu.memory_space<smem>>
    %419 = math.absf %418 : f32
    %c2_109 = arith.constant 2 : index
    %c13_110 = arith.constant 13 : index
    %420 = memref.load %arg1[%c2_109, %c13_110] : memref<16x17xf32, #tpu.memory_space<smem>>
    %421 = math.absf %420 : f32
    %c2_111 = arith.constant 2 : index
    %c14_112 = arith.constant 14 : index
    %422 = memref.load %arg1[%c2_111, %c14_112] : memref<16x17xf32, #tpu.memory_space<smem>>
    %423 = math.absf %422 : f32
    %c2_113 = arith.constant 2 : index
    %c15_114 = arith.constant 15 : index
    %424 = memref.load %arg1[%c2_113, %c15_114] : memref<16x17xf32, #tpu.memory_space<smem>>
    %425 = math.absf %424 : f32
    %c2_115 = arith.constant 2 : index
    %c16_116 = arith.constant 16 : index
    %426 = memref.load %arg1[%c2_115, %c16_116] : memref<16x17xf32, #tpu.memory_space<smem>>
    %427 = math.absf %426 : f32
    %428 = arith.addf %395, %397 : f32
    %429 = arith.addf %428, %399 : f32
    %430 = arith.addf %429, %401 : f32
    %431 = arith.addf %430, %403 : f32
    %432 = arith.addf %431, %405 : f32
    %433 = arith.addf %432, %407 : f32
    %434 = arith.addf %433, %409 : f32
    %435 = arith.addf %434, %411 : f32
    %436 = arith.addf %435, %413 : f32
    %437 = arith.addf %436, %415 : f32
    %438 = arith.addf %437, %417 : f32
    %439 = arith.addf %438, %419 : f32
    %440 = arith.addf %439, %421 : f32
    %441 = arith.addf %440, %423 : f32
    %442 = arith.addf %441, %425 : f32
    %443 = arith.addf %442, %427 : f32
    %cst_117 = arith.constant 1.000000e+00 : f32
    %444 = arith.divf %cst_117, %443 : f32
    %445 = arith.mulf %395, %444 : f32
    %446 = arith.mulf %397, %444 : f32
    %447 = arith.mulf %399, %444 : f32
    %448 = arith.mulf %401, %444 : f32
    %449 = arith.mulf %403, %444 : f32
    %450 = arith.mulf %405, %444 : f32
    %451 = arith.mulf %407, %444 : f32
    %452 = arith.mulf %409, %444 : f32
    %453 = arith.mulf %411, %444 : f32
    %454 = arith.mulf %413, %444 : f32
    %455 = arith.mulf %415, %444 : f32
    %456 = arith.mulf %417, %444 : f32
    %457 = arith.mulf %419, %444 : f32
    %458 = arith.mulf %421, %444 : f32
    %459 = arith.mulf %423, %444 : f32
    %460 = arith.mulf %425, %444 : f32
    %461 = arith.mulf %427, %444 : f32
    %462 = arith.addf %445, %446 : f32
    %463 = arith.addf %462, %447 : f32
    %464 = arith.addf %463, %448 : f32
    %465 = arith.addf %464, %449 : f32
    %466 = arith.addf %465, %450 : f32
    %467 = arith.addf %466, %451 : f32
    %468 = arith.addf %467, %452 : f32
    %469 = arith.addf %468, %453 : f32
    %470 = arith.addf %469, %454 : f32
    %471 = arith.addf %470, %455 : f32
    %472 = arith.addf %471, %456 : f32
    %473 = arith.addf %472, %457 : f32
    %474 = arith.addf %473, %458 : f32
    %475 = arith.addf %474, %459 : f32
    %476 = arith.addf %475, %460 : f32
    %477 = arith.addf %476, %461 : f32
    %cst_118 = arith.constant 0.000000e+00 : f32
    %478 = vector.broadcast %cst_118 : f32 to vector<8x128xf32>
    %cst_119 = arith.constant 0.000000e+00 : f32
    %479 = vector.broadcast %cst_119 : f32 to vector<8x128xf32>
    %c0_i32_120 = arith.constant 0 : i32
    %480 = vector.broadcast %c0_i32_120 : i32 to vector<8x128xi32>
    %481 = arith.cmpi eq, %7, %480 : vector<8x128xi32>
    %482 = vector.broadcast %445 : f32 to vector<8x128xf32>
    %483 = arith.select %481, %482, %478 : vector<8x128xi1>, vector<8x128xf32>
    %484 = vector.broadcast %446 : f32 to vector<8x128xf32>
    %485 = arith.select %481, %484, %479 : vector<8x128xi1>, vector<8x128xf32>
    %c1_i32_121 = arith.constant 1 : i32
    %486 = vector.broadcast %c1_i32_121 : i32 to vector<8x128xi32>
    %487 = arith.cmpi eq, %7, %486 : vector<8x128xi32>
    %488 = vector.broadcast %462 : f32 to vector<8x128xf32>
    %489 = arith.select %487, %488, %483 : vector<8x128xi1>, vector<8x128xf32>
    %490 = vector.broadcast %447 : f32 to vector<8x128xf32>
    %491 = arith.select %487, %490, %485 : vector<8x128xi1>, vector<8x128xf32>
    %c2_i32_122 = arith.constant 2 : i32
    %492 = vector.broadcast %c2_i32_122 : i32 to vector<8x128xi32>
    %493 = arith.cmpi eq, %7, %492 : vector<8x128xi32>
    %494 = vector.broadcast %463 : f32 to vector<8x128xf32>
    %495 = arith.select %493, %494, %489 : vector<8x128xi1>, vector<8x128xf32>
    %496 = vector.broadcast %448 : f32 to vector<8x128xf32>
    %497 = arith.select %493, %496, %491 : vector<8x128xi1>, vector<8x128xf32>
    %c3_i32_123 = arith.constant 3 : i32
    %498 = vector.broadcast %c3_i32_123 : i32 to vector<8x128xi32>
    %499 = arith.cmpi eq, %7, %498 : vector<8x128xi32>
    %500 = vector.broadcast %464 : f32 to vector<8x128xf32>
    %501 = arith.select %499, %500, %495 : vector<8x128xi1>, vector<8x128xf32>
    %502 = vector.broadcast %449 : f32 to vector<8x128xf32>
    %503 = arith.select %499, %502, %497 : vector<8x128xi1>, vector<8x128xf32>
    %c4_i32_124 = arith.constant 4 : i32
    %504 = vector.broadcast %c4_i32_124 : i32 to vector<8x128xi32>
    %505 = arith.cmpi eq, %7, %504 : vector<8x128xi32>
    %506 = vector.broadcast %465 : f32 to vector<8x128xf32>
    %507 = arith.select %505, %506, %501 : vector<8x128xi1>, vector<8x128xf32>
    %508 = vector.broadcast %450 : f32 to vector<8x128xf32>
    %509 = arith.select %505, %508, %503 : vector<8x128xi1>, vector<8x128xf32>
    %c5_i32_125 = arith.constant 5 : i32
    %510 = vector.broadcast %c5_i32_125 : i32 to vector<8x128xi32>
    %511 = arith.cmpi eq, %7, %510 : vector<8x128xi32>
    %512 = vector.broadcast %466 : f32 to vector<8x128xf32>
    %513 = arith.select %511, %512, %507 : vector<8x128xi1>, vector<8x128xf32>
    %514 = vector.broadcast %451 : f32 to vector<8x128xf32>
    %515 = arith.select %511, %514, %509 : vector<8x128xi1>, vector<8x128xf32>
    %c6_i32_126 = arith.constant 6 : i32
    %516 = vector.broadcast %c6_i32_126 : i32 to vector<8x128xi32>
    %517 = arith.cmpi eq, %7, %516 : vector<8x128xi32>
    %518 = vector.broadcast %467 : f32 to vector<8x128xf32>
    %519 = arith.select %517, %518, %513 : vector<8x128xi1>, vector<8x128xf32>
    %520 = vector.broadcast %452 : f32 to vector<8x128xf32>
    %521 = arith.select %517, %520, %515 : vector<8x128xi1>, vector<8x128xf32>
    %c7_i32_127 = arith.constant 7 : i32
    %522 = vector.broadcast %c7_i32_127 : i32 to vector<8x128xi32>
    %523 = arith.cmpi eq, %7, %522 : vector<8x128xi32>
    %524 = vector.broadcast %468 : f32 to vector<8x128xf32>
    %525 = arith.select %523, %524, %519 : vector<8x128xi1>, vector<8x128xf32>
    %526 = vector.broadcast %453 : f32 to vector<8x128xf32>
    %527 = arith.select %523, %526, %521 : vector<8x128xi1>, vector<8x128xf32>
    %c8_i32_128 = arith.constant 8 : i32
    %528 = vector.broadcast %c8_i32_128 : i32 to vector<8x128xi32>
    %529 = arith.cmpi eq, %7, %528 : vector<8x128xi32>
    %530 = vector.broadcast %469 : f32 to vector<8x128xf32>
    %531 = arith.select %529, %530, %525 : vector<8x128xi1>, vector<8x128xf32>
    %532 = vector.broadcast %454 : f32 to vector<8x128xf32>
    %533 = arith.select %529, %532, %527 : vector<8x128xi1>, vector<8x128xf32>
    %c9_i32_129 = arith.constant 9 : i32
    %534 = vector.broadcast %c9_i32_129 : i32 to vector<8x128xi32>
    %535 = arith.cmpi eq, %7, %534 : vector<8x128xi32>
    %536 = vector.broadcast %470 : f32 to vector<8x128xf32>
    %537 = arith.select %535, %536, %531 : vector<8x128xi1>, vector<8x128xf32>
    %538 = vector.broadcast %455 : f32 to vector<8x128xf32>
    %539 = arith.select %535, %538, %533 : vector<8x128xi1>, vector<8x128xf32>
    %c10_i32_130 = arith.constant 10 : i32
    %540 = vector.broadcast %c10_i32_130 : i32 to vector<8x128xi32>
    %541 = arith.cmpi eq, %7, %540 : vector<8x128xi32>
    %542 = vector.broadcast %471 : f32 to vector<8x128xf32>
    %543 = arith.select %541, %542, %537 : vector<8x128xi1>, vector<8x128xf32>
    %544 = vector.broadcast %456 : f32 to vector<8x128xf32>
    %545 = arith.select %541, %544, %539 : vector<8x128xi1>, vector<8x128xf32>
    %c11_i32_131 = arith.constant 11 : i32
    %546 = vector.broadcast %c11_i32_131 : i32 to vector<8x128xi32>
    %547 = arith.cmpi eq, %7, %546 : vector<8x128xi32>
    %548 = vector.broadcast %472 : f32 to vector<8x128xf32>
    %549 = arith.select %547, %548, %543 : vector<8x128xi1>, vector<8x128xf32>
    %550 = vector.broadcast %457 : f32 to vector<8x128xf32>
    %551 = arith.select %547, %550, %545 : vector<8x128xi1>, vector<8x128xf32>
    %c12_i32_132 = arith.constant 12 : i32
    %552 = vector.broadcast %c12_i32_132 : i32 to vector<8x128xi32>
    %553 = arith.cmpi eq, %7, %552 : vector<8x128xi32>
    %554 = vector.broadcast %473 : f32 to vector<8x128xf32>
    %555 = arith.select %553, %554, %549 : vector<8x128xi1>, vector<8x128xf32>
    %556 = vector.broadcast %458 : f32 to vector<8x128xf32>
    %557 = arith.select %553, %556, %551 : vector<8x128xi1>, vector<8x128xf32>
    %c13_i32_133 = arith.constant 13 : i32
    %558 = vector.broadcast %c13_i32_133 : i32 to vector<8x128xi32>
    %559 = arith.cmpi eq, %7, %558 : vector<8x128xi32>
    %560 = vector.broadcast %474 : f32 to vector<8x128xf32>
    %561 = arith.select %559, %560, %555 : vector<8x128xi1>, vector<8x128xf32>
    %562 = vector.broadcast %459 : f32 to vector<8x128xf32>
    %563 = arith.select %559, %562, %557 : vector<8x128xi1>, vector<8x128xf32>
    %c14_i32_134 = arith.constant 14 : i32
    %564 = vector.broadcast %c14_i32_134 : i32 to vector<8x128xi32>
    %565 = arith.cmpi eq, %7, %564 : vector<8x128xi32>
    %566 = vector.broadcast %475 : f32 to vector<8x128xf32>
    %567 = arith.select %565, %566, %561 : vector<8x128xi1>, vector<8x128xf32>
    %568 = vector.broadcast %460 : f32 to vector<8x128xf32>
    %569 = arith.select %565, %568, %563 : vector<8x128xi1>, vector<8x128xf32>
    %c15_i32_135 = arith.constant 15 : i32
    %570 = vector.broadcast %c15_i32_135 : i32 to vector<8x128xi32>
    %571 = arith.cmpi eq, %7, %570 : vector<8x128xi32>
    %572 = vector.broadcast %476 : f32 to vector<8x128xf32>
    %573 = arith.select %571, %572, %567 : vector<8x128xi1>, vector<8x128xf32>
    %574 = vector.broadcast %461 : f32 to vector<8x128xf32>
    %575 = arith.select %571, %574, %569 : vector<8x128xi1>, vector<8x128xf32>
    %c16_i32_136 = arith.constant 16 : i32
    %576 = vector.broadcast %c16_i32_136 : i32 to vector<8x128xi32>
    %577 = arith.cmpi eq, %7, %576 : vector<8x128xi32>
    %578 = vector.broadcast %477 : f32 to vector<8x128xf32>
    %579 = arith.select %577, %578, %573 : vector<8x128xi1>, vector<8x128xf32>
    %580 = vector.broadcast %461 : f32 to vector<8x128xf32>
    %581 = arith.select %577, %580, %575 : vector<8x128xi1>, vector<8x128xf32>
    %582 = arith.mulf %5, %581 : vector<8x128xf32>
    %583 = arith.addf %579, %582 : vector<8x128xf32>
    %c2_137 = arith.constant 2 : index
    %c0_138 = arith.constant 0 : index
    %c0_139 = arith.constant 0 : index
    %584 = vector.load %arg3[%c2_137, %c0_138, %c0_139] : memref<16x8x128xf32, #tpu.memory_space<vmem>>, vector<1x8x128xf32>
    %585 = vector.shape_cast %584 : vector<1x8x128xf32> to vector<8x128xf32>
    %586 = vector.shape_cast %583 : vector<8x128xf32> to vector<1x8x128xf32>
    tpu.vector_store %arg3[%c2_137, %c0_138, %c0_139], %586 {strides = array<i32>} : memref<16x8x128xf32, #tpu.memory_space<vmem>>, vector<1x8x128xf32>,
    %c3_140 = arith.constant 3 : index
    %c0_141 = arith.constant 0 : index
    %587 = memref.load %arg1[%c3_140, %c0_141] : memref<16x17xf32, #tpu.memory_space<smem>>
    %588 = math.absf %587 : f32
    %c3_142 = arith.constant 3 : index
    %c1_143 = arith.constant 1 : index
    %589 = memref.load %arg1[%c3_142, %c1_143] : memref<16x17xf32, #tpu.memory_space<smem>>
    %590 = math.absf %589 : f32
    %c3_144 = arith.constant 3 : index
    %c2_145 = arith.constant 2 : index
    %591 = memref.load %arg1[%c3_144, %c2_145] : memref<16x17xf32, #tpu.memory_space<smem>>
    %592 = math.absf %591 : f32
    %c3_146 = arith.constant 3 : index
    %c3_147 = arith.constant 3 : index
    %593 = memref.load %arg1[%c3_146, %c3_147] : memref<16x17xf32, #tpu.memory_space<smem>>
    %594 = math.absf %593 : f32
    %c3_148 = arith.constant 3 : index
    %c4_149 = arith.constant 4 : index
    %595 = memref.load %arg1[%c3_148, %c4_149] : memref<16x17xf32, #tpu.memory_space<smem>>
    %596 = math.absf %595 : f32
    %c3_150 = arith.constant 3 : index
    %c5_151 = arith.constant 5 : index
    %597 = memref.load %arg1[%c3_150, %c5_151] : memref<16x17xf32, #tpu.memory_space<smem>>
    %598 = math.absf %597 : f32
    %c3_152 = arith.constant 3 : index
    %c6_153 = arith.constant 6 : index
    %599 = memref.load %arg1[%c3_152, %c6_153] : memref<16x17xf32, #tpu.memory_space<smem>>
    %600 = math.absf %599 : f32
    %c3_154 = arith.constant 3 : index
    %c7_155 = arith.constant 7 : index
    %601 = memref.load %arg1[%c3_154, %c7_155] : memref<16x17xf32, #tpu.memory_space<smem>>
    %602 = math.absf %601 : f32
    %c3_156 = arith.constant 3 : index
    %c8_157 = arith.constant 8 : index
    %603 = memref.load %arg1[%c3_156, %c8_157] : memref<16x17xf32, #tpu.memory_space<smem>>
    %604 = math.absf %603 : f32
    %c3_158 = arith.constant 3 : index
    %c9_159 = arith.constant 9 : index
    %605 = memref.load %arg1[%c3_158, %c9_159] : memref<16x17xf32, #tpu.memory_space<smem>>
    %606 = math.absf %605 : f32
    %c3_160 = arith.constant 3 : index
    %c10_161 = arith.constant 10 : index
    %607 = memref.load %arg1[%c3_160, %c10_161] : memref<16x17xf32, #tpu.memory_space<smem>>
    %608 = math.absf %607 : f32
    %c3_162 = arith.constant 3 : index
    %c11_163 = arith.constant 11 : index
    %609 = memref.load %arg1[%c3_162, %c11_163] : memref<16x17xf32, #tpu.memory_space<smem>>
    %610 = math.absf %609 : f32
    %c3_164 = arith.constant 3 : index
    %c12_165 = arith.constant 12 : index
    %611 = memref.load %arg1[%c3_164, %c12_165] : memref<16x17xf32, #tpu.memory_space<smem>>
    %612 = math.absf %611 : f32
    %c3_166 = arith.constant 3 : index
    %c13_167 = arith.constant 13 : index
    %613 = memref.load %arg1[%c3_166, %c13_167] : memref<16x17xf32, #tpu.memory_space<smem>>
    %614 = math.absf %613 : f32
    %c3_168 = arith.constant 3 : index
    %c14_169 = arith.constant 14 : index
    %615 = memref.load %arg1[%c3_168, %c14_169] : memref<16x17xf32, #tpu.memory_space<smem>>
    %616 = math.absf %615 : f32
    %c3_170 = arith.constant 3 : index
    %c15_171 = arith.constant 15 : index
    %617 = memref.load %arg1[%c3_170, %c15_171] : memref<16x17xf32, #tpu.memory_space<smem>>
    %618 = math.absf %617 : f32
    %c3_172 = arith.constant 3 : index
    %c16_173 = arith.constant 16 : index
    %619 = memref.load %arg1[%c3_172, %c16_173] : memref<16x17xf32, #tpu.memory_space<smem>>
    %620 = math.absf %619 : f32
    %621 = arith.addf %588, %590 : f32
    %622 = arith.addf %621, %592 : f32
    %623 = arith.addf %622, %594 : f32
    %624 = arith.addf %623, %596 : f32
    %625 = arith.addf %624, %598 : f32
    %626 = arith.addf %625, %600 : f32
    %627 = arith.addf %626, %602 : f32
    %628 = arith.addf %627, %604 : f32
    %629 = arith.addf %628, %606 : f32
    %630 = arith.addf %629, %608 : f32
    %631 = arith.addf %630, %610 : f32
    %632 = arith.addf %631, %612 : f32
    %633 = arith.addf %632, %614 : f32
    %634 = arith.addf %633, %616 : f32
    %635 = arith.addf %634, %618 : f32
    %636 = arith.addf %635, %620 : f32
    %cst_174 = arith.constant 1.000000e+00 : f32
    %637 = arith.divf %cst_174, %636 : f32
    %638 = arith.mulf %588, %637 : f32
    %639 = arith.mulf %590, %637 : f32
    %640 = arith.mulf %592, %637 : f32
    %641 = arith.mulf %594, %637 : f32
    %642 = arith.mulf %596, %637 : f32
    %643 = arith.mulf %598, %637 : f32
    %644 = arith.mulf %600, %637 : f32
    %645 = arith.mulf %602, %637 : f32
    %646 = arith.mulf %604, %637 : f32
    %647 = arith.mulf %606, %637 : f32
    %648 = arith.mulf %608, %637 : f32
    %649 = arith.mulf %610, %637 : f32
    %650 = arith.mulf %612, %637 : f32
    %651 = arith.mulf %614, %637 : f32
    %652 = arith.mulf %616, %637 : f32
    %653 = arith.mulf %618, %637 : f32
    %654 = arith.mulf %620, %637 : f32
    %655 = arith.addf %638, %639 : f32
    %656 = arith.addf %655, %640 : f32
    %657 = arith.addf %656, %641 : f32
    %658 = arith.addf %657, %642 : f32
    %659 = arith.addf %658, %643 : f32
    %660 = arith.addf %659, %644 : f32
    %661 = arith.addf %660, %645 : f32
    %662 = arith.addf %661, %646 : f32
    %663 = arith.addf %662, %647 : f32
    %664 = arith.addf %663, %648 : f32
    %665 = arith.addf %664, %649 : f32
    %666 = arith.addf %665, %650 : f32
    %667 = arith.addf %666, %651 : f32
    %668 = arith.addf %667, %652 : f32
    %669 = arith.addf %668, %653 : f32
    %670 = arith.addf %669, %654 : f32
    %cst_175 = arith.constant 0.000000e+00 : f32
    %671 = vector.broadcast %cst_175 : f32 to vector<8x128xf32>
    %cst_176 = arith.constant 0.000000e+00 : f32
    %672 = vector.broadcast %cst_176 : f32 to vector<8x128xf32>
    %c0_i32_177 = arith.constant 0 : i32
    %673 = vector.broadcast %c0_i32_177 : i32 to vector<8x128xi32>
    %674 = arith.cmpi eq, %7, %673 : vector<8x128xi32>
    %675 = vector.broadcast %638 : f32 to vector<8x128xf32>
    %676 = arith.select %674, %675, %671 : vector<8x128xi1>, vector<8x128xf32>
    %677 = vector.broadcast %639 : f32 to vector<8x128xf32>
    %678 = arith.select %674, %677, %672 : vector<8x128xi1>, vector<8x128xf32>
    %c1_i32_178 = arith.constant 1 : i32
    %679 = vector.broadcast %c1_i32_178 : i32 to vector<8x128xi32>
    %680 = arith.cmpi eq, %7, %679 : vector<8x128xi32>
    %681 = vector.broadcast %655 : f32 to vector<8x128xf32>
    %682 = arith.select %680, %681, %676 : vector<8x128xi1>, vector<8x128xf32>
    %683 = vector.broadcast %640 : f32 to vector<8x128xf32>
    %684 = arith.select %680, %683, %678 : vector<8x128xi1>, vector<8x128xf32>
    %c2_i32_179 = arith.constant 2 : i32
    %685 = vector.broadcast %c2_i32_179 : i32 to vector<8x128xi32>
    %686 = arith.cmpi eq, %7, %685 : vector<8x128xi32>
    %687 = vector.broadcast %656 : f32 to vector<8x128xf32>
    %688 = arith.select %686, %687, %682 : vector<8x128xi1>, vector<8x128xf32>
    %689 = vector.broadcast %641 : f32 to vector<8x128xf32>
    %690 = arith.select %686, %689, %684 : vector<8x128xi1>, vector<8x128xf32>
    %c3_i32_180 = arith.constant 3 : i32
    %691 = vector.broadcast %c3_i32_180 : i32 to vector<8x128xi32>
    %692 = arith.cmpi eq, %7, %691 : vector<8x128xi32>
    %693 = vector.broadcast %657 : f32 to vector<8x128xf32>
    %694 = arith.select %692, %693, %688 : vector<8x128xi1>, vector<8x128xf32>
    %695 = vector.broadcast %642 : f32 to vector<8x128xf32>
    %696 = arith.select %692, %695, %690 : vector<8x128xi1>, vector<8x128xf32>
    %c4_i32_181 = arith.constant 4 : i32
    %697 = vector.broadcast %c4_i32_181 : i32 to vector<8x128xi32>
    %698 = arith.cmpi eq, %7, %697 : vector<8x128xi32>
    %699 = vector.broadcast %658 : f32 to vector<8x128xf32>
    %700 = arith.select %698, %699, %694 : vector<8x128xi1>, vector<8x128xf32>
    %701 = vector.broadcast %643 : f32 to vector<8x128xf32>
    %702 = arith.select %698, %701, %696 : vector<8x128xi1>, vector<8x128xf32>
    %c5_i32_182 = arith.constant 5 : i32
    %703 = vector.broadcast %c5_i32_182 : i32 to vector<8x128xi32>
    %704 = arith.cmpi eq, %7, %703 : vector<8x128xi32>
    %705 = vector.broadcast %659 : f32 to vector<8x128xf32>
    %706 = arith.select %704, %705, %700 : vector<8x128xi1>, vector<8x128xf32>
    %707 = vector.broadcast %644 : f32 to vector<8x128xf32>
    %708 = arith.select %704, %707, %702 : vector<8x128xi1>, vector<8x128xf32>
    %c6_i32_183 = arith.constant 6 : i32
    %709 = vector.broadcast %c6_i32_183 : i32 to vector<8x128xi32>
    %710 = arith.cmpi eq, %7, %709 : vector<8x128xi32>
    %711 = vector.broadcast %660 : f32 to vector<8x128xf32>
    %712 = arith.select %710, %711, %706 : vector<8x128xi1>, vector<8x128xf32>
    %713 = vector.broadcast %645 : f32 to vector<8x128xf32>
    %714 = arith.select %710, %713, %708 : vector<8x128xi1>, vector<8x128xf32>
    %c7_i32_184 = arith.constant 7 : i32
    %715 = vector.broadcast %c7_i32_184 : i32 to vector<8x128xi32>
    %716 = arith.cmpi eq, %7, %715 : vector<8x128xi32>
    %717 = vector.broadcast %661 : f32 to vector<8x128xf32>
    %718 = arith.select %716, %717, %712 : vector<8x128xi1>, vector<8x128xf32>
    %719 = vector.broadcast %646 : f32 to vector<8x128xf32>
    %720 = arith.select %716, %719, %714 : vector<8x128xi1>, vector<8x128xf32>
    %c8_i32_185 = arith.constant 8 : i32
    %721 = vector.broadcast %c8_i32_185 : i32 to vector<8x128xi32>
    %722 = arith.cmpi eq, %7, %721 : vector<8x128xi32>
    %723 = vector.broadcast %662 : f32 to vector<8x128xf32>
    %724 = arith.select %722, %723, %718 : vector<8x128xi1>, vector<8x128xf32>
    %725 = vector.broadcast %647 : f32 to vector<8x128xf32>
    %726 = arith.select %722, %725, %720 : vector<8x128xi1>, vector<8x128xf32>
    %c9_i32_186 = arith.constant 9 : i32
    %727 = vector.broadcast %c9_i32_186 : i32 to vector<8x128xi32>
    %728 = arith.cmpi eq, %7, %727 : vector<8x128xi32>
    %729 = vector.broadcast %663 : f32 to vector<8x128xf32>
    %730 = arith.select %728, %729, %724 : vector<8x128xi1>, vector<8x128xf32>
    %731 = vector.broadcast %648 : f32 to vector<8x128xf32>
    %732 = arith.select %728, %731, %726 : vector<8x128xi1>, vector<8x128xf32>
    %c10_i32_187 = arith.constant 10 : i32
    %733 = vector.broadcast %c10_i32_187 : i32 to vector<8x128xi32>
    %734 = arith.cmpi eq, %7, %733 : vector<8x128xi32>
    %735 = vector.broadcast %664 : f32 to vector<8x128xf32>
    %736 = arith.select %734, %735, %730 : vector<8x128xi1>, vector<8x128xf32>
    %737 = vector.broadcast %649 : f32 to vector<8x128xf32>
    %738 = arith.select %734, %737, %732 : vector<8x128xi1>, vector<8x128xf32>
    %c11_i32_188 = arith.constant 11 : i32
    %739 = vector.broadcast %c11_i32_188 : i32 to vector<8x128xi32>
    %740 = arith.cmpi eq, %7, %739 : vector<8x128xi32>
    %741 = vector.broadcast %665 : f32 to vector<8x128xf32>
    %742 = arith.select %740, %741, %736 : vector<8x128xi1>, vector<8x128xf32>
    %743 = vector.broadcast %650 : f32 to vector<8x128xf32>
    %744 = arith.select %740, %743, %738 : vector<8x128xi1>, vector<8x128xf32>
    %c12_i32_189 = arith.constant 12 : i32
    %745 = vector.broadcast %c12_i32_189 : i32 to vector<8x128xi32>
    %746 = arith.cmpi eq, %7, %745 : vector<8x128xi32>
    %747 = vector.broadcast %666 : f32 to vector<8x128xf32>
    %748 = arith.select %746, %747, %742 : vector<8x128xi1>, vector<8x128xf32>
    %749 = vector.broadcast %651 : f32 to vector<8x128xf32>
    %750 = arith.select %746, %749, %744 : vector<8x128xi1>, vector<8x128xf32>
    %c13_i32_190 = arith.constant 13 : i32
    %751 = vector.broadcast %c13_i32_190 : i32 to vector<8x128xi32>
    %752 = arith.cmpi eq, %7, %751 : vector<8x128xi32>
    %753 = vector.broadcast %667 : f32 to vector<8x128xf32>
    %754 = arith.select %752, %753, %748 : vector<8x128xi1>, vector<8x128xf32>
    %755 = vector.broadcast %652 : f32 to vector<8x128xf32>
    %756 = arith.select %752, %755, %750 : vector<8x128xi1>, vector<8x128xf32>
    %c14_i32_191 = arith.constant 14 : i32
    %757 = vector.broadcast %c14_i32_191 : i32 to vector<8x128xi32>
    %758 = arith.cmpi eq, %7, %757 : vector<8x128xi32>
    %759 = vector.broadcast %668 : f32 to vector<8x128xf32>
    %760 = arith.select %758, %759, %754 : vector<8x128xi1>, vector<8x128xf32>
    %761 = vector.broadcast %653 : f32 to vector<8x128xf32>
    %762 = arith.select %758, %761, %756 : vector<8x128xi1>, vector<8x128xf32>
    %c15_i32_192 = arith.constant 15 : i32
    %763 = vector.broadcast %c15_i32_192 : i32 to vector<8x128xi32>
    %764 = arith.cmpi eq, %7, %763 : vector<8x128xi32>
    %765 = vector.broadcast %669 : f32 to vector<8x128xf32>
    %766 = arith.select %764, %765, %760 : vector<8x128xi1>, vector<8x128xf32>
    %767 = vector.broadcast %654 : f32 to vector<8x128xf32>
    %768 = arith.select %764, %767, %762 : vector<8x128xi1>, vector<8x128xf32>
    %c16_i32_193 = arith.constant 16 : i32
    %769 = vector.broadcast %c16_i32_193 : i32 to vector<8x128xi32>
    %770 = arith.cmpi eq, %7, %769 : vector<8x128xi32>
    %771 = vector.broadcast %670 : f32 to vector<8x128xf32>
    %772 = arith.select %770, %771, %766 : vector<8x128xi1>, vector<8x128xf32>
    %773 = vector.broadcast %654 : f32 to vector<8x128xf32>
    %774 = arith.select %770, %773, %768 : vector<8x128xi1>, vector<8x128xf32>
    %775 = arith.mulf %5, %774 : vector<8x128xf32>
    %776 = arith.addf %772, %775 : vector<8x128xf32>
    %c3_194 = arith.constant 3 : index
    %c0_195 = arith.constant 0 : index
    %c0_196 = arith.constant 0 : index
    %777 = vector.load %arg3[%c3_194, %c0_195, %c0_196] : memref<16x8x128xf32, #tpu.memory_space<vmem>>, vector<1x8x128xf32>
    %778 = vector.shape_cast %777 : vector<1x8x128xf32> to vector<8x128xf32>
    %779 = vector.shape_cast %776 : vector<8x128xf32> to vector<1x8x128xf32>
    tpu.vector_store %arg3[%c3_194, %c0_195, %c0_196], %779 {strides = array<i32>} : memref<16x8x128xf32, #tpu.memory_space<vmem>>, vector<1x8x128xf32>,
    %c4_197 = arith.constant 4 : index
    %c0_198 = arith.constant 0 : index
    %780 = memref.load %arg1[%c4_197, %c0_198] : memref<16x17xf32, #tpu.memory_space<smem>>
    %781 = math.absf %780 : f32
    %c4_199 = arith.constant 4 : index
    %c1_200 = arith.constant 1 : index
    %782 = memref.load %arg1[%c4_199, %c1_200] : memref<16x17xf32, #tpu.memory_space<smem>>
    %783 = math.absf %782 : f32
    %c4_201 = arith.constant 4 : index
    %c2_202 = arith.constant 2 : index
    %784 = memref.load %arg1[%c4_201, %c2_202] : memref<16x17xf32, #tpu.memory_space<smem>>
    %785 = math.absf %784 : f32
    %c4_203 = arith.constant 4 : index
    %c3_204 = arith.constant 3 : index
    %786 = memref.load %arg1[%c4_203, %c3_204] : memref<16x17xf32, #tpu.memory_space<smem>>
    %787 = math.absf %786 : f32
    %c4_205 = arith.constant 4 : index
    %c4_206 = arith.constant 4 : index
    %788 = memref.load %arg1[%c4_205, %c4_206] : memref<16x17xf32, #tpu.memory_space<smem>>
    %789 = math.absf %788 : f32
    %c4_207 = arith.constant 4 : index
    %c5_208 = arith.constant 5 : index
    %790 = memref.load %arg1[%c4_207, %c5_208] : memref<16x17xf32, #tpu.memory_space<smem>>
    %791 = math.absf %790 : f32
    %c4_209 = arith.constant 4 : index
    %c6_210 = arith.constant 6 : index
    %792 = memref.load %arg1[%c4_209, %c6_210] : memref<16x17xf32, #tpu.memory_space<smem>>
    %793 = math.absf %792 : f32
    %c4_211 = arith.constant 4 : index
    %c7_212 = arith.constant 7 : index
    %794 = memref.load %arg1[%c4_211, %c7_212] : memref<16x17xf32, #tpu.memory_space<smem>>
    %795 = math.absf %794 : f32
    %c4_213 = arith.constant 4 : index
    %c8_214 = arith.constant 8 : index
    %796 = memref.load %arg1[%c4_213, %c8_214] : memref<16x17xf32, #tpu.memory_space<smem>>
    %797 = math.absf %796 : f32
    %c4_215 = arith.constant 4 : index
    %c9_216 = arith.constant 9 : index
    %798 = memref.load %arg1[%c4_215, %c9_216] : memref<16x17xf32, #tpu.memory_space<smem>>
    %799 = math.absf %798 : f32
    %c4_217 = arith.constant 4 : index
    %c10_218 = arith.constant 10 : index
    %800 = memref.load %arg1[%c4_217, %c10_218] : memref<16x17xf32, #tpu.memory_space<smem>>
    %801 = math.absf %800 : f32
    %c4_219 = arith.constant 4 : index
    %c11_220 = arith.constant 11 : index
    %802 = memref.load %arg1[%c4_219, %c11_220] : memref<16x17xf32, #tpu.memory_space<smem>>
    %803 = math.absf %802 : f32
    %c4_221 = arith.constant 4 : index
    %c12_222 = arith.constant 12 : index
    %804 = memref.load %arg1[%c4_221, %c12_222] : memref<16x17xf32, #tpu.memory_space<smem>>
    %805 = math.absf %804 : f32
    %c4_223 = arith.constant 4 : index
    %c13_224 = arith.constant 13 : index
    %806 = memref.load %arg1[%c4_223, %c13_224] : memref<16x17xf32, #tpu.memory_space<smem>>
    %807 = math.absf %806 : f32
    %c4_225 = arith.constant 4 : index
    %c14_226 = arith.constant 14 : index
    %808 = memref.load %arg1[%c4_225, %c14_226] : memref<16x17xf32, #tpu.memory_space<smem>>
    %809 = math.absf %808 : f32
    %c4_227 = arith.constant 4 : index
    %c15_228 = arith.constant 15 : index
    %810 = memref.load %arg1[%c4_227, %c15_228] : memref<16x17xf32, #tpu.memory_space<smem>>
    %811 = math.absf %810 : f32
    %c4_229 = arith.constant 4 : index
    %c16_230 = arith.constant 16 : index
    %812 = memref.load %arg1[%c4_229, %c16_230] : memref<16x17xf32, #tpu.memory_space<smem>>
    %813 = math.absf %812 : f32
    %814 = arith.addf %781, %783 : f32
    %815 = arith.addf %814, %785 : f32
    %816 = arith.addf %815, %787 : f32
    %817 = arith.addf %816, %789 : f32
    %818 = arith.addf %817, %791 : f32
    %819 = arith.addf %818, %793 : f32
    %820 = arith.addf %819, %795 : f32
    %821 = arith.addf %820, %797 : f32
    %822 = arith.addf %821, %799 : f32
    %823 = arith.addf %822, %801 : f32
    %824 = arith.addf %823, %803 : f32
    %825 = arith.addf %824, %805 : f32
    %826 = arith.addf %825, %807 : f32
    %827 = arith.addf %826, %809 : f32
    %828 = arith.addf %827, %811 : f32
    %829 = arith.addf %828, %813 : f32
    %cst_231 = arith.constant 1.000000e+00 : f32
    %830 = arith.divf %cst_231, %829 : f32
    %831 = arith.mulf %781, %830 : f32
    %832 = arith.mulf %783, %830 : f32
    %833 = arith.mulf %785, %830 : f32
    %834 = arith.mulf %787, %830 : f32
    %835 = arith.mulf %789, %830 : f32
    %836 = arith.mulf %791, %830 : f32
    %837 = arith.mulf %793, %830 : f32
    %838 = arith.mulf %795, %830 : f32
    %839 = arith.mulf %797, %830 : f32
    %840 = arith.mulf %799, %830 : f32
    %841 = arith.mulf %801, %830 : f32
    %842 = arith.mulf %803, %830 : f32
    %843 = arith.mulf %805, %830 : f32
    %844 = arith.mulf %807, %830 : f32
    %845 = arith.mulf %809, %830 : f32
    %846 = arith.mulf %811, %830 : f32
    %847 = arith.mulf %813, %830 : f32
    %848 = arith.addf %831, %832 : f32
    %849 = arith.addf %848, %833 : f32
    %850 = arith.addf %849, %834 : f32
    %851 = arith.addf %850, %835 : f32
    %852 = arith.addf %851, %836 : f32
    %853 = arith.addf %852, %837 : f32
    %854 = arith.addf %853, %838 : f32
    %855 = arith.addf %854, %839 : f32
    %856 = arith.addf %855, %840 : f32
    %857 = arith.addf %856, %841 : f32
    %858 = arith.addf %857, %842 : f32
    %859 = arith.addf %858, %843 : f32
    %860 = arith.addf %859, %844 : f32
    %861 = arith.addf %860, %845 : f32
    %862 = arith.addf %861, %846 : f32
    %863 = arith.addf %862, %847 : f32
    %cst_232 = arith.constant 0.000000e+00 : f32
    %864 = vector.broadcast %cst_232 : f32 to vector<8x128xf32>
    %cst_233 = arith.constant 0.000000e+00 : f32
    %865 = vector.broadcast %cst_233 : f32 to vector<8x128xf32>
    %c0_i32_234 = arith.constant 0 : i32
    %866 = vector.broadcast %c0_i32_234 : i32 to vector<8x128xi32>
    %867 = arith.cmpi eq, %7, %866 : vector<8x128xi32>
    %868 = vector.broadcast %831 : f32 to vector<8x128xf32>
    %869 = arith.select %867, %868, %864 : vector<8x128xi1>, vector<8x128xf32>
    %870 = vector.broadcast %832 : f32 to vector<8x128xf32>
    %871 = arith.select %867, %870, %865 : vector<8x128xi1>, vector<8x128xf32>
    %c1_i32_235 = arith.constant 1 : i32
    %872 = vector.broadcast %c1_i32_235 : i32 to vector<8x128xi32>
    %873 = arith.cmpi eq, %7, %872 : vector<8x128xi32>
    %874 = vector.broadcast %848 : f32 to vector<8x128xf32>
    %875 = arith.select %873, %874, %869 : vector<8x128xi1>, vector<8x128xf32>
    %876 = vector.broadcast %833 : f32 to vector<8x128xf32>
    %877 = arith.select %873, %876, %871 : vector<8x128xi1>, vector<8x128xf32>
    %c2_i32_236 = arith.constant 2 : i32
    %878 = vector.broadcast %c2_i32_236 : i32 to vector<8x128xi32>
    %879 = arith.cmpi eq, %7, %878 : vector<8x128xi32>
    %880 = vector.broadcast %849 : f32 to vector<8x128xf32>
    %881 = arith.select %879, %880, %875 : vector<8x128xi1>, vector<8x128xf32>
    %882 = vector.broadcast %834 : f32 to vector<8x128xf32>
    %883 = arith.select %879, %882, %877 : vector<8x128xi1>, vector<8x128xf32>
    %c3_i32_237 = arith.constant 3 : i32
    %884 = vector.broadcast %c3_i32_237 : i32 to vector<8x128xi32>
    %885 = arith.cmpi eq, %7, %884 : vector<8x128xi32>
    %886 = vector.broadcast %850 : f32 to vector<8x128xf32>
    %887 = arith.select %885, %886, %881 : vector<8x128xi1>, vector<8x128xf32>
    %888 = vector.broadcast %835 : f32 to vector<8x128xf32>
    %889 = arith.select %885, %888, %883 : vector<8x128xi1>, vector<8x128xf32>
    %c4_i32_238 = arith.constant 4 : i32
    %890 = vector.broadcast %c4_i32_238 : i32 to vector<8x128xi32>
    %891 = arith.cmpi eq, %7, %890 : vector<8x128xi32>
    %892 = vector.broadcast %851 : f32 to vector<8x128xf32>
    %893 = arith.select %891, %892, %887 : vector<8x128xi1>, vector<8x128xf32>
    %894 = vector.broadcast %836 : f32 to vector<8x128xf32>
    %895 = arith.select %891, %894, %889 : vector<8x128xi1>, vector<8x128xf32>
    %c5_i32_239 = arith.constant 5 : i32
    %896 = vector.broadcast %c5_i32_239 : i32 to vector<8x128xi32>
    %897 = arith.cmpi eq, %7, %896 : vector<8x128xi32>
    %898 = vector.broadcast %852 : f32 to vector<8x128xf32>
    %899 = arith.select %897, %898, %893 : vector<8x128xi1>, vector<8x128xf32>
    %900 = vector.broadcast %837 : f32 to vector<8x128xf32>
    %901 = arith.select %897, %900, %895 : vector<8x128xi1>, vector<8x128xf32>
    %c6_i32_240 = arith.constant 6 : i32
    %902 = vector.broadcast %c6_i32_240 : i32 to vector<8x128xi32>
    %903 = arith.cmpi eq, %7, %902 : vector<8x128xi32>
    %904 = vector.broadcast %853 : f32 to vector<8x128xf32>
    %905 = arith.select %903, %904, %899 : vector<8x128xi1>, vector<8x128xf32>
    %906 = vector.broadcast %838 : f32 to vector<8x128xf32>
    %907 = arith.select %903, %906, %901 : vector<8x128xi1>, vector<8x128xf32>
    %c7_i32_241 = arith.constant 7 : i32
    %908 = vector.broadcast %c7_i32_241 : i32 to vector<8x128xi32>
    %909 = arith.cmpi eq, %7, %908 : vector<8x128xi32>
    %910 = vector.broadcast %854 : f32 to vector<8x128xf32>
    %911 = arith.select %909, %910, %905 : vector<8x128xi1>, vector<8x128xf32>
    %912 = vector.broadcast %839 : f32 to vector<8x128xf32>
    %913 = arith.select %909, %912, %907 : vector<8x128xi1>, vector<8x128xf32>
    %c8_i32_242 = arith.constant 8 : i32
    %914 = vector.broadcast %c8_i32_242 : i32 to vector<8x128xi32>
    %915 = arith.cmpi eq, %7, %914 : vector<8x128xi32>
    %916 = vector.broadcast %855 : f32 to vector<8x128xf32>
    %917 = arith.select %915, %916, %911 : vector<8x128xi1>, vector<8x128xf32>
    %918 = vector.broadcast %840 : f32 to vector<8x128xf32>
    %919 = arith.select %915, %918, %913 : vector<8x128xi1>, vector<8x128xf32>
    %c9_i32_243 = arith.constant 9 : i32
    %920 = vector.broadcast %c9_i32_243 : i32 to vector<8x128xi32>
    %921 = arith.cmpi eq, %7, %920 : vector<8x128xi32>
    %922 = vector.broadcast %856 : f32 to vector<8x128xf32>
    %923 = arith.select %921, %922, %917 : vector<8x128xi1>, vector<8x128xf32>
    %924 = vector.broadcast %841 : f32 to vector<8x128xf32>
    %925 = arith.select %921, %924, %919 : vector<8x128xi1>, vector<8x128xf32>
    %c10_i32_244 = arith.constant 10 : i32
    %926 = vector.broadcast %c10_i32_244 : i32 to vector<8x128xi32>
    %927 = arith.cmpi eq, %7, %926 : vector<8x128xi32>
    %928 = vector.broadcast %857 : f32 to vector<8x128xf32>
    %929 = arith.select %927, %928, %923 : vector<8x128xi1>, vector<8x128xf32>
    %930 = vector.broadcast %842 : f32 to vector<8x128xf32>
    %931 = arith.select %927, %930, %925 : vector<8x128xi1>, vector<8x128xf32>
    %c11_i32_245 = arith.constant 11 : i32
    %932 = vector.broadcast %c11_i32_245 : i32 to vector<8x128xi32>
    %933 = arith.cmpi eq, %7, %932 : vector<8x128xi32>
    %934 = vector.broadcast %858 : f32 to vector<8x128xf32>
    %935 = arith.select %933, %934, %929 : vector<8x128xi1>, vector<8x128xf32>
    %936 = vector.broadcast %843 : f32 to vector<8x128xf32>
    %937 = arith.select %933, %936, %931 : vector<8x128xi1>, vector<8x128xf32>
    %c12_i32_246 = arith.constant 12 : i32
    %938 = vector.broadcast %c12_i32_246 : i32 to vector<8x128xi32>
    %939 = arith.cmpi eq, %7, %938 : vector<8x128xi32>
    %940 = vector.broadcast %859 : f32 to vector<8x128xf32>
    %941 = arith.select %939, %940, %935 : vector<8x128xi1>, vector<8x128xf32>
    %942 = vector.broadcast %844 : f32 to vector<8x128xf32>
    %943 = arith.select %939, %942, %937 : vector<8x128xi1>, vector<8x128xf32>
    %c13_i32_247 = arith.constant 13 : i32
    %944 = vector.broadcast %c13_i32_247 : i32 to vector<8x128xi32>
    %945 = arith.cmpi eq, %7, %944 : vector<8x128xi32>
    %946 = vector.broadcast %860 : f32 to vector<8x128xf32>
    %947 = arith.select %945, %946, %941 : vector<8x128xi1>, vector<8x128xf32>
    %948 = vector.broadcast %845 : f32 to vector<8x128xf32>
    %949 = arith.select %945, %948, %943 : vector<8x128xi1>, vector<8x128xf32>
    %c14_i32_248 = arith.constant 14 : i32
    %950 = vector.broadcast %c14_i32_248 : i32 to vector<8x128xi32>
    %951 = arith.cmpi eq, %7, %950 : vector<8x128xi32>
    %952 = vector.broadcast %861 : f32 to vector<8x128xf32>
    %953 = arith.select %951, %952, %947 : vector<8x128xi1>, vector<8x128xf32>
    %954 = vector.broadcast %846 : f32 to vector<8x128xf32>
    %955 = arith.select %951, %954, %949 : vector<8x128xi1>, vector<8x128xf32>
    %c15_i32_249 = arith.constant 15 : i32
    %956 = vector.broadcast %c15_i32_249 : i32 to vector<8x128xi32>
    %957 = arith.cmpi eq, %7, %956 : vector<8x128xi32>
    %958 = vector.broadcast %862 : f32 to vector<8x128xf32>
    %959 = arith.select %957, %958, %953 : vector<8x128xi1>, vector<8x128xf32>
    %960 = vector.broadcast %847 : f32 to vector<8x128xf32>
    %961 = arith.select %957, %960, %955 : vector<8x128xi1>, vector<8x128xf32>
    %c16_i32_250 = arith.constant 16 : i32
    %962 = vector.broadcast %c16_i32_250 : i32 to vector<8x128xi32>
    %963 = arith.cmpi eq, %7, %962 : vector<8x128xi32>
    %964 = vector.broadcast %863 : f32 to vector<8x128xf32>
    %965 = arith.select %963, %964, %959 : vector<8x128xi1>, vector<8x128xf32>
    %966 = vector.broadcast %847 : f32 to vector<8x128xf32>
    %967 = arith.select %963, %966, %961 : vector<8x128xi1>, vector<8x128xf32>
    %968 = arith.mulf %5, %967 : vector<8x128xf32>
    %969 = arith.addf %965, %968 : vector<8x128xf32>
    %c4_251 = arith.constant 4 : index
    %c0_252 = arith.constant 0 : index
    %c0_253 = arith.constant 0 : index
    %970 = vector.load %arg3[%c4_251, %c0_252, %c0_253] : memref<16x8x128xf32, #tpu.memory_space<vmem>>, vector<1x8x128xf32>
    %971 = vector.shape_cast %970 : vector<1x8x128xf32> to vector<8x128xf32>
    %972 = vector.shape_cast %969 : vector<8x128xf32> to vector<1x8x128xf32>
    tpu.vector_store %arg3[%c4_251, %c0_252, %c0_253], %972 {strides = array<i32>} : memref<16x8x128xf32, #tpu.memory_space<vmem>>, vector<1x8x128xf32>,
    %c5_254 = arith.constant 5 : index
    %c0_255 = arith.constant 0 : index
    %973 = memref.load %arg1[%c5_254, %c0_255] : memref<16x17xf32, #tpu.memory_space<smem>>
    %974 = math.absf %973 : f32
    %c5_256 = arith.constant 5 : index
    %c1_257 = arith.constant 1 : index
    %975 = memref.load %arg1[%c5_256, %c1_257] : memref<16x17xf32, #tpu.memory_space<smem>>
    %976 = math.absf %975 : f32
    %c5_258 = arith.constant 5 : index
    %c2_259 = arith.constant 2 : index
    %977 = memref.load %arg1[%c5_258, %c2_259] : memref<16x17xf32, #tpu.memory_space<smem>>
    %978 = math.absf %977 : f32
    %c5_260 = arith.constant 5 : index
    %c3_261 = arith.constant 3 : index
    %979 = memref.load %arg1[%c5_260, %c3_261] : memref<16x17xf32, #tpu.memory_space<smem>>
    %980 = math.absf %979 : f32
    %c5_262 = arith.constant 5 : index
    %c4_263 = arith.constant 4 : index
    %981 = memref.load %arg1[%c5_262, %c4_263] : memref<16x17xf32, #tpu.memory_space<smem>>
    %982 = math.absf %981 : f32
    %c5_264 = arith.constant 5 : index
    %c5_265 = arith.constant 5 : index
    %983 = memref.load %arg1[%c5_264, %c5_265] : memref<16x17xf32, #tpu.memory_space<smem>>
    %984 = math.absf %983 : f32
    %c5_266 = arith.constant 5 : index
    %c6_267 = arith.constant 6 : index
    %985 = memref.load %arg1[%c5_266, %c6_267] : memref<16x17xf32, #tpu.memory_space<smem>>
    %986 = math.absf %985 : f32
    %c5_268 = arith.constant 5 : index
    %c7_269 = arith.constant 7 : index
    %987 = memref.load %arg1[%c5_268, %c7_269] : memref<16x17xf32, #tpu.memory_space<smem>>
    %988 = math.absf %987 : f32
    %c5_270 = arith.constant 5 : index
    %c8_271 = arith.constant 8 : index
    %989 = memref.load %arg1[%c5_270, %c8_271] : memref<16x17xf32, #tpu.memory_space<smem>>
    %990 = math.absf %989 : f32
    %c5_272 = arith.constant 5 : index
    %c9_273 = arith.constant 9 : index
    %991 = memref.load %arg1[%c5_272, %c9_273] : memref<16x17xf32, #tpu.memory_space<smem>>
    %992 = math.absf %991 : f32
    %c5_274 = arith.constant 5 : index
    %c10_275 = arith.constant 10 : index
    %993 = memref.load %arg1[%c5_274, %c10_275] : memref<16x17xf32, #tpu.memory_space<smem>>
    %994 = math.absf %993 : f32
    %c5_276 = arith.constant 5 : index
    %c11_277 = arith.constant 11 : index
    %995 = memref.load %arg1[%c5_276, %c11_277] : memref<16x17xf32, #tpu.memory_space<smem>>
    %996 = math.absf %995 : f32
    %c5_278 = arith.constant 5 : index
    %c12_279 = arith.constant 12 : index
    %997 = memref.load %arg1[%c5_278, %c12_279] : memref<16x17xf32, #tpu.memory_space<smem>>
    %998 = math.absf %997 : f32
    %c5_280 = arith.constant 5 : index
    %c13_281 = arith.constant 13 : index
    %999 = memref.load %arg1[%c5_280, %c13_281] : memref<16x17xf32, #tpu.memory_space<smem>>
    %1000 = math.absf %999 : f32
    %c5_282 = arith.constant 5 : index
    %c14_283 = arith.constant 14 : index
    %1001 = memref.load %arg1[%c5_282, %c14_283] : memref<16x17xf32, #tpu.memory_space<smem>>
    %1002 = math.absf %1001 : f32
    %c5_284 = arith.constant 5 : index
    %c15_285 = arith.constant 15 : index
    %1003 = memref.load %arg1[%c5_284, %c15_285] : memref<16x17xf32, #tpu.memory_space<smem>>
    %1004 = math.absf %1003 : f32
    %c5_286 = arith.constant 5 : index
    %c16_287 = arith.constant 16 : index
    %1005 = memref.load %arg1[%c5_286, %c16_287] : memref<16x17xf32, #tpu.memory_space<smem>>
    %1006 = math.absf %1005 : f32
    %1007 = arith.addf %974, %976 : f32
    %1008 = arith.addf %1007, %978 : f32
    %1009 = arith.addf %1008, %980 : f32
    %1010 = arith.addf %1009, %982 : f32
    %1011 = arith.addf %1010, %984 : f32
    %1012 = arith.addf %1011, %986 : f32
    %1013 = arith.addf %1012, %988 : f32
    %1014 = arith.addf %1013, %990 : f32
    %1015 = arith.addf %1014, %992 : f32
    %1016 = arith.addf %1015, %994 : f32
    %1017 = arith.addf %1016, %996 : f32
    %1018 = arith.addf %1017, %998 : f32
    %1019 = arith.addf %1018, %1000 : f32
    %1020 = arith.addf %1019, %1002 : f32
    %1021 = arith.addf %1020, %1004 : f32
    %1022 = arith.addf %1021, %1006 : f32
    %cst_288 = arith.constant 1.000000e+00 : f32
    %1023 = arith.divf %cst_288, %1022 : f32
    %1024 = arith.mulf %974, %1023 : f32
    %1025 = arith.mulf %976, %1023 : f32
    %1026 = arith.mulf %978, %1023 : f32
    %1027 = arith.mulf %980, %1023 : f32
    %1028 = arith.mulf %982, %1023 : f32
    %1029 = arith.mulf %984, %1023 : f32
    %1030 = arith.mulf %986, %1023 : f32
    %1031 = arith.mulf %988, %1023 : f32
    %1032 = arith.mulf %990, %1023 : f32
    %1033 = arith.mulf %992, %1023 : f32
    %1034 = arith.mulf %994, %1023 : f32
    %1035 = arith.mulf %996, %1023 : f32
    %1036 = arith.mulf %998, %1023 : f32
    %1037 = arith.mulf %1000, %1023 : f32
    %1038 = arith.mulf %1002, %1023 : f32
    %1039 = arith.mulf %1004, %1023 : f32
    %1040 = arith.mulf %1006, %1023 : f32
    %1041 = arith.addf %1024, %1025 : f32
    %1042 = arith.addf %1041, %1026 : f32
    %1043 = arith.addf %1042, %1027 : f32
    %1044 = arith.addf %1043, %1028 : f32
    %1045 = arith.addf %1044, %1029 : f32
    %1046 = arith.addf %1045, %1030 : f32
    %1047 = arith.addf %1046, %1031 : f32
    %1048 = arith.addf %1047, %1032 : f32
    %1049 = arith.addf %1048, %1033 : f32
    %1050 = arith.addf %1049, %1034 : f32
    %1051 = arith.addf %1050, %1035 : f32
    %1052 = arith.addf %1051, %1036 : f32
    %1053 = arith.addf %1052, %1037 : f32
    %1054 = arith.addf %1053, %1038 : f32
    %1055 = arith.addf %1054, %1039 : f32
    %1056 = arith.addf %1055, %1040 : f32
    %cst_289 = arith.constant 0.000000e+00 : f32
    %1057 = vector.broadcast %cst_289 : f32 to vector<8x128xf32>
    %cst_290 = arith.constant 0.000000e+00 : f32
    %1058 = vector.broadcast %cst_290 : f32 to vector<8x128xf32>
    %c0_i32_291 = arith.constant 0 : i32
    %1059 = vector.broadcast %c0_i32_291 : i32 to vector<8x128xi32>
    %1060 = arith.cmpi eq, %7, %1059 : vector<8x128xi32>
    %1061 = vector.broadcast %1024 : f32 to vector<8x128xf32>
    %1062 = arith.select %1060, %1061, %1057 : vector<8x128xi1>, vector<8x128xf32>
    %1063 = vector.broadcast %1025 : f32 to vector<8x128xf32>
    %1064 = arith.select %1060, %1063, %1058 : vector<8x128xi1>, vector<8x128xf32>
    %c1_i32_292 = arith.constant 1 : i32
    %1065 = vector.broadcast %c1_i32_292 : i32 to vector<8x128xi32>
    %1066 = arith.cmpi eq, %7, %1065 : vector<8x128xi32>
    %1067 = vector.broadcast %1041 : f32 to vector<8x128xf32>
    %1068 = arith.select %1066, %1067, %1062 : vector<8x128xi1>, vector<8x128xf32>
    %1069 = vector.broadcast %1026 : f32 to vector<8x128xf32>
    %1070 = arith.select %1066, %1069, %1064 : vector<8x128xi1>, vector<8x128xf32>
    %c2_i32_293 = arith.constant 2 : i32
    %1071 = vector.broadcast %c2_i32_293 : i32 to vector<8x128xi32>
    %1072 = arith.cmpi eq, %7, %1071 : vector<8x128xi32>
    %1073 = vector.broadcast %1042 : f32 to vector<8x128xf32>
    %1074 = arith.select %1072, %1073, %1068 : vector<8x128xi1>, vector<8x128xf32>
    %1075 = vector.broadcast %1027 : f32 to vector<8x128xf32>
    %1076 = arith.select %1072, %1075, %1070 : vector<8x128xi1>, vector<8x128xf32>
    %c3_i32_294 = arith.constant 3 : i32
    %1077 = vector.broadcast %c3_i32_294 : i32 to vector<8x128xi32>
    %1078 = arith.cmpi eq, %7, %1077 : vector<8x128xi32>
    %1079 = vector.broadcast %1043 : f32 to vector<8x128xf32>
    %1080 = arith.select %1078, %1079, %1074 : vector<8x128xi1>, vector<8x128xf32>
    %1081 = vector.broadcast %1028 : f32 to vector<8x128xf32>
    %1082 = arith.select %1078, %1081, %1076 : vector<8x128xi1>, vector<8x128xf32>
    %c4_i32_295 = arith.constant 4 : i32
    %1083 = vector.broadcast %c4_i32_295 : i32 to vector<8x128xi32>
    %1084 = arith.cmpi eq, %7, %1083 : vector<8x128xi32>
    %1085 = vector.broadcast %1044 : f32 to vector<8x128xf32>
    %1086 = arith.select %1084, %1085, %1080 : vector<8x128xi1>, vector<8x128xf32>
    %1087 = vector.broadcast %1029 : f32 to vector<8x128xf32>
    %1088 = arith.select %1084, %1087, %1082 : vector<8x128xi1>, vector<8x128xf32>
    %c5_i32_296 = arith.constant 5 : i32
    %1089 = vector.broadcast %c5_i32_296 : i32 to vector<8x128xi32>
    %1090 = arith.cmpi eq, %7, %1089 : vector<8x128xi32>
    %1091 = vector.broadcast %1045 : f32 to vector<8x128xf32>
    %1092 = arith.select %1090, %1091, %1086 : vector<8x128xi1>, vector<8x128xf32>
    %1093 = vector.broadcast %1030 : f32 to vector<8x128xf32>
    %1094 = arith.select %1090, %1093, %1088 : vector<8x128xi1>, vector<8x128xf32>
    %c6_i32_297 = arith.constant 6 : i32
    %1095 = vector.broadcast %c6_i32_297 : i32 to vector<8x128xi32>
    %1096 = arith.cmpi eq, %7, %1095 : vector<8x128xi32>
    %1097 = vector.broadcast %1046 : f32 to vector<8x128xf32>
    %1098 = arith.select %1096, %1097, %1092 : vector<8x128xi1>, vector<8x128xf32>
    %1099 = vector.broadcast %1031 : f32 to vector<8x128xf32>
    %1100 = arith.select %1096, %1099, %1094 : vector<8x128xi1>, vector<8x128xf32>
    %c7_i32_298 = arith.constant 7 : i32
    %1101 = vector.broadcast %c7_i32_298 : i32 to vector<8x128xi32>
    %1102 = arith.cmpi eq, %7, %1101 : vector<8x128xi32>
    %1103 = vector.broadcast %1047 : f32 to vector<8x128xf32>
    %1104 = arith.select %1102, %1103, %1098 : vector<8x128xi1>, vector<8x128xf32>
    %1105 = vector.broadcast %1032 : f32 to vector<8x128xf32>
    %1106 = arith.select %1102, %1105, %1100 : vector<8x128xi1>, vector<8x128xf32>
    %c8_i32_299 = arith.constant 8 : i32
    %1107 = vector.broadcast %c8_i32_299 : i32 to vector<8x128xi32>
    %1108 = arith.cmpi eq, %7, %1107 : vector<8x128xi32>
    %1109 = vector.broadcast %1048 : f32 to vector<8x128xf32>
    %1110 = arith.select %1108, %1109, %1104 : vector<8x128xi1>, vector<8x128xf32>
    %1111 = vector.broadcast %1033 : f32 to vector<8x128xf32>
    %1112 = arith.select %1108, %1111, %1106 : vector<8x128xi1>, vector<8x128xf32>
    %c9_i32_300 = arith.constant 9 : i32
    %1113 = vector.broadcast %c9_i32_300 : i32 to vector<8x128xi32>
    %1114 = arith.cmpi eq, %7, %1113 : vector<8x128xi32>
    %1115 = vector.broadcast %1049 : f32 to vector<8x128xf32>
    %1116 = arith.select %1114, %1115, %1110 : vector<8x128xi1>, vector<8x128xf32>
    %1117 = vector.broadcast %1034 : f32 to vector<8x128xf32>
    %1118 = arith.select %1114, %1117, %1112 : vector<8x128xi1>, vector<8x128xf32>
    %c10_i32_301 = arith.constant 10 : i32
    %1119 = vector.broadcast %c10_i32_301 : i32 to vector<8x128xi32>
    %1120 = arith.cmpi eq, %7, %1119 : vector<8x128xi32>
    %1121 = vector.broadcast %1050 : f32 to vector<8x128xf32>
    %1122 = arith.select %1120, %1121, %1116 : vector<8x128xi1>, vector<8x128xf32>
    %1123 = vector.broadcast %1035 : f32 to vector<8x128xf32>
    %1124 = arith.select %1120, %1123, %1118 : vector<8x128xi1>, vector<8x128xf32>
    %c11_i32_302 = arith.constant 11 : i32
    %1125 = vector.broadcast %c11_i32_302 : i32 to vector<8x128xi32>
    %1126 = arith.cmpi eq, %7, %1125 : vector<8x128xi32>
    %1127 = vector.broadcast %1051 : f32 to vector<8x128xf32>
    %1128 = arith.select %1126, %1127, %1122 : vector<8x128xi1>, vector<8x128xf32>
    %1129 = vector.broadcast %1036 : f32 to vector<8x128xf32>
    %1130 = arith.select %1126, %1129, %1124 : vector<8x128xi1>, vector<8x128xf32>
    %c12_i32_303 = arith.constant 12 : i32
    %1131 = vector.broadcast %c12_i32_303 : i32 to vector<8x128xi32>
    %1132 = arith.cmpi eq, %7, %1131 : vector<8x128xi32>
    %1133 = vector.broadcast %1052 : f32 to vector<8x128xf32>
    %1134 = arith.select %1132, %1133, %1128 : vector<8x128xi1>, vector<8x128xf32>
    %1135 = vector.broadcast %1037 : f32 to vector<8x128xf32>
    %1136 = arith.select %1132, %1135, %1130 : vector<8x128xi1>, vector<8x128xf32>
    %c13_i32_304 = arith.constant 13 : i32
    %1137 = vector.broadcast %c13_i32_304 : i32 to vector<8x128xi32>
    %1138 = arith.cmpi eq, %7, %1137 : vector<8x128xi32>
    %1139 = vector.broadcast %1053 : f32 to vector<8x128xf32>
    %1140 = arith.select %1138, %1139, %1134 : vector<8x128xi1>, vector<8x128xf32>
    %1141 = vector.broadcast %1038 : f32 to vector<8x128xf32>
    %1142 = arith.select %1138, %1141, %1136 : vector<8x128xi1>, vector<8x128xf32>
    %c14_i32_305 = arith.constant 14 : i32
    %1143 = vector.broadcast %c14_i32_305 : i32 to vector<8x128xi32>
    %1144 = arith.cmpi eq, %7, %1143 : vector<8x128xi32>
    %1145 = vector.broadcast %1054 : f32 to vector<8x128xf32>
    %1146 = arith.select %1144, %1145, %1140 : vector<8x128xi1>, vector<8x128xf32>
    %1147 = vector.broadcast %1039 : f32 to vector<8x128xf32>
    %1148 = arith.select %1144, %1147, %1142 : vector<8x128xi1>, vector<8x128xf32>
    %c15_i32_306 = arith.constant 15 : i32
    %1149 = vector.broadcast %c15_i32_306 : i32 to vector<8x128xi32>
    %1150 = arith.cmpi eq, %7, %1149 : vector<8x128xi32>
    %1151 = vector.broadcast %1055 : f32 to vector<8x128xf32>
    %1152 = arith.select %1150, %1151, %1146 : vector<8x128xi1>, vector<8x128xf32>
    %1153 = vector.broadcast %1040 : f32 to vector<8x128xf32>
    %1154 = arith.select %1150, %1153, %1148 : vector<8x128xi1>, vector<8x128xf32>
    %c16_i32_307 = arith.constant 16 : i32
    %1155 = vector.broadcast %c16_i32_307 : i32 to vector<8x128xi32>
    %1156 = arith.cmpi eq, %7, %1155 : vector<8x128xi32>
    %1157 = vector.broadcast %1056 : f32 to vector<8x128xf32>
    %1158 = arith.select %1156, %1157, %1152 : vector<8x128xi1>, vector<8x128xf32>
    %1159 = vector.broadcast %1040 : f32 to vector<8x128xf32>
    %1160 = arith.select %1156, %1159, %1154 : vector<8x128xi1>, vector<8x128xf32>
    %1161 = arith.mulf %5, %1160 : vector<8x128xf32>
    %1162 = arith.addf %1158, %1161 : vector<8x128xf32>
    %c5_308 = arith.constant 5 : index
    %c0_309 = arith.constant 0 : index
    %c0_310 = arith.constant 0 : index
    %1163 = vector.load %arg3[%c5_308, %c0_309, %c0_310] : memref<16x8x128xf32, #tpu.memory_space<vmem>>, vector<1x8x128xf32>
    %1164 = vector.shape_cast %1163 : vector<1x8x128xf32> to vector<8x128xf32>
    %1165 = vector.shape_cast %1162 : vector<8x128xf32> to vector<1x8x128xf32>
    tpu.vector_store %arg3[%c5_308, %c0_309, %c0_310], %1165 {strides = array<i32>} : memref<16x8x128xf32, #tpu.memory_space<vmem>>, vector<1x8x128xf32>,
    %c6_311 = arith.constant 6 : index
    %c0_312 = arith.constant 0 : index
    %1166 = memref.load %arg1[%c6_311, %c0_312] : memref<16x17xf32, #tpu.memory_space<smem>>
    %1167 = math.absf %1166 : f32
    %c6_313 = arith.constant 6 : index
    %c1_314 = arith.constant 1 : index
    %1168 = memref.load %arg1[%c6_313, %c1_314] : memref<16x17xf32, #tpu.memory_space<smem>>
    %1169 = math.absf %1168 : f32
    %c6_315 = arith.constant 6 : index
    %c2_316 = arith.constant 2 : index
    %1170 = memref.load %arg1[%c6_315, %c2_316] : memref<16x17xf32, #tpu.memory_space<smem>>
    %1171 = math.absf %1170 : f32
    %c6_317 = arith.constant 6 : index
    %c3_318 = arith.constant 3 : index
    %1172 = memref.load %arg1[%c6_317, %c3_318] : memref<16x17xf32, #tpu.memory_space<smem>>
    %1173 = math.absf %1172 : f32
    %c6_319 = arith.constant 6 : index
    %c4_320 = arith.constant 4 : index
    %1174 = memref.load %arg1[%c6_319, %c4_320] : memref<16x17xf32, #tpu.memory_space<smem>>
    %1175 = math.absf %1174 : f32
    %c6_321 = arith.constant 6 : index
    %c5_322 = arith.constant 5 : index
    %1176 = memref.load %arg1[%c6_321, %c5_322] : memref<16x17xf32, #tpu.memory_space<smem>>
    %1177 = math.absf %1176 : f32
    %c6_323 = arith.constant 6 : index
    %c6_324 = arith.constant 6 : index
    %1178 = memref.load %arg1[%c6_323, %c6_324] : memref<16x17xf32, #tpu.memory_space<smem>>
    %1179 = math.absf %1178 : f32
    %c6_325 = arith.constant 6 : index
    %c7_326 = arith.constant 7 : index
    %1180 = memref.load %arg1[%c6_325, %c7_326] : memref<16x17xf32, #tpu.memory_space<smem>>
    %1181 = math.absf %1180 : f32
    %c6_327 = arith.constant 6 : index
    %c8_328 = arith.constant 8 : index
    %1182 = memref.load %arg1[%c6_327, %c8_328] : memref<16x17xf32, #tpu.memory_space<smem>>
    %1183 = math.absf %1182 : f32
    %c6_329 = arith.constant 6 : index
    %c9_330 = arith.constant 9 : index
    %1184 = memref.load %arg1[%c6_329, %c9_330] : memref<16x17xf32, #tpu.memory_space<smem>>
    %1185 = math.absf %1184 : f32
    %c6_331 = arith.constant 6 : index
    %c10_332 = arith.constant 10 : index
    %1186 = memref.load %arg1[%c6_331, %c10_332] : memref<16x17xf32, #tpu.memory_space<smem>>
    %1187 = math.absf %1186 : f32
    %c6_333 = arith.constant 6 : index
    %c11_334 = arith.constant 11 : index
    %1188 = memref.load %arg1[%c6_333, %c11_334] : memref<16x17xf32, #tpu.memory_space<smem>>
    %1189 = math.absf %1188 : f32
    %c6_335 = arith.constant 6 : index
    %c12_336 = arith.constant 12 : index
    %1190 = memref.load %arg1[%c6_335, %c12_336] : memref<16x17xf32, #tpu.memory_space<smem>>
    %1191 = math.absf %1190 : f32
    %c6_337 = arith.constant 6 : index
    %c13_338 = arith.constant 13 : index
    %1192 = memref.load %arg1[%c6_337, %c13_338] : memref<16x17xf32, #tpu.memory_space<smem>>
    %1193 = math.absf %1192 : f32
    %c6_339 = arith.constant 6 : index
    %c14_340 = arith.constant 14 : index
    %1194 = memref.load %arg1[%c6_339, %c14_340] : memref<16x17xf32, #tpu.memory_space<smem>>
    %1195 = math.absf %1194 : f32
    %c6_341 = arith.constant 6 : index
    %c15_342 = arith.constant 15 : index
    %1196 = memref.load %arg1[%c6_341, %c15_342] : memref<16x17xf32, #tpu.memory_space<smem>>
    %1197 = math.absf %1196 : f32
    %c6_343 = arith.constant 6 : index
    %c16_344 = arith.constant 16 : index
    %1198 = memref.load %arg1[%c6_343, %c16_344] : memref<16x17xf32, #tpu.memory_space<smem>>
    %1199 = math.absf %1198 : f32
    %1200 = arith.addf %1167, %1169 : f32
    %1201 = arith.addf %1200, %1171 : f32
    %1202 = arith.addf %1201, %1173 : f32
    %1203 = arith.addf %1202, %1175 : f32
    %1204 = arith.addf %1203, %1177 : f32
    %1205 = arith.addf %1204, %1179 : f32
    %1206 = arith.addf %1205, %1181 : f32
    %1207 = arith.addf %1206, %1183 : f32
    %1208 = arith.addf %1207, %1185 : f32
    %1209 = arith.addf %1208, %1187 : f32
    %1210 = arith.addf %1209, %1189 : f32
    %1211 = arith.addf %1210, %1191 : f32
    %1212 = arith.addf %1211, %1193 : f32
    %1213 = arith.addf %1212, %1195 : f32
    %1214 = arith.addf %1213, %1197 : f32
    %1215 = arith.addf %1214, %1199 : f32
    %cst_345 = arith.constant 1.000000e+00 : f32
    %1216 = arith.divf %cst_345, %1215 : f32
    %1217 = arith.mulf %1167, %1216 : f32
    %1218 = arith.mulf %1169, %1216 : f32
    %1219 = arith.mulf %1171, %1216 : f32
    %1220 = arith.mulf %1173, %1216 : f32
    %1221 = arith.mulf %1175, %1216 : f32
    %1222 = arith.mulf %1177, %1216 : f32
    %1223 = arith.mulf %1179, %1216 : f32
    %1224 = arith.mulf %1181, %1216 : f32
    %1225 = arith.mulf %1183, %1216 : f32
    %1226 = arith.mulf %1185, %1216 : f32
    %1227 = arith.mulf %1187, %1216 : f32
    %1228 = arith.mulf %1189, %1216 : f32
    %1229 = arith.mulf %1191, %1216 : f32
    %1230 = arith.mulf %1193, %1216 : f32
    %1231 = arith.mulf %1195, %1216 : f32
    %1232 = arith.mulf %1197, %1216 : f32
    %1233 = arith.mulf %1199, %1216 : f32
    %1234 = arith.addf %1217, %1218 : f32
    %1235 = arith.addf %1234, %1219 : f32
    %1236 = arith.addf %1235, %1220 : f32
    %1237 = arith.addf %1236, %1221 : f32
    %1238 = arith.addf %1237, %1222 : f32
    %1239 = arith.addf %1238, %1223 : f32
    %1240 = arith.addf %1239, %1224 : f32
    %1241 = arith.addf %1240, %1225 : f32
    %1242 = arith.addf %1241, %1226 : f32
    %1243 = arith.addf %1242, %1227 : f32
    %1244 = arith.addf %1243, %1228 : f32
    %1245 = arith.addf %1244, %1229 : f32
    %1246 = arith.addf %1245, %1230 : f32
    %1247 = arith.addf %1246, %1231 : f32
    %1248 = arith.addf %1247, %1232 : f32
    %1249 = arith.addf %1248, %1233 : f32
    %cst_346 = arith.constant 0.000000e+00 : f32
    %1250 = vector.broadcast %cst_346 : f32 to vector<8x128xf32>
    %cst_347 = arith.constant 0.000000e+00 : f32
    %1251 = vector.broadcast %cst_347 : f32 to vector<8x128xf32>
    %c0_i32_348 = arith.constant 0 : i32
    %1252 = vector.broadcast %c0_i32_348 : i32 to vector<8x128xi32>
    %1253 = arith.cmpi eq, %7, %1252 : vector<8x128xi32>
    %1254 = vector.broadcast %1217 : f32 to vector<8x128xf32>
    %1255 = arith.select %1253, %1254, %1250 : vector<8x128xi1>, vector<8x128xf32>
    %1256 = vector.broadcast %1218 : f32 to vector<8x128xf32>
    %1257 = arith.select %1253, %1256, %1251 : vector<8x128xi1>, vector<8x128xf32>
    %c1_i32_349 = arith.constant 1 : i32
    %1258 = vector.broadcast %c1_i32_349 : i32 to vector<8x128xi32>
    %1259 = arith.cmpi eq, %7, %1258 : vector<8x128xi32>
    %1260 = vector.broadcast %1234 : f32 to vector<8x128xf32>
    %1261 = arith.select %1259, %1260, %1255 : vector<8x128xi1>, vector<8x128xf32>
    %1262 = vector.broadcast %1219 : f32 to vector<8x128xf32>
    %1263 = arith.select %1259, %1262, %1257 : vector<8x128xi1>, vector<8x128xf32>
    %c2_i32_350 = arith.constant 2 : i32
    %1264 = vector.broadcast %c2_i32_350 : i32 to vector<8x128xi32>
    %1265 = arith.cmpi eq, %7, %1264 : vector<8x128xi32>
    %1266 = vector.broadcast %1235 : f32 to vector<8x128xf32>
    %1267 = arith.select %1265, %1266, %1261 : vector<8x128xi1>, vector<8x128xf32>
    %1268 = vector.broadcast %1220 : f32 to vector<8x128xf32>
    %1269 = arith.select %1265, %1268, %1263 : vector<8x128xi1>, vector<8x128xf32>
    %c3_i32_351 = arith.constant 3 : i32
    %1270 = vector.broadcast %c3_i32_351 : i32 to vector<8x128xi32>
    %1271 = arith.cmpi eq, %7, %1270 : vector<8x128xi32>
    %1272 = vector.broadcast %1236 : f32 to vector<8x128xf32>
    %1273 = arith.select %1271, %1272, %1267 : vector<8x128xi1>, vector<8x128xf32>
    %1274 = vector.broadcast %1221 : f32 to vector<8x128xf32>
    %1275 = arith.select %1271, %1274, %1269 : vector<8x128xi1>, vector<8x128xf32>
    %c4_i32_352 = arith.constant 4 : i32
    %1276 = vector.broadcast %c4_i32_352 : i32 to vector<8x128xi32>
    %1277 = arith.cmpi eq, %7, %1276 : vector<8x128xi32>
    %1278 = vector.broadcast %1237 : f32 to vector<8x128xf32>
    %1279 = arith.select %1277, %1278, %1273 : vector<8x128xi1>, vector<8x128xf32>
    %1280 = vector.broadcast %1222 : f32 to vector<8x128xf32>
    %1281 = arith.select %1277, %1280, %1275 : vector<8x128xi1>, vector<8x128xf32>
    %c5_i32_353 = arith.constant 5 : i32
    %1282 = vector.broadcast %c5_i32_353 : i32 to vector<8x128xi32>
    %1283 = arith.cmpi eq, %7, %1282 : vector<8x128xi32>
    %1284 = vector.broadcast %1238 : f32 to vector<8x128xf32>
    %1285 = arith.select %1283, %1284, %1279 : vector<8x128xi1>, vector<8x128xf32>
    %1286 = vector.broadcast %1223 : f32 to vector<8x128xf32>
    %1287 = arith.select %1283, %1286, %1281 : vector<8x128xi1>, vector<8x128xf32>
    %c6_i32_354 = arith.constant 6 : i32
    %1288 = vector.broadcast %c6_i32_354 : i32 to vector<8x128xi32>
    %1289 = arith.cmpi eq, %7, %1288 : vector<8x128xi32>
    %1290 = vector.broadcast %1239 : f32 to vector<8x128xf32>
    %1291 = arith.select %1289, %1290, %1285 : vector<8x128xi1>, vector<8x128xf32>
    %1292 = vector.broadcast %1224 : f32 to vector<8x128xf32>
    %1293 = arith.select %1289, %1292, %1287 : vector<8x128xi1>, vector<8x128xf32>
    %c7_i32_355 = arith.constant 7 : i32
    %1294 = vector.broadcast %c7_i32_355 : i32 to vector<8x128xi32>
    %1295 = arith.cmpi eq, %7, %1294 : vector<8x128xi32>
    %1296 = vector.broadcast %1240 : f32 to vector<8x128xf32>
    %1297 = arith.select %1295, %1296, %1291 : vector<8x128xi1>, vector<8x128xf32>
    %1298 = vector.broadcast %1225 : f32 to vector<8x128xf32>
    %1299 = arith.select %1295, %1298, %1293 : vector<8x128xi1>, vector<8x128xf32>
    %c8_i32_356 = arith.constant 8 : i32
    %1300 = vector.broadcast %c8_i32_356 : i32 to vector<8x128xi32>
    %1301 = arith.cmpi eq, %7, %1300 : vector<8x128xi32>
    %1302 = vector.broadcast %1241 : f32 to vector<8x128xf32>
    %1303 = arith.select %1301, %1302, %1297 : vector<8x128xi1>, vector<8x128xf32>
    %1304 = vector.broadcast %1226 : f32 to vector<8x128xf32>
    %1305 = arith.select %1301, %1304, %1299 : vector<8x128xi1>, vector<8x128xf32>
    %c9_i32_357 = arith.constant 9 : i32
    %1306 = vector.broadcast %c9_i32_357 : i32 to vector<8x128xi32>
    %1307 = arith.cmpi eq, %7, %1306 : vector<8x128xi32>
    %1308 = vector.broadcast %1242 : f32 to vector<8x128xf32>
    %1309 = arith.select %1307, %1308, %1303 : vector<8x128xi1>, vector<8x128xf32>
    %1310 = vector.broadcast %1227 : f32 to vector<8x128xf32>
    %1311 = arith.select %1307, %1310, %1305 : vector<8x128xi1>, vector<8x128xf32>
    %c10_i32_358 = arith.constant 10 : i32
    %1312 = vector.broadcast %c10_i32_358 : i32 to vector<8x128xi32>
    %1313 = arith.cmpi eq, %7, %1312 : vector<8x128xi32>
    %1314 = vector.broadcast %1243 : f32 to vector<8x128xf32>
    %1315 = arith.select %1313, %1314, %1309 : vector<8x128xi1>, vector<8x128xf32>
    %1316 = vector.broadcast %1228 : f32 to vector<8x128xf32>
    %1317 = arith.select %1313, %1316, %1311 : vector<8x128xi1>, vector<8x128xf32>
    %c11_i32_359 = arith.constant 11 : i32
    %1318 = vector.broadcast %c11_i32_359 : i32 to vector<8x128xi32>
    %1319 = arith.cmpi eq, %7, %1318 : vector<8x128xi32>
    %1320 = vector.broadcast %1244 : f32 to vector<8x128xf32>
    %1321 = arith.select %1319, %1320, %1315 : vector<8x128xi1>, vector<8x128xf32>
    %1322 = vector.broadcast %1229 : f32 to vector<8x128xf32>
    %1323 = arith.select %1319, %1322, %1317 : vector<8x128xi1>, vector<8x128xf32>
    %c12_i32_360 = arith.constant 12 : i32
    %1324 = vector.broadcast %c12_i32_360 : i32 to vector<8x128xi32>
    %1325 = arith.cmpi eq, %7, %1324 : vector<8x128xi32>
    %1326 = vector.broadcast %1245 : f32 to vector<8x128xf32>
    %1327 = arith.select %1325, %1326, %1321 : vector<8x128xi1>, vector<8x128xf32>
    %1328 = vector.broadcast %1230 : f32 to vector<8x128xf32>
    %1329 = arith.select %1325, %1328, %1323 : vector<8x128xi1>, vector<8x128xf32>
    %c13_i32_361 = arith.constant 13 : i32
    %1330 = vector.broadcast %c13_i32_361 : i32 to vector<8x128xi32>
    %1331 = arith.cmpi eq, %7, %1330 : vector<8x128xi32>
    %1332 = vector.broadcast %1246 : f32 to vector<8x128xf32>
    %1333 = arith.select %1331, %1332, %1327 : vector<8x128xi1>, vector<8x128xf32>
    %1334 = vector.broadcast %1231 : f32 to vector<8x128xf32>
    %1335 = arith.select %1331, %1334, %1329 : vector<8x128xi1>, vector<8x128xf32>
    %c14_i32_362 = arith.constant 14 : i32
    %1336 = vector.broadcast %c14_i32_362 : i32 to vector<8x128xi32>
    %1337 = arith.cmpi eq, %7, %1336 : vector<8x128xi32>
    %1338 = vector.broadcast %1247 : f32 to vector<8x128xf32>
    %1339 = arith.select %1337, %1338, %1333 : vector<8x128xi1>, vector<8x128xf32>
    %1340 = vector.broadcast %1232 : f32 to vector<8x128xf32>
    %1341 = arith.select %1337, %1340, %1335 : vector<8x128xi1>, vector<8x128xf32>
    %c15_i32_363 = arith.constant 15 : i32
    %1342 = vector.broadcast %c15_i32_363 : i32 to vector<8x128xi32>
    %1343 = arith.cmpi eq, %7, %1342 : vector<8x128xi32>
    %1344 = vector.broadcast %1248 : f32 to vector<8x128xf32>
    %1345 = arith.select %1343, %1344, %1339 : vector<8x128xi1>, vector<8x128xf32>
    %1346 = vector.broadcast %1233 : f32 to vector<8x128xf32>
    %1347 = arith.select %1343, %1346, %1341 : vector<8x128xi1>, vector<8x128xf32>
    %c16_i32_364 = arith.constant 16 : i32
    %1348 = vector.broadcast %c16_i32_364 : i32 to vector<8x128xi32>
    %1349 = arith.cmpi eq, %7, %1348 : vector<8x128xi32>
    %1350 = vector.broadcast %1249 : f32 to vector<8x128xf32>
    %1351 = arith.select %1349, %1350, %1345 : vector<8x128xi1>, vector<8x128xf32>
    %1352 = vector.broadcast %1233 : f32 to vector<8x128xf32>
    %1353 = arith.select %1349, %1352, %1347 : vector<8x128xi1>, vector<8x128xf32>
    %1354 = arith.mulf %5, %1353 : vector<8x128xf32>
    %1355 = arith.addf %1351, %1354 : vector<8x128xf32>
    %c6_365 = arith.constant 6 : index
    %c0_366 = arith.constant 0 : index
    %c0_367 = arith.constant 0 : index
    %1356 = vector.load %arg3[%c6_365, %c0_366, %c0_367] : memref<16x8x128xf32, #tpu.memory_space<vmem>>, vector<1x8x128xf32>
    %1357 = vector.shape_cast %1356 : vector<1x8x128xf32> to vector<8x128xf32>
    %1358 = vector.shape_cast %1355 : vector<8x128xf32> to vector<1x8x128xf32>
    tpu.vector_store %arg3[%c6_365, %c0_366, %c0_367], %1358 {strides = array<i32>} : memref<16x8x128xf32, #tpu.memory_space<vmem>>, vector<1x8x128xf32>,
    %c7_368 = arith.constant 7 : index
    %c0_369 = arith.constant 0 : index
    %1359 = memref.load %arg1[%c7_368, %c0_369] : memref<16x17xf32, #tpu.memory_space<smem>>
    %1360 = math.absf %1359 : f32
    %c7_370 = arith.constant 7 : index
    %c1_371 = arith.constant 1 : index
    %1361 = memref.load %arg1[%c7_370, %c1_371] : memref<16x17xf32, #tpu.memory_space<smem>>
    %1362 = math.absf %1361 : f32
    %c7_372 = arith.constant 7 : index
    %c2_373 = arith.constant 2 : index
    %1363 = memref.load %arg1[%c7_372, %c2_373] : memref<16x17xf32, #tpu.memory_space<smem>>
    %1364 = math.absf %1363 : f32
    %c7_374 = arith.constant 7 : index
    %c3_375 = arith.constant 3 : index
    %1365 = memref.load %arg1[%c7_374, %c3_375] : memref<16x17xf32, #tpu.memory_space<smem>>
    %1366 = math.absf %1365 : f32
    %c7_376 = arith.constant 7 : index
    %c4_377 = arith.constant 4 : index
    %1367 = memref.load %arg1[%c7_376, %c4_377] : memref<16x17xf32, #tpu.memory_space<smem>>
    %1368 = math.absf %1367 : f32
    %c7_378 = arith.constant 7 : index
    %c5_379 = arith.constant 5 : index
    %1369 = memref.load %arg1[%c7_378, %c5_379] : memref<16x17xf32, #tpu.memory_space<smem>>
    %1370 = math.absf %1369 : f32
    %c7_380 = arith.constant 7 : index
    %c6_381 = arith.constant 6 : index
    %1371 = memref.load %arg1[%c7_380, %c6_381] : memref<16x17xf32, #tpu.memory_space<smem>>
    %1372 = math.absf %1371 : f32
    %c7_382 = arith.constant 7 : index
    %c7_383 = arith.constant 7 : index
    %1373 = memref.load %arg1[%c7_382, %c7_383] : memref<16x17xf32, #tpu.memory_space<smem>>
    %1374 = math.absf %1373 : f32
    %c7_384 = arith.constant 7 : index
    %c8_385 = arith.constant 8 : index
    %1375 = memref.load %arg1[%c7_384, %c8_385] : memref<16x17xf32, #tpu.memory_space<smem>>
    %1376 = math.absf %1375 : f32
    %c7_386 = arith.constant 7 : index
    %c9_387 = arith.constant 9 : index
    %1377 = memref.load %arg1[%c7_386, %c9_387] : memref<16x17xf32, #tpu.memory_space<smem>>
    %1378 = math.absf %1377 : f32
    %c7_388 = arith.constant 7 : index
    %c10_389 = arith.constant 10 : index
    %1379 = memref.load %arg1[%c7_388, %c10_389] : memref<16x17xf32, #tpu.memory_space<smem>>
    %1380 = math.absf %1379 : f32
    %c7_390 = arith.constant 7 : index
    %c11_391 = arith.constant 11 : index
    %1381 = memref.load %arg1[%c7_390, %c11_391] : memref<16x17xf32, #tpu.memory_space<smem>>
    %1382 = math.absf %1381 : f32
    %c7_392 = arith.constant 7 : index
    %c12_393 = arith.constant 12 : index
    %1383 = memref.load %arg1[%c7_392, %c12_393] : memref<16x17xf32, #tpu.memory_space<smem>>
    %1384 = math.absf %1383 : f32
    %c7_394 = arith.constant 7 : index
    %c13_395 = arith.constant 13 : index
    %1385 = memref.load %arg1[%c7_394, %c13_395] : memref<16x17xf32, #tpu.memory_space<smem>>
    %1386 = math.absf %1385 : f32
    %c7_396 = arith.constant 7 : index
    %c14_397 = arith.constant 14 : index
    %1387 = memref.load %arg1[%c7_396, %c14_397] : memref<16x17xf32, #tpu.memory_space<smem>>
    %1388 = math.absf %1387 : f32
    %c7_398 = arith.constant 7 : index
    %c15_399 = arith.constant 15 : index
    %1389 = memref.load %arg1[%c7_398, %c15_399] : memref<16x17xf32, #tpu.memory_space<smem>>
    %1390 = math.absf %1389 : f32
    %c7_400 = arith.constant 7 : index
    %c16_401 = arith.constant 16 : index
    %1391 = memref.load %arg1[%c7_400, %c16_401] : memref<16x17xf32, #tpu.memory_space<smem>>
    %1392 = math.absf %1391 : f32
    %1393 = arith.addf %1360, %1362 : f32
    %1394 = arith.addf %1393, %1364 : f32
    %1395 = arith.addf %1394, %1366 : f32
    %1396 = arith.addf %1395, %1368 : f32
    %1397 = arith.addf %1396, %1370 : f32
    %1398 = arith.addf %1397, %1372 : f32
    %1399 = arith.addf %1398, %1374 : f32
    %1400 = arith.addf %1399, %1376 : f32
    %1401 = arith.addf %1400, %1378 : f32
    %1402 = arith.addf %1401, %1380 : f32
    %1403 = arith.addf %1402, %1382 : f32
    %1404 = arith.addf %1403, %1384 : f32
    %1405 = arith.addf %1404, %1386 : f32
    %1406 = arith.addf %1405, %1388 : f32
    %1407 = arith.addf %1406, %1390 : f32
    %1408 = arith.addf %1407, %1392 : f32
    %cst_402 = arith.constant 1.000000e+00 : f32
    %1409 = arith.divf %cst_402, %1408 : f32
    %1410 = arith.mulf %1360, %1409 : f32
    %1411 = arith.mulf %1362, %1409 : f32
    %1412 = arith.mulf %1364, %1409 : f32
    %1413 = arith.mulf %1366, %1409 : f32
    %1414 = arith.mulf %1368, %1409 : f32
    %1415 = arith.mulf %1370, %1409 : f32
    %1416 = arith.mulf %1372, %1409 : f32
    %1417 = arith.mulf %1374, %1409 : f32
    %1418 = arith.mulf %1376, %1409 : f32
    %1419 = arith.mulf %1378, %1409 : f32
    %1420 = arith.mulf %1380, %1409 : f32
    %1421 = arith.mulf %1382, %1409 : f32
    %1422 = arith.mulf %1384, %1409 : f32
    %1423 = arith.mulf %1386, %1409 : f32
    %1424 = arith.mulf %1388, %1409 : f32
    %1425 = arith.mulf %1390, %1409 : f32
    %1426 = arith.mulf %1392, %1409 : f32
    %1427 = arith.addf %1410, %1411 : f32
    %1428 = arith.addf %1427, %1412 : f32
    %1429 = arith.addf %1428, %1413 : f32
    %1430 = arith.addf %1429, %1414 : f32
    %1431 = arith.addf %1430, %1415 : f32
    %1432 = arith.addf %1431, %1416 : f32
    %1433 = arith.addf %1432, %1417 : f32
    %1434 = arith.addf %1433, %1418 : f32
    %1435 = arith.addf %1434, %1419 : f32
    %1436 = arith.addf %1435, %1420 : f32
    %1437 = arith.addf %1436, %1421 : f32
    %1438 = arith.addf %1437, %1422 : f32
    %1439 = arith.addf %1438, %1423 : f32
    %1440 = arith.addf %1439, %1424 : f32
    %1441 = arith.addf %1440, %1425 : f32
    %1442 = arith.addf %1441, %1426 : f32
    %cst_403 = arith.constant 0.000000e+00 : f32
    %1443 = vector.broadcast %cst_403 : f32 to vector<8x128xf32>
    %cst_404 = arith.constant 0.000000e+00 : f32
    %1444 = vector.broadcast %cst_404 : f32 to vector<8x128xf32>
    %c0_i32_405 = arith.constant 0 : i32
    %1445 = vector.broadcast %c0_i32_405 : i32 to vector<8x128xi32>
    %1446 = arith.cmpi eq, %7, %1445 : vector<8x128xi32>
    %1447 = vector.broadcast %1410 : f32 to vector<8x128xf32>
    %1448 = arith.select %1446, %1447, %1443 : vector<8x128xi1>, vector<8x128xf32>
    %1449 = vector.broadcast %1411 : f32 to vector<8x128xf32>
    %1450 = arith.select %1446, %1449, %1444 : vector<8x128xi1>, vector<8x128xf32>
    %c1_i32_406 = arith.constant 1 : i32
    %1451 = vector.broadcast %c1_i32_406 : i32 to vector<8x128xi32>
    %1452 = arith.cmpi eq, %7, %1451 : vector<8x128xi32>
    %1453 = vector.broadcast %1427 : f32 to vector<8x128xf32>
    %1454 = arith.select %1452, %1453, %1448 : vector<8x128xi1>, vector<8x128xf32>
    %1455 = vector.broadcast %1412 : f32 to vector<8x128xf32>
    %1456 = arith.select %1452, %1455, %1450 : vector<8x128xi1>, vector<8x128xf32>
    %c2_i32_407 = arith.constant 2 : i32
    %1457 = vector.broadcast %c2_i32_407 : i32 to vector<8x128xi32>
    %1458 = arith.cmpi eq, %7, %1457 : vector<8x128xi32>
    %1459 = vector.broadcast %1428 : f32 to vector<8x128xf32>
    %1460 = arith.select %1458, %1459, %1454 : vector<8x128xi1>, vector<8x128xf32>
    %1461 = vector.broadcast %1413 : f32 to vector<8x128xf32>
    %1462 = arith.select %1458, %1461, %1456 : vector<8x128xi1>, vector<8x128xf32>
    %c3_i32_408 = arith.constant 3 : i32
    %1463 = vector.broadcast %c3_i32_408 : i32 to vector<8x128xi32>
    %1464 = arith.cmpi eq, %7, %1463 : vector<8x128xi32>
    %1465 = vector.broadcast %1429 : f32 to vector<8x128xf32>
    %1466 = arith.select %1464, %1465, %1460 : vector<8x128xi1>, vector<8x128xf32>
    %1467 = vector.broadcast %1414 : f32 to vector<8x128xf32>
    %1468 = arith.select %1464, %1467, %1462 : vector<8x128xi1>, vector<8x128xf32>
    %c4_i32_409 = arith.constant 4 : i32
    %1469 = vector.broadcast %c4_i32_409 : i32 to vector<8x128xi32>
    %1470 = arith.cmpi eq, %7, %1469 : vector<8x128xi32>
    %1471 = vector.broadcast %1430 : f32 to vector<8x128xf32>
    %1472 = arith.select %1470, %1471, %1466 : vector<8x128xi1>, vector<8x128xf32>
    %1473 = vector.broadcast %1415 : f32 to vector<8x128xf32>
    %1474 = arith.select %1470, %1473, %1468 : vector<8x128xi1>, vector<8x128xf32>
    %c5_i32_410 = arith.constant 5 : i32
    %1475 = vector.broadcast %c5_i32_410 : i32 to vector<8x128xi32>
    %1476 = arith.cmpi eq, %7, %1475 : vector<8x128xi32>
    %1477 = vector.broadcast %1431 : f32 to vector<8x128xf32>
    %1478 = arith.select %1476, %1477, %1472 : vector<8x128xi1>, vector<8x128xf32>
    %1479 = vector.broadcast %1416 : f32 to vector<8x128xf32>
    %1480 = arith.select %1476, %1479, %1474 : vector<8x128xi1>, vector<8x128xf32>
    %c6_i32_411 = arith.constant 6 : i32
    %1481 = vector.broadcast %c6_i32_411 : i32 to vector<8x128xi32>
    %1482 = arith.cmpi eq, %7, %1481 : vector<8x128xi32>
    %1483 = vector.broadcast %1432 : f32 to vector<8x128xf32>
    %1484 = arith.select %1482, %1483, %1478 : vector<8x128xi1>, vector<8x128xf32>
    %1485 = vector.broadcast %1417 : f32 to vector<8x128xf32>
    %1486 = arith.select %1482, %1485, %1480 : vector<8x128xi1>, vector<8x128xf32>
    %c7_i32_412 = arith.constant 7 : i32
    %1487 = vector.broadcast %c7_i32_412 : i32 to vector<8x128xi32>
    %1488 = arith.cmpi eq, %7, %1487 : vector<8x128xi32>
    %1489 = vector.broadcast %1433 : f32 to vector<8x128xf32>
    %1490 = arith.select %1488, %1489, %1484 : vector<8x128xi1>, vector<8x128xf32>
    %1491 = vector.broadcast %1418 : f32 to vector<8x128xf32>
    %1492 = arith.select %1488, %1491, %1486 : vector<8x128xi1>, vector<8x128xf32>
    %c8_i32_413 = arith.constant 8 : i32
    %1493 = vector.broadcast %c8_i32_413 : i32 to vector<8x128xi32>
    %1494 = arith.cmpi eq, %7, %1493 : vector<8x128xi32>
    %1495 = vector.broadcast %1434 : f32 to vector<8x128xf32>
    %1496 = arith.select %1494, %1495, %1490 : vector<8x128xi1>, vector<8x128xf32>
    %1497 = vector.broadcast %1419 : f32 to vector<8x128xf32>
    %1498 = arith.select %1494, %1497, %1492 : vector<8x128xi1>, vector<8x128xf32>
    %c9_i32_414 = arith.constant 9 : i32
    %1499 = vector.broadcast %c9_i32_414 : i32 to vector<8x128xi32>
    %1500 = arith.cmpi eq, %7, %1499 : vector<8x128xi32>
    %1501 = vector.broadcast %1435 : f32 to vector<8x128xf32>
    %1502 = arith.select %1500, %1501, %1496 : vector<8x128xi1>, vector<8x128xf32>
    %1503 = vector.broadcast %1420 : f32 to vector<8x128xf32>
    %1504 = arith.select %1500, %1503, %1498 : vector<8x128xi1>, vector<8x128xf32>
    %c10_i32_415 = arith.constant 10 : i32
    %1505 = vector.broadcast %c10_i32_415 : i32 to vector<8x128xi32>
    %1506 = arith.cmpi eq, %7, %1505 : vector<8x128xi32>
    %1507 = vector.broadcast %1436 : f32 to vector<8x128xf32>
    %1508 = arith.select %1506, %1507, %1502 : vector<8x128xi1>, vector<8x128xf32>
    %1509 = vector.broadcast %1421 : f32 to vector<8x128xf32>
    %1510 = arith.select %1506, %1509, %1504 : vector<8x128xi1>, vector<8x128xf32>
    %c11_i32_416 = arith.constant 11 : i32
    %1511 = vector.broadcast %c11_i32_416 : i32 to vector<8x128xi32>
    %1512 = arith.cmpi eq, %7, %1511 : vector<8x128xi32>
    %1513 = vector.broadcast %1437 : f32 to vector<8x128xf32>
    %1514 = arith.select %1512, %1513, %1508 : vector<8x128xi1>, vector<8x128xf32>
    %1515 = vector.broadcast %1422 : f32 to vector<8x128xf32>
    %1516 = arith.select %1512, %1515, %1510 : vector<8x128xi1>, vector<8x128xf32>
    %c12_i32_417 = arith.constant 12 : i32
    %1517 = vector.broadcast %c12_i32_417 : i32 to vector<8x128xi32>
    %1518 = arith.cmpi eq, %7, %1517 : vector<8x128xi32>
    %1519 = vector.broadcast %1438 : f32 to vector<8x128xf32>
    %1520 = arith.select %1518, %1519, %1514 : vector<8x128xi1>, vector<8x128xf32>
    %1521 = vector.broadcast %1423 : f32 to vector<8x128xf32>
    %1522 = arith.select %1518, %1521, %1516 : vector<8x128xi1>, vector<8x128xf32>
    %c13_i32_418 = arith.constant 13 : i32
    %1523 = vector.broadcast %c13_i32_418 : i32 to vector<8x128xi32>
    %1524 = arith.cmpi eq, %7, %1523 : vector<8x128xi32>
    %1525 = vector.broadcast %1439 : f32 to vector<8x128xf32>
    %1526 = arith.select %1524, %1525, %1520 : vector<8x128xi1>, vector<8x128xf32>
    %1527 = vector.broadcast %1424 : f32 to vector<8x128xf32>
    %1528 = arith.select %1524, %1527, %1522 : vector<8x128xi1>, vector<8x128xf32>
    %c14_i32_419 = arith.constant 14 : i32
    %1529 = vector.broadcast %c14_i32_419 : i32 to vector<8x128xi32>
    %1530 = arith.cmpi eq, %7, %1529 : vector<8x128xi32>
    %1531 = vector.broadcast %1440 : f32 to vector<8x128xf32>
    %1532 = arith.select %1530, %1531, %1526 : vector<8x128xi1>, vector<8x128xf32>
    %1533 = vector.broadcast %1425 : f32 to vector<8x128xf32>
    %1534 = arith.select %1530, %1533, %1528 : vector<8x128xi1>, vector<8x128xf32>
    %c15_i32_420 = arith.constant 15 : i32
    %1535 = vector.broadcast %c15_i32_420 : i32 to vector<8x128xi32>
    %1536 = arith.cmpi eq, %7, %1535 : vector<8x128xi32>
    %1537 = vector.broadcast %1441 : f32 to vector<8x128xf32>
    %1538 = arith.select %1536, %1537, %1532 : vector<8x128xi1>, vector<8x128xf32>
    %1539 = vector.broadcast %1426 : f32 to vector<8x128xf32>
    %1540 = arith.select %1536, %1539, %1534 : vector<8x128xi1>, vector<8x128xf32>
    %c16_i32_421 = arith.constant 16 : i32
    %1541 = vector.broadcast %c16_i32_421 : i32 to vector<8x128xi32>
    %1542 = arith.cmpi eq, %7, %1541 : vector<8x128xi32>
    %1543 = vector.broadcast %1442 : f32 to vector<8x128xf32>
    %1544 = arith.select %1542, %1543, %1538 : vector<8x128xi1>, vector<8x128xf32>
    %1545 = vector.broadcast %1426 : f32 to vector<8x128xf32>
    %1546 = arith.select %1542, %1545, %1540 : vector<8x128xi1>, vector<8x128xf32>
    %1547 = arith.mulf %5, %1546 : vector<8x128xf32>
    %1548 = arith.addf %1544, %1547 : vector<8x128xf32>
    %c7_422 = arith.constant 7 : index
    %c0_423 = arith.constant 0 : index
    %c0_424 = arith.constant 0 : index
    %1549 = vector.load %arg3[%c7_422, %c0_423, %c0_424] : memref<16x8x128xf32, #tpu.memory_space<vmem>>, vector<1x8x128xf32>
    %1550 = vector.shape_cast %1549 : vector<1x8x128xf32> to vector<8x128xf32>
    %1551 = vector.shape_cast %1548 : vector<8x128xf32> to vector<1x8x128xf32>
    tpu.vector_store %arg3[%c7_422, %c0_423, %c0_424], %1551 {strides = array<i32>} : memref<16x8x128xf32, #tpu.memory_space<vmem>>, vector<1x8x128xf32>,
    %c8_425 = arith.constant 8 : index
    %c0_426 = arith.constant 0 : index
    %1552 = memref.load %arg1[%c8_425, %c0_426] : memref<16x17xf32, #tpu.memory_space<smem>>
    %1553 = math.absf %1552 : f32
    %c8_427 = arith.constant 8 : index
    %c1_428 = arith.constant 1 : index
    %1554 = memref.load %arg1[%c8_427, %c1_428] : memref<16x17xf32, #tpu.memory_space<smem>>
    %1555 = math.absf %1554 : f32
    %c8_429 = arith.constant 8 : index
    %c2_430 = arith.constant 2 : index
    %1556 = memref.load %arg1[%c8_429, %c2_430] : memref<16x17xf32, #tpu.memory_space<smem>>
    %1557 = math.absf %1556 : f32
    %c8_431 = arith.constant 8 : index
    %c3_432 = arith.constant 3 : index
    %1558 = memref.load %arg1[%c8_431, %c3_432] : memref<16x17xf32, #tpu.memory_space<smem>>
    %1559 = math.absf %1558 : f32
    %c8_433 = arith.constant 8 : index
    %c4_434 = arith.constant 4 : index
    %1560 = memref.load %arg1[%c8_433, %c4_434] : memref<16x17xf32, #tpu.memory_space<smem>>
    %1561 = math.absf %1560 : f32
    %c8_435 = arith.constant 8 : index
    %c5_436 = arith.constant 5 : index
    %1562 = memref.load %arg1[%c8_435, %c5_436] : memref<16x17xf32, #tpu.memory_space<smem>>
    %1563 = math.absf %1562 : f32
    %c8_437 = arith.constant 8 : index
    %c6_438 = arith.constant 6 : index
    %1564 = memref.load %arg1[%c8_437, %c6_438] : memref<16x17xf32, #tpu.memory_space<smem>>
    %1565 = math.absf %1564 : f32
    %c8_439 = arith.constant 8 : index
    %c7_440 = arith.constant 7 : index
    %1566 = memref.load %arg1[%c8_439, %c7_440] : memref<16x17xf32, #tpu.memory_space<smem>>
    %1567 = math.absf %1566 : f32
    %c8_441 = arith.constant 8 : index
    %c8_442 = arith.constant 8 : index
    %1568 = memref.load %arg1[%c8_441, %c8_442] : memref<16x17xf32, #tpu.memory_space<smem>>
    %1569 = math.absf %1568 : f32
    %c8_443 = arith.constant 8 : index
    %c9_444 = arith.constant 9 : index
    %1570 = memref.load %arg1[%c8_443, %c9_444] : memref<16x17xf32, #tpu.memory_space<smem>>
    %1571 = math.absf %1570 : f32
    %c8_445 = arith.constant 8 : index
    %c10_446 = arith.constant 10 : index
    %1572 = memref.load %arg1[%c8_445, %c10_446] : memref<16x17xf32, #tpu.memory_space<smem>>
    %1573 = math.absf %1572 : f32
    %c8_447 = arith.constant 8 : index
    %c11_448 = arith.constant 11 : index
    %1574 = memref.load %arg1[%c8_447, %c11_448] : memref<16x17xf32, #tpu.memory_space<smem>>
    %1575 = math.absf %1574 : f32
    %c8_449 = arith.constant 8 : index
    %c12_450 = arith.constant 12 : index
    %1576 = memref.load %arg1[%c8_449, %c12_450] : memref<16x17xf32, #tpu.memory_space<smem>>
    %1577 = math.absf %1576 : f32
    %c8_451 = arith.constant 8 : index
    %c13_452 = arith.constant 13 : index
    %1578 = memref.load %arg1[%c8_451, %c13_452] : memref<16x17xf32, #tpu.memory_space<smem>>
    %1579 = math.absf %1578 : f32
    %c8_453 = arith.constant 8 : index
    %c14_454 = arith.constant 14 : index
    %1580 = memref.load %arg1[%c8_453, %c14_454] : memref<16x17xf32, #tpu.memory_space<smem>>
    %1581 = math.absf %1580 : f32
    %c8_455 = arith.constant 8 : index
    %c15_456 = arith.constant 15 : index
    %1582 = memref.load %arg1[%c8_455, %c15_456] : memref<16x17xf32, #tpu.memory_space<smem>>
    %1583 = math.absf %1582 : f32
    %c8_457 = arith.constant 8 : index
    %c16_458 = arith.constant 16 : index
    %1584 = memref.load %arg1[%c8_457, %c16_458] : memref<16x17xf32, #tpu.memory_space<smem>>
    %1585 = math.absf %1584 : f32
    %1586 = arith.addf %1553, %1555 : f32
    %1587 = arith.addf %1586, %1557 : f32
    %1588 = arith.addf %1587, %1559 : f32
    %1589 = arith.addf %1588, %1561 : f32
    %1590 = arith.addf %1589, %1563 : f32
    %1591 = arith.addf %1590, %1565 : f32
    %1592 = arith.addf %1591, %1567 : f32
    %1593 = arith.addf %1592, %1569 : f32
    %1594 = arith.addf %1593, %1571 : f32
    %1595 = arith.addf %1594, %1573 : f32
    %1596 = arith.addf %1595, %1575 : f32
    %1597 = arith.addf %1596, %1577 : f32
    %1598 = arith.addf %1597, %1579 : f32
    %1599 = arith.addf %1598, %1581 : f32
    %1600 = arith.addf %1599, %1583 : f32
    %1601 = arith.addf %1600, %1585 : f32
    %cst_459 = arith.constant 1.000000e+00 : f32
    %1602 = arith.divf %cst_459, %1601 : f32
    %1603 = arith.mulf %1553, %1602 : f32
    %1604 = arith.mulf %1555, %1602 : f32
    %1605 = arith.mulf %1557, %1602 : f32
    %1606 = arith.mulf %1559, %1602 : f32
    %1607 = arith.mulf %1561, %1602 : f32
    %1608 = arith.mulf %1563, %1602 : f32
    %1609 = arith.mulf %1565, %1602 : f32
    %1610 = arith.mulf %1567, %1602 : f32
    %1611 = arith.mulf %1569, %1602 : f32
    %1612 = arith.mulf %1571, %1602 : f32
    %1613 = arith.mulf %1573, %1602 : f32
    %1614 = arith.mulf %1575, %1602 : f32
    %1615 = arith.mulf %1577, %1602 : f32
    %1616 = arith.mulf %1579, %1602 : f32
    %1617 = arith.mulf %1581, %1602 : f32
    %1618 = arith.mulf %1583, %1602 : f32
    %1619 = arith.mulf %1585, %1602 : f32
    %1620 = arith.addf %1603, %1604 : f32
    %1621 = arith.addf %1620, %1605 : f32
    %1622 = arith.addf %1621, %1606 : f32
    %1623 = arith.addf %1622, %1607 : f32
    %1624 = arith.addf %1623, %1608 : f32
    %1625 = arith.addf %1624, %1609 : f32
    %1626 = arith.addf %1625, %1610 : f32
    %1627 = arith.addf %1626, %1611 : f32
    %1628 = arith.addf %1627, %1612 : f32
    %1629 = arith.addf %1628, %1613 : f32
    %1630 = arith.addf %1629, %1614 : f32
    %1631 = arith.addf %1630, %1615 : f32
    %1632 = arith.addf %1631, %1616 : f32
    %1633 = arith.addf %1632, %1617 : f32
    %1634 = arith.addf %1633, %1618 : f32
    %1635 = arith.addf %1634, %1619 : f32
    %cst_460 = arith.constant 0.000000e+00 : f32
    %1636 = vector.broadcast %cst_460 : f32 to vector<8x128xf32>
    %cst_461 = arith.constant 0.000000e+00 : f32
    %1637 = vector.broadcast %cst_461 : f32 to vector<8x128xf32>
    %c0_i32_462 = arith.constant 0 : i32
    %1638 = vector.broadcast %c0_i32_462 : i32 to vector<8x128xi32>
    %1639 = arith.cmpi eq, %7, %1638 : vector<8x128xi32>
    %1640 = vector.broadcast %1603 : f32 to vector<8x128xf32>
    %1641 = arith.select %1639, %1640, %1636 : vector<8x128xi1>, vector<8x128xf32>
    %1642 = vector.broadcast %1604 : f32 to vector<8x128xf32>
    %1643 = arith.select %1639, %1642, %1637 : vector<8x128xi1>, vector<8x128xf32>
    %c1_i32_463 = arith.constant 1 : i32
    %1644 = vector.broadcast %c1_i32_463 : i32 to vector<8x128xi32>
    %1645 = arith.cmpi eq, %7, %1644 : vector<8x128xi32>
    %1646 = vector.broadcast %1620 : f32 to vector<8x128xf32>
    %1647 = arith.select %1645, %1646, %1641 : vector<8x128xi1>, vector<8x128xf32>
    %1648 = vector.broadcast %1605 : f32 to vector<8x128xf32>
    %1649 = arith.select %1645, %1648, %1643 : vector<8x128xi1>, vector<8x128xf32>
    %c2_i32_464 = arith.constant 2 : i32
    %1650 = vector.broadcast %c2_i32_464 : i32 to vector<8x128xi32>
    %1651 = arith.cmpi eq, %7, %1650 : vector<8x128xi32>
    %1652 = vector.broadcast %1621 : f32 to vector<8x128xf32>
    %1653 = arith.select %1651, %1652, %1647 : vector<8x128xi1>, vector<8x128xf32>
    %1654 = vector.broadcast %1606 : f32 to vector<8x128xf32>
    %1655 = arith.select %1651, %1654, %1649 : vector<8x128xi1>, vector<8x128xf32>
    %c3_i32_465 = arith.constant 3 : i32
    %1656 = vector.broadcast %c3_i32_465 : i32 to vector<8x128xi32>
    %1657 = arith.cmpi eq, %7, %1656 : vector<8x128xi32>
    %1658 = vector.broadcast %1622 : f32 to vector<8x128xf32>
    %1659 = arith.select %1657, %1658, %1653 : vector<8x128xi1>, vector<8x128xf32>
    %1660 = vector.broadcast %1607 : f32 to vector<8x128xf32>
    %1661 = arith.select %1657, %1660, %1655 : vector<8x128xi1>, vector<8x128xf32>
    %c4_i32_466 = arith.constant 4 : i32
    %1662 = vector.broadcast %c4_i32_466 : i32 to vector<8x128xi32>
    %1663 = arith.cmpi eq, %7, %1662 : vector<8x128xi32>
    %1664 = vector.broadcast %1623 : f32 to vector<8x128xf32>
    %1665 = arith.select %1663, %1664, %1659 : vector<8x128xi1>, vector<8x128xf32>
    %1666 = vector.broadcast %1608 : f32 to vector<8x128xf32>
    %1667 = arith.select %1663, %1666, %1661 : vector<8x128xi1>, vector<8x128xf32>
    %c5_i32_467 = arith.constant 5 : i32
    %1668 = vector.broadcast %c5_i32_467 : i32 to vector<8x128xi32>
    %1669 = arith.cmpi eq, %7, %1668 : vector<8x128xi32>
    %1670 = vector.broadcast %1624 : f32 to vector<8x128xf32>
    %1671 = arith.select %1669, %1670, %1665 : vector<8x128xi1>, vector<8x128xf32>
    %1672 = vector.broadcast %1609 : f32 to vector<8x128xf32>
    %1673 = arith.select %1669, %1672, %1667 : vector<8x128xi1>, vector<8x128xf32>
    %c6_i32_468 = arith.constant 6 : i32
    %1674 = vector.broadcast %c6_i32_468 : i32 to vector<8x128xi32>
    %1675 = arith.cmpi eq, %7, %1674 : vector<8x128xi32>
    %1676 = vector.broadcast %1625 : f32 to vector<8x128xf32>
    %1677 = arith.select %1675, %1676, %1671 : vector<8x128xi1>, vector<8x128xf32>
    %1678 = vector.broadcast %1610 : f32 to vector<8x128xf32>
    %1679 = arith.select %1675, %1678, %1673 : vector<8x128xi1>, vector<8x128xf32>
    %c7_i32_469 = arith.constant 7 : i32
    %1680 = vector.broadcast %c7_i32_469 : i32 to vector<8x128xi32>
    %1681 = arith.cmpi eq, %7, %1680 : vector<8x128xi32>
    %1682 = vector.broadcast %1626 : f32 to vector<8x128xf32>
    %1683 = arith.select %1681, %1682, %1677 : vector<8x128xi1>, vector<8x128xf32>
    %1684 = vector.broadcast %1611 : f32 to vector<8x128xf32>
    %1685 = arith.select %1681, %1684, %1679 : vector<8x128xi1>, vector<8x128xf32>
    %c8_i32_470 = arith.constant 8 : i32
    %1686 = vector.broadcast %c8_i32_470 : i32 to vector<8x128xi32>
    %1687 = arith.cmpi eq, %7, %1686 : vector<8x128xi32>
    %1688 = vector.broadcast %1627 : f32 to vector<8x128xf32>
    %1689 = arith.select %1687, %1688, %1683 : vector<8x128xi1>, vector<8x128xf32>
    %1690 = vector.broadcast %1612 : f32 to vector<8x128xf32>
    %1691 = arith.select %1687, %1690, %1685 : vector<8x128xi1>, vector<8x128xf32>
    %c9_i32_471 = arith.constant 9 : i32
    %1692 = vector.broadcast %c9_i32_471 : i32 to vector<8x128xi32>
    %1693 = arith.cmpi eq, %7, %1692 : vector<8x128xi32>
    %1694 = vector.broadcast %1628 : f32 to vector<8x128xf32>
    %1695 = arith.select %1693, %1694, %1689 : vector<8x128xi1>, vector<8x128xf32>
    %1696 = vector.broadcast %1613 : f32 to vector<8x128xf32>
    %1697 = arith.select %1693, %1696, %1691 : vector<8x128xi1>, vector<8x128xf32>
    %c10_i32_472 = arith.constant 10 : i32
    %1698 = vector.broadcast %c10_i32_472 : i32 to vector<8x128xi32>
    %1699 = arith.cmpi eq, %7, %1698 : vector<8x128xi32>
    %1700 = vector.broadcast %1629 : f32 to vector<8x128xf32>
    %1701 = arith.select %1699, %1700, %1695 : vector<8x128xi1>, vector<8x128xf32>
    %1702 = vector.broadcast %1614 : f32 to vector<8x128xf32>
    %1703 = arith.select %1699, %1702, %1697 : vector<8x128xi1>, vector<8x128xf32>
    %c11_i32_473 = arith.constant 11 : i32
    %1704 = vector.broadcast %c11_i32_473 : i32 to vector<8x128xi32>
    %1705 = arith.cmpi eq, %7, %1704 : vector<8x128xi32>
    %1706 = vector.broadcast %1630 : f32 to vector<8x128xf32>
    %1707 = arith.select %1705, %1706, %1701 : vector<8x128xi1>, vector<8x128xf32>
    %1708 = vector.broadcast %1615 : f32 to vector<8x128xf32>
    %1709 = arith.select %1705, %1708, %1703 : vector<8x128xi1>, vector<8x128xf32>
    %c12_i32_474 = arith.constant 12 : i32
    %1710 = vector.broadcast %c12_i32_474 : i32 to vector<8x128xi32>
    %1711 = arith.cmpi eq, %7, %1710 : vector<8x128xi32>
    %1712 = vector.broadcast %1631 : f32 to vector<8x128xf32>
    %1713 = arith.select %1711, %1712, %1707 : vector<8x128xi1>, vector<8x128xf32>
    %1714 = vector.broadcast %1616 : f32 to vector<8x128xf32>
    %1715 = arith.select %1711, %1714, %1709 : vector<8x128xi1>, vector<8x128xf32>
    %c13_i32_475 = arith.constant 13 : i32
    %1716 = vector.broadcast %c13_i32_475 : i32 to vector<8x128xi32>
    %1717 = arith.cmpi eq, %7, %1716 : vector<8x128xi32>
    %1718 = vector.broadcast %1632 : f32 to vector<8x128xf32>
    %1719 = arith.select %1717, %1718, %1713 : vector<8x128xi1>, vector<8x128xf32>
    %1720 = vector.broadcast %1617 : f32 to vector<8x128xf32>
    %1721 = arith.select %1717, %1720, %1715 : vector<8x128xi1>, vector<8x128xf32>
    %c14_i32_476 = arith.constant 14 : i32
    %1722 = vector.broadcast %c14_i32_476 : i32 to vector<8x128xi32>
    %1723 = arith.cmpi eq, %7, %1722 : vector<8x128xi32>
    %1724 = vector.broadcast %1633 : f32 to vector<8x128xf32>
    %1725 = arith.select %1723, %1724, %1719 : vector<8x128xi1>, vector<8x128xf32>
    %1726 = vector.broadcast %1618 : f32 to vector<8x128xf32>
    %1727 = arith.select %1723, %1726, %1721 : vector<8x128xi1>, vector<8x128xf32>
    %c15_i32_477 = arith.constant 15 : i32
    %1728 = vector.broadcast %c15_i32_477 : i32 to vector<8x128xi32>
    %1729 = arith.cmpi eq, %7, %1728 : vector<8x128xi32>
    %1730 = vector.broadcast %1634 : f32 to vector<8x128xf32>
    %1731 = arith.select %1729, %1730, %1725 : vector<8x128xi1>, vector<8x128xf32>
    %1732 = vector.broadcast %1619 : f32 to vector<8x128xf32>
    %1733 = arith.select %1729, %1732, %1727 : vector<8x128xi1>, vector<8x128xf32>
    %c16_i32_478 = arith.constant 16 : i32
    %1734 = vector.broadcast %c16_i32_478 : i32 to vector<8x128xi32>
    %1735 = arith.cmpi eq, %7, %1734 : vector<8x128xi32>
    %1736 = vector.broadcast %1635 : f32 to vector<8x128xf32>
    %1737 = arith.select %1735, %1736, %1731 : vector<8x128xi1>, vector<8x128xf32>
    %1738 = vector.broadcast %1619 : f32 to vector<8x128xf32>
    %1739 = arith.select %1735, %1738, %1733 : vector<8x128xi1>, vector<8x128xf32>
    %1740 = arith.mulf %5, %1739 : vector<8x128xf32>
    %1741 = arith.addf %1737, %1740 : vector<8x128xf32>
    %c8_479 = arith.constant 8 : index
    %c0_480 = arith.constant 0 : index
    %c0_481 = arith.constant 0 : index
    %1742 = vector.load %arg3[%c8_479, %c0_480, %c0_481] : memref<16x8x128xf32, #tpu.memory_space<vmem>>, vector<1x8x128xf32>
    %1743 = vector.shape_cast %1742 : vector<1x8x128xf32> to vector<8x128xf32>
    %1744 = vector.shape_cast %1741 : vector<8x128xf32> to vector<1x8x128xf32>
    tpu.vector_store %arg3[%c8_479, %c0_480, %c0_481], %1744 {strides = array<i32>} : memref<16x8x128xf32, #tpu.memory_space<vmem>>, vector<1x8x128xf32>,
    %c9_482 = arith.constant 9 : index
    %c0_483 = arith.constant 0 : index
    %1745 = memref.load %arg1[%c9_482, %c0_483] : memref<16x17xf32, #tpu.memory_space<smem>>
    %1746 = math.absf %1745 : f32
    %c9_484 = arith.constant 9 : index
    %c1_485 = arith.constant 1 : index
    %1747 = memref.load %arg1[%c9_484, %c1_485] : memref<16x17xf32, #tpu.memory_space<smem>>
    %1748 = math.absf %1747 : f32
    %c9_486 = arith.constant 9 : index
    %c2_487 = arith.constant 2 : index
    %1749 = memref.load %arg1[%c9_486, %c2_487] : memref<16x17xf32, #tpu.memory_space<smem>>
    %1750 = math.absf %1749 : f32
    %c9_488 = arith.constant 9 : index
    %c3_489 = arith.constant 3 : index
    %1751 = memref.load %arg1[%c9_488, %c3_489] : memref<16x17xf32, #tpu.memory_space<smem>>
    %1752 = math.absf %1751 : f32
    %c9_490 = arith.constant 9 : index
    %c4_491 = arith.constant 4 : index
    %1753 = memref.load %arg1[%c9_490, %c4_491] : memref<16x17xf32, #tpu.memory_space<smem>>
    %1754 = math.absf %1753 : f32
    %c9_492 = arith.constant 9 : index
    %c5_493 = arith.constant 5 : index
    %1755 = memref.load %arg1[%c9_492, %c5_493] : memref<16x17xf32, #tpu.memory_space<smem>>
    %1756 = math.absf %1755 : f32
    %c9_494 = arith.constant 9 : index
    %c6_495 = arith.constant 6 : index
    %1757 = memref.load %arg1[%c9_494, %c6_495] : memref<16x17xf32, #tpu.memory_space<smem>>
    %1758 = math.absf %1757 : f32
    %c9_496 = arith.constant 9 : index
    %c7_497 = arith.constant 7 : index
    %1759 = memref.load %arg1[%c9_496, %c7_497] : memref<16x17xf32, #tpu.memory_space<smem>>
    %1760 = math.absf %1759 : f32
    %c9_498 = arith.constant 9 : index
    %c8_499 = arith.constant 8 : index
    %1761 = memref.load %arg1[%c9_498, %c8_499] : memref<16x17xf32, #tpu.memory_space<smem>>
    %1762 = math.absf %1761 : f32
    %c9_500 = arith.constant 9 : index
    %c9_501 = arith.constant 9 : index
    %1763 = memref.load %arg1[%c9_500, %c9_501] : memref<16x17xf32, #tpu.memory_space<smem>>
    %1764 = math.absf %1763 : f32
    %c9_502 = arith.constant 9 : index
    %c10_503 = arith.constant 10 : index
    %1765 = memref.load %arg1[%c9_502, %c10_503] : memref<16x17xf32, #tpu.memory_space<smem>>
    %1766 = math.absf %1765 : f32
    %c9_504 = arith.constant 9 : index
    %c11_505 = arith.constant 11 : index
    %1767 = memref.load %arg1[%c9_504, %c11_505] : memref<16x17xf32, #tpu.memory_space<smem>>
    %1768 = math.absf %1767 : f32
    %c9_506 = arith.constant 9 : index
    %c12_507 = arith.constant 12 : index
    %1769 = memref.load %arg1[%c9_506, %c12_507] : memref<16x17xf32, #tpu.memory_space<smem>>
    %1770 = math.absf %1769 : f32
    %c9_508 = arith.constant 9 : index
    %c13_509 = arith.constant 13 : index
    %1771 = memref.load %arg1[%c9_508, %c13_509] : memref<16x17xf32, #tpu.memory_space<smem>>
    %1772 = math.absf %1771 : f32
    %c9_510 = arith.constant 9 : index
    %c14_511 = arith.constant 14 : index
    %1773 = memref.load %arg1[%c9_510, %c14_511] : memref<16x17xf32, #tpu.memory_space<smem>>
    %1774 = math.absf %1773 : f32
    %c9_512 = arith.constant 9 : index
    %c15_513 = arith.constant 15 : index
    %1775 = memref.load %arg1[%c9_512, %c15_513] : memref<16x17xf32, #tpu.memory_space<smem>>
    %1776 = math.absf %1775 : f32
    %c9_514 = arith.constant 9 : index
    %c16_515 = arith.constant 16 : index
    %1777 = memref.load %arg1[%c9_514, %c16_515] : memref<16x17xf32, #tpu.memory_space<smem>>
    %1778 = math.absf %1777 : f32
    %1779 = arith.addf %1746, %1748 : f32
    %1780 = arith.addf %1779, %1750 : f32
    %1781 = arith.addf %1780, %1752 : f32
    %1782 = arith.addf %1781, %1754 : f32
    %1783 = arith.addf %1782, %1756 : f32
    %1784 = arith.addf %1783, %1758 : f32
    %1785 = arith.addf %1784, %1760 : f32
    %1786 = arith.addf %1785, %1762 : f32
    %1787 = arith.addf %1786, %1764 : f32
    %1788 = arith.addf %1787, %1766 : f32
    %1789 = arith.addf %1788, %1768 : f32
    %1790 = arith.addf %1789, %1770 : f32
    %1791 = arith.addf %1790, %1772 : f32
    %1792 = arith.addf %1791, %1774 : f32
    %1793 = arith.addf %1792, %1776 : f32
    %1794 = arith.addf %1793, %1778 : f32
    %cst_516 = arith.constant 1.000000e+00 : f32
    %1795 = arith.divf %cst_516, %1794 : f32
    %1796 = arith.mulf %1746, %1795 : f32
    %1797 = arith.mulf %1748, %1795 : f32
    %1798 = arith.mulf %1750, %1795 : f32
    %1799 = arith.mulf %1752, %1795 : f32
    %1800 = arith.mulf %1754, %1795 : f32
    %1801 = arith.mulf %1756, %1795 : f32
    %1802 = arith.mulf %1758, %1795 : f32
    %1803 = arith.mulf %1760, %1795 : f32
    %1804 = arith.mulf %1762, %1795 : f32
    %1805 = arith.mulf %1764, %1795 : f32
    %1806 = arith.mulf %1766, %1795 : f32
    %1807 = arith.mulf %1768, %1795 : f32
    %1808 = arith.mulf %1770, %1795 : f32
    %1809 = arith.mulf %1772, %1795 : f32
    %1810 = arith.mulf %1774, %1795 : f32
    %1811 = arith.mulf %1776, %1795 : f32
    %1812 = arith.mulf %1778, %1795 : f32
    %1813 = arith.addf %1796, %1797 : f32
    %1814 = arith.addf %1813, %1798 : f32
    %1815 = arith.addf %1814, %1799 : f32
    %1816 = arith.addf %1815, %1800 : f32
    %1817 = arith.addf %1816, %1801 : f32
    %1818 = arith.addf %1817, %1802 : f32
    %1819 = arith.addf %1818, %1803 : f32
    %1820 = arith.addf %1819, %1804 : f32
    %1821 = arith.addf %1820, %1805 : f32
    %1822 = arith.addf %1821, %1806 : f32
    %1823 = arith.addf %1822, %1807 : f32
    %1824 = arith.addf %1823, %1808 : f32
    %1825 = arith.addf %1824, %1809 : f32
    %1826 = arith.addf %1825, %1810 : f32
    %1827 = arith.addf %1826, %1811 : f32
    %1828 = arith.addf %1827, %1812 : f32
    %cst_517 = arith.constant 0.000000e+00 : f32
    %1829 = vector.broadcast %cst_517 : f32 to vector<8x128xf32>
    %cst_518 = arith.constant 0.000000e+00 : f32
    %1830 = vector.broadcast %cst_518 : f32 to vector<8x128xf32>
    %c0_i32_519 = arith.constant 0 : i32
    %1831 = vector.broadcast %c0_i32_519 : i32 to vector<8x128xi32>
    %1832 = arith.cmpi eq, %7, %1831 : vector<8x128xi32>
    %1833 = vector.broadcast %1796 : f32 to vector<8x128xf32>
    %1834 = arith.select %1832, %1833, %1829 : vector<8x128xi1>, vector<8x128xf32>
    %1835 = vector.broadcast %1797 : f32 to vector<8x128xf32>
    %1836 = arith.select %1832, %1835, %1830 : vector<8x128xi1>, vector<8x128xf32>
    %c1_i32_520 = arith.constant 1 : i32
    %1837 = vector.broadcast %c1_i32_520 : i32 to vector<8x128xi32>
    %1838 = arith.cmpi eq, %7, %1837 : vector<8x128xi32>
    %1839 = vector.broadcast %1813 : f32 to vector<8x128xf32>
    %1840 = arith.select %1838, %1839, %1834 : vector<8x128xi1>, vector<8x128xf32>
    %1841 = vector.broadcast %1798 : f32 to vector<8x128xf32>
    %1842 = arith.select %1838, %1841, %1836 : vector<8x128xi1>, vector<8x128xf32>
    %c2_i32_521 = arith.constant 2 : i32
    %1843 = vector.broadcast %c2_i32_521 : i32 to vector<8x128xi32>
    %1844 = arith.cmpi eq, %7, %1843 : vector<8x128xi32>
    %1845 = vector.broadcast %1814 : f32 to vector<8x128xf32>
    %1846 = arith.select %1844, %1845, %1840 : vector<8x128xi1>, vector<8x128xf32>
    %1847 = vector.broadcast %1799 : f32 to vector<8x128xf32>
    %1848 = arith.select %1844, %1847, %1842 : vector<8x128xi1>, vector<8x128xf32>
    %c3_i32_522 = arith.constant 3 : i32
    %1849 = vector.broadcast %c3_i32_522 : i32 to vector<8x128xi32>
    %1850 = arith.cmpi eq, %7, %1849 : vector<8x128xi32>
    %1851 = vector.broadcast %1815 : f32 to vector<8x128xf32>
    %1852 = arith.select %1850, %1851, %1846 : vector<8x128xi1>, vector<8x128xf32>
    %1853 = vector.broadcast %1800 : f32 to vector<8x128xf32>
    %1854 = arith.select %1850, %1853, %1848 : vector<8x128xi1>, vector<8x128xf32>
    %c4_i32_523 = arith.constant 4 : i32
    %1855 = vector.broadcast %c4_i32_523 : i32 to vector<8x128xi32>
    %1856 = arith.cmpi eq, %7, %1855 : vector<8x128xi32>
    %1857 = vector.broadcast %1816 : f32 to vector<8x128xf32>
    %1858 = arith.select %1856, %1857, %1852 : vector<8x128xi1>, vector<8x128xf32>
    %1859 = vector.broadcast %1801 : f32 to vector<8x128xf32>
    %1860 = arith.select %1856, %1859, %1854 : vector<8x128xi1>, vector<8x128xf32>
    %c5_i32_524 = arith.constant 5 : i32
    %1861 = vector.broadcast %c5_i32_524 : i32 to vector<8x128xi32>
    %1862 = arith.cmpi eq, %7, %1861 : vector<8x128xi32>
    %1863 = vector.broadcast %1817 : f32 to vector<8x128xf32>
    %1864 = arith.select %1862, %1863, %1858 : vector<8x128xi1>, vector<8x128xf32>
    %1865 = vector.broadcast %1802 : f32 to vector<8x128xf32>
    %1866 = arith.select %1862, %1865, %1860 : vector<8x128xi1>, vector<8x128xf32>
    %c6_i32_525 = arith.constant 6 : i32
    %1867 = vector.broadcast %c6_i32_525 : i32 to vector<8x128xi32>
    %1868 = arith.cmpi eq, %7, %1867 : vector<8x128xi32>
    %1869 = vector.broadcast %1818 : f32 to vector<8x128xf32>
    %1870 = arith.select %1868, %1869, %1864 : vector<8x128xi1>, vector<8x128xf32>
    %1871 = vector.broadcast %1803 : f32 to vector<8x128xf32>
    %1872 = arith.select %1868, %1871, %1866 : vector<8x128xi1>, vector<8x128xf32>
    %c7_i32_526 = arith.constant 7 : i32
    %1873 = vector.broadcast %c7_i32_526 : i32 to vector<8x128xi32>
    %1874 = arith.cmpi eq, %7, %1873 : vector<8x128xi32>
    %1875 = vector.broadcast %1819 : f32 to vector<8x128xf32>
    %1876 = arith.select %1874, %1875, %1870 : vector<8x128xi1>, vector<8x128xf32>
    %1877 = vector.broadcast %1804 : f32 to vector<8x128xf32>
    %1878 = arith.select %1874, %1877, %1872 : vector<8x128xi1>, vector<8x128xf32>
    %c8_i32_527 = arith.constant 8 : i32
    %1879 = vector.broadcast %c8_i32_527 : i32 to vector<8x128xi32>
    %1880 = arith.cmpi eq, %7, %1879 : vector<8x128xi32>
    %1881 = vector.broadcast %1820 : f32 to vector<8x128xf32>
    %1882 = arith.select %1880, %1881, %1876 : vector<8x128xi1>, vector<8x128xf32>
    %1883 = vector.broadcast %1805 : f32 to vector<8x128xf32>
    %1884 = arith.select %1880, %1883, %1878 : vector<8x128xi1>, vector<8x128xf32>
    %c9_i32_528 = arith.constant 9 : i32
    %1885 = vector.broadcast %c9_i32_528 : i32 to vector<8x128xi32>
    %1886 = arith.cmpi eq, %7, %1885 : vector<8x128xi32>
    %1887 = vector.broadcast %1821 : f32 to vector<8x128xf32>
    %1888 = arith.select %1886, %1887, %1882 : vector<8x128xi1>, vector<8x128xf32>
    %1889 = vector.broadcast %1806 : f32 to vector<8x128xf32>
    %1890 = arith.select %1886, %1889, %1884 : vector<8x128xi1>, vector<8x128xf32>
    %c10_i32_529 = arith.constant 10 : i32
    %1891 = vector.broadcast %c10_i32_529 : i32 to vector<8x128xi32>
    %1892 = arith.cmpi eq, %7, %1891 : vector<8x128xi32>
    %1893 = vector.broadcast %1822 : f32 to vector<8x128xf32>
    %1894 = arith.select %1892, %1893, %1888 : vector<8x128xi1>, vector<8x128xf32>
    %1895 = vector.broadcast %1807 : f32 to vector<8x128xf32>
    %1896 = arith.select %1892, %1895, %1890 : vector<8x128xi1>, vector<8x128xf32>
    %c11_i32_530 = arith.constant 11 : i32
    %1897 = vector.broadcast %c11_i32_530 : i32 to vector<8x128xi32>
    %1898 = arith.cmpi eq, %7, %1897 : vector<8x128xi32>
    %1899 = vector.broadcast %1823 : f32 to vector<8x128xf32>
    %1900 = arith.select %1898, %1899, %1894 : vector<8x128xi1>, vector<8x128xf32>
    %1901 = vector.broadcast %1808 : f32 to vector<8x128xf32>
    %1902 = arith.select %1898, %1901, %1896 : vector<8x128xi1>, vector<8x128xf32>
    %c12_i32_531 = arith.constant 12 : i32
    %1903 = vector.broadcast %c12_i32_531 : i32 to vector<8x128xi32>
    %1904 = arith.cmpi eq, %7, %1903 : vector<8x128xi32>
    %1905 = vector.broadcast %1824 : f32 to vector<8x128xf32>
    %1906 = arith.select %1904, %1905, %1900 : vector<8x128xi1>, vector<8x128xf32>
    %1907 = vector.broadcast %1809 : f32 to vector<8x128xf32>
    %1908 = arith.select %1904, %1907, %1902 : vector<8x128xi1>, vector<8x128xf32>
    %c13_i32_532 = arith.constant 13 : i32
    %1909 = vector.broadcast %c13_i32_532 : i32 to vector<8x128xi32>
    %1910 = arith.cmpi eq, %7, %1909 : vector<8x128xi32>
    %1911 = vector.broadcast %1825 : f32 to vector<8x128xf32>
    %1912 = arith.select %1910, %1911, %1906 : vector<8x128xi1>, vector<8x128xf32>
    %1913 = vector.broadcast %1810 : f32 to vector<8x128xf32>
    %1914 = arith.select %1910, %1913, %1908 : vector<8x128xi1>, vector<8x128xf32>
    %c14_i32_533 = arith.constant 14 : i32
    %1915 = vector.broadcast %c14_i32_533 : i32 to vector<8x128xi32>
    %1916 = arith.cmpi eq, %7, %1915 : vector<8x128xi32>
    %1917 = vector.broadcast %1826 : f32 to vector<8x128xf32>
    %1918 = arith.select %1916, %1917, %1912 : vector<8x128xi1>, vector<8x128xf32>
    %1919 = vector.broadcast %1811 : f32 to vector<8x128xf32>
    %1920 = arith.select %1916, %1919, %1914 : vector<8x128xi1>, vector<8x128xf32>
    %c15_i32_534 = arith.constant 15 : i32
    %1921 = vector.broadcast %c15_i32_534 : i32 to vector<8x128xi32>
    %1922 = arith.cmpi eq, %7, %1921 : vector<8x128xi32>
    %1923 = vector.broadcast %1827 : f32 to vector<8x128xf32>
    %1924 = arith.select %1922, %1923, %1918 : vector<8x128xi1>, vector<8x128xf32>
    %1925 = vector.broadcast %1812 : f32 to vector<8x128xf32>
    %1926 = arith.select %1922, %1925, %1920 : vector<8x128xi1>, vector<8x128xf32>
    %c16_i32_535 = arith.constant 16 : i32
    %1927 = vector.broadcast %c16_i32_535 : i32 to vector<8x128xi32>
    %1928 = arith.cmpi eq, %7, %1927 : vector<8x128xi32>
    %1929 = vector.broadcast %1828 : f32 to vector<8x128xf32>
    %1930 = arith.select %1928, %1929, %1924 : vector<8x128xi1>, vector<8x128xf32>
    %1931 = vector.broadcast %1812 : f32 to vector<8x128xf32>
    %1932 = arith.select %1928, %1931, %1926 : vector<8x128xi1>, vector<8x128xf32>
    %1933 = arith.mulf %5, %1932 : vector<8x128xf32>
    %1934 = arith.addf %1930, %1933 : vector<8x128xf32>
    %c9_536 = arith.constant 9 : index
    %c0_537 = arith.constant 0 : index
    %c0_538 = arith.constant 0 : index
    %1935 = vector.load %arg3[%c9_536, %c0_537, %c0_538] : memref<16x8x128xf32, #tpu.memory_space<vmem>>, vector<1x8x128xf32>
    %1936 = vector.shape_cast %1935 : vector<1x8x128xf32> to vector<8x128xf32>
    %1937 = vector.shape_cast %1934 : vector<8x128xf32> to vector<1x8x128xf32>
    tpu.vector_store %arg3[%c9_536, %c0_537, %c0_538], %1937 {strides = array<i32>} : memref<16x8x128xf32, #tpu.memory_space<vmem>>, vector<1x8x128xf32>,
    %c10_539 = arith.constant 10 : index
    %c0_540 = arith.constant 0 : index
    %1938 = memref.load %arg1[%c10_539, %c0_540] : memref<16x17xf32, #tpu.memory_space<smem>>
    %1939 = math.absf %1938 : f32
    %c10_541 = arith.constant 10 : index
    %c1_542 = arith.constant 1 : index
    %1940 = memref.load %arg1[%c10_541, %c1_542] : memref<16x17xf32, #tpu.memory_space<smem>>
    %1941 = math.absf %1940 : f32
    %c10_543 = arith.constant 10 : index
    %c2_544 = arith.constant 2 : index
    %1942 = memref.load %arg1[%c10_543, %c2_544] : memref<16x17xf32, #tpu.memory_space<smem>>
    %1943 = math.absf %1942 : f32
    %c10_545 = arith.constant 10 : index
    %c3_546 = arith.constant 3 : index
    %1944 = memref.load %arg1[%c10_545, %c3_546] : memref<16x17xf32, #tpu.memory_space<smem>>
    %1945 = math.absf %1944 : f32
    %c10_547 = arith.constant 10 : index
    %c4_548 = arith.constant 4 : index
    %1946 = memref.load %arg1[%c10_547, %c4_548] : memref<16x17xf32, #tpu.memory_space<smem>>
    %1947 = math.absf %1946 : f32
    %c10_549 = arith.constant 10 : index
    %c5_550 = arith.constant 5 : index
    %1948 = memref.load %arg1[%c10_549, %c5_550] : memref<16x17xf32, #tpu.memory_space<smem>>
    %1949 = math.absf %1948 : f32
    %c10_551 = arith.constant 10 : index
    %c6_552 = arith.constant 6 : index
    %1950 = memref.load %arg1[%c10_551, %c6_552] : memref<16x17xf32, #tpu.memory_space<smem>>
    %1951 = math.absf %1950 : f32
    %c10_553 = arith.constant 10 : index
    %c7_554 = arith.constant 7 : index
    %1952 = memref.load %arg1[%c10_553, %c7_554] : memref<16x17xf32, #tpu.memory_space<smem>>
    %1953 = math.absf %1952 : f32
    %c10_555 = arith.constant 10 : index
    %c8_556 = arith.constant 8 : index
    %1954 = memref.load %arg1[%c10_555, %c8_556] : memref<16x17xf32, #tpu.memory_space<smem>>
    %1955 = math.absf %1954 : f32
    %c10_557 = arith.constant 10 : index
    %c9_558 = arith.constant 9 : index
    %1956 = memref.load %arg1[%c10_557, %c9_558] : memref<16x17xf32, #tpu.memory_space<smem>>
    %1957 = math.absf %1956 : f32
    %c10_559 = arith.constant 10 : index
    %c10_560 = arith.constant 10 : index
    %1958 = memref.load %arg1[%c10_559, %c10_560] : memref<16x17xf32, #tpu.memory_space<smem>>
    %1959 = math.absf %1958 : f32
    %c10_561 = arith.constant 10 : index
    %c11_562 = arith.constant 11 : index
    %1960 = memref.load %arg1[%c10_561, %c11_562] : memref<16x17xf32, #tpu.memory_space<smem>>
    %1961 = math.absf %1960 : f32
    %c10_563 = arith.constant 10 : index
    %c12_564 = arith.constant 12 : index
    %1962 = memref.load %arg1[%c10_563, %c12_564] : memref<16x17xf32, #tpu.memory_space<smem>>
    %1963 = math.absf %1962 : f32
    %c10_565 = arith.constant 10 : index
    %c13_566 = arith.constant 13 : index
    %1964 = memref.load %arg1[%c10_565, %c13_566] : memref<16x17xf32, #tpu.memory_space<smem>>
    %1965 = math.absf %1964 : f32
    %c10_567 = arith.constant 10 : index
    %c14_568 = arith.constant 14 : index
    %1966 = memref.load %arg1[%c10_567, %c14_568] : memref<16x17xf32, #tpu.memory_space<smem>>
    %1967 = math.absf %1966 : f32
    %c10_569 = arith.constant 10 : index
    %c15_570 = arith.constant 15 : index
    %1968 = memref.load %arg1[%c10_569, %c15_570] : memref<16x17xf32, #tpu.memory_space<smem>>
    %1969 = math.absf %1968 : f32
    %c10_571 = arith.constant 10 : index
    %c16_572 = arith.constant 16 : index
    %1970 = memref.load %arg1[%c10_571, %c16_572] : memref<16x17xf32, #tpu.memory_space<smem>>
    %1971 = math.absf %1970 : f32
    %1972 = arith.addf %1939, %1941 : f32
    %1973 = arith.addf %1972, %1943 : f32
    %1974 = arith.addf %1973, %1945 : f32
    %1975 = arith.addf %1974, %1947 : f32
    %1976 = arith.addf %1975, %1949 : f32
    %1977 = arith.addf %1976, %1951 : f32
    %1978 = arith.addf %1977, %1953 : f32
    %1979 = arith.addf %1978, %1955 : f32
    %1980 = arith.addf %1979, %1957 : f32
    %1981 = arith.addf %1980, %1959 : f32
    %1982 = arith.addf %1981, %1961 : f32
    %1983 = arith.addf %1982, %1963 : f32
    %1984 = arith.addf %1983, %1965 : f32
    %1985 = arith.addf %1984, %1967 : f32
    %1986 = arith.addf %1985, %1969 : f32
    %1987 = arith.addf %1986, %1971 : f32
    %cst_573 = arith.constant 1.000000e+00 : f32
    %1988 = arith.divf %cst_573, %1987 : f32
    %1989 = arith.mulf %1939, %1988 : f32
    %1990 = arith.mulf %1941, %1988 : f32
    %1991 = arith.mulf %1943, %1988 : f32
    %1992 = arith.mulf %1945, %1988 : f32
    %1993 = arith.mulf %1947, %1988 : f32
    %1994 = arith.mulf %1949, %1988 : f32
    %1995 = arith.mulf %1951, %1988 : f32
    %1996 = arith.mulf %1953, %1988 : f32
    %1997 = arith.mulf %1955, %1988 : f32
    %1998 = arith.mulf %1957, %1988 : f32
    %1999 = arith.mulf %1959, %1988 : f32
    %2000 = arith.mulf %1961, %1988 : f32
    %2001 = arith.mulf %1963, %1988 : f32
    %2002 = arith.mulf %1965, %1988 : f32
    %2003 = arith.mulf %1967, %1988 : f32
    %2004 = arith.mulf %1969, %1988 : f32
    %2005 = arith.mulf %1971, %1988 : f32
    %2006 = arith.addf %1989, %1990 : f32
    %2007 = arith.addf %2006, %1991 : f32
    %2008 = arith.addf %2007, %1992 : f32
    %2009 = arith.addf %2008, %1993 : f32
    %2010 = arith.addf %2009, %1994 : f32
    %2011 = arith.addf %2010, %1995 : f32
    %2012 = arith.addf %2011, %1996 : f32
    %2013 = arith.addf %2012, %1997 : f32
    %2014 = arith.addf %2013, %1998 : f32
    %2015 = arith.addf %2014, %1999 : f32
    %2016 = arith.addf %2015, %2000 : f32
    %2017 = arith.addf %2016, %2001 : f32
    %2018 = arith.addf %2017, %2002 : f32
    %2019 = arith.addf %2018, %2003 : f32
    %2020 = arith.addf %2019, %2004 : f32
    %2021 = arith.addf %2020, %2005 : f32
    %cst_574 = arith.constant 0.000000e+00 : f32
    %2022 = vector.broadcast %cst_574 : f32 to vector<8x128xf32>
    %cst_575 = arith.constant 0.000000e+00 : f32
    %2023 = vector.broadcast %cst_575 : f32 to vector<8x128xf32>
    %c0_i32_576 = arith.constant 0 : i32
    %2024 = vector.broadcast %c0_i32_576 : i32 to vector<8x128xi32>
    %2025 = arith.cmpi eq, %7, %2024 : vector<8x128xi32>
    %2026 = vector.broadcast %1989 : f32 to vector<8x128xf32>
    %2027 = arith.select %2025, %2026, %2022 : vector<8x128xi1>, vector<8x128xf32>
    %2028 = vector.broadcast %1990 : f32 to vector<8x128xf32>
    %2029 = arith.select %2025, %2028, %2023 : vector<8x128xi1>, vector<8x128xf32>
    %c1_i32_577 = arith.constant 1 : i32
    %2030 = vector.broadcast %c1_i32_577 : i32 to vector<8x128xi32>
    %2031 = arith.cmpi eq, %7, %2030 : vector<8x128xi32>
    %2032 = vector.broadcast %2006 : f32 to vector<8x128xf32>
    %2033 = arith.select %2031, %2032, %2027 : vector<8x128xi1>, vector<8x128xf32>
    %2034 = vector.broadcast %1991 : f32 to vector<8x128xf32>
    %2035 = arith.select %2031, %2034, %2029 : vector<8x128xi1>, vector<8x128xf32>
    %c2_i32_578 = arith.constant 2 : i32
    %2036 = vector.broadcast %c2_i32_578 : i32 to vector<8x128xi32>
    %2037 = arith.cmpi eq, %7, %2036 : vector<8x128xi32>
    %2038 = vector.broadcast %2007 : f32 to vector<8x128xf32>
    %2039 = arith.select %2037, %2038, %2033 : vector<8x128xi1>, vector<8x128xf32>
    %2040 = vector.broadcast %1992 : f32 to vector<8x128xf32>
    %2041 = arith.select %2037, %2040, %2035 : vector<8x128xi1>, vector<8x128xf32>
    %c3_i32_579 = arith.constant 3 : i32
    %2042 = vector.broadcast %c3_i32_579 : i32 to vector<8x128xi32>
    %2043 = arith.cmpi eq, %7, %2042 : vector<8x128xi32>
    %2044 = vector.broadcast %2008 : f32 to vector<8x128xf32>
    %2045 = arith.select %2043, %2044, %2039 : vector<8x128xi1>, vector<8x128xf32>
    %2046 = vector.broadcast %1993 : f32 to vector<8x128xf32>
    %2047 = arith.select %2043, %2046, %2041 : vector<8x128xi1>, vector<8x128xf32>
    %c4_i32_580 = arith.constant 4 : i32
    %2048 = vector.broadcast %c4_i32_580 : i32 to vector<8x128xi32>
    %2049 = arith.cmpi eq, %7, %2048 : vector<8x128xi32>
    %2050 = vector.broadcast %2009 : f32 to vector<8x128xf32>
    %2051 = arith.select %2049, %2050, %2045 : vector<8x128xi1>, vector<8x128xf32>
    %2052 = vector.broadcast %1994 : f32 to vector<8x128xf32>
    %2053 = arith.select %2049, %2052, %2047 : vector<8x128xi1>, vector<8x128xf32>
    %c5_i32_581 = arith.constant 5 : i32
    %2054 = vector.broadcast %c5_i32_581 : i32 to vector<8x128xi32>
    %2055 = arith.cmpi eq, %7, %2054 : vector<8x128xi32>
    %2056 = vector.broadcast %2010 : f32 to vector<8x128xf32>
    %2057 = arith.select %2055, %2056, %2051 : vector<8x128xi1>, vector<8x128xf32>
    %2058 = vector.broadcast %1995 : f32 to vector<8x128xf32>
    %2059 = arith.select %2055, %2058, %2053 : vector<8x128xi1>, vector<8x128xf32>
    %c6_i32_582 = arith.constant 6 : i32
    %2060 = vector.broadcast %c6_i32_582 : i32 to vector<8x128xi32>
    %2061 = arith.cmpi eq, %7, %2060 : vector<8x128xi32>
    %2062 = vector.broadcast %2011 : f32 to vector<8x128xf32>
    %2063 = arith.select %2061, %2062, %2057 : vector<8x128xi1>, vector<8x128xf32>
    %2064 = vector.broadcast %1996 : f32 to vector<8x128xf32>
    %2065 = arith.select %2061, %2064, %2059 : vector<8x128xi1>, vector<8x128xf32>
    %c7_i32_583 = arith.constant 7 : i32
    %2066 = vector.broadcast %c7_i32_583 : i32 to vector<8x128xi32>
    %2067 = arith.cmpi eq, %7, %2066 : vector<8x128xi32>
    %2068 = vector.broadcast %2012 : f32 to vector<8x128xf32>
    %2069 = arith.select %2067, %2068, %2063 : vector<8x128xi1>, vector<8x128xf32>
    %2070 = vector.broadcast %1997 : f32 to vector<8x128xf32>
    %2071 = arith.select %2067, %2070, %2065 : vector<8x128xi1>, vector<8x128xf32>
    %c8_i32_584 = arith.constant 8 : i32
    %2072 = vector.broadcast %c8_i32_584 : i32 to vector<8x128xi32>
    %2073 = arith.cmpi eq, %7, %2072 : vector<8x128xi32>
    %2074 = vector.broadcast %2013 : f32 to vector<8x128xf32>
    %2075 = arith.select %2073, %2074, %2069 : vector<8x128xi1>, vector<8x128xf32>
    %2076 = vector.broadcast %1998 : f32 to vector<8x128xf32>
    %2077 = arith.select %2073, %2076, %2071 : vector<8x128xi1>, vector<8x128xf32>
    %c9_i32_585 = arith.constant 9 : i32
    %2078 = vector.broadcast %c9_i32_585 : i32 to vector<8x128xi32>
    %2079 = arith.cmpi eq, %7, %2078 : vector<8x128xi32>
    %2080 = vector.broadcast %2014 : f32 to vector<8x128xf32>
    %2081 = arith.select %2079, %2080, %2075 : vector<8x128xi1>, vector<8x128xf32>
    %2082 = vector.broadcast %1999 : f32 to vector<8x128xf32>
    %2083 = arith.select %2079, %2082, %2077 : vector<8x128xi1>, vector<8x128xf32>
    %c10_i32_586 = arith.constant 10 : i32
    %2084 = vector.broadcast %c10_i32_586 : i32 to vector<8x128xi32>
    %2085 = arith.cmpi eq, %7, %2084 : vector<8x128xi32>
    %2086 = vector.broadcast %2015 : f32 to vector<8x128xf32>
    %2087 = arith.select %2085, %2086, %2081 : vector<8x128xi1>, vector<8x128xf32>
    %2088 = vector.broadcast %2000 : f32 to vector<8x128xf32>
    %2089 = arith.select %2085, %2088, %2083 : vector<8x128xi1>, vector<8x128xf32>
    %c11_i32_587 = arith.constant 11 : i32
    %2090 = vector.broadcast %c11_i32_587 : i32 to vector<8x128xi32>
    %2091 = arith.cmpi eq, %7, %2090 : vector<8x128xi32>
    %2092 = vector.broadcast %2016 : f32 to vector<8x128xf32>
    %2093 = arith.select %2091, %2092, %2087 : vector<8x128xi1>, vector<8x128xf32>
    %2094 = vector.broadcast %2001 : f32 to vector<8x128xf32>
    %2095 = arith.select %2091, %2094, %2089 : vector<8x128xi1>, vector<8x128xf32>
    %c12_i32_588 = arith.constant 12 : i32
    %2096 = vector.broadcast %c12_i32_588 : i32 to vector<8x128xi32>
    %2097 = arith.cmpi eq, %7, %2096 : vector<8x128xi32>
    %2098 = vector.broadcast %2017 : f32 to vector<8x128xf32>
    %2099 = arith.select %2097, %2098, %2093 : vector<8x128xi1>, vector<8x128xf32>
    %2100 = vector.broadcast %2002 : f32 to vector<8x128xf32>
    %2101 = arith.select %2097, %2100, %2095 : vector<8x128xi1>, vector<8x128xf32>
    %c13_i32_589 = arith.constant 13 : i32
    %2102 = vector.broadcast %c13_i32_589 : i32 to vector<8x128xi32>
    %2103 = arith.cmpi eq, %7, %2102 : vector<8x128xi32>
    %2104 = vector.broadcast %2018 : f32 to vector<8x128xf32>
    %2105 = arith.select %2103, %2104, %2099 : vector<8x128xi1>, vector<8x128xf32>
    %2106 = vector.broadcast %2003 : f32 to vector<8x128xf32>
    %2107 = arith.select %2103, %2106, %2101 : vector<8x128xi1>, vector<8x128xf32>
    %c14_i32_590 = arith.constant 14 : i32
    %2108 = vector.broadcast %c14_i32_590 : i32 to vector<8x128xi32>
    %2109 = arith.cmpi eq, %7, %2108 : vector<8x128xi32>
    %2110 = vector.broadcast %2019 : f32 to vector<8x128xf32>
    %2111 = arith.select %2109, %2110, %2105 : vector<8x128xi1>, vector<8x128xf32>
    %2112 = vector.broadcast %2004 : f32 to vector<8x128xf32>
    %2113 = arith.select %2109, %2112, %2107 : vector<8x128xi1>, vector<8x128xf32>
    %c15_i32_591 = arith.constant 15 : i32
    %2114 = vector.broadcast %c15_i32_591 : i32 to vector<8x128xi32>
    %2115 = arith.cmpi eq, %7, %2114 : vector<8x128xi32>
    %2116 = vector.broadcast %2020 : f32 to vector<8x128xf32>
    %2117 = arith.select %2115, %2116, %2111 : vector<8x128xi1>, vector<8x128xf32>
    %2118 = vector.broadcast %2005 : f32 to vector<8x128xf32>
    %2119 = arith.select %2115, %2118, %2113 : vector<8x128xi1>, vector<8x128xf32>
    %c16_i32_592 = arith.constant 16 : i32
    %2120 = vector.broadcast %c16_i32_592 : i32 to vector<8x128xi32>
    %2121 = arith.cmpi eq, %7, %2120 : vector<8x128xi32>
    %2122 = vector.broadcast %2021 : f32 to vector<8x128xf32>
    %2123 = arith.select %2121, %2122, %2117 : vector<8x128xi1>, vector<8x128xf32>
    %2124 = vector.broadcast %2005 : f32 to vector<8x128xf32>
    %2125 = arith.select %2121, %2124, %2119 : vector<8x128xi1>, vector<8x128xf32>
    %2126 = arith.mulf %5, %2125 : vector<8x128xf32>
    %2127 = arith.addf %2123, %2126 : vector<8x128xf32>
    %c10_593 = arith.constant 10 : index
    %c0_594 = arith.constant 0 : index
    %c0_595 = arith.constant 0 : index
    %2128 = vector.load %arg3[%c10_593, %c0_594, %c0_595] : memref<16x8x128xf32, #tpu.memory_space<vmem>>, vector<1x8x128xf32>
    %2129 = vector.shape_cast %2128 : vector<1x8x128xf32> to vector<8x128xf32>
    %2130 = vector.shape_cast %2127 : vector<8x128xf32> to vector<1x8x128xf32>
    tpu.vector_store %arg3[%c10_593, %c0_594, %c0_595], %2130 {strides = array<i32>} : memref<16x8x128xf32, #tpu.memory_space<vmem>>, vector<1x8x128xf32>,
    %c11_596 = arith.constant 11 : index
    %c0_597 = arith.constant 0 : index
    %2131 = memref.load %arg1[%c11_596, %c0_597] : memref<16x17xf32, #tpu.memory_space<smem>>
    %2132 = math.absf %2131 : f32
    %c11_598 = arith.constant 11 : index
    %c1_599 = arith.constant 1 : index
    %2133 = memref.load %arg1[%c11_598, %c1_599] : memref<16x17xf32, #tpu.memory_space<smem>>
    %2134 = math.absf %2133 : f32
    %c11_600 = arith.constant 11 : index
    %c2_601 = arith.constant 2 : index
    %2135 = memref.load %arg1[%c11_600, %c2_601] : memref<16x17xf32, #tpu.memory_space<smem>>
    %2136 = math.absf %2135 : f32
    %c11_602 = arith.constant 11 : index
    %c3_603 = arith.constant 3 : index
    %2137 = memref.load %arg1[%c11_602, %c3_603] : memref<16x17xf32, #tpu.memory_space<smem>>
    %2138 = math.absf %2137 : f32
    %c11_604 = arith.constant 11 : index
    %c4_605 = arith.constant 4 : index
    %2139 = memref.load %arg1[%c11_604, %c4_605] : memref<16x17xf32, #tpu.memory_space<smem>>
    %2140 = math.absf %2139 : f32
    %c11_606 = arith.constant 11 : index
    %c5_607 = arith.constant 5 : index
    %2141 = memref.load %arg1[%c11_606, %c5_607] : memref<16x17xf32, #tpu.memory_space<smem>>
    %2142 = math.absf %2141 : f32
    %c11_608 = arith.constant 11 : index
    %c6_609 = arith.constant 6 : index
    %2143 = memref.load %arg1[%c11_608, %c6_609] : memref<16x17xf32, #tpu.memory_space<smem>>
    %2144 = math.absf %2143 : f32
    %c11_610 = arith.constant 11 : index
    %c7_611 = arith.constant 7 : index
    %2145 = memref.load %arg1[%c11_610, %c7_611] : memref<16x17xf32, #tpu.memory_space<smem>>
    %2146 = math.absf %2145 : f32
    %c11_612 = arith.constant 11 : index
    %c8_613 = arith.constant 8 : index
    %2147 = memref.load %arg1[%c11_612, %c8_613] : memref<16x17xf32, #tpu.memory_space<smem>>
    %2148 = math.absf %2147 : f32
    %c11_614 = arith.constant 11 : index
    %c9_615 = arith.constant 9 : index
    %2149 = memref.load %arg1[%c11_614, %c9_615] : memref<16x17xf32, #tpu.memory_space<smem>>
    %2150 = math.absf %2149 : f32
    %c11_616 = arith.constant 11 : index
    %c10_617 = arith.constant 10 : index
    %2151 = memref.load %arg1[%c11_616, %c10_617] : memref<16x17xf32, #tpu.memory_space<smem>>
    %2152 = math.absf %2151 : f32
    %c11_618 = arith.constant 11 : index
    %c11_619 = arith.constant 11 : index
    %2153 = memref.load %arg1[%c11_618, %c11_619] : memref<16x17xf32, #tpu.memory_space<smem>>
    %2154 = math.absf %2153 : f32
    %c11_620 = arith.constant 11 : index
    %c12_621 = arith.constant 12 : index
    %2155 = memref.load %arg1[%c11_620, %c12_621] : memref<16x17xf32, #tpu.memory_space<smem>>
    %2156 = math.absf %2155 : f32
    %c11_622 = arith.constant 11 : index
    %c13_623 = arith.constant 13 : index
    %2157 = memref.load %arg1[%c11_622, %c13_623] : memref<16x17xf32, #tpu.memory_space<smem>>
    %2158 = math.absf %2157 : f32
    %c11_624 = arith.constant 11 : index
    %c14_625 = arith.constant 14 : index
    %2159 = memref.load %arg1[%c11_624, %c14_625] : memref<16x17xf32, #tpu.memory_space<smem>>
    %2160 = math.absf %2159 : f32
    %c11_626 = arith.constant 11 : index
    %c15_627 = arith.constant 15 : index
    %2161 = memref.load %arg1[%c11_626, %c15_627] : memref<16x17xf32, #tpu.memory_space<smem>>
    %2162 = math.absf %2161 : f32
    %c11_628 = arith.constant 11 : index
    %c16_629 = arith.constant 16 : index
    %2163 = memref.load %arg1[%c11_628, %c16_629] : memref<16x17xf32, #tpu.memory_space<smem>>
    %2164 = math.absf %2163 : f32
    %2165 = arith.addf %2132, %2134 : f32
    %2166 = arith.addf %2165, %2136 : f32
    %2167 = arith.addf %2166, %2138 : f32
    %2168 = arith.addf %2167, %2140 : f32
    %2169 = arith.addf %2168, %2142 : f32
    %2170 = arith.addf %2169, %2144 : f32
    %2171 = arith.addf %2170, %2146 : f32
    %2172 = arith.addf %2171, %2148 : f32
    %2173 = arith.addf %2172, %2150 : f32
    %2174 = arith.addf %2173, %2152 : f32
    %2175 = arith.addf %2174, %2154 : f32
    %2176 = arith.addf %2175, %2156 : f32
    %2177 = arith.addf %2176, %2158 : f32
    %2178 = arith.addf %2177, %2160 : f32
    %2179 = arith.addf %2178, %2162 : f32
    %2180 = arith.addf %2179, %2164 : f32
    %cst_630 = arith.constant 1.000000e+00 : f32
    %2181 = arith.divf %cst_630, %2180 : f32
    %2182 = arith.mulf %2132, %2181 : f32
    %2183 = arith.mulf %2134, %2181 : f32
    %2184 = arith.mulf %2136, %2181 : f32
    %2185 = arith.mulf %2138, %2181 : f32
    %2186 = arith.mulf %2140, %2181 : f32
    %2187 = arith.mulf %2142, %2181 : f32
    %2188 = arith.mulf %2144, %2181 : f32
    %2189 = arith.mulf %2146, %2181 : f32
    %2190 = arith.mulf %2148, %2181 : f32
    %2191 = arith.mulf %2150, %2181 : f32
    %2192 = arith.mulf %2152, %2181 : f32
    %2193 = arith.mulf %2154, %2181 : f32
    %2194 = arith.mulf %2156, %2181 : f32
    %2195 = arith.mulf %2158, %2181 : f32
    %2196 = arith.mulf %2160, %2181 : f32
    %2197 = arith.mulf %2162, %2181 : f32
    %2198 = arith.mulf %2164, %2181 : f32
    %2199 = arith.addf %2182, %2183 : f32
    %2200 = arith.addf %2199, %2184 : f32
    %2201 = arith.addf %2200, %2185 : f32
    %2202 = arith.addf %2201, %2186 : f32
    %2203 = arith.addf %2202, %2187 : f32
    %2204 = arith.addf %2203, %2188 : f32
    %2205 = arith.addf %2204, %2189 : f32
    %2206 = arith.addf %2205, %2190 : f32
    %2207 = arith.addf %2206, %2191 : f32
    %2208 = arith.addf %2207, %2192 : f32
    %2209 = arith.addf %2208, %2193 : f32
    %2210 = arith.addf %2209, %2194 : f32
    %2211 = arith.addf %2210, %2195 : f32
    %2212 = arith.addf %2211, %2196 : f32
    %2213 = arith.addf %2212, %2197 : f32
    %2214 = arith.addf %2213, %2198 : f32
    %cst_631 = arith.constant 0.000000e+00 : f32
    %2215 = vector.broadcast %cst_631 : f32 to vector<8x128xf32>
    %cst_632 = arith.constant 0.000000e+00 : f32
    %2216 = vector.broadcast %cst_632 : f32 to vector<8x128xf32>
    %c0_i32_633 = arith.constant 0 : i32
    %2217 = vector.broadcast %c0_i32_633 : i32 to vector<8x128xi32>
    %2218 = arith.cmpi eq, %7, %2217 : vector<8x128xi32>
    %2219 = vector.broadcast %2182 : f32 to vector<8x128xf32>
    %2220 = arith.select %2218, %2219, %2215 : vector<8x128xi1>, vector<8x128xf32>
    %2221 = vector.broadcast %2183 : f32 to vector<8x128xf32>
    %2222 = arith.select %2218, %2221, %2216 : vector<8x128xi1>, vector<8x128xf32>
    %c1_i32_634 = arith.constant 1 : i32
    %2223 = vector.broadcast %c1_i32_634 : i32 to vector<8x128xi32>
    %2224 = arith.cmpi eq, %7, %2223 : vector<8x128xi32>
    %2225 = vector.broadcast %2199 : f32 to vector<8x128xf32>
    %2226 = arith.select %2224, %2225, %2220 : vector<8x128xi1>, vector<8x128xf32>
    %2227 = vector.broadcast %2184 : f32 to vector<8x128xf32>
    %2228 = arith.select %2224, %2227, %2222 : vector<8x128xi1>, vector<8x128xf32>
    %c2_i32_635 = arith.constant 2 : i32
    %2229 = vector.broadcast %c2_i32_635 : i32 to vector<8x128xi32>
    %2230 = arith.cmpi eq, %7, %2229 : vector<8x128xi32>
    %2231 = vector.broadcast %2200 : f32 to vector<8x128xf32>
    %2232 = arith.select %2230, %2231, %2226 : vector<8x128xi1>, vector<8x128xf32>
    %2233 = vector.broadcast %2185 : f32 to vector<8x128xf32>
    %2234 = arith.select %2230, %2233, %2228 : vector<8x128xi1>, vector<8x128xf32>
    %c3_i32_636 = arith.constant 3 : i32
    %2235 = vector.broadcast %c3_i32_636 : i32 to vector<8x128xi32>
    %2236 = arith.cmpi eq, %7, %2235 : vector<8x128xi32>
    %2237 = vector.broadcast %2201 : f32 to vector<8x128xf32>
    %2238 = arith.select %2236, %2237, %2232 : vector<8x128xi1>, vector<8x128xf32>
    %2239 = vector.broadcast %2186 : f32 to vector<8x128xf32>
    %2240 = arith.select %2236, %2239, %2234 : vector<8x128xi1>, vector<8x128xf32>
    %c4_i32_637 = arith.constant 4 : i32
    %2241 = vector.broadcast %c4_i32_637 : i32 to vector<8x128xi32>
    %2242 = arith.cmpi eq, %7, %2241 : vector<8x128xi32>
    %2243 = vector.broadcast %2202 : f32 to vector<8x128xf32>
    %2244 = arith.select %2242, %2243, %2238 : vector<8x128xi1>, vector<8x128xf32>
    %2245 = vector.broadcast %2187 : f32 to vector<8x128xf32>
    %2246 = arith.select %2242, %2245, %2240 : vector<8x128xi1>, vector<8x128xf32>
    %c5_i32_638 = arith.constant 5 : i32
    %2247 = vector.broadcast %c5_i32_638 : i32 to vector<8x128xi32>
    %2248 = arith.cmpi eq, %7, %2247 : vector<8x128xi32>
    %2249 = vector.broadcast %2203 : f32 to vector<8x128xf32>
    %2250 = arith.select %2248, %2249, %2244 : vector<8x128xi1>, vector<8x128xf32>
    %2251 = vector.broadcast %2188 : f32 to vector<8x128xf32>
    %2252 = arith.select %2248, %2251, %2246 : vector<8x128xi1>, vector<8x128xf32>
    %c6_i32_639 = arith.constant 6 : i32
    %2253 = vector.broadcast %c6_i32_639 : i32 to vector<8x128xi32>
    %2254 = arith.cmpi eq, %7, %2253 : vector<8x128xi32>
    %2255 = vector.broadcast %2204 : f32 to vector<8x128xf32>
    %2256 = arith.select %2254, %2255, %2250 : vector<8x128xi1>, vector<8x128xf32>
    %2257 = vector.broadcast %2189 : f32 to vector<8x128xf32>
    %2258 = arith.select %2254, %2257, %2252 : vector<8x128xi1>, vector<8x128xf32>
    %c7_i32_640 = arith.constant 7 : i32
    %2259 = vector.broadcast %c7_i32_640 : i32 to vector<8x128xi32>
    %2260 = arith.cmpi eq, %7, %2259 : vector<8x128xi32>
    %2261 = vector.broadcast %2205 : f32 to vector<8x128xf32>
    %2262 = arith.select %2260, %2261, %2256 : vector<8x128xi1>, vector<8x128xf32>
    %2263 = vector.broadcast %2190 : f32 to vector<8x128xf32>
    %2264 = arith.select %2260, %2263, %2258 : vector<8x128xi1>, vector<8x128xf32>
    %c8_i32_641 = arith.constant 8 : i32
    %2265 = vector.broadcast %c8_i32_641 : i32 to vector<8x128xi32>
    %2266 = arith.cmpi eq, %7, %2265 : vector<8x128xi32>
    %2267 = vector.broadcast %2206 : f32 to vector<8x128xf32>
    %2268 = arith.select %2266, %2267, %2262 : vector<8x128xi1>, vector<8x128xf32>
    %2269 = vector.broadcast %2191 : f32 to vector<8x128xf32>
    %2270 = arith.select %2266, %2269, %2264 : vector<8x128xi1>, vector<8x128xf32>
    %c9_i32_642 = arith.constant 9 : i32
    %2271 = vector.broadcast %c9_i32_642 : i32 to vector<8x128xi32>
    %2272 = arith.cmpi eq, %7, %2271 : vector<8x128xi32>
    %2273 = vector.broadcast %2207 : f32 to vector<8x128xf32>
    %2274 = arith.select %2272, %2273, %2268 : vector<8x128xi1>, vector<8x128xf32>
    %2275 = vector.broadcast %2192 : f32 to vector<8x128xf32>
    %2276 = arith.select %2272, %2275, %2270 : vector<8x128xi1>, vector<8x128xf32>
    %c10_i32_643 = arith.constant 10 : i32
    %2277 = vector.broadcast %c10_i32_643 : i32 to vector<8x128xi32>
    %2278 = arith.cmpi eq, %7, %2277 : vector<8x128xi32>
    %2279 = vector.broadcast %2208 : f32 to vector<8x128xf32>
    %2280 = arith.select %2278, %2279, %2274 : vector<8x128xi1>, vector<8x128xf32>
    %2281 = vector.broadcast %2193 : f32 to vector<8x128xf32>
    %2282 = arith.select %2278, %2281, %2276 : vector<8x128xi1>, vector<8x128xf32>
    %c11_i32_644 = arith.constant 11 : i32
    %2283 = vector.broadcast %c11_i32_644 : i32 to vector<8x128xi32>
    %2284 = arith.cmpi eq, %7, %2283 : vector<8x128xi32>
    %2285 = vector.broadcast %2209 : f32 to vector<8x128xf32>
    %2286 = arith.select %2284, %2285, %2280 : vector<8x128xi1>, vector<8x128xf32>
    %2287 = vector.broadcast %2194 : f32 to vector<8x128xf32>
    %2288 = arith.select %2284, %2287, %2282 : vector<8x128xi1>, vector<8x128xf32>
    %c12_i32_645 = arith.constant 12 : i32
    %2289 = vector.broadcast %c12_i32_645 : i32 to vector<8x128xi32>
    %2290 = arith.cmpi eq, %7, %2289 : vector<8x128xi32>
    %2291 = vector.broadcast %2210 : f32 to vector<8x128xf32>
    %2292 = arith.select %2290, %2291, %2286 : vector<8x128xi1>, vector<8x128xf32>
    %2293 = vector.broadcast %2195 : f32 to vector<8x128xf32>
    %2294 = arith.select %2290, %2293, %2288 : vector<8x128xi1>, vector<8x128xf32>
    %c13_i32_646 = arith.constant 13 : i32
    %2295 = vector.broadcast %c13_i32_646 : i32 to vector<8x128xi32>
    %2296 = arith.cmpi eq, %7, %2295 : vector<8x128xi32>
    %2297 = vector.broadcast %2211 : f32 to vector<8x128xf32>
    %2298 = arith.select %2296, %2297, %2292 : vector<8x128xi1>, vector<8x128xf32>
    %2299 = vector.broadcast %2196 : f32 to vector<8x128xf32>
    %2300 = arith.select %2296, %2299, %2294 : vector<8x128xi1>, vector<8x128xf32>
    %c14_i32_647 = arith.constant 14 : i32
    %2301 = vector.broadcast %c14_i32_647 : i32 to vector<8x128xi32>
    %2302 = arith.cmpi eq, %7, %2301 : vector<8x128xi32>
    %2303 = vector.broadcast %2212 : f32 to vector<8x128xf32>
    %2304 = arith.select %2302, %2303, %2298 : vector<8x128xi1>, vector<8x128xf32>
    %2305 = vector.broadcast %2197 : f32 to vector<8x128xf32>
    %2306 = arith.select %2302, %2305, %2300 : vector<8x128xi1>, vector<8x128xf32>
    %c15_i32_648 = arith.constant 15 : i32
    %2307 = vector.broadcast %c15_i32_648 : i32 to vector<8x128xi32>
    %2308 = arith.cmpi eq, %7, %2307 : vector<8x128xi32>
    %2309 = vector.broadcast %2213 : f32 to vector<8x128xf32>
    %2310 = arith.select %2308, %2309, %2304 : vector<8x128xi1>, vector<8x128xf32>
    %2311 = vector.broadcast %2198 : f32 to vector<8x128xf32>
    %2312 = arith.select %2308, %2311, %2306 : vector<8x128xi1>, vector<8x128xf32>
    %c16_i32_649 = arith.constant 16 : i32
    %2313 = vector.broadcast %c16_i32_649 : i32 to vector<8x128xi32>
    %2314 = arith.cmpi eq, %7, %2313 : vector<8x128xi32>
    %2315 = vector.broadcast %2214 : f32 to vector<8x128xf32>
    %2316 = arith.select %2314, %2315, %2310 : vector<8x128xi1>, vector<8x128xf32>
    %2317 = vector.broadcast %2198 : f32 to vector<8x128xf32>
    %2318 = arith.select %2314, %2317, %2312 : vector<8x128xi1>, vector<8x128xf32>
    %2319 = arith.mulf %5, %2318 : vector<8x128xf32>
    %2320 = arith.addf %2316, %2319 : vector<8x128xf32>
    %c11_650 = arith.constant 11 : index
    %c0_651 = arith.constant 0 : index
    %c0_652 = arith.constant 0 : index
    %2321 = vector.load %arg3[%c11_650, %c0_651, %c0_652] : memref<16x8x128xf32, #tpu.memory_space<vmem>>, vector<1x8x128xf32>
    %2322 = vector.shape_cast %2321 : vector<1x8x128xf32> to vector<8x128xf32>
    %2323 = vector.shape_cast %2320 : vector<8x128xf32> to vector<1x8x128xf32>
    tpu.vector_store %arg3[%c11_650, %c0_651, %c0_652], %2323 {strides = array<i32>} : memref<16x8x128xf32, #tpu.memory_space<vmem>>, vector<1x8x128xf32>,
    %c12_653 = arith.constant 12 : index
    %c0_654 = arith.constant 0 : index
    %2324 = memref.load %arg1[%c12_653, %c0_654] : memref<16x17xf32, #tpu.memory_space<smem>>
    %2325 = math.absf %2324 : f32
    %c12_655 = arith.constant 12 : index
    %c1_656 = arith.constant 1 : index
    %2326 = memref.load %arg1[%c12_655, %c1_656] : memref<16x17xf32, #tpu.memory_space<smem>>
    %2327 = math.absf %2326 : f32
    %c12_657 = arith.constant 12 : index
    %c2_658 = arith.constant 2 : index
    %2328 = memref.load %arg1[%c12_657, %c2_658] : memref<16x17xf32, #tpu.memory_space<smem>>
    %2329 = math.absf %2328 : f32
    %c12_659 = arith.constant 12 : index
    %c3_660 = arith.constant 3 : index
    %2330 = memref.load %arg1[%c12_659, %c3_660] : memref<16x17xf32, #tpu.memory_space<smem>>
    %2331 = math.absf %2330 : f32
    %c12_661 = arith.constant 12 : index
    %c4_662 = arith.constant 4 : index
    %2332 = memref.load %arg1[%c12_661, %c4_662] : memref<16x17xf32, #tpu.memory_space<smem>>
    %2333 = math.absf %2332 : f32
    %c12_663 = arith.constant 12 : index
    %c5_664 = arith.constant 5 : index
    %2334 = memref.load %arg1[%c12_663, %c5_664] : memref<16x17xf32, #tpu.memory_space<smem>>
    %2335 = math.absf %2334 : f32
    %c12_665 = arith.constant 12 : index
    %c6_666 = arith.constant 6 : index
    %2336 = memref.load %arg1[%c12_665, %c6_666] : memref<16x17xf32, #tpu.memory_space<smem>>
    %2337 = math.absf %2336 : f32
    %c12_667 = arith.constant 12 : index
    %c7_668 = arith.constant 7 : index
    %2338 = memref.load %arg1[%c12_667, %c7_668] : memref<16x17xf32, #tpu.memory_space<smem>>
    %2339 = math.absf %2338 : f32
    %c12_669 = arith.constant 12 : index
    %c8_670 = arith.constant 8 : index
    %2340 = memref.load %arg1[%c12_669, %c8_670] : memref<16x17xf32, #tpu.memory_space<smem>>
    %2341 = math.absf %2340 : f32
    %c12_671 = arith.constant 12 : index
    %c9_672 = arith.constant 9 : index
    %2342 = memref.load %arg1[%c12_671, %c9_672] : memref<16x17xf32, #tpu.memory_space<smem>>
    %2343 = math.absf %2342 : f32
    %c12_673 = arith.constant 12 : index
    %c10_674 = arith.constant 10 : index
    %2344 = memref.load %arg1[%c12_673, %c10_674] : memref<16x17xf32, #tpu.memory_space<smem>>
    %2345 = math.absf %2344 : f32
    %c12_675 = arith.constant 12 : index
    %c11_676 = arith.constant 11 : index
    %2346 = memref.load %arg1[%c12_675, %c11_676] : memref<16x17xf32, #tpu.memory_space<smem>>
    %2347 = math.absf %2346 : f32
    %c12_677 = arith.constant 12 : index
    %c12_678 = arith.constant 12 : index
    %2348 = memref.load %arg1[%c12_677, %c12_678] : memref<16x17xf32, #tpu.memory_space<smem>>
    %2349 = math.absf %2348 : f32
    %c12_679 = arith.constant 12 : index
    %c13_680 = arith.constant 13 : index
    %2350 = memref.load %arg1[%c12_679, %c13_680] : memref<16x17xf32, #tpu.memory_space<smem>>
    %2351 = math.absf %2350 : f32
    %c12_681 = arith.constant 12 : index
    %c14_682 = arith.constant 14 : index
    %2352 = memref.load %arg1[%c12_681, %c14_682] : memref<16x17xf32, #tpu.memory_space<smem>>
    %2353 = math.absf %2352 : f32
    %c12_683 = arith.constant 12 : index
    %c15_684 = arith.constant 15 : index
    %2354 = memref.load %arg1[%c12_683, %c15_684] : memref<16x17xf32, #tpu.memory_space<smem>>
    %2355 = math.absf %2354 : f32
    %c12_685 = arith.constant 12 : index
    %c16_686 = arith.constant 16 : index
    %2356 = memref.load %arg1[%c12_685, %c16_686] : memref<16x17xf32, #tpu.memory_space<smem>>
    %2357 = math.absf %2356 : f32
    %2358 = arith.addf %2325, %2327 : f32
    %2359 = arith.addf %2358, %2329 : f32
    %2360 = arith.addf %2359, %2331 : f32
    %2361 = arith.addf %2360, %2333 : f32
    %2362 = arith.addf %2361, %2335 : f32
    %2363 = arith.addf %2362, %2337 : f32
    %2364 = arith.addf %2363, %2339 : f32
    %2365 = arith.addf %2364, %2341 : f32
    %2366 = arith.addf %2365, %2343 : f32
    %2367 = arith.addf %2366, %2345 : f32
    %2368 = arith.addf %2367, %2347 : f32
    %2369 = arith.addf %2368, %2349 : f32
    %2370 = arith.addf %2369, %2351 : f32
    %2371 = arith.addf %2370, %2353 : f32
    %2372 = arith.addf %2371, %2355 : f32
    %2373 = arith.addf %2372, %2357 : f32
    %cst_687 = arith.constant 1.000000e+00 : f32
    %2374 = arith.divf %cst_687, %2373 : f32
    %2375 = arith.mulf %2325, %2374 : f32
    %2376 = arith.mulf %2327, %2374 : f32
    %2377 = arith.mulf %2329, %2374 : f32
    %2378 = arith.mulf %2331, %2374 : f32
    %2379 = arith.mulf %2333, %2374 : f32
    %2380 = arith.mulf %2335, %2374 : f32
    %2381 = arith.mulf %2337, %2374 : f32
    %2382 = arith.mulf %2339, %2374 : f32
    %2383 = arith.mulf %2341, %2374 : f32
    %2384 = arith.mulf %2343, %2374 : f32
    %2385 = arith.mulf %2345, %2374 : f32
    %2386 = arith.mulf %2347, %2374 : f32
    %2387 = arith.mulf %2349, %2374 : f32
    %2388 = arith.mulf %2351, %2374 : f32
    %2389 = arith.mulf %2353, %2374 : f32
    %2390 = arith.mulf %2355, %2374 : f32
    %2391 = arith.mulf %2357, %2374 : f32
    %2392 = arith.addf %2375, %2376 : f32
    %2393 = arith.addf %2392, %2377 : f32
    %2394 = arith.addf %2393, %2378 : f32
    %2395 = arith.addf %2394, %2379 : f32
    %2396 = arith.addf %2395, %2380 : f32
    %2397 = arith.addf %2396, %2381 : f32
    %2398 = arith.addf %2397, %2382 : f32
    %2399 = arith.addf %2398, %2383 : f32
    %2400 = arith.addf %2399, %2384 : f32
    %2401 = arith.addf %2400, %2385 : f32
    %2402 = arith.addf %2401, %2386 : f32
    %2403 = arith.addf %2402, %2387 : f32
    %2404 = arith.addf %2403, %2388 : f32
    %2405 = arith.addf %2404, %2389 : f32
    %2406 = arith.addf %2405, %2390 : f32
    %2407 = arith.addf %2406, %2391 : f32
    %cst_688 = arith.constant 0.000000e+00 : f32
    %2408 = vector.broadcast %cst_688 : f32 to vector<8x128xf32>
    %cst_689 = arith.constant 0.000000e+00 : f32
    %2409 = vector.broadcast %cst_689 : f32 to vector<8x128xf32>
    %c0_i32_690 = arith.constant 0 : i32
    %2410 = vector.broadcast %c0_i32_690 : i32 to vector<8x128xi32>
    %2411 = arith.cmpi eq, %7, %2410 : vector<8x128xi32>
    %2412 = vector.broadcast %2375 : f32 to vector<8x128xf32>
    %2413 = arith.select %2411, %2412, %2408 : vector<8x128xi1>, vector<8x128xf32>
    %2414 = vector.broadcast %2376 : f32 to vector<8x128xf32>
    %2415 = arith.select %2411, %2414, %2409 : vector<8x128xi1>, vector<8x128xf32>
    %c1_i32_691 = arith.constant 1 : i32
    %2416 = vector.broadcast %c1_i32_691 : i32 to vector<8x128xi32>
    %2417 = arith.cmpi eq, %7, %2416 : vector<8x128xi32>
    %2418 = vector.broadcast %2392 : f32 to vector<8x128xf32>
    %2419 = arith.select %2417, %2418, %2413 : vector<8x128xi1>, vector<8x128xf32>
    %2420 = vector.broadcast %2377 : f32 to vector<8x128xf32>
    %2421 = arith.select %2417, %2420, %2415 : vector<8x128xi1>, vector<8x128xf32>
    %c2_i32_692 = arith.constant 2 : i32
    %2422 = vector.broadcast %c2_i32_692 : i32 to vector<8x128xi32>
    %2423 = arith.cmpi eq, %7, %2422 : vector<8x128xi32>
    %2424 = vector.broadcast %2393 : f32 to vector<8x128xf32>
    %2425 = arith.select %2423, %2424, %2419 : vector<8x128xi1>, vector<8x128xf32>
    %2426 = vector.broadcast %2378 : f32 to vector<8x128xf32>
    %2427 = arith.select %2423, %2426, %2421 : vector<8x128xi1>, vector<8x128xf32>
    %c3_i32_693 = arith.constant 3 : i32
    %2428 = vector.broadcast %c3_i32_693 : i32 to vector<8x128xi32>
    %2429 = arith.cmpi eq, %7, %2428 : vector<8x128xi32>
    %2430 = vector.broadcast %2394 : f32 to vector<8x128xf32>
    %2431 = arith.select %2429, %2430, %2425 : vector<8x128xi1>, vector<8x128xf32>
    %2432 = vector.broadcast %2379 : f32 to vector<8x128xf32>
    %2433 = arith.select %2429, %2432, %2427 : vector<8x128xi1>, vector<8x128xf32>
    %c4_i32_694 = arith.constant 4 : i32
    %2434 = vector.broadcast %c4_i32_694 : i32 to vector<8x128xi32>
    %2435 = arith.cmpi eq, %7, %2434 : vector<8x128xi32>
    %2436 = vector.broadcast %2395 : f32 to vector<8x128xf32>
    %2437 = arith.select %2435, %2436, %2431 : vector<8x128xi1>, vector<8x128xf32>
    %2438 = vector.broadcast %2380 : f32 to vector<8x128xf32>
    %2439 = arith.select %2435, %2438, %2433 : vector<8x128xi1>, vector<8x128xf32>
    %c5_i32_695 = arith.constant 5 : i32
    %2440 = vector.broadcast %c5_i32_695 : i32 to vector<8x128xi32>
    %2441 = arith.cmpi eq, %7, %2440 : vector<8x128xi32>
    %2442 = vector.broadcast %2396 : f32 to vector<8x128xf32>
    %2443 = arith.select %2441, %2442, %2437 : vector<8x128xi1>, vector<8x128xf32>
    %2444 = vector.broadcast %2381 : f32 to vector<8x128xf32>
    %2445 = arith.select %2441, %2444, %2439 : vector<8x128xi1>, vector<8x128xf32>
    %c6_i32_696 = arith.constant 6 : i32
    %2446 = vector.broadcast %c6_i32_696 : i32 to vector<8x128xi32>
    %2447 = arith.cmpi eq, %7, %2446 : vector<8x128xi32>
    %2448 = vector.broadcast %2397 : f32 to vector<8x128xf32>
    %2449 = arith.select %2447, %2448, %2443 : vector<8x128xi1>, vector<8x128xf32>
    %2450 = vector.broadcast %2382 : f32 to vector<8x128xf32>
    %2451 = arith.select %2447, %2450, %2445 : vector<8x128xi1>, vector<8x128xf32>
    %c7_i32_697 = arith.constant 7 : i32
    %2452 = vector.broadcast %c7_i32_697 : i32 to vector<8x128xi32>
    %2453 = arith.cmpi eq, %7, %2452 : vector<8x128xi32>
    %2454 = vector.broadcast %2398 : f32 to vector<8x128xf32>
    %2455 = arith.select %2453, %2454, %2449 : vector<8x128xi1>, vector<8x128xf32>
    %2456 = vector.broadcast %2383 : f32 to vector<8x128xf32>
    %2457 = arith.select %2453, %2456, %2451 : vector<8x128xi1>, vector<8x128xf32>
    %c8_i32_698 = arith.constant 8 : i32
    %2458 = vector.broadcast %c8_i32_698 : i32 to vector<8x128xi32>
    %2459 = arith.cmpi eq, %7, %2458 : vector<8x128xi32>
    %2460 = vector.broadcast %2399 : f32 to vector<8x128xf32>
    %2461 = arith.select %2459, %2460, %2455 : vector<8x128xi1>, vector<8x128xf32>
    %2462 = vector.broadcast %2384 : f32 to vector<8x128xf32>
    %2463 = arith.select %2459, %2462, %2457 : vector<8x128xi1>, vector<8x128xf32>
    %c9_i32_699 = arith.constant 9 : i32
    %2464 = vector.broadcast %c9_i32_699 : i32 to vector<8x128xi32>
    %2465 = arith.cmpi eq, %7, %2464 : vector<8x128xi32>
    %2466 = vector.broadcast %2400 : f32 to vector<8x128xf32>
    %2467 = arith.select %2465, %2466, %2461 : vector<8x128xi1>, vector<8x128xf32>
    %2468 = vector.broadcast %2385 : f32 to vector<8x128xf32>
    %2469 = arith.select %2465, %2468, %2463 : vector<8x128xi1>, vector<8x128xf32>
    %c10_i32_700 = arith.constant 10 : i32
    %2470 = vector.broadcast %c10_i32_700 : i32 to vector<8x128xi32>
    %2471 = arith.cmpi eq, %7, %2470 : vector<8x128xi32>
    %2472 = vector.broadcast %2401 : f32 to vector<8x128xf32>
    %2473 = arith.select %2471, %2472, %2467 : vector<8x128xi1>, vector<8x128xf32>
    %2474 = vector.broadcast %2386 : f32 to vector<8x128xf32>
    %2475 = arith.select %2471, %2474, %2469 : vector<8x128xi1>, vector<8x128xf32>
    %c11_i32_701 = arith.constant 11 : i32
    %2476 = vector.broadcast %c11_i32_701 : i32 to vector<8x128xi32>
    %2477 = arith.cmpi eq, %7, %2476 : vector<8x128xi32>
    %2478 = vector.broadcast %2402 : f32 to vector<8x128xf32>
    %2479 = arith.select %2477, %2478, %2473 : vector<8x128xi1>, vector<8x128xf32>
    %2480 = vector.broadcast %2387 : f32 to vector<8x128xf32>
    %2481 = arith.select %2477, %2480, %2475 : vector<8x128xi1>, vector<8x128xf32>
    %c12_i32_702 = arith.constant 12 : i32
    %2482 = vector.broadcast %c12_i32_702 : i32 to vector<8x128xi32>
    %2483 = arith.cmpi eq, %7, %2482 : vector<8x128xi32>
    %2484 = vector.broadcast %2403 : f32 to vector<8x128xf32>
    %2485 = arith.select %2483, %2484, %2479 : vector<8x128xi1>, vector<8x128xf32>
    %2486 = vector.broadcast %2388 : f32 to vector<8x128xf32>
    %2487 = arith.select %2483, %2486, %2481 : vector<8x128xi1>, vector<8x128xf32>
    %c13_i32_703 = arith.constant 13 : i32
    %2488 = vector.broadcast %c13_i32_703 : i32 to vector<8x128xi32>
    %2489 = arith.cmpi eq, %7, %2488 : vector<8x128xi32>
    %2490 = vector.broadcast %2404 : f32 to vector<8x128xf32>
    %2491 = arith.select %2489, %2490, %2485 : vector<8x128xi1>, vector<8x128xf32>
    %2492 = vector.broadcast %2389 : f32 to vector<8x128xf32>
    %2493 = arith.select %2489, %2492, %2487 : vector<8x128xi1>, vector<8x128xf32>
    %c14_i32_704 = arith.constant 14 : i32
    %2494 = vector.broadcast %c14_i32_704 : i32 to vector<8x128xi32>
    %2495 = arith.cmpi eq, %7, %2494 : vector<8x128xi32>
    %2496 = vector.broadcast %2405 : f32 to vector<8x128xf32>
    %2497 = arith.select %2495, %2496, %2491 : vector<8x128xi1>, vector<8x128xf32>
    %2498 = vector.broadcast %2390 : f32 to vector<8x128xf32>
    %2499 = arith.select %2495, %2498, %2493 : vector<8x128xi1>, vector<8x128xf32>
    %c15_i32_705 = arith.constant 15 : i32
    %2500 = vector.broadcast %c15_i32_705 : i32 to vector<8x128xi32>
    %2501 = arith.cmpi eq, %7, %2500 : vector<8x128xi32>
    %2502 = vector.broadcast %2406 : f32 to vector<8x128xf32>
    %2503 = arith.select %2501, %2502, %2497 : vector<8x128xi1>, vector<8x128xf32>
    %2504 = vector.broadcast %2391 : f32 to vector<8x128xf32>
    %2505 = arith.select %2501, %2504, %2499 : vector<8x128xi1>, vector<8x128xf32>
    %c16_i32_706 = arith.constant 16 : i32
    %2506 = vector.broadcast %c16_i32_706 : i32 to vector<8x128xi32>
    %2507 = arith.cmpi eq, %7, %2506 : vector<8x128xi32>
    %2508 = vector.broadcast %2407 : f32 to vector<8x128xf32>
    %2509 = arith.select %2507, %2508, %2503 : vector<8x128xi1>, vector<8x128xf32>
    %2510 = vector.broadcast %2391 : f32 to vector<8x128xf32>
    %2511 = arith.select %2507, %2510, %2505 : vector<8x128xi1>, vector<8x128xf32>
    %2512 = arith.mulf %5, %2511 : vector<8x128xf32>
    %2513 = arith.addf %2509, %2512 : vector<8x128xf32>
    %c12_707 = arith.constant 12 : index
    %c0_708 = arith.constant 0 : index
    %c0_709 = arith.constant 0 : index
    %2514 = vector.load %arg3[%c12_707, %c0_708, %c0_709] : memref<16x8x128xf32, #tpu.memory_space<vmem>>, vector<1x8x128xf32>
    %2515 = vector.shape_cast %2514 : vector<1x8x128xf32> to vector<8x128xf32>
    %2516 = vector.shape_cast %2513 : vector<8x128xf32> to vector<1x8x128xf32>
    tpu.vector_store %arg3[%c12_707, %c0_708, %c0_709], %2516 {strides = array<i32>} : memref<16x8x128xf32, #tpu.memory_space<vmem>>, vector<1x8x128xf32>,
    %c13_710 = arith.constant 13 : index
    %c0_711 = arith.constant 0 : index
    %2517 = memref.load %arg1[%c13_710, %c0_711] : memref<16x17xf32, #tpu.memory_space<smem>>
    %2518 = math.absf %2517 : f32
    %c13_712 = arith.constant 13 : index
    %c1_713 = arith.constant 1 : index
    %2519 = memref.load %arg1[%c13_712, %c1_713] : memref<16x17xf32, #tpu.memory_space<smem>>
    %2520 = math.absf %2519 : f32
    %c13_714 = arith.constant 13 : index
    %c2_715 = arith.constant 2 : index
    %2521 = memref.load %arg1[%c13_714, %c2_715] : memref<16x17xf32, #tpu.memory_space<smem>>
    %2522 = math.absf %2521 : f32
    %c13_716 = arith.constant 13 : index
    %c3_717 = arith.constant 3 : index
    %2523 = memref.load %arg1[%c13_716, %c3_717] : memref<16x17xf32, #tpu.memory_space<smem>>
    %2524 = math.absf %2523 : f32
    %c13_718 = arith.constant 13 : index
    %c4_719 = arith.constant 4 : index
    %2525 = memref.load %arg1[%c13_718, %c4_719] : memref<16x17xf32, #tpu.memory_space<smem>>
    %2526 = math.absf %2525 : f32
    %c13_720 = arith.constant 13 : index
    %c5_721 = arith.constant 5 : index
    %2527 = memref.load %arg1[%c13_720, %c5_721] : memref<16x17xf32, #tpu.memory_space<smem>>
    %2528 = math.absf %2527 : f32
    %c13_722 = arith.constant 13 : index
    %c6_723 = arith.constant 6 : index
    %2529 = memref.load %arg1[%c13_722, %c6_723] : memref<16x17xf32, #tpu.memory_space<smem>>
    %2530 = math.absf %2529 : f32
    %c13_724 = arith.constant 13 : index
    %c7_725 = arith.constant 7 : index
    %2531 = memref.load %arg1[%c13_724, %c7_725] : memref<16x17xf32, #tpu.memory_space<smem>>
    %2532 = math.absf %2531 : f32
    %c13_726 = arith.constant 13 : index
    %c8_727 = arith.constant 8 : index
    %2533 = memref.load %arg1[%c13_726, %c8_727] : memref<16x17xf32, #tpu.memory_space<smem>>
    %2534 = math.absf %2533 : f32
    %c13_728 = arith.constant 13 : index
    %c9_729 = arith.constant 9 : index
    %2535 = memref.load %arg1[%c13_728, %c9_729] : memref<16x17xf32, #tpu.memory_space<smem>>
    %2536 = math.absf %2535 : f32
    %c13_730 = arith.constant 13 : index
    %c10_731 = arith.constant 10 : index
    %2537 = memref.load %arg1[%c13_730, %c10_731] : memref<16x17xf32, #tpu.memory_space<smem>>
    %2538 = math.absf %2537 : f32
    %c13_732 = arith.constant 13 : index
    %c11_733 = arith.constant 11 : index
    %2539 = memref.load %arg1[%c13_732, %c11_733] : memref<16x17xf32, #tpu.memory_space<smem>>
    %2540 = math.absf %2539 : f32
    %c13_734 = arith.constant 13 : index
    %c12_735 = arith.constant 12 : index
    %2541 = memref.load %arg1[%c13_734, %c12_735] : memref<16x17xf32, #tpu.memory_space<smem>>
    %2542 = math.absf %2541 : f32
    %c13_736 = arith.constant 13 : index
    %c13_737 = arith.constant 13 : index
    %2543 = memref.load %arg1[%c13_736, %c13_737] : memref<16x17xf32, #tpu.memory_space<smem>>
    %2544 = math.absf %2543 : f32
    %c13_738 = arith.constant 13 : index
    %c14_739 = arith.constant 14 : index
    %2545 = memref.load %arg1[%c13_738, %c14_739] : memref<16x17xf32, #tpu.memory_space<smem>>
    %2546 = math.absf %2545 : f32
    %c13_740 = arith.constant 13 : index
    %c15_741 = arith.constant 15 : index
    %2547 = memref.load %arg1[%c13_740, %c15_741] : memref<16x17xf32, #tpu.memory_space<smem>>
    %2548 = math.absf %2547 : f32
    %c13_742 = arith.constant 13 : index
    %c16_743 = arith.constant 16 : index
    %2549 = memref.load %arg1[%c13_742, %c16_743] : memref<16x17xf32, #tpu.memory_space<smem>>
    %2550 = math.absf %2549 : f32
    %2551 = arith.addf %2518, %2520 : f32
    %2552 = arith.addf %2551, %2522 : f32
    %2553 = arith.addf %2552, %2524 : f32
    %2554 = arith.addf %2553, %2526 : f32
    %2555 = arith.addf %2554, %2528 : f32
    %2556 = arith.addf %2555, %2530 : f32
    %2557 = arith.addf %2556, %2532 : f32
    %2558 = arith.addf %2557, %2534 : f32
    %2559 = arith.addf %2558, %2536 : f32
    %2560 = arith.addf %2559, %2538 : f32
    %2561 = arith.addf %2560, %2540 : f32
    %2562 = arith.addf %2561, %2542 : f32
    %2563 = arith.addf %2562, %2544 : f32
    %2564 = arith.addf %2563, %2546 : f32
    %2565 = arith.addf %2564, %2548 : f32
    %2566 = arith.addf %2565, %2550 : f32
    %cst_744 = arith.constant 1.000000e+00 : f32
    %2567 = arith.divf %cst_744, %2566 : f32
    %2568 = arith.mulf %2518, %2567 : f32
    %2569 = arith.mulf %2520, %2567 : f32
    %2570 = arith.mulf %2522, %2567 : f32
    %2571 = arith.mulf %2524, %2567 : f32
    %2572 = arith.mulf %2526, %2567 : f32
    %2573 = arith.mulf %2528, %2567 : f32
    %2574 = arith.mulf %2530, %2567 : f32
    %2575 = arith.mulf %2532, %2567 : f32
    %2576 = arith.mulf %2534, %2567 : f32
    %2577 = arith.mulf %2536, %2567 : f32
    %2578 = arith.mulf %2538, %2567 : f32
    %2579 = arith.mulf %2540, %2567 : f32
    %2580 = arith.mulf %2542, %2567 : f32
    %2581 = arith.mulf %2544, %2567 : f32
    %2582 = arith.mulf %2546, %2567 : f32
    %2583 = arith.mulf %2548, %2567 : f32
    %2584 = arith.mulf %2550, %2567 : f32
    %2585 = arith.addf %2568, %2569 : f32
    %2586 = arith.addf %2585, %2570 : f32
    %2587 = arith.addf %2586, %2571 : f32
    %2588 = arith.addf %2587, %2572 : f32
    %2589 = arith.addf %2588, %2573 : f32
    %2590 = arith.addf %2589, %2574 : f32
    %2591 = arith.addf %2590, %2575 : f32
    %2592 = arith.addf %2591, %2576 : f32
    %2593 = arith.addf %2592, %2577 : f32
    %2594 = arith.addf %2593, %2578 : f32
    %2595 = arith.addf %2594, %2579 : f32
    %2596 = arith.addf %2595, %2580 : f32
    %2597 = arith.addf %2596, %2581 : f32
    %2598 = arith.addf %2597, %2582 : f32
    %2599 = arith.addf %2598, %2583 : f32
    %2600 = arith.addf %2599, %2584 : f32
    %cst_745 = arith.constant 0.000000e+00 : f32
    %2601 = vector.broadcast %cst_745 : f32 to vector<8x128xf32>
    %cst_746 = arith.constant 0.000000e+00 : f32
    %2602 = vector.broadcast %cst_746 : f32 to vector<8x128xf32>
    %c0_i32_747 = arith.constant 0 : i32
    %2603 = vector.broadcast %c0_i32_747 : i32 to vector<8x128xi32>
    %2604 = arith.cmpi eq, %7, %2603 : vector<8x128xi32>
    %2605 = vector.broadcast %2568 : f32 to vector<8x128xf32>
    %2606 = arith.select %2604, %2605, %2601 : vector<8x128xi1>, vector<8x128xf32>
    %2607 = vector.broadcast %2569 : f32 to vector<8x128xf32>
    %2608 = arith.select %2604, %2607, %2602 : vector<8x128xi1>, vector<8x128xf32>
    %c1_i32_748 = arith.constant 1 : i32
    %2609 = vector.broadcast %c1_i32_748 : i32 to vector<8x128xi32>
    %2610 = arith.cmpi eq, %7, %2609 : vector<8x128xi32>
    %2611 = vector.broadcast %2585 : f32 to vector<8x128xf32>
    %2612 = arith.select %2610, %2611, %2606 : vector<8x128xi1>, vector<8x128xf32>
    %2613 = vector.broadcast %2570 : f32 to vector<8x128xf32>
    %2614 = arith.select %2610, %2613, %2608 : vector<8x128xi1>, vector<8x128xf32>
    %c2_i32_749 = arith.constant 2 : i32
    %2615 = vector.broadcast %c2_i32_749 : i32 to vector<8x128xi32>
    %2616 = arith.cmpi eq, %7, %2615 : vector<8x128xi32>
    %2617 = vector.broadcast %2586 : f32 to vector<8x128xf32>
    %2618 = arith.select %2616, %2617, %2612 : vector<8x128xi1>, vector<8x128xf32>
    %2619 = vector.broadcast %2571 : f32 to vector<8x128xf32>
    %2620 = arith.select %2616, %2619, %2614 : vector<8x128xi1>, vector<8x128xf32>
    %c3_i32_750 = arith.constant 3 : i32
    %2621 = vector.broadcast %c3_i32_750 : i32 to vector<8x128xi32>
    %2622 = arith.cmpi eq, %7, %2621 : vector<8x128xi32>
    %2623 = vector.broadcast %2587 : f32 to vector<8x128xf32>
    %2624 = arith.select %2622, %2623, %2618 : vector<8x128xi1>, vector<8x128xf32>
    %2625 = vector.broadcast %2572 : f32 to vector<8x128xf32>
    %2626 = arith.select %2622, %2625, %2620 : vector<8x128xi1>, vector<8x128xf32>
    %c4_i32_751 = arith.constant 4 : i32
    %2627 = vector.broadcast %c4_i32_751 : i32 to vector<8x128xi32>
    %2628 = arith.cmpi eq, %7, %2627 : vector<8x128xi32>
    %2629 = vector.broadcast %2588 : f32 to vector<8x128xf32>
    %2630 = arith.select %2628, %2629, %2624 : vector<8x128xi1>, vector<8x128xf32>
    %2631 = vector.broadcast %2573 : f32 to vector<8x128xf32>
    %2632 = arith.select %2628, %2631, %2626 : vector<8x128xi1>, vector<8x128xf32>
    %c5_i32_752 = arith.constant 5 : i32
    %2633 = vector.broadcast %c5_i32_752 : i32 to vector<8x128xi32>
    %2634 = arith.cmpi eq, %7, %2633 : vector<8x128xi32>
    %2635 = vector.broadcast %2589 : f32 to vector<8x128xf32>
    %2636 = arith.select %2634, %2635, %2630 : vector<8x128xi1>, vector<8x128xf32>
    %2637 = vector.broadcast %2574 : f32 to vector<8x128xf32>
    %2638 = arith.select %2634, %2637, %2632 : vector<8x128xi1>, vector<8x128xf32>
    %c6_i32_753 = arith.constant 6 : i32
    %2639 = vector.broadcast %c6_i32_753 : i32 to vector<8x128xi32>
    %2640 = arith.cmpi eq, %7, %2639 : vector<8x128xi32>
    %2641 = vector.broadcast %2590 : f32 to vector<8x128xf32>
    %2642 = arith.select %2640, %2641, %2636 : vector<8x128xi1>, vector<8x128xf32>
    %2643 = vector.broadcast %2575 : f32 to vector<8x128xf32>
    %2644 = arith.select %2640, %2643, %2638 : vector<8x128xi1>, vector<8x128xf32>
    %c7_i32_754 = arith.constant 7 : i32
    %2645 = vector.broadcast %c7_i32_754 : i32 to vector<8x128xi32>
    %2646 = arith.cmpi eq, %7, %2645 : vector<8x128xi32>
    %2647 = vector.broadcast %2591 : f32 to vector<8x128xf32>
    %2648 = arith.select %2646, %2647, %2642 : vector<8x128xi1>, vector<8x128xf32>
    %2649 = vector.broadcast %2576 : f32 to vector<8x128xf32>
    %2650 = arith.select %2646, %2649, %2644 : vector<8x128xi1>, vector<8x128xf32>
    %c8_i32_755 = arith.constant 8 : i32
    %2651 = vector.broadcast %c8_i32_755 : i32 to vector<8x128xi32>
    %2652 = arith.cmpi eq, %7, %2651 : vector<8x128xi32>
    %2653 = vector.broadcast %2592 : f32 to vector<8x128xf32>
    %2654 = arith.select %2652, %2653, %2648 : vector<8x128xi1>, vector<8x128xf32>
    %2655 = vector.broadcast %2577 : f32 to vector<8x128xf32>
    %2656 = arith.select %2652, %2655, %2650 : vector<8x128xi1>, vector<8x128xf32>
    %c9_i32_756 = arith.constant 9 : i32
    %2657 = vector.broadcast %c9_i32_756 : i32 to vector<8x128xi32>
    %2658 = arith.cmpi eq, %7, %2657 : vector<8x128xi32>
    %2659 = vector.broadcast %2593 : f32 to vector<8x128xf32>
    %2660 = arith.select %2658, %2659, %2654 : vector<8x128xi1>, vector<8x128xf32>
    %2661 = vector.broadcast %2578 : f32 to vector<8x128xf32>
    %2662 = arith.select %2658, %2661, %2656 : vector<8x128xi1>, vector<8x128xf32>
    %c10_i32_757 = arith.constant 10 : i32
    %2663 = vector.broadcast %c10_i32_757 : i32 to vector<8x128xi32>
    %2664 = arith.cmpi eq, %7, %2663 : vector<8x128xi32>
    %2665 = vector.broadcast %2594 : f32 to vector<8x128xf32>
    %2666 = arith.select %2664, %2665, %2660 : vector<8x128xi1>, vector<8x128xf32>
    %2667 = vector.broadcast %2579 : f32 to vector<8x128xf32>
    %2668 = arith.select %2664, %2667, %2662 : vector<8x128xi1>, vector<8x128xf32>
    %c11_i32_758 = arith.constant 11 : i32
    %2669 = vector.broadcast %c11_i32_758 : i32 to vector<8x128xi32>
    %2670 = arith.cmpi eq, %7, %2669 : vector<8x128xi32>
    %2671 = vector.broadcast %2595 : f32 to vector<8x128xf32>
    %2672 = arith.select %2670, %2671, %2666 : vector<8x128xi1>, vector<8x128xf32>
    %2673 = vector.broadcast %2580 : f32 to vector<8x128xf32>
    %2674 = arith.select %2670, %2673, %2668 : vector<8x128xi1>, vector<8x128xf32>
    %c12_i32_759 = arith.constant 12 : i32
    %2675 = vector.broadcast %c12_i32_759 : i32 to vector<8x128xi32>
    %2676 = arith.cmpi eq, %7, %2675 : vector<8x128xi32>
    %2677 = vector.broadcast %2596 : f32 to vector<8x128xf32>
    %2678 = arith.select %2676, %2677, %2672 : vector<8x128xi1>, vector<8x128xf32>
    %2679 = vector.broadcast %2581 : f32 to vector<8x128xf32>
    %2680 = arith.select %2676, %2679, %2674 : vector<8x128xi1>, vector<8x128xf32>
    %c13_i32_760 = arith.constant 13 : i32
    %2681 = vector.broadcast %c13_i32_760 : i32 to vector<8x128xi32>
    %2682 = arith.cmpi eq, %7, %2681 : vector<8x128xi32>
    %2683 = vector.broadcast %2597 : f32 to vector<8x128xf32>
    %2684 = arith.select %2682, %2683, %2678 : vector<8x128xi1>, vector<8x128xf32>
    %2685 = vector.broadcast %2582 : f32 to vector<8x128xf32>
    %2686 = arith.select %2682, %2685, %2680 : vector<8x128xi1>, vector<8x128xf32>
    %c14_i32_761 = arith.constant 14 : i32
    %2687 = vector.broadcast %c14_i32_761 : i32 to vector<8x128xi32>
    %2688 = arith.cmpi eq, %7, %2687 : vector<8x128xi32>
    %2689 = vector.broadcast %2598 : f32 to vector<8x128xf32>
    %2690 = arith.select %2688, %2689, %2684 : vector<8x128xi1>, vector<8x128xf32>
    %2691 = vector.broadcast %2583 : f32 to vector<8x128xf32>
    %2692 = arith.select %2688, %2691, %2686 : vector<8x128xi1>, vector<8x128xf32>
    %c15_i32_762 = arith.constant 15 : i32
    %2693 = vector.broadcast %c15_i32_762 : i32 to vector<8x128xi32>
    %2694 = arith.cmpi eq, %7, %2693 : vector<8x128xi32>
    %2695 = vector.broadcast %2599 : f32 to vector<8x128xf32>
    %2696 = arith.select %2694, %2695, %2690 : vector<8x128xi1>, vector<8x128xf32>
    %2697 = vector.broadcast %2584 : f32 to vector<8x128xf32>
    %2698 = arith.select %2694, %2697, %2692 : vector<8x128xi1>, vector<8x128xf32>
    %c16_i32_763 = arith.constant 16 : i32
    %2699 = vector.broadcast %c16_i32_763 : i32 to vector<8x128xi32>
    %2700 = arith.cmpi eq, %7, %2699 : vector<8x128xi32>
    %2701 = vector.broadcast %2600 : f32 to vector<8x128xf32>
    %2702 = arith.select %2700, %2701, %2696 : vector<8x128xi1>, vector<8x128xf32>
    %2703 = vector.broadcast %2584 : f32 to vector<8x128xf32>
    %2704 = arith.select %2700, %2703, %2698 : vector<8x128xi1>, vector<8x128xf32>
    %2705 = arith.mulf %5, %2704 : vector<8x128xf32>
    %2706 = arith.addf %2702, %2705 : vector<8x128xf32>
    %c13_764 = arith.constant 13 : index
    %c0_765 = arith.constant 0 : index
    %c0_766 = arith.constant 0 : index
    %2707 = vector.load %arg3[%c13_764, %c0_765, %c0_766] : memref<16x8x128xf32, #tpu.memory_space<vmem>>, vector<1x8x128xf32>
    %2708 = vector.shape_cast %2707 : vector<1x8x128xf32> to vector<8x128xf32>
    %2709 = vector.shape_cast %2706 : vector<8x128xf32> to vector<1x8x128xf32>
    tpu.vector_store %arg3[%c13_764, %c0_765, %c0_766], %2709 {strides = array<i32>} : memref<16x8x128xf32, #tpu.memory_space<vmem>>, vector<1x8x128xf32>,
    %c14_767 = arith.constant 14 : index
    %c0_768 = arith.constant 0 : index
    %2710 = memref.load %arg1[%c14_767, %c0_768] : memref<16x17xf32, #tpu.memory_space<smem>>
    %2711 = math.absf %2710 : f32
    %c14_769 = arith.constant 14 : index
    %c1_770 = arith.constant 1 : index
    %2712 = memref.load %arg1[%c14_769, %c1_770] : memref<16x17xf32, #tpu.memory_space<smem>>
    %2713 = math.absf %2712 : f32
    %c14_771 = arith.constant 14 : index
    %c2_772 = arith.constant 2 : index
    %2714 = memref.load %arg1[%c14_771, %c2_772] : memref<16x17xf32, #tpu.memory_space<smem>>
    %2715 = math.absf %2714 : f32
    %c14_773 = arith.constant 14 : index
    %c3_774 = arith.constant 3 : index
    %2716 = memref.load %arg1[%c14_773, %c3_774] : memref<16x17xf32, #tpu.memory_space<smem>>
    %2717 = math.absf %2716 : f32
    %c14_775 = arith.constant 14 : index
    %c4_776 = arith.constant 4 : index
    %2718 = memref.load %arg1[%c14_775, %c4_776] : memref<16x17xf32, #tpu.memory_space<smem>>
    %2719 = math.absf %2718 : f32
    %c14_777 = arith.constant 14 : index
    %c5_778 = arith.constant 5 : index
    %2720 = memref.load %arg1[%c14_777, %c5_778] : memref<16x17xf32, #tpu.memory_space<smem>>
    %2721 = math.absf %2720 : f32
    %c14_779 = arith.constant 14 : index
    %c6_780 = arith.constant 6 : index
    %2722 = memref.load %arg1[%c14_779, %c6_780] : memref<16x17xf32, #tpu.memory_space<smem>>
    %2723 = math.absf %2722 : f32
    %c14_781 = arith.constant 14 : index
    %c7_782 = arith.constant 7 : index
    %2724 = memref.load %arg1[%c14_781, %c7_782] : memref<16x17xf32, #tpu.memory_space<smem>>
    %2725 = math.absf %2724 : f32
    %c14_783 = arith.constant 14 : index
    %c8_784 = arith.constant 8 : index
    %2726 = memref.load %arg1[%c14_783, %c8_784] : memref<16x17xf32, #tpu.memory_space<smem>>
    %2727 = math.absf %2726 : f32
    %c14_785 = arith.constant 14 : index
    %c9_786 = arith.constant 9 : index
    %2728 = memref.load %arg1[%c14_785, %c9_786] : memref<16x17xf32, #tpu.memory_space<smem>>
    %2729 = math.absf %2728 : f32
    %c14_787 = arith.constant 14 : index
    %c10_788 = arith.constant 10 : index
    %2730 = memref.load %arg1[%c14_787, %c10_788] : memref<16x17xf32, #tpu.memory_space<smem>>
    %2731 = math.absf %2730 : f32
    %c14_789 = arith.constant 14 : index
    %c11_790 = arith.constant 11 : index
    %2732 = memref.load %arg1[%c14_789, %c11_790] : memref<16x17xf32, #tpu.memory_space<smem>>
    %2733 = math.absf %2732 : f32
    %c14_791 = arith.constant 14 : index
    %c12_792 = arith.constant 12 : index
    %2734 = memref.load %arg1[%c14_791, %c12_792] : memref<16x17xf32, #tpu.memory_space<smem>>
    %2735 = math.absf %2734 : f32
    %c14_793 = arith.constant 14 : index
    %c13_794 = arith.constant 13 : index
    %2736 = memref.load %arg1[%c14_793, %c13_794] : memref<16x17xf32, #tpu.memory_space<smem>>
    %2737 = math.absf %2736 : f32
    %c14_795 = arith.constant 14 : index
    %c14_796 = arith.constant 14 : index
    %2738 = memref.load %arg1[%c14_795, %c14_796] : memref<16x17xf32, #tpu.memory_space<smem>>
    %2739 = math.absf %2738 : f32
    %c14_797 = arith.constant 14 : index
    %c15_798 = arith.constant 15 : index
    %2740 = memref.load %arg1[%c14_797, %c15_798] : memref<16x17xf32, #tpu.memory_space<smem>>
    %2741 = math.absf %2740 : f32
    %c14_799 = arith.constant 14 : index
    %c16_800 = arith.constant 16 : index
    %2742 = memref.load %arg1[%c14_799, %c16_800] : memref<16x17xf32, #tpu.memory_space<smem>>
    %2743 = math.absf %2742 : f32
    %2744 = arith.addf %2711, %2713 : f32
    %2745 = arith.addf %2744, %2715 : f32
    %2746 = arith.addf %2745, %2717 : f32
    %2747 = arith.addf %2746, %2719 : f32
    %2748 = arith.addf %2747, %2721 : f32
    %2749 = arith.addf %2748, %2723 : f32
    %2750 = arith.addf %2749, %2725 : f32
    %2751 = arith.addf %2750, %2727 : f32
    %2752 = arith.addf %2751, %2729 : f32
    %2753 = arith.addf %2752, %2731 : f32
    %2754 = arith.addf %2753, %2733 : f32
    %2755 = arith.addf %2754, %2735 : f32
    %2756 = arith.addf %2755, %2737 : f32
    %2757 = arith.addf %2756, %2739 : f32
    %2758 = arith.addf %2757, %2741 : f32
    %2759 = arith.addf %2758, %2743 : f32
    %cst_801 = arith.constant 1.000000e+00 : f32
    %2760 = arith.divf %cst_801, %2759 : f32
    %2761 = arith.mulf %2711, %2760 : f32
    %2762 = arith.mulf %2713, %2760 : f32
    %2763 = arith.mulf %2715, %2760 : f32
    %2764 = arith.mulf %2717, %2760 : f32
    %2765 = arith.mulf %2719, %2760 : f32
    %2766 = arith.mulf %2721, %2760 : f32
    %2767 = arith.mulf %2723, %2760 : f32
    %2768 = arith.mulf %2725, %2760 : f32
    %2769 = arith.mulf %2727, %2760 : f32
    %2770 = arith.mulf %2729, %2760 : f32
    %2771 = arith.mulf %2731, %2760 : f32
    %2772 = arith.mulf %2733, %2760 : f32
    %2773 = arith.mulf %2735, %2760 : f32
    %2774 = arith.mulf %2737, %2760 : f32
    %2775 = arith.mulf %2739, %2760 : f32
    %2776 = arith.mulf %2741, %2760 : f32
    %2777 = arith.mulf %2743, %2760 : f32
    %2778 = arith.addf %2761, %2762 : f32
    %2779 = arith.addf %2778, %2763 : f32
    %2780 = arith.addf %2779, %2764 : f32
    %2781 = arith.addf %2780, %2765 : f32
    %2782 = arith.addf %2781, %2766 : f32
    %2783 = arith.addf %2782, %2767 : f32
    %2784 = arith.addf %2783, %2768 : f32
    %2785 = arith.addf %2784, %2769 : f32
    %2786 = arith.addf %2785, %2770 : f32
    %2787 = arith.addf %2786, %2771 : f32
    %2788 = arith.addf %2787, %2772 : f32
    %2789 = arith.addf %2788, %2773 : f32
    %2790 = arith.addf %2789, %2774 : f32
    %2791 = arith.addf %2790, %2775 : f32
    %2792 = arith.addf %2791, %2776 : f32
    %2793 = arith.addf %2792, %2777 : f32
    %cst_802 = arith.constant 0.000000e+00 : f32
    %2794 = vector.broadcast %cst_802 : f32 to vector<8x128xf32>
    %cst_803 = arith.constant 0.000000e+00 : f32
    %2795 = vector.broadcast %cst_803 : f32 to vector<8x128xf32>
    %c0_i32_804 = arith.constant 0 : i32
    %2796 = vector.broadcast %c0_i32_804 : i32 to vector<8x128xi32>
    %2797 = arith.cmpi eq, %7, %2796 : vector<8x128xi32>
    %2798 = vector.broadcast %2761 : f32 to vector<8x128xf32>
    %2799 = arith.select %2797, %2798, %2794 : vector<8x128xi1>, vector<8x128xf32>
    %2800 = vector.broadcast %2762 : f32 to vector<8x128xf32>
    %2801 = arith.select %2797, %2800, %2795 : vector<8x128xi1>, vector<8x128xf32>
    %c1_i32_805 = arith.constant 1 : i32
    %2802 = vector.broadcast %c1_i32_805 : i32 to vector<8x128xi32>
    %2803 = arith.cmpi eq, %7, %2802 : vector<8x128xi32>
    %2804 = vector.broadcast %2778 : f32 to vector<8x128xf32>
    %2805 = arith.select %2803, %2804, %2799 : vector<8x128xi1>, vector<8x128xf32>
    %2806 = vector.broadcast %2763 : f32 to vector<8x128xf32>
    %2807 = arith.select %2803, %2806, %2801 : vector<8x128xi1>, vector<8x128xf32>
    %c2_i32_806 = arith.constant 2 : i32
    %2808 = vector.broadcast %c2_i32_806 : i32 to vector<8x128xi32>
    %2809 = arith.cmpi eq, %7, %2808 : vector<8x128xi32>
    %2810 = vector.broadcast %2779 : f32 to vector<8x128xf32>
    %2811 = arith.select %2809, %2810, %2805 : vector<8x128xi1>, vector<8x128xf32>
    %2812 = vector.broadcast %2764 : f32 to vector<8x128xf32>
    %2813 = arith.select %2809, %2812, %2807 : vector<8x128xi1>, vector<8x128xf32>
    %c3_i32_807 = arith.constant 3 : i32
    %2814 = vector.broadcast %c3_i32_807 : i32 to vector<8x128xi32>
    %2815 = arith.cmpi eq, %7, %2814 : vector<8x128xi32>
    %2816 = vector.broadcast %2780 : f32 to vector<8x128xf32>
    %2817 = arith.select %2815, %2816, %2811 : vector<8x128xi1>, vector<8x128xf32>
    %2818 = vector.broadcast %2765 : f32 to vector<8x128xf32>
    %2819 = arith.select %2815, %2818, %2813 : vector<8x128xi1>, vector<8x128xf32>
    %c4_i32_808 = arith.constant 4 : i32
    %2820 = vector.broadcast %c4_i32_808 : i32 to vector<8x128xi32>
    %2821 = arith.cmpi eq, %7, %2820 : vector<8x128xi32>
    %2822 = vector.broadcast %2781 : f32 to vector<8x128xf32>
    %2823 = arith.select %2821, %2822, %2817 : vector<8x128xi1>, vector<8x128xf32>
    %2824 = vector.broadcast %2766 : f32 to vector<8x128xf32>
    %2825 = arith.select %2821, %2824, %2819 : vector<8x128xi1>, vector<8x128xf32>
    %c5_i32_809 = arith.constant 5 : i32
    %2826 = vector.broadcast %c5_i32_809 : i32 to vector<8x128xi32>
    %2827 = arith.cmpi eq, %7, %2826 : vector<8x128xi32>
    %2828 = vector.broadcast %2782 : f32 to vector<8x128xf32>
    %2829 = arith.select %2827, %2828, %2823 : vector<8x128xi1>, vector<8x128xf32>
    %2830 = vector.broadcast %2767 : f32 to vector<8x128xf32>
    %2831 = arith.select %2827, %2830, %2825 : vector<8x128xi1>, vector<8x128xf32>
    %c6_i32_810 = arith.constant 6 : i32
    %2832 = vector.broadcast %c6_i32_810 : i32 to vector<8x128xi32>
    %2833 = arith.cmpi eq, %7, %2832 : vector<8x128xi32>
    %2834 = vector.broadcast %2783 : f32 to vector<8x128xf32>
    %2835 = arith.select %2833, %2834, %2829 : vector<8x128xi1>, vector<8x128xf32>
    %2836 = vector.broadcast %2768 : f32 to vector<8x128xf32>
    %2837 = arith.select %2833, %2836, %2831 : vector<8x128xi1>, vector<8x128xf32>
    %c7_i32_811 = arith.constant 7 : i32
    %2838 = vector.broadcast %c7_i32_811 : i32 to vector<8x128xi32>
    %2839 = arith.cmpi eq, %7, %2838 : vector<8x128xi32>
    %2840 = vector.broadcast %2784 : f32 to vector<8x128xf32>
    %2841 = arith.select %2839, %2840, %2835 : vector<8x128xi1>, vector<8x128xf32>
    %2842 = vector.broadcast %2769 : f32 to vector<8x128xf32>
    %2843 = arith.select %2839, %2842, %2837 : vector<8x128xi1>, vector<8x128xf32>
    %c8_i32_812 = arith.constant 8 : i32
    %2844 = vector.broadcast %c8_i32_812 : i32 to vector<8x128xi32>
    %2845 = arith.cmpi eq, %7, %2844 : vector<8x128xi32>
    %2846 = vector.broadcast %2785 : f32 to vector<8x128xf32>
    %2847 = arith.select %2845, %2846, %2841 : vector<8x128xi1>, vector<8x128xf32>
    %2848 = vector.broadcast %2770 : f32 to vector<8x128xf32>
    %2849 = arith.select %2845, %2848, %2843 : vector<8x128xi1>, vector<8x128xf32>
    %c9_i32_813 = arith.constant 9 : i32
    %2850 = vector.broadcast %c9_i32_813 : i32 to vector<8x128xi32>
    %2851 = arith.cmpi eq, %7, %2850 : vector<8x128xi32>
    %2852 = vector.broadcast %2786 : f32 to vector<8x128xf32>
    %2853 = arith.select %2851, %2852, %2847 : vector<8x128xi1>, vector<8x128xf32>
    %2854 = vector.broadcast %2771 : f32 to vector<8x128xf32>
    %2855 = arith.select %2851, %2854, %2849 : vector<8x128xi1>, vector<8x128xf32>
    %c10_i32_814 = arith.constant 10 : i32
    %2856 = vector.broadcast %c10_i32_814 : i32 to vector<8x128xi32>
    %2857 = arith.cmpi eq, %7, %2856 : vector<8x128xi32>
    %2858 = vector.broadcast %2787 : f32 to vector<8x128xf32>
    %2859 = arith.select %2857, %2858, %2853 : vector<8x128xi1>, vector<8x128xf32>
    %2860 = vector.broadcast %2772 : f32 to vector<8x128xf32>
    %2861 = arith.select %2857, %2860, %2855 : vector<8x128xi1>, vector<8x128xf32>
    %c11_i32_815 = arith.constant 11 : i32
    %2862 = vector.broadcast %c11_i32_815 : i32 to vector<8x128xi32>
    %2863 = arith.cmpi eq, %7, %2862 : vector<8x128xi32>
    %2864 = vector.broadcast %2788 : f32 to vector<8x128xf32>
    %2865 = arith.select %2863, %2864, %2859 : vector<8x128xi1>, vector<8x128xf32>
    %2866 = vector.broadcast %2773 : f32 to vector<8x128xf32>
    %2867 = arith.select %2863, %2866, %2861 : vector<8x128xi1>, vector<8x128xf32>
    %c12_i32_816 = arith.constant 12 : i32
    %2868 = vector.broadcast %c12_i32_816 : i32 to vector<8x128xi32>
    %2869 = arith.cmpi eq, %7, %2868 : vector<8x128xi32>
    %2870 = vector.broadcast %2789 : f32 to vector<8x128xf32>
    %2871 = arith.select %2869, %2870, %2865 : vector<8x128xi1>, vector<8x128xf32>
    %2872 = vector.broadcast %2774 : f32 to vector<8x128xf32>
    %2873 = arith.select %2869, %2872, %2867 : vector<8x128xi1>, vector<8x128xf32>
    %c13_i32_817 = arith.constant 13 : i32
    %2874 = vector.broadcast %c13_i32_817 : i32 to vector<8x128xi32>
    %2875 = arith.cmpi eq, %7, %2874 : vector<8x128xi32>
    %2876 = vector.broadcast %2790 : f32 to vector<8x128xf32>
    %2877 = arith.select %2875, %2876, %2871 : vector<8x128xi1>, vector<8x128xf32>
    %2878 = vector.broadcast %2775 : f32 to vector<8x128xf32>
    %2879 = arith.select %2875, %2878, %2873 : vector<8x128xi1>, vector<8x128xf32>
    %c14_i32_818 = arith.constant 14 : i32
    %2880 = vector.broadcast %c14_i32_818 : i32 to vector<8x128xi32>
    %2881 = arith.cmpi eq, %7, %2880 : vector<8x128xi32>
    %2882 = vector.broadcast %2791 : f32 to vector<8x128xf32>
    %2883 = arith.select %2881, %2882, %2877 : vector<8x128xi1>, vector<8x128xf32>
    %2884 = vector.broadcast %2776 : f32 to vector<8x128xf32>
    %2885 = arith.select %2881, %2884, %2879 : vector<8x128xi1>, vector<8x128xf32>
    %c15_i32_819 = arith.constant 15 : i32
    %2886 = vector.broadcast %c15_i32_819 : i32 to vector<8x128xi32>
    %2887 = arith.cmpi eq, %7, %2886 : vector<8x128xi32>
    %2888 = vector.broadcast %2792 : f32 to vector<8x128xf32>
    %2889 = arith.select %2887, %2888, %2883 : vector<8x128xi1>, vector<8x128xf32>
    %2890 = vector.broadcast %2777 : f32 to vector<8x128xf32>
    %2891 = arith.select %2887, %2890, %2885 : vector<8x128xi1>, vector<8x128xf32>
    %c16_i32_820 = arith.constant 16 : i32
    %2892 = vector.broadcast %c16_i32_820 : i32 to vector<8x128xi32>
    %2893 = arith.cmpi eq, %7, %2892 : vector<8x128xi32>
    %2894 = vector.broadcast %2793 : f32 to vector<8x128xf32>
    %2895 = arith.select %2893, %2894, %2889 : vector<8x128xi1>, vector<8x128xf32>
    %2896 = vector.broadcast %2777 : f32 to vector<8x128xf32>
    %2897 = arith.select %2893, %2896, %2891 : vector<8x128xi1>, vector<8x128xf32>
    %2898 = arith.mulf %5, %2897 : vector<8x128xf32>
    %2899 = arith.addf %2895, %2898 : vector<8x128xf32>
    %c14_821 = arith.constant 14 : index
    %c0_822 = arith.constant 0 : index
    %c0_823 = arith.constant 0 : index
    %2900 = vector.load %arg3[%c14_821, %c0_822, %c0_823] : memref<16x8x128xf32, #tpu.memory_space<vmem>>, vector<1x8x128xf32>
    %2901 = vector.shape_cast %2900 : vector<1x8x128xf32> to vector<8x128xf32>
    %2902 = vector.shape_cast %2899 : vector<8x128xf32> to vector<1x8x128xf32>
    tpu.vector_store %arg3[%c14_821, %c0_822, %c0_823], %2902 {strides = array<i32>} : memref<16x8x128xf32, #tpu.memory_space<vmem>>, vector<1x8x128xf32>,
    %c15_824 = arith.constant 15 : index
    %c0_825 = arith.constant 0 : index
    %2903 = memref.load %arg1[%c15_824, %c0_825] : memref<16x17xf32, #tpu.memory_space<smem>>
    %2904 = math.absf %2903 : f32
    %c15_826 = arith.constant 15 : index
    %c1_827 = arith.constant 1 : index
    %2905 = memref.load %arg1[%c15_826, %c1_827] : memref<16x17xf32, #tpu.memory_space<smem>>
    %2906 = math.absf %2905 : f32
    %c15_828 = arith.constant 15 : index
    %c2_829 = arith.constant 2 : index
    %2907 = memref.load %arg1[%c15_828, %c2_829] : memref<16x17xf32, #tpu.memory_space<smem>>
    %2908 = math.absf %2907 : f32
    %c15_830 = arith.constant 15 : index
    %c3_831 = arith.constant 3 : index
    %2909 = memref.load %arg1[%c15_830, %c3_831] : memref<16x17xf32, #tpu.memory_space<smem>>
    %2910 = math.absf %2909 : f32
    %c15_832 = arith.constant 15 : index
    %c4_833 = arith.constant 4 : index
    %2911 = memref.load %arg1[%c15_832, %c4_833] : memref<16x17xf32, #tpu.memory_space<smem>>
    %2912 = math.absf %2911 : f32
    %c15_834 = arith.constant 15 : index
    %c5_835 = arith.constant 5 : index
    %2913 = memref.load %arg1[%c15_834, %c5_835] : memref<16x17xf32, #tpu.memory_space<smem>>
    %2914 = math.absf %2913 : f32
    %c15_836 = arith.constant 15 : index
    %c6_837 = arith.constant 6 : index
    %2915 = memref.load %arg1[%c15_836, %c6_837] : memref<16x17xf32, #tpu.memory_space<smem>>
    %2916 = math.absf %2915 : f32
    %c15_838 = arith.constant 15 : index
    %c7_839 = arith.constant 7 : index
    %2917 = memref.load %arg1[%c15_838, %c7_839] : memref<16x17xf32, #tpu.memory_space<smem>>
    %2918 = math.absf %2917 : f32
    %c15_840 = arith.constant 15 : index
    %c8_841 = arith.constant 8 : index
    %2919 = memref.load %arg1[%c15_840, %c8_841] : memref<16x17xf32, #tpu.memory_space<smem>>
    %2920 = math.absf %2919 : f32
    %c15_842 = arith.constant 15 : index
    %c9_843 = arith.constant 9 : index
    %2921 = memref.load %arg1[%c15_842, %c9_843] : memref<16x17xf32, #tpu.memory_space<smem>>
    %2922 = math.absf %2921 : f32
    %c15_844 = arith.constant 15 : index
    %c10_845 = arith.constant 10 : index
    %2923 = memref.load %arg1[%c15_844, %c10_845] : memref<16x17xf32, #tpu.memory_space<smem>>
    %2924 = math.absf %2923 : f32
    %c15_846 = arith.constant 15 : index
    %c11_847 = arith.constant 11 : index
    %2925 = memref.load %arg1[%c15_846, %c11_847] : memref<16x17xf32, #tpu.memory_space<smem>>
    %2926 = math.absf %2925 : f32
    %c15_848 = arith.constant 15 : index
    %c12_849 = arith.constant 12 : index
    %2927 = memref.load %arg1[%c15_848, %c12_849] : memref<16x17xf32, #tpu.memory_space<smem>>
    %2928 = math.absf %2927 : f32
    %c15_850 = arith.constant 15 : index
    %c13_851 = arith.constant 13 : index
    %2929 = memref.load %arg1[%c15_850, %c13_851] : memref<16x17xf32, #tpu.memory_space<smem>>
    %2930 = math.absf %2929 : f32
    %c15_852 = arith.constant 15 : index
    %c14_853 = arith.constant 14 : index
    %2931 = memref.load %arg1[%c15_852, %c14_853] : memref<16x17xf32, #tpu.memory_space<smem>>
    %2932 = math.absf %2931 : f32
    %c15_854 = arith.constant 15 : index
    %c15_855 = arith.constant 15 : index
    %2933 = memref.load %arg1[%c15_854, %c15_855] : memref<16x17xf32, #tpu.memory_space<smem>>
    %2934 = math.absf %2933 : f32
    %c15_856 = arith.constant 15 : index
    %c16_857 = arith.constant 16 : index
    %2935 = memref.load %arg1[%c15_856, %c16_857] : memref<16x17xf32, #tpu.memory_space<smem>>
    %2936 = math.absf %2935 : f32
    %2937 = arith.addf %2904, %2906 : f32
    %2938 = arith.addf %2937, %2908 : f32
    %2939 = arith.addf %2938, %2910 : f32
    %2940 = arith.addf %2939, %2912 : f32
    %2941 = arith.addf %2940, %2914 : f32
    %2942 = arith.addf %2941, %2916 : f32
    %2943 = arith.addf %2942, %2918 : f32
    %2944 = arith.addf %2943, %2920 : f32
    %2945 = arith.addf %2944, %2922 : f32
    %2946 = arith.addf %2945, %2924 : f32
    %2947 = arith.addf %2946, %2926 : f32
    %2948 = arith.addf %2947, %2928 : f32
    %2949 = arith.addf %2948, %2930 : f32
    %2950 = arith.addf %2949, %2932 : f32
    %2951 = arith.addf %2950, %2934 : f32
    %2952 = arith.addf %2951, %2936 : f32
    %cst_858 = arith.constant 1.000000e+00 : f32
    %2953 = arith.divf %cst_858, %2952 : f32
    %2954 = arith.mulf %2904, %2953 : f32
    %2955 = arith.mulf %2906, %2953 : f32
    %2956 = arith.mulf %2908, %2953 : f32
    %2957 = arith.mulf %2910, %2953 : f32
    %2958 = arith.mulf %2912, %2953 : f32
    %2959 = arith.mulf %2914, %2953 : f32
    %2960 = arith.mulf %2916, %2953 : f32
    %2961 = arith.mulf %2918, %2953 : f32
    %2962 = arith.mulf %2920, %2953 : f32
    %2963 = arith.mulf %2922, %2953 : f32
    %2964 = arith.mulf %2924, %2953 : f32
    %2965 = arith.mulf %2926, %2953 : f32
    %2966 = arith.mulf %2928, %2953 : f32
    %2967 = arith.mulf %2930, %2953 : f32
    %2968 = arith.mulf %2932, %2953 : f32
    %2969 = arith.mulf %2934, %2953 : f32
    %2970 = arith.mulf %2936, %2953 : f32
    %2971 = arith.addf %2954, %2955 : f32
    %2972 = arith.addf %2971, %2956 : f32
    %2973 = arith.addf %2972, %2957 : f32
    %2974 = arith.addf %2973, %2958 : f32
    %2975 = arith.addf %2974, %2959 : f32
    %2976 = arith.addf %2975, %2960 : f32
    %2977 = arith.addf %2976, %2961 : f32
    %2978 = arith.addf %2977, %2962 : f32
    %2979 = arith.addf %2978, %2963 : f32
    %2980 = arith.addf %2979, %2964 : f32
    %2981 = arith.addf %2980, %2965 : f32
    %2982 = arith.addf %2981, %2966 : f32
    %2983 = arith.addf %2982, %2967 : f32
    %2984 = arith.addf %2983, %2968 : f32
    %2985 = arith.addf %2984, %2969 : f32
    %2986 = arith.addf %2985, %2970 : f32
    %cst_859 = arith.constant 0.000000e+00 : f32
    %2987 = vector.broadcast %cst_859 : f32 to vector<8x128xf32>
    %cst_860 = arith.constant 0.000000e+00 : f32
    %2988 = vector.broadcast %cst_860 : f32 to vector<8x128xf32>
    %c0_i32_861 = arith.constant 0 : i32
    %2989 = vector.broadcast %c0_i32_861 : i32 to vector<8x128xi32>
    %2990 = arith.cmpi eq, %7, %2989 : vector<8x128xi32>
    %2991 = vector.broadcast %2954 : f32 to vector<8x128xf32>
    %2992 = arith.select %2990, %2991, %2987 : vector<8x128xi1>, vector<8x128xf32>
    %2993 = vector.broadcast %2955 : f32 to vector<8x128xf32>
    %2994 = arith.select %2990, %2993, %2988 : vector<8x128xi1>, vector<8x128xf32>
    %c1_i32_862 = arith.constant 1 : i32
    %2995 = vector.broadcast %c1_i32_862 : i32 to vector<8x128xi32>
    %2996 = arith.cmpi eq, %7, %2995 : vector<8x128xi32>
    %2997 = vector.broadcast %2971 : f32 to vector<8x128xf32>
    %2998 = arith.select %2996, %2997, %2992 : vector<8x128xi1>, vector<8x128xf32>
    %2999 = vector.broadcast %2956 : f32 to vector<8x128xf32>
    %3000 = arith.select %2996, %2999, %2994 : vector<8x128xi1>, vector<8x128xf32>
    %c2_i32_863 = arith.constant 2 : i32
    %3001 = vector.broadcast %c2_i32_863 : i32 to vector<8x128xi32>
    %3002 = arith.cmpi eq, %7, %3001 : vector<8x128xi32>
    %3003 = vector.broadcast %2972 : f32 to vector<8x128xf32>
    %3004 = arith.select %3002, %3003, %2998 : vector<8x128xi1>, vector<8x128xf32>
    %3005 = vector.broadcast %2957 : f32 to vector<8x128xf32>
    %3006 = arith.select %3002, %3005, %3000 : vector<8x128xi1>, vector<8x128xf32>
    %c3_i32_864 = arith.constant 3 : i32
    %3007 = vector.broadcast %c3_i32_864 : i32 to vector<8x128xi32>
    %3008 = arith.cmpi eq, %7, %3007 : vector<8x128xi32>
    %3009 = vector.broadcast %2973 : f32 to vector<8x128xf32>
    %3010 = arith.select %3008, %3009, %3004 : vector<8x128xi1>, vector<8x128xf32>
    %3011 = vector.broadcast %2958 : f32 to vector<8x128xf32>
    %3012 = arith.select %3008, %3011, %3006 : vector<8x128xi1>, vector<8x128xf32>
    %c4_i32_865 = arith.constant 4 : i32
    %3013 = vector.broadcast %c4_i32_865 : i32 to vector<8x128xi32>
    %3014 = arith.cmpi eq, %7, %3013 : vector<8x128xi32>
    %3015 = vector.broadcast %2974 : f32 to vector<8x128xf32>
    %3016 = arith.select %3014, %3015, %3010 : vector<8x128xi1>, vector<8x128xf32>
    %3017 = vector.broadcast %2959 : f32 to vector<8x128xf32>
    %3018 = arith.select %3014, %3017, %3012 : vector<8x128xi1>, vector<8x128xf32>
    %c5_i32_866 = arith.constant 5 : i32
    %3019 = vector.broadcast %c5_i32_866 : i32 to vector<8x128xi32>
    %3020 = arith.cmpi eq, %7, %3019 : vector<8x128xi32>
    %3021 = vector.broadcast %2975 : f32 to vector<8x128xf32>
    %3022 = arith.select %3020, %3021, %3016 : vector<8x128xi1>, vector<8x128xf32>
    %3023 = vector.broadcast %2960 : f32 to vector<8x128xf32>
    %3024 = arith.select %3020, %3023, %3018 : vector<8x128xi1>, vector<8x128xf32>
    %c6_i32_867 = arith.constant 6 : i32
    %3025 = vector.broadcast %c6_i32_867 : i32 to vector<8x128xi32>
    %3026 = arith.cmpi eq, %7, %3025 : vector<8x128xi32>
    %3027 = vector.broadcast %2976 : f32 to vector<8x128xf32>
    %3028 = arith.select %3026, %3027, %3022 : vector<8x128xi1>, vector<8x128xf32>
    %3029 = vector.broadcast %2961 : f32 to vector<8x128xf32>
    %3030 = arith.select %3026, %3029, %3024 : vector<8x128xi1>, vector<8x128xf32>
    %c7_i32_868 = arith.constant 7 : i32
    %3031 = vector.broadcast %c7_i32_868 : i32 to vector<8x128xi32>
    %3032 = arith.cmpi eq, %7, %3031 : vector<8x128xi32>
    %3033 = vector.broadcast %2977 : f32 to vector<8x128xf32>
    %3034 = arith.select %3032, %3033, %3028 : vector<8x128xi1>, vector<8x128xf32>
    %3035 = vector.broadcast %2962 : f32 to vector<8x128xf32>
    %3036 = arith.select %3032, %3035, %3030 : vector<8x128xi1>, vector<8x128xf32>
    %c8_i32_869 = arith.constant 8 : i32
    %3037 = vector.broadcast %c8_i32_869 : i32 to vector<8x128xi32>
    %3038 = arith.cmpi eq, %7, %3037 : vector<8x128xi32>
    %3039 = vector.broadcast %2978 : f32 to vector<8x128xf32>
    %3040 = arith.select %3038, %3039, %3034 : vector<8x128xi1>, vector<8x128xf32>
    %3041 = vector.broadcast %2963 : f32 to vector<8x128xf32>
    %3042 = arith.select %3038, %3041, %3036 : vector<8x128xi1>, vector<8x128xf32>
    %c9_i32_870 = arith.constant 9 : i32
    %3043 = vector.broadcast %c9_i32_870 : i32 to vector<8x128xi32>
    %3044 = arith.cmpi eq, %7, %3043 : vector<8x128xi32>
    %3045 = vector.broadcast %2979 : f32 to vector<8x128xf32>
    %3046 = arith.select %3044, %3045, %3040 : vector<8x128xi1>, vector<8x128xf32>
    %3047 = vector.broadcast %2964 : f32 to vector<8x128xf32>
    %3048 = arith.select %3044, %3047, %3042 : vector<8x128xi1>, vector<8x128xf32>
    %c10_i32_871 = arith.constant 10 : i32
    %3049 = vector.broadcast %c10_i32_871 : i32 to vector<8x128xi32>
    %3050 = arith.cmpi eq, %7, %3049 : vector<8x128xi32>
    %3051 = vector.broadcast %2980 : f32 to vector<8x128xf32>
    %3052 = arith.select %3050, %3051, %3046 : vector<8x128xi1>, vector<8x128xf32>
    %3053 = vector.broadcast %2965 : f32 to vector<8x128xf32>
    %3054 = arith.select %3050, %3053, %3048 : vector<8x128xi1>, vector<8x128xf32>
    %c11_i32_872 = arith.constant 11 : i32
    %3055 = vector.broadcast %c11_i32_872 : i32 to vector<8x128xi32>
    %3056 = arith.cmpi eq, %7, %3055 : vector<8x128xi32>
    %3057 = vector.broadcast %2981 : f32 to vector<8x128xf32>
    %3058 = arith.select %3056, %3057, %3052 : vector<8x128xi1>, vector<8x128xf32>
    %3059 = vector.broadcast %2966 : f32 to vector<8x128xf32>
    %3060 = arith.select %3056, %3059, %3054 : vector<8x128xi1>, vector<8x128xf32>
    %c12_i32_873 = arith.constant 12 : i32
    %3061 = vector.broadcast %c12_i32_873 : i32 to vector<8x128xi32>
    %3062 = arith.cmpi eq, %7, %3061 : vector<8x128xi32>
    %3063 = vector.broadcast %2982 : f32 to vector<8x128xf32>
    %3064 = arith.select %3062, %3063, %3058 : vector<8x128xi1>, vector<8x128xf32>
    %3065 = vector.broadcast %2967 : f32 to vector<8x128xf32>
    %3066 = arith.select %3062, %3065, %3060 : vector<8x128xi1>, vector<8x128xf32>
    %c13_i32_874 = arith.constant 13 : i32
    %3067 = vector.broadcast %c13_i32_874 : i32 to vector<8x128xi32>
    %3068 = arith.cmpi eq, %7, %3067 : vector<8x128xi32>
    %3069 = vector.broadcast %2983 : f32 to vector<8x128xf32>
    %3070 = arith.select %3068, %3069, %3064 : vector<8x128xi1>, vector<8x128xf32>
    %3071 = vector.broadcast %2968 : f32 to vector<8x128xf32>
    %3072 = arith.select %3068, %3071, %3066 : vector<8x128xi1>, vector<8x128xf32>
    %c14_i32_875 = arith.constant 14 : i32
    %3073 = vector.broadcast %c14_i32_875 : i32 to vector<8x128xi32>
    %3074 = arith.cmpi eq, %7, %3073 : vector<8x128xi32>
    %3075 = vector.broadcast %2984 : f32 to vector<8x128xf32>
    %3076 = arith.select %3074, %3075, %3070 : vector<8x128xi1>, vector<8x128xf32>
    %3077 = vector.broadcast %2969 : f32 to vector<8x128xf32>
    %3078 = arith.select %3074, %3077, %3072 : vector<8x128xi1>, vector<8x128xf32>
    %c15_i32_876 = arith.constant 15 : i32
    %3079 = vector.broadcast %c15_i32_876 : i32 to vector<8x128xi32>
    %3080 = arith.cmpi eq, %7, %3079 : vector<8x128xi32>
    %3081 = vector.broadcast %2985 : f32 to vector<8x128xf32>
    %3082 = arith.select %3080, %3081, %3076 : vector<8x128xi1>, vector<8x128xf32>
    %3083 = vector.broadcast %2970 : f32 to vector<8x128xf32>
    %3084 = arith.select %3080, %3083, %3078 : vector<8x128xi1>, vector<8x128xf32>
    %c16_i32_877 = arith.constant 16 : i32
    %3085 = vector.broadcast %c16_i32_877 : i32 to vector<8x128xi32>
    %3086 = arith.cmpi eq, %7, %3085 : vector<8x128xi32>
    %3087 = vector.broadcast %2986 : f32 to vector<8x128xf32>
    %3088 = arith.select %3086, %3087, %3082 : vector<8x128xi1>, vector<8x128xf32>
    %3089 = vector.broadcast %2970 : f32 to vector<8x128xf32>
    %3090 = arith.select %3086, %3089, %3084 : vector<8x128xi1>, vector<8x128xf32>
    %3091 = arith.mulf %5, %3090 : vector<8x128xf32>
    %3092 = arith.addf %3088, %3091 : vector<8x128xf32>
    %c15_878 = arith.constant 15 : index
    %c0_879 = arith.constant 0 : index
    %c0_880 = arith.constant 0 : index
    %3093 = vector.load %arg3[%c15_878, %c0_879, %c0_880] : memref<16x8x128xf32, #tpu.memory_space<vmem>>, vector<1x8x128xf32>
    %3094 = vector.shape_cast %3093 : vector<1x8x128xf32> to vector<8x128xf32>
    %3095 = vector.shape_cast %3092 : vector<8x128xf32> to vector<1x8x128xf32>
    tpu.vector_store %arg3[%c15_878, %c0_879, %c0_880], %3095 {strides = array<i32>} : memref<16x8x128xf32, #tpu.memory_space<vmem>>, vector<1x8x128xf32>,
    return
  }
  func.func @transform_0(%arg0: i32) -> (i32, i32) {
    %c0_i32 = arith.constant 0 : i32
    %c0_i32_0 = arith.constant 0 : i32
    %c0_i32_1 = arith.constant 0 : i32
    return %c0_i32, %c0_i32_0 : i32, i32
  }
  func.func @transform_1(%arg0: i32) -> (i32, i32) {
    %c0_i32 = arith.constant 0 : i32
    %c0_i32_0 = arith.constant 0 : i32
    return %arg0, %c0_i32 : i32, i32
  }
  func.func @transform_2(%arg0: i32) -> (i32, i32, i32) {
    %c0_i32 = arith.constant 0 : i32
    %c0_i32_0 = arith.constant 0 : i32
    %c0_i32_1 = arith.constant 0 : i32
    return %c0_i32, %arg0, %c0_i32_0 : i32, i32, i32
  }
}

</mosaic_0001>

<bundles_post_ra>
// kernel: tpu_custom_call.1
= control target key start
LH: loop header
LB: loop body
LE: loop exit
PB: predicated region body
PF: predicated region fallthrough
CT: control target
= control target key end

     0   :  { %s7504_s0 = inlined_call_operand.hbm [shape: f32[16,17], index: 0, kind: input, shape index: {}]   ;;  %s7505_s1 = inlined_call_operand.hbm [shape: f32[8,128], index: 1, kind: input, shape index: {}]   ;;  %s7506_s2 = inlined_call_operand.hbm [shape: f32[16,8,128], index: 2, kind: output, shape index: {}]  }
   0x1   :  { %7948 = sst [smem:[#allocation281_spill]] %s7506_s2 }
   0x2   :  { %7 = vsyncpa [#allocation5], 0 }
   0x3   :  { %8 = vsyncpa [#allocation3], 0 }
   0x4   :  { %9 = vsyncpa [#allocation4], 0  ;;  %s2932_s11 = scalar_lea.hbm %s7504_s0, 256 }
   0x5   :  { %p2933_p0 = scmp.ne.s32.totalorder %s7504_s0, %s2932_s11  ;;  %p2936_p1 = scmp.lt.u32.totalorder %s2932_s11, %s7504_s0 }
   0x7   :  { %p2938_p2 = pnand %p2936_p1, %p2933_p0 }
   0x9   :  { %2941 = shalt.err (!%p2938_p2)
}
   0xa   :  { %s2992_s16 = smov [#allocation2]   ;;  %s7507_s17 = smov 128  }
   0xb   :  { %s7508_s18 = smov 8   ;;  %s2995_s21 = smov [#allocation6]  }
   0xc   :  { %19 = dma.hbm_to_smem %s7504_s0, 256, %s2992_s16, [#allocation5], %s7507_s17, %s7507_s17, %s7508_s18  }
   0xd   :  { %s26_s22 = sshll.u32 %s2995_s21, 4  ;;  %s2942_s25 = scalar_lea.hbm %s7505_s1, 128  ;;  %s27_s22 = int_to_ptr.vmem [resolvable:$true] %s26_s22 }
   0xe   :  { %p2943_p3 = scmp.ne.s32.totalorder %s7505_s1, %s2942_s25  ;;  %p2946_p4 = scmp.lt.u32.totalorder %s2942_s25, %s7505_s1 }
  0x10   :  { %p2948_p5 = pnand %p2946_p4, %p2943_p3 }
  0x12   :  { %2951 = shalt.err (!%p2948_p5)
}
  0x13   :  { %s2952_s30 = scalar_lea.vmem %s27_s22, 128  ;;  %p2957_p7 = scmp.lt.s32.totalorder %s27_s22, %s27_s22 }
  0x14   :  { %p2953_p6 = scmp.ne.s32.totalorder %s27_s22, %s2952_s30  ;;  %p2958_p8 = scmp.lt.s32.totalorder %s2952_s30, %s2952_s30 }
  0x16   :  { %p2959_p9 = por %p2958_p8, %p2957_p7 }
  0x18   :  { %p2960_p10 = pnand %p2959_p9, %p2953_p6 }
  0x1a   :  { %2963 = shalt.err (!%p2960_p10)
}
  0x1b   :  { %29 = dma.hbm_to_vmem [thread:$0]  %s7505_s1, 128, %s27_s22, [#allocation3]  }
  0x1c   :  { %2986 = dma.done.wait [#allocation5], 256  }
  0x1d   :  { %2987 = vsyncadd [#allocation5], 4294967040 }
  0x1e   :  { %2988 = dma.done.wait [#allocation3], 128  }
  0x1f   :  { %2989 = vsyncadd [#allocation3], 4294967168 }
  0x20   :  { %36 = sfence }
  0x21   :  { %s3039_s4 = sld [smem:[#allocation2]]  ;;  %s3041_s5 = sld [smem:[#allocation2 + $0x1]]  ;;  %v37_v27 = vld [vmem:[#allocation6] sm:$0xff] }
  0x22   :  { %s3043_s6 = sld [smem:[#allocation2 + $0x2]]  ;;  %s3045_s7 = sld [smem:[#allocation2 + $0x3]]  ;;  %v4311_v28 = vmul.f32 16.0, %v37_v27 }
  0x23   :  { %s3047_s8 = sld [smem:[#allocation2 + $0x4]]  ;;  %s3049_s1 = sld [smem:[#allocation2 + $0x5]] }
  0x24   :  { %s3051_s9 = sld [smem:[#allocation2 + $0x6]]  ;;  %s3053_s10 = sld [smem:[#allocation2 + $0x7]]  ;;  %v2861_v29 = vtrunc.f32 %v4311_v28 }
  0x25   :  { %s3055_s11 = sld [smem:[#allocation2 + $0x8]]  ;;  %s3057_s12 = sld [smem:[#allocation2 + $0x9]] }
  0x26   :  { %s3059_s13 = sld [smem:[#allocation2 + $0xa]]  ;;  %s3062_s15 = sld [smem:[#allocation2 + $0xb]]  ;;  %v4338_v31 = vcvt.f32.s32 %v2861_v29 }
  0x27   :  { %7949 = sst [smem:[#allocation11_spill]] %s3039_s4  ;;  %s7510_s14 = sand.u32 2147483647, %s3039_s4 }
  0x28   :  { %7950 = sst [smem:[#allocation12_spill]] %s3041_s5  ;;  %s7509_s16 = sand.u32 2147483647, %s3041_s5  ;;  %vm42_vm0 = vcmp.lt.s32.totalorder %v4338_v31, 16 }
  0x29   :  { %7951 = sst [smem:[#allocation13_spill]] %s3043_s6  ;;  %s7512_s19 = sand.u32 2147483647, %s3043_s6  ;;  %v4367_v32 = vsel %vm42_vm0, %v4338_v31, 16 }
  0x2a   :  { %7952 = sst [smem:[#allocation14_spill]] %s3045_s7  ;;  %s7524_s20 = sand.u32 2147483647, %s3045_s7  ;;  %vm130_vm1 = vcmp.eq.s32.totalorder %v4367_v32, 0  ;;  %vm135_vm2 = vcmp.eq.s32.totalorder %v4367_v32, 1  ;;  %vm140_vm3 = vcmp.eq.s32.totalorder %v4367_v32, 2 }
  0x2b   :  { %7953 = sst [smem:[#allocation15_spill]] %s3047_s8  ;;  %s3076_s29 = sld [smem:[#allocation2 + $0xd]]  ;;  %vm145_vm4 = vcmp.eq.s32.totalorder %v4367_v32, 3  ;;  %vm7947_vm5 = vcmp.eq.s32.totalorder %v4367_v32, 4  ;;  %vm155_vm6 = vcmp.eq.s32.totalorder %v4367_v32, 5  ;;  %vm7946_vm7 = vcmp.eq.s32.totalorder %v4367_v32, 6 }
  0x2c   :  { %7954 = sst [smem:[#allocation16_spill]] %s3049_s1  ;;  %s3074_s28 = sld [smem:[#allocation2 + $0xc]]  ;;  %vm7944_vm8 = vcmp.eq.s32.totalorder %v4367_v32, 7  ;;  %vm170_vm9 = vcmp.eq.s32.totalorder %v4367_v32, 8  ;;  %vm175_vm10 = vcmp.eq.s32.totalorder %v4367_v32, 9  ;;  %vm180_vm11 = vcmp.eq.s32.totalorder %v4367_v32, 10 }
  0x2d   :  { %7955 = sst [smem:[#allocation17_spill]] %s3051_s9  ;;  %s3080_s0 = sld [smem:[#allocation2 + $0xf]]  ;;  %vm185_vm12 = vcmp.eq.s32.totalorder %v4367_v32, 11  ;;  %vm190_vm13 = vcmp.eq.s32.totalorder %v4367_v32, 12  ;;  %vm195_vm14 = vcmp.eq.s32.totalorder %v4367_v32, 13  ;;  %vm7940_vm15 = vcmp.eq.s32.totalorder %v4367_v32, 14 }
  0x2e   :  { %7956 = sst [smem:[#allocation18_spill]] %s3053_s10  ;;  %s3078_s30 = sld [smem:[#allocation2 + $0xe]]  ;;  %vm205_vm0 = vcmp.eq.s32.totalorder %v4367_v32, 15 }
  0x2f   :  { %7957 = sst [smem:[#allocation19_spill]] %s3055_s11  ;;  %s3093_s25 = sld [smem:[#allocation2 + $0x81]] }
  0x30   :  { %7958 = sst [smem:[#allocation20_spill]] %s3057_s12  ;;  %s3082_s3 = sld [smem:[#allocation2 + $0x10]] }
  0x31   :  { %7959 = sst [smem:[#allocation21_spill]] %s3059_s13  ;;  %s3089_s27 = sld [smem:[#allocation2 + $0x80]] }
  0x32   :  { %7960 = sst [smem:[#allocation22_spill]] %s3062_s15  ;;  %s3095_s24 = sld [smem:[#allocation2 + $0x82]] }
  0x33   :  { %7961 = sst [smem:[#allocation23_spill]] %s3074_s28  ;;  %s3097_s23 = sld [smem:[#allocation2 + $0x83]] }
  0x34   :  { %7962 = sst [smem:[#allocation24_spill]] %s3076_s29  ;;  %s7971_s6 = sand.u32 2147483647, %s3047_s8 }
  0x35   :  { %7963 = sst [smem:[#allocation25_spill]] %s3078_s30  ;;  %s7972_s12 = sand.u32 2147483647, %s3049_s1 }
  0x36   :  { %7964 = sst [smem:[#allocation26_spill]] %s3080_s0  ;;  %s7973_s28 = sld [smem:[#allocation20_spill]] }
  0x37   :  { %7965 = sst [smem:[#allocation27_spill]] %s3082_s3  ;;  %s3116_s21 = sld [smem:[#allocation2 + $0x85]] }
  0x38   :  { %s78_s17 = sadd.f32 %s7509_s16, %s7510_s14  ;;  %s3118_s18 = sld [smem:[#allocation2 + $0x86]] }
  0x39   :  { %7966 = sst [smem:[#allocation28_spill]] %s3089_s27  ;;  %s7978_s16 = smov %s3059_s13 }
  0x3a   :  { %s79_s26 = sadd.f32 %s78_s17, %s7512_s19  ;;  %s3107_s19 = sld [smem:[#allocation2 + $0x84]] }
  0x3b   :  { %7967 = sst [smem:[#allocation29_spill]] %s3093_s25  ;;  %s3127_s13 = sld [smem:[#allocation2 + $0x89]] }
  0x3c   :  { %7968 = sst [smem:[#allocation30_spill]] %s3095_s24  ;;  %s3131_s4 = sld [smem:[#allocation2 + $0x8a]] }
  0x3d   :  { %7969 = sst [smem:[#allocation31_spill]] %s3097_s23  ;;  %s3133_s17 = sld [smem:[#allocation2 + $0x8b]] }
  0x3e   :  { %s80_s2 = sadd.f32 %s79_s26, %s7524_s20  ;;  %s3120_s26 = sld [smem:[#allocation2 + $0x87]] }
  0x3f   :  { %7974 = sst [smem:[#allocation33_spill]] %s3116_s21  ;;  %s7977_s20 = sand.u32 2147483647, %s3051_s9 }
  0x40   :  { %7970 = sst [smem:[#allocation32_spill]] %s3107_s19  ;;  %s3135_s9 = sld [smem:[#allocation2 + $0x8c]] }
  0x41   :  { %s81_s5 = sadd.f32 %s80_s2, %s7971_s6  ;;  %s3124_s2 = sld [smem:[#allocation2 + $0x88]] }
  0x42   :  { %7975 = sst [smem:[#allocation34_spill]] %s3118_s18  ;;  %s7986_s1 = sld [smem:[#allocation23_spill]] }
  0x43   :  { %s82_s22 = sadd.f32 %s81_s5, %s7972_s12  ;;  %s7981_s5 = sand.u32 2147483647, %s3053_s10 }
  0x44   :  { %7976 = sst [smem:[#allocation35_spill]] %s3120_s26  ;;  %s7987_s19 = sand.u32 2147483647, %s7973_s28 }
  0x45   :  { %s83_s14 = sadd.f32 %s82_s22, %s7977_s20  ;;  %s7985_s20 = sand.u32 2147483647, %s3055_s11 }
  0x46   :  { %7980 = sst [smem:[#allocation37_spill]] %s3127_s13  ;;  %s3146_s3 = sld [smem:[#allocation2 + $0x8d]] }
  0x47   :  { %7979 = sst [smem:[#allocation36_spill]] %s3124_s2  ;;  %s7989_s23 = sand.u32 2147483647, %s7978_s16 }
  0x48   :  { %s84_s12 = sadd.f32 %s83_s14, %s7981_s5  ;;  %s7990_s8 = sand.u32 2147483647, %s3062_s15 }
  0x49   :  { %7982 = sst [smem:[#allocation38_spill]] %s3131_s4  ;;  %s7991_s7 = sld [smem:[#allocation26_spill]] }
  0x4a   :  { %7983 = sst [smem:[#allocation39_spill]] %s3133_s17  ;;  %s3155_s28 = sld [smem:[#allocation2 + $0x8e]] }
  0x4b   :  { %7984 = sst [smem:[#allocation40_spill]] %s3135_s9  ;;  %s3159_s10 = sld [smem:[#allocation2 + $0x90]] }
  0x4c   :  { %s85_s22 = sadd.f32 %s84_s12, %s7985_s20  ;;  %s7996_s5 = sand.u32 2147483647, %s7986_s1 }
  0x4d   :  { %7988 = sst [smem:[#allocation41_spill]] %s3146_s3  ;;  %s7999_s12 = sand.u32 2147483647, %s3089_s27 }
  0x4e   :  { %s86_s14 = sadd.f32 %s85_s22, %s7987_s19  ;;  %s3157_s19 = sld [smem:[#allocation2 + $0x8f]] }
  0x4f   :  { %s7994_s22 = sld [smem:[#allocation31_spill]]  ;;  %s8002_s15 = sand.u32 2147483647, %s3076_s29 }
  0x50   :  { %s87_s0 = sadd.f32 %s86_s14, %s7989_s23  ;;  %s7997_s23 = sld [smem:[#allocation27_spill]] }
  0x51   :  { %7992 = sst [smem:[#allocation42_spill]] %s3155_s28  ;;  %s3163_s14 = sld [smem:[#allocation2 + $0x100]] }
  0x52   :  { %s88_s6 = sadd.f32 %s87_s0, %s7990_s8  ;;  %s8000_s8 = sand.u32 2147483647, %s3093_s25 }
  0x53   :  { %7995 = sst [smem:[#allocation44_spill]] %s3159_s10  ;;  %s8001_s0 = sld [smem:[#allocation32_spill]] }
  0x54   :  { %7993 = sst [smem:[#allocation43_spill]] %s3157_s19  ;;  %s3172_s17 = sld [smem:[#allocation2 + $0x101]] }
  0x55   :  { %s89_s16 = sadd.f32 %s88_s6, %s7996_s5  ;;  %s8004_s4 = sand.u32 2147483647, %s3095_s24 }
  0x56   :  { %s251_s11 = sadd.f32 %s8000_s8, %s7999_s12  ;;  %s3176_s2 = sld [smem:[#allocation2 + $0x102]] }
  0x57   :  { %7998 = sst [smem:[#allocation45_spill]] %s3163_s14  ;;  %s8006_s1 = sand.u32 2147483647, %s3078_s30 }
  0x58   :  { %s90_s9 = sadd.f32 %s89_s16, %s8002_s15  ;;  %s8007_s27 = sand.u32 2147483647, %s7991_s7 }
  0x59   :  { %s252_s13 = sadd.f32 %s251_s11, %s8004_s4  ;;  %s8008_s8 = sand.u32 2147483647, %s7994_s22 }
  0x5a   :  { %8003 = sst [smem:[#allocation46_spill]] %s3172_s17  ;;  %s8010_s24 = sand.u32 2147483647, %s7997_s23 }
  0x5b   :  { %s91_s6 = sadd.f32 %s90_s9, %s8006_s1  ;;  %s3188_s16 = sld [smem:[#allocation2 + $0x103]] }
  0x5c   :  { %8005 = sst [smem:[#allocation47_spill]] %s3176_s2  ;;  %s8011_s11 = smov %s3120_s26 }
  0x5d   :  { %s92_s25 = sadd.f32 %s91_s6, %s8007_s27  ;;  %s8012_s30 = sand.u32 2147483647, %s8001_s0 }
  0x5e   :  { %s253_s15 = sadd.f32 %s252_s13, %s8008_s8  ;;  %s8013_s9 = sld [smem:[#allocation36_spill]] }
  0x5f   :  { %s93_s4 = sadd.f32 %s92_s25, %s8010_s24  ;;  %s3196_s26 = sld [smem:[#allocation2 + $0x104]] }
  0x60   :  { %s254_s3 = sadd.f32 %s253_s15, %s8012_s30  ;;  %s3198_s27 = sld [smem:[#allocation2 + $0x105]] }
  0x61   :  { %8009 = sst [smem:[#allocation48_spill]] %s3188_s16  ;;  %v94_v0 = vstv %s93_s4  ;;  %s8016_s13 = sand.u32 2147483647, %s3116_s21 }
  0x62   :  { %2900 = vrcp.f32 %v94_v0  ;;  %s255_s6 = sadd.f32 %s254_s3, %s8016_s13  ;;  %s8017_s8 = sld [smem:[#allocation37_spill]] }
  0x63   :  { %s3202_s20 = sld [smem:[#allocation2 + $0x106]]  ;;  %s3204_s24 = sld [smem:[#allocation2 + $0x107]] }
  0x64   :  { %s3206_s25 = sld [smem:[#allocation2 + $0x108]]  ;;  %s8021_s30 = sand.u32 2147483647, %s3118_s18 }
  0x65   :  { %8014 = sst [smem:[#allocation49_spill]] %s3196_s26  ;;  %s8022_s5 = sld [smem:[#allocation38_spill]] }
  0x66   :  { %8015 = sst [smem:[#allocation50_spill]] %s3198_s27  ;;  %s3211_s1 = sld [smem:[#allocation2 + $0x109]] }
  0x67   :  { %s256_s15 = sadd.f32 %s255_s6, %s8021_s30  ;;  %s3213_s29 = sld [smem:[#allocation2 + $0x10a]] }
  0x68   :  { %s8025_s3 = sand.u32 2147483647, %s8011_s11  ;;  %s3217_s12 = sld [smem:[#allocation2 + $0x10b]] }
  0x69   :  { %8018 = sst [smem:[#allocation51_spill]] %s3202_s20  ;;  %s8027_s0 = sld [smem:[#allocation39_spill]] }
  0x6a   :  { %8019 = sst [smem:[#allocation52_spill]] %s3204_s24  ;;  %s8028_s23 = sand.u32 2147483647, %s8013_s9 }
  0x6b   :  { %8020 = sst [smem:[#allocation53_spill]] %s3206_s25  ;;  %s8029_s30 = sld [smem:[#allocation40_spill]] }
  0x6c   :  { %8023 = sst [smem:[#allocation54_spill]] %s3211_s1  ;;  %s8030_s10 = sand.u32 2147483647, %s8017_s8  ;;  %v2901_v1 = vpop.eup %2900 }
  0x6d   :  { %8024 = sst [smem:[#allocation55_spill]] %s3213_s29  ;;  %s8033_s21 = sand.u32 2147483647, %s8022_s5  ;;  %2863 = vpush %v2901_v1 }
  0x6e   :  { %s257_s13 = sadd.f32 %s256_s15, %s8025_s3  ;;  %s3228_s11 = sld [smem:[#allocation2 + $0x10c]] }
  0x6f   :  { %8026 = sst [smem:[#allocation56_spill]] %s3217_s12  ;;  %s8032_s3 = sld [smem:[#allocation41_spill]] }
  0x70   :  { %s258_s18 = sadd.f32 %s257_s13, %s8028_s23  ;;  %s3235_s23 = sld [smem:[#allocation2 + $0x10d]] }
  0x71   :  { %s3237_s13 = sld [smem:[#allocation2 + $0x10e]]  ;;  %s8036_s4 = sand.u32 2147483647, %s8027_s0 }
  0x72   :  { %s259_s19 = sadd.f32 %s258_s18, %s8030_s10  ;;  %s8037_s18 = smov %s3188_s16 }
  0x73   :  { %s8038_s6 = sld [smem:[#allocation43_spill]]  ;;  %s3241_s7 = sld [smem:[#allocation2 + $0x10f]] }
  0x74   :  { %8031 = sst [smem:[#allocation57_spill]] %s3228_s11  ;;  %s3243_s16 = sld [smem:[#allocation2 + $0x110]] }
  0x75   :  { %s260_s22 = sadd.f32 %s259_s19, %s8033_s21  ;;  %s8041_s15 = sand.u32 2147483647, %s3163_s14 }
  0x76   :  { %8034 = sst [smem:[#allocation58_spill]] %s3235_s23  ;;  %s8042_s21 = sand.u32 2147483647, %s3172_s17 }
  0x77   :  { %8035 = sst [smem:[#allocation59_spill]] %s3237_s13  ;;  %s8043_s9 = sand.u32 2147483647, %s8029_s30 }
  0x78   :  { %s261_s10 = sadd.f32 %s260_s22, %s8036_s4  ;;  %s8044_s8 = sld [smem:[#allocation44_spill]] }
  0x79   :  { %8039 = sst [smem:[#allocation60_spill]] %s3241_s7  ;;  %s8045_s29 = sand.u32 2147483647, %s3176_s2 }
  0x7a   :  { %8040 = sst [smem:[#allocation61_spill]] %s3243_s16  ;;  %s3254_s1 = sld [smem:[#allocation2 + $0x180]] }
  0x7b   :  { %s408_s19 = sadd.f32 %s8042_s21, %s8041_s15  ;;  %s8047_s22 = sand.u32 2147483647, %s8032_s3 }
  0x7c   :  { %s262_s5 = sadd.f32 %s261_s10, %s8043_s9  ;;  %s3258_s25 = sld [smem:[#allocation2 + $0x181]] }
  0x7d   :  { %s409_s0 = sadd.f32 %s408_s19, %s8045_s29  ;;  %s8049_s24 = sand.u32 2147483647, %s3155_s28 }
  0x7e   :  { %s263_s4 = sadd.f32 %s262_s5, %s8047_s22  ;;  %s8050_s15 = sld [smem:[#allocation51_spill]] }
  0x7f   :  { %s8051_s10 = sand.u32 2147483647, %s8037_s18  ;;  %s8052_s2 = sand.u32 2147483647, %s8038_s6 }
  0x80   :  { %8046 = sst [smem:[#allocation62_spill]] %s3254_s1  ;;  %s8053_s19 = sld [smem:[#allocation52_spill]] }
  0x81   :  { %s264_s20 = sadd.f32 %s263_s4, %s8049_s24  ;;  %s3270_s30 = sld [smem:[#allocation2 + $0x182]] }
  0x82   :  { %8048 = sst [smem:[#allocation63_spill]] %s3258_s25  ;;  %s8055_s3 = sand.u32 2147483647, %s3196_s26 }
  0x83   :  { %s410_s12 = sadd.f32 %s409_s0, %s8051_s10  ;;  %s8056_s11 = sand.u32 2147483647, %s8044_s8 }
  0x84   :  { %s265_s29 = sadd.f32 %s264_s20, %s8052_s2  ;;  %s8057_s23 = sld [smem:[#allocation53_spill]] }
  0x85   :  { %s411_s5 = sadd.f32 %s410_s12, %s8055_s3  ;;  %s8058_s28 = sand.u32 2147483647, %s3198_s27 }
  0x86   :  { %s266_s14 = sadd.f32 %s265_s29, %s8056_s11  ;;  %s3280_s4 = sld [smem:[#allocation2 + $0x183]] }
  0x87   :  { %8054 = sst [smem:[#allocation64_spill]] %s3270_s30  ;;  %s8060_s0 = sld [smem:[#allocation54_spill]] }
  0x88   :  { %s412_s24 = sadd.f32 %s411_s5, %s8058_s28  ;;  %v267_v2 = vstv %s266_s14  ;;  %s3282_s10 = sld [smem:[#allocation2 + $0x184]] }
  0x89   :  { %s3284_s2 = sld [smem:[#allocation2 + $0x185]]  ;;  %2902 = vrcp.f32 %v267_v2  ;;  %s8063_s20 = sand.u32 2147483647, %s8050_s15 }
  0x8a   :  { %s413_s12 = sadd.f32 %s412_s24, %s8063_s20  ;;  %s8064_s3 = sld [smem:[#allocation55_spill]] }
  0x8b   :  { %s3288_s11 = sld [smem:[#allocation2 + $0x186]]  ;;  %s3291_s28 = sld [smem:[#allocation2 + $0x187]] }
  0x8c   :  { %8059 = sst [smem:[#allocation65_spill]] %s3280_s4  ;;  %s8067_s5 = sand.u32 2147483647, %s8053_s19 }
  0x8d   :  { %s414_s14 = sadd.f32 %s413_s12, %s8067_s5  ;;  %s3295_s9 = sld [smem:[#allocation2 + $0x188]] }
  0x8e   :  { %8061 = sst [smem:[#allocation66_spill]] %s3282_s10  ;;  %s8069_s21 = sld [smem:[#allocation56_spill]] }
  0x8f   :  { %8062 = sst [smem:[#allocation67_spill]] %s3284_s2  ;;  %s3297_s17 = sld [smem:[#allocation2 + $0x189]] }
  0x90   :  { %s3299_s22 = sld [smem:[#allocation2 + $0x18a]]  ;;  %s8072_s24 = sand.u32 2147483647, %s8057_s23 }
  0x91   :  { %8065 = sst [smem:[#allocation68_spill]] %s3288_s11  ;;  %s8073_s29 = sld [smem:[#allocation57_spill]] }
  0x92   :  { %8066 = sst [smem:[#allocation69_spill]] %s3291_s28  ;;  %s8074_s18 = sand.u32 2147483647, %s8060_s0 }
  0x93   :  { %8068 = sst [smem:[#allocation70_spill]] %s3295_s9  ;;  %s8075_s5 = sld [smem:[#allocation58_spill]]  ;;  %v2903_v3 = vpop.eup %2902 }
  0x94   :  { %s415_s20 = sadd.f32 %s414_s14, %s8072_s24  ;;  %s3310_s6 = sld [smem:[#allocation2 + $0x18b]]  ;;  %2865 = vpush %v2903_v3 }
  0x95   :  { %8070 = sst [smem:[#allocation71_spill]] %s3297_s17  ;;  %s8077_s16 = sand.u32 2147483647, %s8064_s3 }
  0x96   :  { %8071 = sst [smem:[#allocation72_spill]] %s3299_s22  ;;  %s8078_s24 = sand.u32 2147483647, %s8069_s21 }
  0x97   :  { %s416_s19 = sadd.f32 %s415_s20, %s8074_s18  ;;  %s3319_s26 = sld [smem:[#allocation2 + $0x18c]] }
  0x98   :  { %s8080_s18 = smov %s3241_s7  ;;  %s3321_s20 = sld [smem:[#allocation2 + $0x18d]] }
  0x99   :  { %s417_s30 = sadd.f32 %s416_s19, %s8077_s16  ;;  %s3323_s12 = sld [smem:[#allocation2 + $0x18e]] }
  0x9a   :  { %8076 = sst [smem:[#allocation73_spill]] %s3310_s6  ;;  %s8083_s16 = sand.u32 2147483647, %s8073_s29 }
  0x9b   :  { %s418_s27 = sadd.f32 %s417_s30, %s8078_s24  ;;  %s8084_s19 = sld [smem:[#allocation64_spill]] }
  0x9c   :  { %s8085_s23 = sld [smem:[#allocation61_spill]]  ;;  %s3327_s8 = sld [smem:[#allocation2 + $0x18f]] }
  0x9d   :  { %8079 = sst [smem:[#allocation74_spill]] %s3319_s26  ;;  %s3330_s30 = sld [smem:[#allocation2 + $0x190]] }
  0x9e   :  { %8081 = sst [smem:[#allocation75_spill]] %s3321_s20  ;;  %s8088_s24 = sand.u32 2147483647, %s8075_s5 }
  0x9f   :  { %8082 = sst [smem:[#allocation76_spill]] %s3323_s12  ;;  %s3334_s21 = sld [smem:[#allocation2 + $0x200]] }
  0xa0   :  { %s419_s7 = sadd.f32 %s418_s27, %s8083_s16  ;;  %s8090_s3 = sand.u32 2147483647, %s3254_s1 }
  0xa1   :  { %s8091_s0 = sand.u32 2147483647, %s3258_s25  ;;  %s3340_s22 = sld [smem:[#allocation2 + $0x201]] }
  0xa2   :  { %8086 = sst [smem:[#allocation77_spill]] %s3327_s8  ;;  %s8093_s27 = sand.u32 2147483647, %s3237_s13 }
  0xa3   :  { %8087 = sst [smem:[#allocation78_spill]] %s3330_s30  ;;  %s8094_s9 = sand.u32 2147483647, %s8080_s18 }
  0xa4   :  { %s420_s15 = sadd.f32 %s419_s7, %s8088_s24  ;;  %s8095_s24 = sand.u32 2147483647, %s8084_s19 }
  0xa5   :  { %8089 = sst [smem:[#allocation79_spill]] %s3334_s21  ;;  %s8096_s1 = sand.u32 2147483647, %s8085_s23 }
  0xa6   :  { %s565_s29 = sadd.f32 %s8091_s0, %s8090_s3  ;;  %s8097_s0 = sld [smem:[#allocation68_spill]] }
  0xa7   :  { %8092 = sst [smem:[#allocation80_spill]] %s3340_s22  ;;  %s8098_s13 = sand.u32 2147483647, %s3280_s4 }
  0xa8   :  { %s421_s16 = sadd.f32 %s420_s15, %s8093_s27  ;;  %s8099_s17 = sld [smem:[#allocation69_spill]] }
  0xa9   :  { %s566_s11 = sadd.f32 %s565_s29, %s8095_s24  ;;  %s3359_s26 = sld [smem:[#allocation2 + $0x202]] }
  0xaa   :  { %s422_s28 = sadd.f32 %s421_s16, %s8094_s9  ;;  %s3361_s6 = sld [smem:[#allocation2 + $0x203]] }
  0xab   :  { %s567_s15 = sadd.f32 %s566_s11, %s8098_s13  ;;  %s8102_s9 = sand.u32 2147483647, %s3282_s10 }
  0xac   :  { %s423_s25 = sadd.f32 %s422_s28, %s8096_s1  ;;  %s8103_s7 = sld [smem:[#allocation70_spill]] }
  0xad   :  { %s568_s16 = sadd.f32 %s567_s15, %s8102_s9  ;;  %s3365_s29 = sld [smem:[#allocation2 + $0x204]] }
  0xae   :  { %v424_v4 = vstv %s423_s25  ;;  %s3367_s1 = sld [smem:[#allocation2 + $0x205]]  ;;  %s3369_s13 = sld [smem:[#allocation2 + $0x206]] }
  0xaf   :  { %8100 = sst [smem:[#allocation81_spill]] %s3359_s26  ;;  %2904 = vrcp.f32 %v424_v4  ;;  %s8107_s25 = sand.u32 2147483647, %s3284_s2 }
  0xb0   :  { %8101 = sst [smem:[#allocation82_spill]] %s3361_s6  ;;  %s8109_s24 = sld [smem:[#allocation71_spill]] }
  0xb1   :  { %s569_s11 = sadd.f32 %s568_s16, %s8107_s25  ;;  %s3373_s28 = sld [smem:[#allocation2 + $0x207]] }
  0xb2   :  { %s3375_s5 = sld [smem:[#allocation2 + $0x208]]  ;;  %s3377_s15 = sld [smem:[#allocation2 + $0x209]] }
  0xb3   :  { %8104 = sst [smem:[#allocation83_spill]] %s3365_s29  ;;  %s8112_s9 = sand.u32 2147483647, %s8097_s0 }
  0xb4   :  { %8105 = sst [smem:[#allocation84_spill]] %s3367_s1  ;;  %s3381_s27 = sld [smem:[#allocation2 + $0x20a]] }
  0xb5   :  { %8106 = sst [smem:[#allocation85_spill]] %s3369_s13  ;;  %s8114_s10 = sld [smem:[#allocation72_spill]] }
  0xb6   :  { %s570_s14 = sadd.f32 %s569_s11, %s8112_s9  ;;  %s8115_s4 = sand.u32 2147483647, %s8099_s17 }
  0xb7   :  { %8108 = sst [smem:[#allocation86_spill]] %s3373_s28  ;;  %s8116_s23 = sld [smem:[#allocation73_spill]] }
  0xb8   :  { %8110 = sst [smem:[#allocation87_spill]] %s3375_s5  ;;  %s8117_s30 = sand.u32 2147483647, %s8103_s7 }
  0xb9   :  { %8111 = sst [smem:[#allocation88_spill]] %s3377_s15  ;;  %s8118_s20 = sld [smem:[#allocation74_spill]]  ;;  %v2905_v5 = vpop.eup %2904 }
  0xba   :  { %8113 = sst [smem:[#allocation89_spill]] %s3381_s27  ;;  %s8119_s9 = sand.u32 2147483647, %s8109_s24  ;;  %2867 = vpush %v2905_v5 }
  0xbb   :  { %s571_s16 = sadd.f32 %s570_s14, %s8115_s4  ;;  %s8120_s2 = sld [smem:[#allocation75_spill]] }
  0xbc   :  { %s3398_s17 = sld [smem:[#allocation2 + $0x20b]]  ;;  %s3400_s4 = sld [smem:[#allocation2 + $0x20c]] }
  0xbd   :  { %s572_s8 = sadd.f32 %s571_s16, %s8117_s30  ;;  %s8123_s14 = sand.u32 2147483647, %s8114_s10 }
  0xbe   :  { %s8124_s16 = smov %s3323_s12  ;;  %s3404_s18 = sld [smem:[#allocation2 + $0x20d]] }
  0xbf   :  { %s573_s3 = sadd.f32 %s572_s8, %s8119_s9  ;;  %s3406_s0 = sld [smem:[#allocation2 + $0x20e]] }
  0xc0   :  { %s8127_s11 = smov %s3359_s26  ;;  %s3408_s8 = sld [smem:[#allocation2 + $0x20f]] }
  0xc1   :  { %s574_s30 = sadd.f32 %s573_s3, %s8123_s14  ;;  %s8129_s9 = sand.u32 2147483647, %s8116_s23 }
  0xc2   :  { %8121 = sst [smem:[#allocation90_spill]] %s3398_s17  ;;  %s8130_s12 = sld [smem:[#allocation77_spill]] }
  0xc3   :  { %8122 = sst [smem:[#allocation91_spill]] %s3400_s4  ;;  %s8132_s25 = sand.u32 2147483647, %s3334_s21 }
  0xc4   :  { %8125 = sst [smem:[#allocation92_spill]] %s3404_s18  ;;  %s3412_s19 = sld [smem:[#allocation2 + $0x210]] }
  0xc5   :  { %8126 = sst [smem:[#allocation93_spill]] %s3406_s0  ;;  %s8133_s10 = sand.u32 2147483647, %s3340_s22 }
  0xc6   :  { %8128 = sst [smem:[#allocation94_spill]] %s3408_s8  ;;  %s3418_s14 = sld [smem:[#allocation2 + $0x280]] }
  0xc7   :  { %s575_s26 = sadd.f32 %s574_s30, %s8129_s9  ;;  %s8135_s24 = sand.u32 2147483647, %s8118_s20 }
  0xc8   :  { %s722_s3 = sadd.f32 %s8133_s10, %s8132_s25  ;;  %s8136_s27 = sld [smem:[#allocation78_spill]] }
  0xc9   :  { %s576_s7 = sadd.f32 %s575_s26, %s8135_s24  ;;  %s3422_s15 = sld [smem:[#allocation2 + $0x281]] }
  0xca   :  { %8131 = sst [smem:[#allocation95_spill]] %s3412_s19  ;;  %s8138_s9 = sand.u32 2147483647, %s8120_s2 }
  0xcb   :  { %s577_s5 = sadd.f32 %s576_s7, %s8138_s9  ;;  %s8139_s13 = sand.u32 2147483647, %s8124_s16 }
  0xcc   :  { %8134 = sst [smem:[#allocation96_spill]] %s3418_s14  ;;  %s8140_s20 = sand.u32 2147483647, %s8127_s11 }
  0xcd   :  { %s578_s10 = sadd.f32 %s577_s5, %s8139_s13  ;;  %s8141_s17 = sand.u32 2147483647, %s8130_s12 }
  0xce   :  { %s723_s24 = sadd.f32 %s722_s3, %s8140_s20  ;;  %s8142_s4 = sld [smem:[#allocation85_spill]] }
  0xcf   :  { %8137 = sst [smem:[#allocation97_spill]] %s3422_s15  ;;  %s8143_s2 = sand.u32 2147483647, %s3361_s6 }
  0xd0   :  { %s579_s23 = sadd.f32 %s578_s10, %s8141_s17  ;;  %s3442_s9 = sld [smem:[#allocation2 + $0x282]] }
  0xd1   :  { %s724_s7 = sadd.f32 %s723_s24, %s8143_s2  ;;  %s8145_s18 = sand.u32 2147483647, %s8136_s27 }
  0xd2   :  { %s580_s28 = sadd.f32 %s579_s23, %s8145_s18  ;;  %s8146_s21 = sld [smem:[#allocation86_spill]] }
  0xd3   :  { %s3446_s22 = sld [smem:[#allocation2 + $0x283]]  ;;  %s8148_s5 = sand.u32 2147483647, %s3365_s29 }
  0xd4   :  { %s725_s13 = sadd.f32 %s724_s7, %s8148_s5  ;;  %s3450_s25 = sld [smem:[#allocation2 + $0x284]]  ;;  %v581_v6 = vstv %s580_s28 }
  0xd5   :  { %s8150_s17 = sld [smem:[#allocation87_spill]]  ;;  %s3452_s20 = sld [smem:[#allocation2 + $0x285]]  ;;  %2906 = vrcp.f32 %v581_v6 }
  0xd6   :  { %8144 = sst [smem:[#allocation98_spill]] %s3442_s9  ;;  %s3454_s2 = sld [smem:[#allocation2 + $0x286]] }
  0xd7   :  { %s8153_s3 = sand.u32 2147483647, %s3367_s1  ;;  %s8154_s18 = sld [smem:[#allocation88_spill]] }
  0xd8   :  { %s726_s23 = sadd.f32 %s725_s13, %s8153_s3  ;;  %s3458_s10 = sld [smem:[#allocation2 + $0x287]] }
  0xd9   :  { %8147 = sst [smem:[#allocation99_spill]] %s3446_s22  ;;  %s3462_s7 = sld [smem:[#allocation2 + $0x289]] }
  0xda   :  { %8149 = sst [smem:[#allocation100_spill]] %s3450_s25  ;;  %s3460_s24 = sld [smem:[#allocation2 + $0x288]] }
  0xdb   :  { %8151 = sst [smem:[#allocation101_spill]] %s3452_s20  ;;  %s8158_s28 = sand.u32 2147483647, %s8142_s4 }
  0xdc   :  { %8152 = sst [smem:[#allocation102_spill]] %s3454_s2  ;;  %s8159_s26 = sld [smem:[#allocation89_spill]] }
  0xdd   :  { %s727_s5 = sadd.f32 %s726_s23, %s8158_s28  ;;  %s3468_s6 = sld [smem:[#allocation2 + $0x28a]] }
  0xde   :  { %8155 = sst [smem:[#allocation103_spill]] %s3458_s10  ;;  %s8161_s11 = sand.u32 2147483647, %s8146_s21 }
  0xdf   :  { %8157 = sst [smem:[#allocation105_spill]] %s3462_s7  ;;  %s8162_s27 = sld [smem:[#allocation90_spill]]  ;;  %v2907_v7 = vpop.eup %2906 }
  0xe0   :  { %8156 = sst [smem:[#allocation104_spill]] %s3460_s24  ;;  %s8163_s16 = sand.u32 2147483647, %s8150_s17  ;;  %2869 = vpush %v2907_v7 }
  0xe1   :  { %s728_s13 = sadd.f32 %s727_s5, %s8161_s11  ;;  %s8164_s0 = sld [smem:[#allocation91_spill]] }
  0xe2   :  { %s8165_s28 = sand.u32 2147483647, %s8154_s18  ;;  %s3482_s29 = sld [smem:[#allocation2 + $0x28b]] }
  0xe3   :  { %8160 = sst [smem:[#allocation106_spill]] %s3468_s6  ;;  %s8167_s11 = sld [smem:[#allocation92_spill]] }
  0xe4   :  { %s729_s19 = sadd.f32 %s728_s13, %s8163_s16  ;;  %s3485_s5 = sld [smem:[#allocation2 + $0x28c]] }
  0xe5   :  { %s8169_s12 = sand.u32 2147483647, %s8159_s26  ;;  %s3489_s13 = sld [smem:[#allocation2 + $0x28d]] }
  0xe6   :  { %s730_s30 = sadd.f32 %s729_s19, %s8165_s28  ;;  %s8171_s4 = sld [smem:[#allocation93_spill]] }
  0xe7   :  { %s3491_s23 = sld [smem:[#allocation2 + $0x28e]]  ;;  %s3493_s19 = sld [smem:[#allocation2 + $0x28f]] }
  0xe8   :  { %8166 = sst [smem:[#allocation107_spill]] %s3482_s29  ;;  %s8174_s28 = sand.u32 2147483647, %s8162_s27 }
  0xe9   :  { %s731_s16 = sadd.f32 %s730_s30, %s8169_s12  ;;  %s3497_s1 = sld [smem:[#allocation2 + $0x290]] }
  0xea   :  { %8168 = sst [smem:[#allocation108_spill]] %s3485_s5  ;;  %s8176_s3 = sand.u32 2147483647, %s3418_s14 }
  0xeb   :  { %8170 = sst [smem:[#allocation109_spill]] %s3489_s13  ;;  %s8177_s26 = sand.u32 2147483647, %s3422_s15 }
  0xec   :  { %s732_s21 = sadd.f32 %s731_s16, %s8174_s28  ;;  %s3503_s30 = sld [smem:[#allocation2 + $0x300]] }
  0xed   :  { %8172 = sst [smem:[#allocation110_spill]] %s3491_s23  ;;  %s8179_s18 = sand.u32 2147483647, %s8164_s0 }
  0xee   :  { %8173 = sst [smem:[#allocation111_spill]] %s3493_s19  ;;  %s8181_s10 = sand.u32 2147483647, %s3442_s9 }
  0xef   :  { %8175 = sst [smem:[#allocation112_spill]] %s3497_s1  ;;  %s8180_s6 = sld [smem:[#allocation95_spill]] }
  0xf0   :  { %s879_s12 = sadd.f32 %s8177_s26, %s8176_s3  ;;  %s8182_s16 = sand.u32 2147483647, %s8167_s11 }
  0xf1   :  { %s733_s17 = sadd.f32 %s732_s21, %s8179_s18  ;;  %s8183_s3 = sand.u32 2147483647, %s8171_s4 }
  0xf2   :  { %8178 = sst [smem:[#allocation113_spill]] %s3503_s30  ;;  %s8184_s0 = smov %s3454_s2 }
  0xf3   :  { %s880_s27 = sadd.f32 %s879_s12, %s8181_s10  ;;  %s8185_s21 = sand.u32 2147483647, %s3446_s22 }
  0xf4   :  { %s734_s28 = sadd.f32 %s733_s17, %s8182_s16  ;;  %s8186_s5 = sand.u32 2147483647, %s3408_s8 }
  0xf5   :  { %s881_s7 = sadd.f32 %s880_s27, %s8185_s21  ;;  %s8187_s9 = sld [smem:[#allocation103_spill]] }
  0xf6   :  { %s735_s26 = sadd.f32 %s734_s28, %s8183_s3  ;;  %s3524_s10 = sld [smem:[#allocation2 + $0x301]] }
  0xf7   :  { %s8189_s12 = sand.u32 2147483647, %s3450_s25  ;;  %s3528_s16 = sld [smem:[#allocation2 + $0x302]] }
  0xf8   :  { %s736_s24 = sadd.f32 %s735_s26, %s8186_s5  ;;  %s8191_s17 = sand.u32 2147483647, %s8180_s6 }
  0xf9   :  { %s882_s11 = sadd.f32 %s881_s7, %s8189_s12  ;;  %s8192_s14 = sld [smem:[#allocation104_spill]] }
  0xfa   :  { %s737_s15 = sadd.f32 %s736_s24, %s8191_s17  ;;  %s3532_s28 = sld [smem:[#allocation2 + $0x303]] }
  0xfb   :  { %s8194_s3 = sand.u32 2147483647, %s3452_s20  ;;  %s3536_s21 = sld [smem:[#allocation2 + $0x304]] }
  0xfc   :  { %8188 = sst [smem:[#allocation114_spill]] %s3524_s10  ;;  %v738_v8 = vstv %s737_s15  ;;  %s8196_s5 = sld [smem:[#allocation105_spill]] }
  0xfd   :  { %8190 = sst [smem:[#allocation115_spill]] %s3528_s16  ;;  %s3538_s26 = sld [smem:[#allocation2 + $0x305]]  ;;  %2908 = vrcp.f32 %v738_v8 }
  0xfe   :  { %s883_s27 = sadd.f32 %s882_s11, %s8194_s3  ;;  %s3540_s7 = sld [smem:[#allocation2 + $0x306]] }
  0xff   :  { %s8199_s12 = sand.u32 2147483647, %s8184_s0  ;;  %s8200_s17 = sld [smem:[#allocation106_spill]] }
 0x100   :  { %8193 = sst [smem:[#allocation116_spill]] %s3532_s28  ;;  %s3544_s18 = sld [smem:[#allocation2 + $0x307]] }
 0x101   :  { %8195 = sst [smem:[#allocation117_spill]] %s3536_s21  ;;  %s3547_s11 = sld [smem:[#allocation2 + $0x308]] }
 0x102   :  { %s884_s24 = sadd.f32 %s883_s27, %s8199_s12  ;;  %s8203_s3 = sand.u32 2147483647, %s8187_s9 }
 0x103   :  { %8197 = sst [smem:[#allocation118_spill]] %s3538_s26  ;;  %s8204_s20 = smov %s3482_s29 }
 0x104   :  { %8198 = sst [smem:[#allocation119_spill]] %s3540_s7  ;;  %s3553_s22 = sld [smem:[#allocation2 + $0x309]] }
 0x105   :  { %s885_s15 = sadd.f32 %s884_s24, %s8203_s3  ;;  %s8206_s6 = sand.u32 2147483647, %s8192_s14 }
 0x106   :  { %8201 = sst [smem:[#allocation120_spill]] %s3544_s18  ;;  %s8207_s12 = sld [smem:[#allocation108_spill]] }
 0x107   :  { %8202 = sst [smem:[#allocation121_spill]] %s3547_s11  ;;  %s8208_s1 = sand.u32 2147483647, %s8196_s5  ;;  %v2909_v9 = vpop.eup %2908 }
 0x108   :  { %s886_s8 = sadd.f32 %s885_s15, %s8206_s6  ;;  %s3564_s24 = sld [smem:[#allocation2 + $0x30a]]  ;;  %2871 = vpush %v2909_v9 }
 0x109   :  { %s8210_s3 = sand.u32 2147483647, %s8200_s17  ;;  %s3568_s29 = sld [smem:[#allocation2 + $0x30b]] }
 0x10a   :  { %8205 = sst [smem:[#allocation122_spill]] %s3553_s22  ;;  %s3571_s15 = sld [smem:[#allocation2 + $0x30c]] }
 0x10b   :  { %s887_s19 = sadd.f32 %s886_s8, %s8208_s1  ;;  %s8213_s1 = sand.u32 2147483647, %s8204_s20 }
 0x10c   :  { %s3575_s2 = sld [smem:[#allocation2 + $0x30d]]  ;;  %s8215_s9 = sld [smem:[#allocation111_spill]] }
 0x10d   :  { %s888_s25 = sadd.f32 %s887_s19, %s8210_s3  ;;  %s3577_s4 = sld [smem:[#allocation2 + $0x30e]] }
 0x10e   :  { %8209 = sst [smem:[#allocation123_spill]] %s3564_s24  ;;  %s3579_s19 = sld [smem:[#allocation2 + $0x30f]] }
 0x10f   :  { %8211 = sst [smem:[#allocation124_spill]] %s3568_s29  ;;  %s8218_s3 = sand.u32 2147483647, %s8207_s12 }
 0x110   :  { %8212 = sst [smem:[#allocation125_spill]] %s3571_s15  ;;  %s8219_s27 = sld [smem:[#allocation112_spill]] }
 0x111   :  { %s889_s8 = sadd.f32 %s888_s25, %s8213_s1  ;;  %s3583_s0 = sld [smem:[#allocation2 + $0x310]] }
 0x112   :  { %8214 = sst [smem:[#allocation126_spill]] %s3575_s2  ;;  %s8221_s25 = sand.u32 2147483647, %s3503_s30 }
 0x113   :  { %8216 = sst [smem:[#allocation127_spill]] %s3577_s4  ;;  %s8222_s1 = sand.u32 2147483647, %s3524_s10 }
 0x114   :  { %8217 = sst [smem:[#allocation128_spill]] %s3579_s19  ;;  %s8223_s5 = sand.u32 2147483647, %s3489_s13 }
 0x115   :  { %s890_s6 = sadd.f32 %s889_s8, %s8218_s3  ;;  %s8224_s18 = sand.u32 2147483647, %s3528_s16 }
 0x116   :  { %s1036_s17 = sadd.f32 %s8222_s1, %s8221_s25  ;;  %s8225_s26 = sand.u32 2147483647, %s3491_s23 }
 0x117   :  { %8220 = sst [smem:[#allocation129_spill]] %s3583_s0  ;;  %s8226_s3 = sld [smem:[#allocation118_spill]] }
 0x118   :  { %s891_s14 = sadd.f32 %s890_s6, %s8223_s5  ;;  %s8227_s30 = sand.u32 2147483647, %s8215_s9 }
 0x119   :  { %s1037_s7 = sadd.f32 %s1036_s17, %s8224_s18  ;;  %s8228_s1 = sld [smem:[#allocation119_spill]] }
 0x11a   :  { %s892_s12 = sadd.f32 %s891_s14, %s8225_s26  ;;  %s8229_s13 = sand.u32 2147483647, %s3532_s28 }
 0x11b   :  { %s1038_s5 = sadd.f32 %s1037_s7, %s8229_s13  ;;  %s3606_s6 = sld [smem:[#allocation2 + $0x380]] }
 0x11c   :  { %s893_s10 = sadd.f32 %s892_s12, %s8227_s30  ;;  %s8231_s22 = sand.u32 2147483647, %s8219_s27 }
 0x11d   :  { %s8232_s11 = sld [smem:[#allocation120_spill]]  ;;  %s3610_s16 = sld [smem:[#allocation2 + $0x381]] }
 0x11e   :  { %s894_s29 = sadd.f32 %s893_s10, %s8231_s22  ;;  %s8234_s18 = sand.u32 2147483647, %s3536_s21 }
 0x11f   :  { %s1039_s14 = sadd.f32 %s1038_s5, %s8234_s18  ;;  %s3614_s26 = sld [smem:[#allocation2 + $0x382]] }
 0x120   :  { %v895_v10 = vstv %s894_s29  ;;  %s8236_s30 = sld [smem:[#allocation121_spill]]  ;;  %s3616_s17 = sld [smem:[#allocation2 + $0x383]] }
 0x121   :  { %8230 = sst [smem:[#allocation130_spill]] %s3606_s6  ;;  %s3618_s13 = sld [smem:[#allocation2 + $0x384]]  ;;  %2910 = vrcp.f32 %v895_v10 }
 0x122   :  { %s8239_s7 = sand.u32 2147483647, %s8226_s3  ;;  %s8240_s10 = sld [smem:[#allocation122_spill]] }
 0x123   :  { %8233 = sst [smem:[#allocation131_spill]] %s3610_s16  ;;  %s3622_s12 = sld [smem:[#allocation2 + $0x385]] }
 0x124   :  { %s1040_s22 = sadd.f32 %s1039_s14, %s8239_s7  ;;  %s3624_s25 = sld [smem:[#allocation2 + $0x386]] }
 0x125   :  { %8235 = sst [smem:[#allocation132_spill]] %s3614_s26  ;;  %s3626_s5 = sld [smem:[#allocation2 + $0x387]] }
 0x126   :  { %8237 = sst [smem:[#allocation133_spill]] %s3616_s17  ;;  %s8244_s29 = sand.u32 2147483647, %s8228_s1 }
 0x127   :  { %8238 = sst [smem:[#allocation134_spill]] %s3618_s13  ;;  %s8245_s20 = smov %s3564_s24 }
 0x128   :  { %s1041_s18 = sadd.f32 %s1040_s22, %s8244_s29  ;;  %s3632_s21 = sld [smem:[#allocation2 + $0x388]] }
 0x129   :  { %8241 = sst [smem:[#allocation135_spill]] %s3622_s12  ;;  %s8247_s28 = sand.u32 2147483647, %s8232_s11 }
 0x12a   :  { %8242 = sst [smem:[#allocation136_spill]] %s3624_s25  ;;  %s8248_s27 = sld [smem:[#allocation124_spill]] }
 0x12b   :  { %8243 = sst [smem:[#allocation137_spill]] %s3626_s5  ;;  %s8249_s23 = sand.u32 2147483647, %s8236_s30  ;;  %v2911_v11 = vpop.eup %2910 }
 0x12c   :  { %s1042_s14 = sadd.f32 %s1041_s18, %s8247_s28  ;;  %s8250_s2 = sand.u32 2147483647, %s8240_s10  ;;  %2873 = vpush %v2911_v11 }
 0x12d   :  { %s3646_s29 = sld [smem:[#allocation2 + $0x389]]  ;;  %s8252_s24 = sld [smem:[#allocation126_spill]] }
 0x12e   :  { %8246 = sst [smem:[#allocation138_spill]] %s3632_s21  ;;  %s3649_s28 = sld [smem:[#allocation2 + $0x38a]] }
 0x12f   :  { %s1043_s0 = sadd.f32 %s1042_s14, %s8249_s23  ;;  %s8254_s18 = sand.u32 2147483647, %s8245_s20 }
 0x130   :  { %s3653_s23 = sld [smem:[#allocation2 + $0x38b]]  ;;  %s8256_s14 = smov %s3577_s4 }
 0x131   :  { %s1044_s22 = sadd.f32 %s1043_s0, %s8250_s2  ;;  %s3655_s1 = sld [smem:[#allocation2 + $0x38c]] }
 0x132   :  { %s3657_s0 = sld [smem:[#allocation2 + $0x38d]]  ;;  %s8259_s2 = sand.u32 2147483647, %s8248_s27 }
 0x133   :  { %8251 = sst [smem:[#allocation139_spill]] %s3646_s29  ;;  %s8260_s4 = smov %s3579_s19 }
 0x134   :  { %8253 = sst [smem:[#allocation140_spill]] %s3649_s28  ;;  %s3661_s19 = sld [smem:[#allocation2 + $0x38e]] }
 0x135   :  { %s1045_s9 = sadd.f32 %s1044_s22, %s8254_s18  ;;  %s3663_s3 = sld [smem:[#allocation2 + $0x38f]] }
 0x136   :  { %8255 = sst [smem:[#allocation141_spill]] %s3653_s23  ;;  %s3665_s22 = sld [smem:[#allocation2 + $0x390]] }
 0x137   :  { %8257 = sst [smem:[#allocation142_spill]] %s3655_s1  ;;  %s8264_s18 = sand.u32 2147483647, %s3571_s15 }
 0x138   :  { %8258 = sst [smem:[#allocation143_spill]] %s3657_s0  ;;  %s8265_s20 = sld [smem:[#allocation129_spill]] }
 0x139   :  { %s1046_s8 = sadd.f32 %s1045_s9, %s8259_s2  ;;  %s8266_s11 = sand.u32 2147483647, %s3606_s6 }
 0x13a   :  { %8261 = sst [smem:[#allocation144_spill]] %s3661_s19  ;;  %s8267_s27 = sand.u32 2147483647, %s3610_s16 }
 0x13b   :  { %8262 = sst [smem:[#allocation145_spill]] %s3663_s3  ;;  %s8268_s2 = sand.u32 2147483647, %s8252_s24 }
 0x13c   :  { %8263 = sst [smem:[#allocation146_spill]] %s3665_s22  ;;  %s8269_s13 = sand.u32 2147483647, %s8256_s14 }
 0x13d   :  { %s1047_s7 = sadd.f32 %s1046_s8, %s8264_s18  ;;  %s8270_s8 = sld [smem:[#allocation134_spill]] }
 0x13e   :  { %s1193_s9 = sadd.f32 %s8267_s27, %s8266_s11  ;;  %s8271_s28 = sand.u32 2147483647, %s8260_s4 }
 0x13f   :  { %s1048_s21 = sadd.f32 %s1047_s7, %s8268_s2  ;;  %s8272_s6 = smov %s3622_s12 }
 0x140   :  { %s3687_s16 = sld [smem:[#allocation2 + $0x400]]  ;;  %s8274_s11 = sand.u32 2147483647, %s3614_s26 }
 0x141   :  { %s1049_s15 = sadd.f32 %s1048_s21, %s8269_s13  ;;  %s3691_s24 = sld [smem:[#allocation2 + $0x401]] }
 0x142   :  { %s1194_s27 = sadd.f32 %s1193_s9, %s8274_s11  ;;  %s8276_s7 = sand.u32 2147483647, %s8265_s20 }
 0x143   :  { %s1050_s30 = sadd.f32 %s1049_s15, %s8271_s28  ;;  %s8277_s12 = smov %s3624_s25 }
 0x144   :  { %s3695_s25 = sld [smem:[#allocation2 + $0x402]]  ;;  %s8279_s21 = sand.u32 2147483647, %s3616_s17 }
 0x145   :  { %s1051_s2 = sadd.f32 %s1050_s30, %s8276_s7  ;;  %s3699_s29 = sld [smem:[#allocation2 + $0x403]] }
 0x146   :  { %8273 = sst [smem:[#allocation147_spill]] %s3687_s16  ;;  %s8281_s15 = smov %s3626_s5 }
 0x147   :  { %8275 = sst [smem:[#allocation148_spill]] %s3691_s24  ;;  %v1052_v12 = vstv %s1051_s2  ;;  %s3701_s28 = sld [smem:[#allocation2 + $0x404]] }
 0x148   :  { %s1195_s13 = sadd.f32 %s1194_s27, %s8279_s21  ;;  %s3703_s9 = sld [smem:[#allocation2 + $0x405]]  ;;  %2912 = vrcp.f32 %v1052_v12 }
 0x149   :  { %s8284_s11 = sand.u32 2147483647, %s8270_s8  ;;  %s8285_s7 = sld [smem:[#allocation138_spill]] }
 0x14a   :  { %8278 = sst [smem:[#allocation149_spill]] %s3695_s25  ;;  %s3707_s10 = sld [smem:[#allocation2 + $0x406]] }
 0x14b   :  { %8280 = sst [smem:[#allocation150_spill]] %s3699_s29  ;;  %s3710_s27 = sld [smem:[#allocation2 + $0x407]] }
 0x14c   :  { %s1196_s30 = sadd.f32 %s1195_s13, %s8284_s11  ;;  %s8288_s21 = sand.u32 2147483647, %s8272_s6 }
 0x14d   :  { %8282 = sst [smem:[#allocation151_spill]] %s3701_s28  ;;  %s8289_s17 = sld [smem:[#allocation139_spill]] }
 0x14e   :  { %8283 = sst [smem:[#allocation152_spill]] %s3703_s9  ;;  %s3716_s20 = sld [smem:[#allocation2 + $0x408]] }
 0x14f   :  { %s1197_s2 = sadd.f32 %s1196_s30, %s8288_s21  ;;  %s8291_s4 = sand.u32 2147483647, %s8277_s12 }
 0x150   :  { %8286 = sst [smem:[#allocation153_spill]] %s3707_s10  ;;  %s8292_s11 = sld [smem:[#allocation140_spill]] }
 0x151   :  { %8287 = sst [smem:[#allocation154_spill]] %s3710_s27  ;;  %s8293_s3 = sand.u32 2147483647, %s8281_s15 }
 0x152   :  { %s1198_s14 = sadd.f32 %s1197_s2, %s8291_s4  ;;  %s3727_s6 = sld [smem:[#allocation2 + $0x409]]  ;;  %v2913_v13 = vpop.eup %2912 }
 0x153   :  { %s8295_s30 = sand.u32 2147483647, %s8285_s7  ;;  %s3731_s26 = sld [smem:[#allocation2 + $0x40a]]  ;;  %2875 = vpush %v2913_v13 }
 0x154   :  { %8290 = sst [smem:[#allocation155_spill]] %s3716_s20  ;;  %s3734_s2 = sld [smem:[#allocation2 + $0x40b]] }
 0x155   :  { %s1199_s19 = sadd.f32 %s1198_s14, %s8293_s3  ;;  %s8298_s3 = sand.u32 2147483647, %s8289_s17 }
 0x156   :  { %s3738_s0 = sld [smem:[#allocation2 + $0x40c]]  ;;  %s3740_s22 = sld [smem:[#allocation2 + $0x40d]] }
 0x157   :  { %s1200_s21 = sadd.f32 %s1199_s19, %s8295_s30  ;;  %s8300_s18 = sld [smem:[#allocation143_spill]] }
 0x158   :  { %8294 = sst [smem:[#allocation156_spill]] %s3727_s6  ;;  %s3742_s19 = sld [smem:[#allocation2 + $0x40e]] }
 0x159   :  { %8296 = sst [smem:[#allocation157_spill]] %s3731_s26  ;;  %s8303_s30 = sand.u32 2147483647, %s8292_s11 }
 0x15a   :  { %8297 = sst [smem:[#allocation158_spill]] %s3734_s2  ;;  %s8304_s13 = sld [smem:[#allocation144_spill]] }
 0x15b   :  { %s1201_s14 = sadd.f32 %s1200_s21, %s8298_s3  ;;  %s3746_s8 = sld [smem:[#allocation2 + $0x40f]] }
 0x15c   :  { %8299 = sst [smem:[#allocation159_spill]] %s3738_s0  ;;  %s3749_s21 = sld [smem:[#allocation2 + $0x410]] }
 0x15d   :  { %8301 = sst [smem:[#allocation160_spill]] %s3740_s22  ;;  %s8307_s3 = sand.u32 2147483647, %s3653_s23 }
 0x15e   :  { %8302 = sst [smem:[#allocation161_spill]] %s3742_s19  ;;  %s8309_s20 = sand.u32 2147483647, %s3687_s16 }
 0x15f   :  { %s1202_s4 = sadd.f32 %s1201_s14, %s8303_s30  ;;  %s8308_s7 = sld [smem:[#allocation145_spill]] }
 0x160   :  { %s8310_s27 = sand.u32 2147483647, %s3691_s24  ;;  %s8311_s10 = sand.u32 2147483647, %s3655_s1 }
 0x161   :  { %8305 = sst [smem:[#allocation162_spill]] %s3746_s8  ;;  %s8313_s6 = smov %s3703_s9 }
 0x162   :  { %8306 = sst [smem:[#allocation163_spill]] %s3749_s21  ;;  %s8312_s30 = sld [smem:[#allocation146_spill]] }
 0x163   :  { %s1203_s17 = sadd.f32 %s1202_s4, %s8307_s3  ;;  %s8314_s3 = sand.u32 2147483647, %s8300_s18 }
 0x164   :  { %s1350_s11 = sadd.f32 %s8310_s27, %s8309_s20  ;;  %s8315_s2 = sand.u32 2147483647, %s3695_s25 }
 0x165   :  { %s1204_s14 = sadd.f32 %s1203_s17, %s8311_s10  ;;  %s8316_s16 = sand.u32 2147483647, %s8304_s13 }
 0x166   :  { %s1351_s12 = sadd.f32 %s1350_s11, %s8315_s2  ;;  %s8317_s20 = sld [smem:[#allocation153_spill]] }
 0x167   :  { %s1205_s4 = sadd.f32 %s1204_s14, %s8314_s3  ;;  %s3772_s27 = sld [smem:[#allocation2 + $0x480]] }
 0x168   :  { %s8319_s1 = sand.u32 2147483647, %s3699_s29  ;;  %s3776_s17 = sld [smem:[#allocation2 + $0x481]] }
 0x169   :  { %s1206_s24 = sadd.f32 %s1205_s4, %s8316_s16  ;;  %s8321_s9 = sand.u32 2147483647, %s8308_s7 }
 0x16a   :  { %s1352_s10 = sadd.f32 %s1351_s12, %s8319_s1  ;;  %s8322_s23 = sld [smem:[#allocation154_spill]] }
 0x16b   :  { %s1207_s5 = sadd.f32 %s1206_s24, %s8321_s9  ;;  %s3780_s18 = sld [smem:[#allocation2 + $0x482]] }
 0x16c   :  { %s8324_s14 = sand.u32 2147483647, %s3701_s28  ;;  %s3784_s11 = sld [smem:[#allocation2 + $0x483]] }
 0x16d   :  { %8318 = sst [smem:[#allocation164_spill]] %s3772_s27  ;;  %s8326_s16 = sand.u32 2147483647, %s8312_s30 }
 0x16e   :  { %8320 = sst [smem:[#allocation165_spill]] %s3776_s17  ;;  %s8327_s4 = sld [smem:[#allocation155_spill]] }
 0x16f   :  { %s1353_s3 = sadd.f32 %s1352_s10, %s8324_s14  ;;  %s3788_s26 = sld [smem:[#allocation2 + $0x484]] }
 0x170   :  { %s1208_s2 = sadd.f32 %s1207_s5, %s8326_s16  ;;  %s8329_s1 = sand.u32 2147483647, %s8313_s6 }
 0x171   :  { %8323 = sst [smem:[#allocation166_spill]] %s3780_s18  ;;  %s3792_s15 = sld [smem:[#allocation2 + $0x485]] }
 0x172   :  { %8325 = sst [smem:[#allocation167_spill]] %s3784_s11  ;;  %v1209_v14 = vstv %s1208_s2  ;;  %s8331_s24 = sld [smem:[#allocation156_spill]] }
 0x173   :  { %s1354_s12 = sadd.f32 %s1353_s3, %s8329_s1  ;;  %s3795_s28 = sld [smem:[#allocation2 + $0x486]]  ;;  %2914 = vrcp.f32 %v1209_v14 }
 0x174   :  { %s8333_s10 = sand.u32 2147483647, %s8317_s20  ;;  %s8334_s29 = sld [smem:[#allocation157_spill]] }
 0x175   :  { %8328 = sst [smem:[#allocation168_spill]] %s3788_s26  ;;  %s3801_s25 = sld [smem:[#allocation2 + $0x487]] }
 0x176   :  { %s1355_s14 = sadd.f32 %s1354_s12, %s8333_s10  ;;  %s8336_s6 = sand.u32 2147483647, %s8322_s23 }
 0x177   :  { %8330 = sst [smem:[#allocation169_spill]] %s3792_s15  ;;  %s8337_s30 = sld [smem:[#allocation158_spill]] }
 0x178   :  { %s1356_s3 = sadd.f32 %s1355_s14, %s8336_s6  ;;  %s3807_s2 = sld [smem:[#allocation2 + $0x488]] }
 0x179   :  { %8332 = sst [smem:[#allocation170_spill]] %s3795_s28  ;;  %s8339_s9 = sand.u32 2147483647, %s8327_s4 }
 0x17a   :  { %s1357_s13 = sadd.f32 %s1356_s3, %s8339_s9  ;;  %s3813_s12 = sld [smem:[#allocation2 + $0x489]] }
 0x17b   :  { %8335 = sst [smem:[#allocation171_spill]] %s3801_s25  ;;  %s8341_s10 = sand.u32 2147483647, %s8331_s24 }
 0x17c   :  { %s1358_s16 = sadd.f32 %s1357_s13, %s8341_s10  ;;  %s3817_s5 = sld [smem:[#allocation2 + $0x48a]] }
 0x17d   :  { %s3820_s14 = sld [smem:[#allocation2 + $0x48b]]  ;;  %s8344_s7 = sand.u32 2147483647, %s8334_s29  ;;  %v2915_v15 = vpop.eup %2914 }
 0x17e   :  { %8338 = sst [smem:[#allocation172_spill]] %s3807_s2  ;;  %s3824_s4 = sld [smem:[#allocation2 + $0x48c]]  ;;  %2877 = vpush %v2915_v15 }
 0x17f   :  { %s1359_s1 = sadd.f32 %s1358_s16, %s8344_s7  ;;  %s3827_s3 = sld [smem:[#allocation2 + $0x48d]] }
 0x180   :  { %8340 = sst [smem:[#allocation173_spill]] %s3813_s12  ;;  %s8347_s13 = sand.u32 2147483647, %s8337_s30 }
 0x181   :  { %s1360_s10 = sadd.f32 %s1359_s1, %s8347_s13  ;;  %s3831_s6 = sld [smem:[#allocation2 + $0x48e]] }
 0x182   :  { %8342 = sst [smem:[#allocation174_spill]] %s3817_s5  ;;  %s3834_s16 = sld [smem:[#allocation2 + $0x48f]] }
 0x183   :  { %8343 = sst [smem:[#allocation175_spill]] %s3820_s14  ;;  %s8350_s21 = sand.u32 2147483647, %s3738_s0 }
 0x184   :  { %8345 = sst [smem:[#allocation176_spill]] %s3824_s4  ;;  %s8351_s29 = sld [smem:[#allocation163_spill]] }
 0x185   :  { %8346 = sst [smem:[#allocation177_spill]] %s3827_s3  ;;  %s3840_s20 = sld [smem:[#allocation2 + $0x490]] }
 0x186   :  { %s1361_s9 = sadd.f32 %s1360_s10, %s8350_s21  ;;  %s8353_s1 = sand.u32 2147483647, %s3740_s22 }
 0x187   :  { %8348 = sst [smem:[#allocation178_spill]] %s3831_s6  ;;  %s8354_s25 = sand.u32 2147483647, %s3772_s27 }
 0x188   :  { %8349 = sst [smem:[#allocation179_spill]] %s3834_s16  ;;  %s8355_s28 = sand.u32 2147483647, %s3776_s17 }
 0x189   :  { %s1362_s13 = sadd.f32 %s1361_s9, %s8353_s1  ;;  %s8356_s12 = sand.u32 2147483647, %s3742_s19 }
 0x18a   :  { %s1507_s7 = sadd.f32 %s8355_s28, %s8354_s25  ;;  %s8357_s0 = sld [smem:[#allocation169_spill]] }
 0x18b   :  { %8352 = sst [smem:[#allocation180_spill]] %s3840_s20  ;;  %s8358_s5 = sand.u32 2147483647, %s3780_s18 }
 0x18c   :  { %s1363_s15 = sadd.f32 %s1362_s13, %s8356_s12  ;;  %s8359_s14 = sand.u32 2147483647, %s3746_s8 }
 0x18d   :  { %s1508_s24 = sadd.f32 %s1507_s7, %s8358_s5  ;;  %s8360_s22 = sld [smem:[#allocation170_spill]] }
 0x18e   :  { %s1364_s23 = sadd.f32 %s1363_s15, %s8359_s14  ;;  %s3858_s1 = sld [smem:[#allocation2 + $0x500]] }
 0x18f   :  { %s8362_s4 = sand.u32 2147483647, %s3784_s11  ;;  %s8363_s2 = sand.u32 2147483647, %s8351_s29 }
 0x190   :  { %s1509_s30 = sadd.f32 %s1508_s24, %s8362_s4  ;;  %s8364_s17 = sld [smem:[#allocation171_spill]] }
 0x191   :  { %s1365_s27 = sadd.f32 %s1364_s23, %s8363_s2  ;;  %s3865_s25 = sld [smem:[#allocation2 + $0x501]] }
 0x192   :  { %s8366_s28 = sand.u32 2147483647, %s3788_s26  ;;  %s3869_s13 = sld [smem:[#allocation2 + $0x502]] }
 0x193   :  { %s1510_s12 = sadd.f32 %s1509_s30, %s8366_s28  ;;  %v1366_v16 = vstv %s1365_s27  ;;  %s8368_s15 = sld [smem:[#allocation172_spill]] }
 0x194   :  { %8361 = sst [smem:[#allocation181_spill]] %s3858_s1  ;;  %s3871_s5 = sld [smem:[#allocation2 + $0x503]]  ;;  %2916 = vrcp.f32 %v1366_v16 }
 0x195   :  { %s3873_s14 = sld [smem:[#allocation2 + $0x504]]  ;;  %s8371_s4 = sand.u32 2147483647, %s8357_s0 }
 0x196   :  { %s1511_s23 = sadd.f32 %s1510_s12, %s8371_s4  ;;  %s8372_s24 = sld [smem:[#allocation173_spill]] }
 0x197   :  { %8365 = sst [smem:[#allocation182_spill]] %s3865_s25  ;;  %s3877_s2 = sld [smem:[#allocation2 + $0x505]] }
 0x198   :  { %8367 = sst [smem:[#allocation183_spill]] %s3869_s13  ;;  %s3880_s30 = sld [smem:[#allocation2 + $0x506]] }
 0x199   :  { %s8375_s28 = sand.u32 2147483647, %s8360_s22  ;;  %s3884_s9 = sld [smem:[#allocation2 + $0x507]] }
 0x19a   :  { %8369 = sst [smem:[#allocation184_spill]] %s3871_s5  ;;  %s8377_s21 = sld [smem:[#allocation174_spill]] }
 0x19b   :  { %8370 = sst [smem:[#allocation185_spill]] %s3873_s14  ;;  %s3887_s26 = sld [smem:[#allocation2 + $0x508]] }
 0x19c   :  { %s1512_s27 = sadd.f32 %s1511_s23, %s8375_s28  ;;  %s8379_s11 = sand.u32 2147483647, %s8364_s17 }
 0x19d   :  { %8373 = sst [smem:[#allocation186_spill]] %s3877_s2  ;;  %s8380_s18 = sld [smem:[#allocation175_spill]] }
 0x19e   :  { %8374 = sst [smem:[#allocation187_spill]] %s3880_s30  ;;  %s8381_s7 = sand.u32 2147483647, %s8368_s15  ;;  %v2917_v17 = vpop.eup %2916 }
 0x19f   :  { %8376 = sst [smem:[#allocation188_spill]] %s3884_s9  ;;  %s8382_s20 = sld [smem:[#allocation176_spill]]  ;;  %2879 = vpush %v2917_v17 }
 0x1a0   :  { %s1513_s12 = sadd.f32 %s1512_s27, %s8379_s11  ;;  %s3898_s23 = sld [smem:[#allocation2 + $0x509]] }
 0x1a1   :  { %8378 = sst [smem:[#allocation189_spill]] %s3887_s26  ;;  %s8384_s28 = sand.u32 2147483647, %s8372_s24 }
 0x1a2   :  { %s1514_s8 = sadd.f32 %s1513_s12, %s8381_s7  ;;  %s3904_s11 = sld [smem:[#allocation2 + $0x50a]] }
 0x1a3   :  { %s8386_s27 = sand.u32 2147483647, %s8377_s21  ;;  %s3908_s7 = sld [smem:[#allocation2 + $0x50b]] }
 0x1a4   :  { %s1515_s16 = sadd.f32 %s1514_s8, %s8384_s28  ;;  %s3910_s12 = sld [smem:[#allocation2 + $0x50c]] }
 0x1a5   :  { %s3912_s8 = sld [smem:[#allocation2 + $0x50d]]  ;;  %s8390_s28 = sand.u32 2147483647, %s8380_s18 }
 0x1a6   :  { %8383 = sst [smem:[#allocation190_spill]] %s3898_s23  ;;  %s8391_s10 = sld [smem:[#allocation179_spill]] }
 0x1a7   :  { %s1516_s29 = sadd.f32 %s1515_s16, %s8386_s27  ;;  %s3916_s22 = sld [smem:[#allocation2 + $0x50e]] }
 0x1a8   :  { %8385 = sst [smem:[#allocation191_spill]] %s3904_s11  ;;  %s3919_s16 = sld [smem:[#allocation2 + $0x50f]] }
 0x1a9   :  { %8387 = sst [smem:[#allocation192_spill]] %s3908_s7  ;;  %s8394_s27 = sand.u32 2147483647, %s8382_s20 }
 0x1aa   :  { %8388 = sst [smem:[#allocation193_spill]] %s3910_s12  ;;  %s8395_s4 = sld [smem:[#allocation180_spill]] }
 0x1ab   :  { %8389 = sst [smem:[#allocation194_spill]] %s3912_s8  ;;  %s3923_s21 = sld [smem:[#allocation2 + $0x510]] }
 0x1ac   :  { %s1517_s17 = sadd.f32 %s1516_s29, %s8390_s28  ;;  %s8397_s18 = sand.u32 2147483647, %s3858_s1 }
 0x1ad   :  { %8392 = sst [smem:[#allocation195_spill]] %s3916_s22  ;;  %s8398_s15 = sand.u32 2147483647, %s3865_s25 }
 0x1ae   :  { %8393 = sst [smem:[#allocation196_spill]] %s3919_s16  ;;  %s8399_s28 = sand.u32 2147483647, %s3827_s3 }
 0x1af   :  { %s1518_s0 = sadd.f32 %s1517_s17, %s8394_s27  ;;  %s8400_s23 = sand.u32 2147483647, %s3831_s6 }
 0x1b0   :  { %s1664_s29 = sadd.f32 %s8398_s15, %s8397_s18  ;;  %s8401_s20 = sld [smem:[#allocation186_spill]] }
 0x1b1   :  { %8396 = sst [smem:[#allocation197_spill]] %s3923_s21  ;;  %s8402_s11 = sand.u32 2147483647, %s3869_s13 }
 0x1b2   :  { %s1519_s26 = sadd.f32 %s1518_s0, %s8399_s28  ;;  %s8403_s1 = sand.u32 2147483647, %s8391_s10 }
 0x1b3   :  { %s1665_s24 = sadd.f32 %s1664_s29, %s8402_s11  ;;  %s8404_s15 = smov %s3880_s30 }
 0x1b4   :  { %s1520_s2 = sadd.f32 %s1519_s26, %s8400_s23  ;;  %s8405_s3 = sand.u32 2147483647, %s3871_s5 }
 0x1b5   :  { %s1666_s0 = sadd.f32 %s1665_s24, %s8405_s3  ;;  %s3946_s28 = sld [smem:[#allocation2 + $0x580]] }
 0x1b6   :  { %s1521_s25 = sadd.f32 %s1520_s2, %s8403_s1  ;;  %s8407_s7 = sand.u32 2147483647, %s8395_s4 }
 0x1b7   :  { %s8408_s30 = sld [smem:[#allocation188_spill]]  ;;  %s8410_s26 = sand.u32 2147483647, %s3873_s14 }
 0x1b8   :  { %s1522_s9 = sadd.f32 %s1521_s25, %s8407_s7  ;;  %s3950_s19 = sld [smem:[#allocation2 + $0x581]] }
 0x1b9   :  { %s1667_s23 = sadd.f32 %s1666_s0, %s8410_s26  ;;  %s3954_s27 = sld [smem:[#allocation2 + $0x582]] }
 0x1ba   :  { %v1523_v18 = vstv %s1522_s9  ;;  %s8412_s1 = sld [smem:[#allocation189_spill]]  ;;  %s3956_s2 = sld [smem:[#allocation2 + $0x583]] }
 0x1bb   :  { %8406 = sst [smem:[#allocation198_spill]] %s3946_s28  ;;  %s3958_s3 = sld [smem:[#allocation2 + $0x584]]  ;;  %2918 = vrcp.f32 %v1523_v18  ;;  %v40_v18 = vcvt.s32.f32 %v4338_v31 }
 0x1bc   :  { %s8415_s24 = sand.u32 2147483647, %s8401_s20  ;;  %s8416_s11 = sld [smem:[#allocation190_spill]] }
 0x1bd   :  { %s1668_s25 = sadd.f32 %s1667_s23, %s8415_s24  ;;  %s3962_s7 = sld [smem:[#allocation2 + $0x585]]  ;;  %v4612_v31 = vsub.f32 %v4311_v28, %v40_v18 }
 0x1be   :  { %8409 = sst [smem:[#allocation199_spill]] %s3950_s19  ;;  %s3964_s29 = sld [smem:[#allocation2 + $0x586]] }
 0x1bf   :  { %8411 = sst [smem:[#allocation200_spill]] %s3954_s27  ;;  %s3966_s0 = sld [smem:[#allocation2 + $0x587]] }
 0x1c0   :  { %8413 = sst [smem:[#allocation201_spill]] %s3956_s2  ;;  %s8420_s9 = sand.u32 2147483647, %s8404_s15 }
 0x1c1   :  { %8414 = sst [smem:[#allocation202_spill]] %s3958_s3  ;;  %s8421_s17 = sld [smem:[#allocation191_spill]] }
 0x1c2   :  { %s1669_s26 = sadd.f32 %s1668_s25, %s8420_s9  ;;  %s3972_s5 = sld [smem:[#allocation2 + $0x588]] }
 0x1c3   :  { %8417 = sst [smem:[#allocation203_spill]] %s3962_s7  ;;  %s8423_s13 = sand.u32 2147483647, %s8408_s30 }
 0x1c4   :  { %8418 = sst [smem:[#allocation204_spill]] %s3964_s29  ;;  %s8424_s4 = sld [smem:[#allocation192_spill]] }
 0x1c5   :  { %8419 = sst [smem:[#allocation205_spill]] %s3966_s0  ;;  %s8425_s6 = sand.u32 2147483647, %s8412_s1  ;;  %v2919_v19 = vpop.eup %2918 }
 0x1c6   :  { %s1670_s23 = sadd.f32 %s1669_s26, %s8423_s13  ;;  %s8426_s8 = sand.u32 2147483647, %s8416_s11  ;;  %2881 = vpush %v2919_v19 }
 0x1c7   :  { %s3986_s9 = sld [smem:[#allocation2 + $0x589]]  ;;  %s8428_s18 = sld [smem:[#allocation194_spill]] }
 0x1c8   :  { %8422 = sst [smem:[#allocation206_spill]] %s3972_s5  ;;  %s3989_s13 = sld [smem:[#allocation2 + $0x58a]] }
 0x1c9   :  { %s1671_s21 = sadd.f32 %s1670_s23, %s8425_s6  ;;  %s8430_s26 = sand.u32 2147483647, %s8421_s17 }
 0x1ca   :  { %s3993_s6 = sld [smem:[#allocation2 + $0x58b]]  ;;  %s8432_s23 = smov %s3916_s22 }
 0x1cb   :  { %s1672_s25 = sadd.f32 %s1671_s21, %s8426_s8  ;;  %s3995_s15 = sld [smem:[#allocation2 + $0x58c]] }
 0x1cc   :  { %s3997_s21 = sld [smem:[#allocation2 + $0x58d]]  ;;  %s8435_s8 = sand.u32 2147483647, %s8424_s4 }
 0x1cd   :  { %8427 = sst [smem:[#allocation207_spill]] %s3986_s9  ;;  %s8436_s22 = smov %s3919_s16 }
 0x1ce   :  { %8429 = sst [smem:[#allocation208_spill]] %s3989_s13  ;;  %s4001_s16 = sld [smem:[#allocation2 + $0x58e]] }
 0x1cf   :  { %s1673_s10 = sadd.f32 %s1672_s25, %s8430_s26  ;;  %s4003_s20 = sld [smem:[#allocation2 + $0x58f]] }
 0x1d0   :  { %8431 = sst [smem:[#allocation209_spill]] %s3993_s6  ;;  %s4005_s25 = sld [smem:[#allocation2 + $0x590]] }
 0x1d1   :  { %8433 = sst [smem:[#allocation210_spill]] %s3995_s15  ;;  %s8440_s26 = sand.u32 2147483647, %s3910_s12 }
 0x1d2   :  { %8434 = sst [smem:[#allocation211_spill]] %s3997_s21  ;;  %s8441_s17 = sld [smem:[#allocation197_spill]] }
 0x1d3   :  { %s1674_s14 = sadd.f32 %s1673_s10, %s8435_s8  ;;  %s8442_s30 = sand.u32 2147483647, %s3946_s28 }
 0x1d4   :  { %8437 = sst [smem:[#allocation212_spill]] %s4001_s16  ;;  %s8443_s4 = sand.u32 2147483647, %s3950_s19 }
 0x1d5   :  { %8438 = sst [smem:[#allocation213_spill]] %s4003_s20  ;;  %s8444_s8 = sand.u32 2147483647, %s8428_s18 }
 0x1d6   :  { %8439 = sst [smem:[#allocation214_spill]] %s4005_s25  ;;  %s8445_s3 = sand.u32 2147483647, %s8432_s23 }
 0x1d7   :  { %s1675_s24 = sadd.f32 %s1674_s14, %s8440_s26  ;;  %s8446_s14 = sld [smem:[#allocation202_spill]] }
 0x1d8   :  { %s1821_s10 = sadd.f32 %s8443_s4, %s8442_s30  ;;  %s8447_s1 = sand.u32 2147483647, %s8436_s22 }
 0x1d9   :  { %s1676_s5 = sadd.f32 %s1675_s24, %s8444_s8  ;;  %s8448_s28 = smov %s3962_s7 }
 0x1da   :  { %s4027_s19 = sld [smem:[#allocation2 + $0x600]]  ;;  %s8450_s4 = sand.u32 2147483647, %s3954_s27 }
 0x1db   :  { %s1677_s12 = sadd.f32 %s1676_s5, %s8445_s3  ;;  %s4031_s18 = sld [smem:[#allocation2 + $0x601]] }
 0x1dc   :  { %s1822_s30 = sadd.f32 %s1821_s10, %s8450_s4  ;;  %s8452_s24 = sand.u32 2147483647, %s8441_s17 }
 0x1dd   :  { %s1678_s13 = sadd.f32 %s1677_s12, %s8447_s1  ;;  %s8453_s7 = smov %s3964_s29 }
 0x1de   :  { %s4035_s29 = sld [smem:[#allocation2 + $0x602]]  ;;  %s8455_s5 = sand.u32 2147483647, %s3956_s2 }
 0x1df   :  { %s1679_s8 = sadd.f32 %s1678_s13, %s8452_s24  ;;  %s4039_s11 = sld [smem:[#allocation2 + $0x603]] }
 0x1e0   :  { %8449 = sst [smem:[#allocation215_spill]] %s4027_s19  ;;  %s8457_s12 = smov %s3966_s0 }
 0x1e1   :  { %8451 = sst [smem:[#allocation216_spill]] %s4031_s18  ;;  %v1680_v20 = vstv %s1679_s8  ;;  %s4041_s1 = sld [smem:[#allocation2 + $0x604]] }
 0x1e2   :  { %s1823_s3 = sadd.f32 %s1822_s30, %s8455_s5  ;;  %s4043_s10 = sld [smem:[#allocation2 + $0x605]]  ;;  %2920 = vrcp.f32 %v1680_v20 }
 0x1e3   :  { %s8460_s4 = sand.u32 2147483647, %s8446_s14  ;;  %s8461_s24 = sld [smem:[#allocation206_spill]] }
 0x1e4   :  { %8454 = sst [smem:[#allocation217_spill]] %s4035_s29  ;;  %s4050_s30 = sld [smem:[#allocation2 + $0x607]] }
 0x1e5   :  { %8456 = sst [smem:[#allocation218_spill]] %s4039_s11  ;;  %s4047_s9 = sld [smem:[#allocation2 + $0x606]] }
 0x1e6   :  { %s1824_s13 = sadd.f32 %s1823_s3, %s8460_s4  ;;  %s8464_s5 = sand.u32 2147483647, %s8448_s28 }
 0x1e7   :  { %8458 = sst [smem:[#allocation219_spill]] %s4041_s1  ;;  %s8465_s2 = sld [smem:[#allocation207_spill]] }
 0x1e8   :  { %8459 = sst [smem:[#allocation220_spill]] %s4043_s10  ;;  %s4056_s17 = sld [smem:[#allocation2 + $0x608]] }
 0x1e9   :  { %s1825_s8 = sadd.f32 %s1824_s13, %s8464_s5  ;;  %s8467_s22 = sand.u32 2147483647, %s8453_s7 }
 0x1ea   :  { %8463 = sst [smem:[#allocation222_spill]] %s4050_s30  ;;  %s8468_s4 = sld [smem:[#allocation208_spill]] }
 0x1eb   :  { %8462 = sst [smem:[#allocation221_spill]] %s4047_s9  ;;  %s8469_s20 = sand.u32 2147483647, %s8457_s12 }
 0x1ec   :  { %s1826_s23 = sadd.f32 %s1825_s8, %s8467_s22  ;;  %s4067_s28 = sld [smem:[#allocation2 + $0x609]]  ;;  %v2921_v21 = vpop.eup %2920 }
 0x1ed   :  { %s8471_s13 = sand.u32 2147483647, %s8461_s24  ;;  %s4071_s27 = sld [smem:[#allocation2 + $0x60a]]  ;;  %2883 = vpush %v2921_v21 }
 0x1ee   :  { %8466 = sst [smem:[#allocation223_spill]] %s4056_s17  ;;  %s4074_s8 = sld [smem:[#allocation2 + $0x60b]] }
 0x1ef   :  { %s1827_s16 = sadd.f32 %s1826_s23, %s8469_s20  ;;  %s8474_s20 = sand.u32 2147483647, %s8465_s2 }
 0x1f0   :  { %s4078_s21 = sld [smem:[#allocation2 + $0x60c]]  ;;  %s8476_s26 = sld [smem:[#allocation211_spill]] }
 0x1f1   :  { %s1828_s5 = sadd.f32 %s1827_s16, %s8471_s13  ;;  %s4080_s25 = sld [smem:[#allocation2 + $0x60d]] }
 0x1f2   :  { %8470 = sst [smem:[#allocation224_spill]] %s4067_s28  ;;  %s4082_s16 = sld [smem:[#allocation2 + $0x60e]] }
 0x1f3   :  { %8472 = sst [smem:[#allocation225_spill]] %s4071_s27  ;;  %s8479_s13 = sand.u32 2147483647, %s8468_s4 }
 0x1f4   :  { %8473 = sst [smem:[#allocation226_spill]] %s4074_s8  ;;  %s8480_s3 = sld [smem:[#allocation212_spill]] }
 0x1f5   :  { %s1829_s23 = sadd.f32 %s1828_s5, %s8474_s20  ;;  %s4086_s14 = sld [smem:[#allocation2 + $0x60f]] }
 0x1f6   :  { %8475 = sst [smem:[#allocation227_spill]] %s4078_s21  ;;  %s8483_s20 = sand.u32 2147483647, %s3993_s6 }
 0x1f7   :  { %8477 = sst [smem:[#allocation228_spill]] %s4080_s25  ;;  %s4089_s5 = sld [smem:[#allocation2 + $0x610]] }
 0x1f8   :  { %8478 = sst [smem:[#allocation229_spill]] %s4082_s16  ;;  %s8485_s17 = sand.u32 2147483647, %s4027_s19 }
 0x1f9   :  { %s1830_s22 = sadd.f32 %s1829_s23, %s8479_s13  ;;  %s8484_s24 = sld [smem:[#allocation213_spill]] }
 0x1fa   :  { %s8486_s30 = sand.u32 2147483647, %s4031_s18  ;;  %s8487_s9 = sand.u32 2147483647, %s3995_s15 }
 0x1fb   :  { %8481 = sst [smem:[#allocation230_spill]] %s4086_s14  ;;  %s8489_s28 = smov %s4043_s10 }
 0x1fc   :  { %s1831_s2 = sadd.f32 %s1830_s22, %s8483_s20  ;;  %s8488_s13 = sld [smem:[#allocation214_spill]] }
 0x1fd   :  { %8482 = sst [smem:[#allocation231_spill]] %s4089_s5  ;;  %s8490_s20 = sand.u32 2147483647, %s8476_s26 }
 0x1fe   :  { %s1978_s4 = sadd.f32 %s8486_s30, %s8485_s17  ;;  %s8491_s7 = sand.u32 2147483647, %s4035_s29 }
 0x1ff   :  { %s1832_s23 = sadd.f32 %s1831_s2, %s8487_s9  ;;  %s8492_s19 = sand.u32 2147483647, %s8480_s3 }
 0x200   :  { %s1979_s8 = sadd.f32 %s1978_s4, %s8491_s7  ;;  %s8493_s17 = sld [smem:[#allocation221_spill]] }
 0x201   :  { %s1833_s22 = sadd.f32 %s1832_s23, %s8490_s20  ;;  %s4112_s30 = sld [smem:[#allocation2 + $0x680]] }
 0x202   :  { %s8495_s15 = sand.u32 2147483647, %s4039_s11  ;;  %s4116_s9 = sld [smem:[#allocation2 + $0x681]] }
 0x203   :  { %s1834_s18 = sadd.f32 %s1833_s22, %s8492_s19  ;;  %s8497_s10 = sand.u32 2147483647, %s8484_s24 }
 0x204   :  { %s1980_s2 = sadd.f32 %s1979_s8, %s8495_s15  ;;  %s8498_s6 = sld [smem:[#allocation222_spill]] }
 0x205   :  { %s1835_s0 = sadd.f32 %s1834_s18, %s8497_s10  ;;  %s4120_s26 = sld [smem:[#allocation2 + $0x682]] }
 0x206   :  { %s8500_s23 = sand.u32 2147483647, %s4041_s1  ;;  %s4124_s7 = sld [smem:[#allocation2 + $0x683]] }
 0x207   :  { %8494 = sst [smem:[#allocation232_spill]] %s4112_s30  ;;  %s8502_s19 = sand.u32 2147483647, %s8488_s13 }
 0x208   :  { %8496 = sst [smem:[#allocation233_spill]] %s4116_s9  ;;  %s8503_s22 = sld [smem:[#allocation223_spill]] }
 0x209   :  { %s1981_s20 = sadd.f32 %s1980_s2, %s8500_s23  ;;  %s4128_s27 = sld [smem:[#allocation2 + $0x684]] }
 0x20a   :  { %s1836_s4 = sadd.f32 %s1835_s0, %s8502_s19  ;;  %s8505_s15 = sand.u32 2147483647, %s8489_s28 }
 0x20b   :  { %8499 = sst [smem:[#allocation234_spill]] %s4120_s26  ;;  %s4132_s12 = sld [smem:[#allocation2 + $0x685]] }
 0x20c   :  { %8501 = sst [smem:[#allocation235_spill]] %s4124_s7  ;;  %v1837_v22 = vstv %s1836_s4  ;;  %s8507_s18 = sld [smem:[#allocation224_spill]] }
 0x20d   :  { %s1982_s8 = sadd.f32 %s1981_s20, %s8505_s15  ;;  %s4135_s1 = sld [smem:[#allocation2 + $0x686]]  ;;  %2922 = vrcp.f32 %v1837_v22 }
 0x20e   :  { %s8509_s2 = sand.u32 2147483647, %s8493_s17  ;;  %s8510_s11 = sld [smem:[#allocation225_spill]] }
 0x20f   :  { %8504 = sst [smem:[#allocation236_spill]] %s4128_s27  ;;  %s4141_s29 = sld [smem:[#allocation2 + $0x687]] }
 0x210   :  { %s1983_s23 = sadd.f32 %s1982_s8, %s8509_s2  ;;  %s8512_s28 = sand.u32 2147483647, %s8498_s6 }
 0x211   :  { %8506 = sst [smem:[#allocation237_spill]] %s4132_s12  ;;  %s8513_s13 = sld [smem:[#allocation226_spill]] }
 0x212   :  { %s1984_s20 = sadd.f32 %s1983_s23, %s8512_s28  ;;  %s4147_s4 = sld [smem:[#allocation2 + $0x688]] }
 0x213   :  { %8508 = sst [smem:[#allocation238_spill]] %s4135_s1  ;;  %s8515_s10 = sand.u32 2147483647, %s8503_s22 }
 0x214   :  { %s1985_s3 = sadd.f32 %s1984_s20, %s8515_s10  ;;  %s4153_s8 = sld [smem:[#allocation2 + $0x689]] }
 0x215   :  { %8511 = sst [smem:[#allocation239_spill]] %s4141_s29  ;;  %s8517_s2 = sand.u32 2147483647, %s8507_s18 }
 0x216   :  { %s1986_s19 = sadd.f32 %s1985_s3, %s8517_s2  ;;  %s4157_s0 = sld [smem:[#allocation2 + $0x68a]] }
 0x217   :  { %s4160_s23 = sld [smem:[#allocation2 + $0x68b]]  ;;  %s8520_s24 = sand.u32 2147483647, %s8510_s11  ;;  %v2923_v23 = vpop.eup %2922 }
 0x218   :  { %8514 = sst [smem:[#allocation240_spill]] %s4147_s4  ;;  %s4164_s22 = sld [smem:[#allocation2 + $0x68c]]  ;;  %2885 = vpush %v2923_v23 }
 0x219   :  { %s1987_s15 = sadd.f32 %s1986_s19, %s8520_s24  ;;  %s4167_s20 = sld [smem:[#allocation2 + $0x68d]] }
 0x21a   :  { %8516 = sst [smem:[#allocation241_spill]] %s4153_s8  ;;  %s8523_s3 = sand.u32 2147483647, %s8513_s13 }
 0x21b   :  { %s1988_s2 = sadd.f32 %s1987_s15, %s8523_s3  ;;  %s4171_s28 = sld [smem:[#allocation2 + $0x68e]] }
 0x21c   :  { %8518 = sst [smem:[#allocation242_spill]] %s4157_s0  ;;  %s8526_s5 = sand.u32 2147483647, %s4078_s21 }
 0x21d   :  { %8519 = sst [smem:[#allocation243_spill]] %s4160_s23  ;;  %s4174_s19 = sld [smem:[#allocation2 + $0x68f]] }
 0x21e   :  { %8521 = sst [smem:[#allocation244_spill]] %s4164_s22  ;;  %s8527_s11 = sld [smem:[#allocation231_spill]] }
 0x21f   :  { %8522 = sst [smem:[#allocation245_spill]] %s4167_s20  ;;  %s4180_s17 = sld [smem:[#allocation2 + $0x690]] }
 0x220   :  { %s1989_s10 = sadd.f32 %s1988_s2, %s8526_s5  ;;  %s8529_s15 = sand.u32 2147483647, %s4080_s25 }
 0x221   :  { %8524 = sst [smem:[#allocation246_spill]] %s4171_s28  ;;  %s8530_s29 = sand.u32 2147483647, %s4112_s30 }
 0x222   :  { %s1990_s3 = sadd.f32 %s1989_s10, %s8529_s15  ;;  %s8531_s1 = sand.u32 2147483647, %s4116_s9 }
 0x223   :  { %8525 = sst [smem:[#allocation247_spill]] %s4174_s19  ;;  %s8532_s8 = sand.u32 2147483647, %s4082_s16 }
 0x224   :  { %s2135_s24 = sadd.f32 %s8531_s1, %s8530_s29  ;;  %s8533_s21 = sld [smem:[#allocation237_spill]] }
 0x225   :  { %8528 = sst [smem:[#allocation248_spill]] %s4180_s17  ;;  %s8534_s0 = sand.u32 2147483647, %s4120_s26 }
 0x226   :  { %s1991_s12 = sadd.f32 %s1990_s3, %s8532_s8  ;;  %s8535_s6 = sand.u32 2147483647, %s4086_s14 }
 0x227   :  { %s2136_s18 = sadd.f32 %s2135_s24, %s8534_s0  ;;  %s8536_s25 = sld [smem:[#allocation238_spill]] }
 0x228   :  { %s1992_s23 = sadd.f32 %s1991_s12, %s8535_s6  ;;  %s4198_s10 = sld [smem:[#allocation2 + $0x700]] }
 0x229   :  { %s8538_s13 = sand.u32 2147483647, %s4124_s7  ;;  %s8539_s4 = sand.u32 2147483647, %s8527_s11 }
 0x22a   :  { %s2137_s22 = sadd.f32 %s2136_s18, %s8538_s13  ;;  %s8540_s9 = sld [smem:[#allocation239_spill]] }
 0x22b   :  { %s1993_s30 = sadd.f32 %s1992_s23, %s8539_s4  ;;  %s4205_s29 = sld [smem:[#allocation2 + $0x701]] }
 0x22c   :  { %s8542_s1 = sand.u32 2147483647, %s4128_s27  ;;  %s4209_s3 = sld [smem:[#allocation2 + $0x702]] }
 0x22d   :  { %s2138_s8 = sadd.f32 %s2137_s22, %s8542_s1  ;;  %v1994_v24 = vstv %s1993_s30  ;;  %s8544_s6 = sld [smem:[#allocation240_spill]] }
 0x22e   :  { %8537 = sst [smem:[#allocation249_spill]] %s4198_s10  ;;  %s4211_s12 = sld [smem:[#allocation2 + $0x703]]  ;;  %2924 = vrcp.f32 %v1994_v24 }
 0x22f   :  { %s4213_s0 = sld [smem:[#allocation2 + $0x704]]  ;;  %s8547_s13 = sand.u32 2147483647, %s8533_s21 }
 0x230   :  { %s2139_s18 = sadd.f32 %s2138_s8, %s8547_s13  ;;  %s8548_s4 = sld [smem:[#allocation241_spill]] }
 0x231   :  { %8541 = sst [smem:[#allocation250_spill]] %s4205_s29  ;;  %s4217_s23 = sld [smem:[#allocation2 + $0x705]] }
 0x232   :  { %8543 = sst [smem:[#allocation251_spill]] %s4209_s3  ;;  %s4220_s22 = sld [smem:[#allocation2 + $0x706]] }
 0x233   :  { %s8551_s1 = sand.u32 2147483647, %s8536_s25  ;;  %s4224_s15 = sld [smem:[#allocation2 + $0x707]] }
 0x234   :  { %8545 = sst [smem:[#allocation252_spill]] %s4211_s12  ;;  %s8553_s5 = sld [smem:[#allocation242_spill]] }
 0x235   :  { %8546 = sst [smem:[#allocation253_spill]] %s4213_s0  ;;  %s4227_s27 = sld [smem:[#allocation2 + $0x708]] }
 0x236   :  { %s2140_s30 = sadd.f32 %s2139_s18, %s8551_s1  ;;  %s8555_s7 = sand.u32 2147483647, %s8540_s9 }
 0x237   :  { %8549 = sst [smem:[#allocation254_spill]] %s4217_s23  ;;  %s8556_s26 = sld [smem:[#allocation243_spill]] }
 0x238   :  { %8550 = sst [smem:[#allocation255_spill]] %s4220_s22  ;;  %s8557_s24 = sand.u32 2147483647, %s8544_s6  ;;  %v2925_v25 = vpop.eup %2924 }
 0x239   :  { %8552 = sst [smem:[#allocation256_spill]] %s4224_s15  ;;  %s8558_s17 = sld [smem:[#allocation244_spill]]  ;;  %2887 = vpush %v2925_v25 }
 0x23a   :  { %s2141_s8 = sadd.f32 %s2140_s30, %s8555_s7  ;;  %s4238_s18 = sld [smem:[#allocation2 + $0x709]] }
 0x23b   :  { %8554 = sst [smem:[#allocation257_spill]] %s4227_s27  ;;  %s8560_s1 = sand.u32 2147483647, %s8548_s4 }
 0x23c   :  { %s2142_s14 = sadd.f32 %s2141_s8, %s8557_s24  ;;  %s4244_s7 = sld [smem:[#allocation2 + $0x70a]] }
 0x23d   :  { %s8562_s30 = sand.u32 2147483647, %s8553_s5  ;;  %s4248_s24 = sld [smem:[#allocation2 + $0x70b]] }
 0x23e   :  { %s2143_s19 = sadd.f32 %s2142_s14, %s8560_s1  ;;  %s4250_s8 = sld [smem:[#allocation2 + $0x70c]] }
 0x23f   :  { %s4252_s14 = sld [smem:[#allocation2 + $0x70d]]  ;;  %s8566_s1 = sand.u32 2147483647, %s8556_s26 }
 0x240   :  { %8559 = sst [smem:[#allocation258_spill]] %s4238_s18  ;;  %s8567_s2 = sld [smem:[#allocation247_spill]] }
 0x241   :  { %s2144_s11 = sadd.f32 %s2143_s19, %s8562_s30  ;;  %s4256_s25 = sld [smem:[#allocation2 + $0x70e]] }
 0x242   :  { %8561 = sst [smem:[#allocation259_spill]] %s4244_s7  ;;  %s4259_s19 = sld [smem:[#allocation2 + $0x70f]] }
 0x243   :  { %8563 = sst [smem:[#allocation260_spill]] %s4248_s24  ;;  %s8570_s30 = sand.u32 2147483647, %s8558_s17 }
 0x244   :  { %8564 = sst [smem:[#allocation261_spill]] %s4250_s8  ;;  %s8571_s13 = sld [smem:[#allocation248_spill]] }
 0x245   :  { %8565 = sst [smem:[#allocation262_spill]] %s4252_s14  ;;  %s4263_s5 = sld [smem:[#allocation2 + $0x710]] }
 0x246   :  { %s2145_s9 = sadd.f32 %s2144_s11, %s8566_s1  ;;  %s8573_s26 = sand.u32 2147483647, %s4198_s10 }
 0x247   :  { %8568 = sst [smem:[#allocation263_spill]] %s4256_s25  ;;  %s8574_s6 = sand.u32 2147483647, %s4205_s29 }
 0x248   :  { %8569 = sst [smem:[#allocation264_spill]] %s4259_s19  ;;  %s8575_s1 = sand.u32 2147483647, %s4167_s20 }
 0x249   :  { %s2146_s21 = sadd.f32 %s2145_s9, %s8570_s30  ;;  %s8576_s18 = sand.u32 2147483647, %s4171_s28 }
 0x24a   :  { %s2292_s11 = sadd.f32 %s8574_s6, %s8573_s26  ;;  %s8577_s9 = sld [smem:[#allocation254_spill]] }
 0x24b   :  { %8572 = sst [smem:[#allocation265_spill]] %s4263_s5  ;;  %s8578_s4 = sand.u32 2147483647, %s4209_s3 }
 0x24c   :  { %s2147_s27 = sadd.f32 %s2146_s21, %s8575_s1  ;;  %s8579_s10 = sand.u32 2147483647, %s8567_s2 }
 0x24d   :  { %s2293_s7 = sadd.f32 %s2292_s11, %s8578_s4  ;;  %s8580_s26 = sand.u32 2147483647, %s4211_s12 }
 0x24e   :  { %s2148_s23 = sadd.f32 %s2147_s27, %s8576_s18  ;;  %s8581_s20 = smov %s4220_s22 }
 0x24f   :  { %s2294_s1 = sadd.f32 %s2293_s7, %s8580_s26  ;;  %s4286_s21 = sld [smem:[#allocation2 + $0x780]] }
 0x250   :  { %s2149_s29 = sadd.f32 %s2148_s23, %s8579_s10  ;;  %s8583_s15 = sand.u32 2147483647, %s8571_s13 }
 0x251   :  { %s4290_s22 = sld [smem:[#allocation2 + $0x781]]  ;;  %s8585_s16 = sand.u32 2147483647, %s4213_s0 }
 0x252   :  { %s2150_s24 = sadd.f32 %s2149_s29, %s8583_s15  ;;  %s8586_s18 = sld [smem:[#allocation256_spill]] }
 0x253   :  { %s2295_s27 = sadd.f32 %s2294_s1, %s8585_s16  ;;  %s4294_s30 = sld [smem:[#allocation2 + $0x782]] }
 0x254   :  { %v2151_v26 = vstv %s2150_s24  ;;  %s4296_s10 = sld [smem:[#allocation2 + $0x783]]  ;;  %s4298_s4 = sld [smem:[#allocation2 + $0x784]] }
 0x255   :  { %8582 = sst [smem:[#allocation266_spill]] %s4286_s21  ;;  %s8589_s23 = sld [smem:[#allocation257_spill]]  ;;  %2926 = vrcp.f32 %v2151_v26 }
 0x256   :  { %s8590_s15 = sand.u32 2147483647, %s8577_s9  ;;  %s4302_s7 = sld [smem:[#allocation2 + $0x785]] }
 0x257   :  { %8584 = sst [smem:[#allocation267_spill]] %s4290_s22  ;;  %s4304_s16 = sld [smem:[#allocation2 + $0x786]] }
 0x258   :  { %s2296_s29 = sadd.f32 %s2295_s27, %s8590_s15  ;;  %s8593_s11 = sld [smem:[#allocation258_spill]] }
 0x259   :  { %s4306_s26 = sld [smem:[#allocation2 + $0x787]]  ;;  %s8595_s24 = sand.u32 2147483647, %s8581_s20 }
 0x25a   :  { %8587 = sst [smem:[#allocation268_spill]] %s4296_s10  ;;  %s8596_s0 = sld [smem:[#allocation259_spill]] }
 0x25b   :  { %8588 = sst [smem:[#allocation269_spill]] %s4298_s4  ;;  %s4314_s12 = sld [smem:[#allocation2 + $0x788]] }
 0x25c   :  { %8591 = sst [smem:[#allocation270_spill]] %s4302_s7  ;;  %s8598_s27 = sand.u32 2147483647, %s8586_s18 }
 0x25d   :  { %8592 = sst [smem:[#allocation271_spill]] %s4304_s16  ;;  %s8599_s2 = sand.u32 2147483647, %s8589_s23 }
 0x25e   :  { %s2297_s1 = sadd.f32 %s2296_s29, %s8595_s24  ;;  %s8600_s5 = sld [smem:[#allocation260_spill]] }
 0x25f   :  { %8594 = sst [smem:[#allocation272_spill]] %s4306_s26  ;;  %s8601_s6 = sand.u32 2147483647, %s8593_s11  ;;  %v2927_v30 = vpop.eup %2926 }
 0x260   :  { %s2298_s15 = sadd.f32 %s2297_s1, %s8598_s27  ;;  %s4329_s20 = sld [smem:[#allocation2 + $0x789]]  ;;  %2889 = vpush %v2927_v30 }
 0x261   :  { %8597 = sst [smem:[#allocation273_spill]] %s4314_s12  ;;  %s4332_s25 = sld [smem:[#allocation2 + $0x78a]] }
 0x262   :  { %s2299_s28 = sadd.f32 %s2298_s15, %s8599_s2  ;;  %s8604_s2 = sand.u32 2147483647, %s8596_s0 }
 0x263   :  { %s4336_s27 = sld [smem:[#allocation2 + $0x78b]]  ;;  %s4342_s15 = sld [smem:[#allocation2 + $0x78d]] }
 0x264   :  { %s2300_s17 = sadd.f32 %s2299_s28, %s8601_s6  ;;  %s4340_s28 = sld [smem:[#allocation2 + $0x78c]] }
 0x265   :  { %s8606_s6 = sld [smem:[#allocation263_spill]]  ;;  %s8608_s18 = sand.u32 2147483647, %s8600_s5 }
 0x266   :  { %8602 = sst [smem:[#allocation274_spill]] %s4329_s20  ;;  %s4346_s29 = sld [smem:[#allocation2 + $0x78e]] }
 0x267   :  { %8603 = sst [smem:[#allocation275_spill]] %s4332_s25  ;;  %s4348_s19 = sld [smem:[#allocation2 + $0x78f]] }
 0x268   :  { %s2301_s1 = sadd.f32 %s2300_s17, %s8604_s2  ;;  %s8611_s17 = sld [smem:[#allocation264_spill]] }
 0x269   :  { %8605 = sst [smem:[#allocation276_spill]] %s4336_s27  ;;  %s4350_s2 = sld [smem:[#allocation2 + $0x790]] }
 0x26a   :  { %8607 = sst [smem:[#allocation277_spill]] %s4342_s15  ;;  %s8613_s13 = sand.u32 2147483647, %s4250_s8 }
 0x26b   :  { %s2302_s24 = sadd.f32 %s2301_s1, %s8608_s18  ;;  %s8614_s0 = sld [smem:[#allocation11_spill]] }
 0x26c   :  { %8609 = sst [smem:[#allocation278_spill]] %s4346_s29  ;;  %s8615_s11 = sand.u32 2147483647, %s4286_s21 }
 0x26d   :  { %8610 = sst [smem:[#allocation279_spill]] %s4348_s19  ;;  %s8616_s18 = sand.u32 2147483647, %s4290_s22 }
 0x26e   :  { %s2303_s3 = sadd.f32 %s2302_s24, %s8613_s13  ;;  %s8617_s1 = sld [smem:[#allocation265_spill]] }
 0x26f   :  { %8612 = sst [smem:[#allocation280_spill]] %s4350_s2  ;;  %s8618_s12 = sand.u32 2147483647, %s4252_s14 }
 0x270   :  { %s2449_s23 = sadd.f32 %s8616_s18, %s8615_s11  ;;  %s8619_s26 = sld [smem:[#allocation12_spill]] }
 0x271   :  { %s2304_s16 = sadd.f32 %s2303_s3, %s8618_s12  ;;  %s8620_s8 = sld [smem:[#allocation13_spill]] }
 0x272   :  { %s8621_s24 = sand.u32 2147483647, %s8606_s6  ;;  %s8622_s5 = sld [smem:[#allocation14_spill]] }
 0x273   :  { %s2305_s9 = sadd.f32 %s2304_s16, %s8621_s24  ;;  %s8623_s22 = sand.u32 2147483647, %s8611_s17 }
 0x274   :  { %s4376_s18 = spop %2863  ;;  %s8624_s3 = sand.u32 2147483647, %s4294_s30 }
 0x275   :  { %s2306_s11 = sadd.f32 %s2305_s9, %s8623_s22  ;;  %s8625_s13 = sand.u32 2147483647, %s8614_s0 }
 0x276   :  { %s2450_s12 = sadd.f32 %s2449_s23, %s8624_s3  ;;  %s97_s7 = smul.f32 %s4376_s18, %s8625_s13 }
 0x277   :  { %s8626_s16 = sand.u32 2147483647, %s8617_s1  ;;  %s8627_s24 = sld [smem:[#allocation15_spill]] }
 0x278   :  { %s2307_s25 = sadd.f32 %s2306_s11, %s8626_s16  ;;  %s8628_s21 = sand.u32 2147483647, %s8619_s26  ;;  %v131_v33 = vstv %s97_s7 }
 0x279   :  { %s98_s20 = smul.f32 %s4376_s18, %s8628_s21  ;;  %s8629_s22 = sand.u32 2147483647, %s4296_s10  ;;  %v132_v35 = vsel %vm130_vm1, %v131_v33, 0.0 }
 0x27a   :  { %s2451_s9 = sadd.f32 %s2450_s12, %s8629_s22  ;;  %s8630_s17 = sand.u32 2147483647, %s8620_s8  ;;  %v2308_v34 = vstv %s2307_s25 }
 0x27b   :  { %s8631_s6 = sld [smem:[#allocation16_spill]]  ;;  %s99_s14 = smul.f32 %s4376_s18, %s8630_s17  ;;  %v133_v36 = vstv %s98_s20  ;;  %2928 = vrcp.f32 %v2308_v34 }
 0x27c   :  { %s8632_s0 = sand.u32 2147483647, %s8622_s5  ;;  %s114_s13 = sadd.f32 %s98_s20, %s97_s7  ;;  %v134_v37 = vsel %vm130_vm1, %v133_v36, 0.0 }
 0x27d   :  { %s100_s23 = smul.f32 %s4376_s18, %s8632_s0  ;;  %s8633_s11 = sld [smem:[#allocation270_spill]]  ;;  %v138_v38 = vstv %s99_s14 }
 0x27e   :  { %s8634_s21 = sld [smem:[#allocation17_spill]]  ;;  %s8635_s8 = sand.u32 2147483647, %s4298_s4  ;;  %v136_v39 = vstv %s114_s13  ;;  %v139_v40 = vsel %vm135_vm2, %v138_v38, %v134_v37 }
 0x27f   :  { %s2452_s26 = sadd.f32 %s2451_s9, %s8635_s8  ;;  %s8636_s17 = sand.u32 2147483647, %s8627_s24  ;;  %v143_v41 = vstv %s100_s23  ;;  %v137_v42 = vsel %vm135_vm2, %v136_v39, %v132_v35 }
 0x280   :  { %s4407_s3 = smul.f32 %s4376_s18, %s8636_s17  ;;  %s8637_s25 = sld [smem:[#allocation18_spill]]  ;;  %v144_v43 = vsel %vm140_vm3, %v143_v41, %v139_v40 }
 0x281   :  { %s8638_s5 = sand.u32 2147483647, %s8631_s6  ;;  %s115_s20 = sadd.f32 %s114_s13, %s99_s14 }
 0x282   :  { %s4415_s7 = smul.f32 %s4376_s18, %s8638_s5  ;;  %s8639_s12 = sld [smem:[#allocation271_spill]]  ;;  %v148_v44 = vstv %s4407_s3 }
 0x283   :  { %s8640_s16 = sld [smem:[#allocation19_spill]]  ;;  %s8641_s24 = sand.u32 2147483647, %s8633_s11  ;;  %v141_v45 = vstv %s115_s20  ;;  %v149_v46 = vsel %vm145_vm4, %v148_v44, %v144_v43 }
 0x284   :  { %s2453_s22 = sadd.f32 %s2452_s26, %s8641_s24  ;;  %s8642_s9 = sand.u32 2147483647, %s8634_s21  ;;  %v153_v47 = vstv %s4415_s7  ;;  %v142_v48 = vsel %vm140_vm3, %v141_v45, %v137_v42 }
 0x285   :  { %s4425_s0 = smul.f32 %s4376_s18, %s8642_s9  ;;  %s8643_s14 = sld [smem:[#allocation20_spill]]  ;;  %v154_v49 = vsel %vm7947_vm5, %v153_v47, %v149_v46  ;;  %v2929_v2 = vpop.eup %2928 }
 0x286   :  { %s8644_s6 = sand.u32 2147483647, %s8637_s25  ;;  %s116_s21 = sadd.f32 %s115_s20, %s100_s23  ;;  %2891 = vpush %v2929_v2 }
 0x287   :  { %s4436_s13 = smul.f32 %s4376_s18, %s8644_s6  ;;  %s8645_s8 = sld [smem:[#allocation272_spill]]  ;;  %v158_v50 = vstv %s4425_s0 }
 0x288   :  { %s8646_s26 = sld [smem:[#allocation21_spill]]  ;;  %s8647_s17 = sand.u32 2147483647, %s8639_s12  ;;  %v146_v51 = vstv %s116_s21  ;;  %v159_v52 = vsel %vm155_vm6, %v158_v50, %v154_v49 }
 0x289   :  { %s2454_s5 = sadd.f32 %s2453_s22, %s8647_s17  ;;  %s8648_s24 = sand.u32 2147483647, %s8640_s16  ;;  %v163_v53 = vstv %s4436_s13  ;;  %v147_v54 = vsel %vm145_vm4, %v146_v51, %v142_v48 }
 0x28a   :  { %s4447_s9 = smul.f32 %s4376_s18, %s8648_s24  ;;  %s8649_s23 = sld [smem:[#allocation22_spill]]  ;;  %v164_v55 = vsel %vm7946_vm7, %v163_v53, %v159_v52 }
 0x28b   :  { %s8650_s25 = sand.u32 2147483647, %s8643_s14  ;;  %s117_s16 = sadd.f32 %s116_s21, %s4407_s3 }
 0x28c   :  { %s4458_s20 = smul.f32 %s4376_s18, %s8650_s25  ;;  %s8651_s22 = sld [smem:[#allocation273_spill]]  ;;  %v168_v56 = vstv %s4447_s9 }
 0x28d   :  { %s8652_s6 = sld [smem:[#allocation23_spill]]  ;;  %s8653_s17 = sand.u32 2147483647, %s8645_s8  ;;  %v151_v57 = vstv %s117_s16  ;;  %v169_v58 = vsel %vm7944_vm8, %v168_v56, %v164_v55 }
 0x28e   :  { %s2455_s24 = sadd.f32 %s2454_s5, %s8653_s17  ;;  %s8654_s12 = sand.u32 2147483647, %s8646_s26  ;;  %v173_v59 = vstv %s4458_s20  ;;  %v152_v60 = vsel %vm7947_vm5, %v151_v57, %v147_v54 }
 0x28f   :  { %s4470_s11 = smul.f32 %s4376_s18, %s8654_s12  ;;  %s8655_s3 = sld [smem:[#allocation24_spill]]  ;;  %v174_v61 = vsel %vm170_vm9, %v173_v59, %v169_v58 }
 0x290   :  { %s8656_s14 = sand.u32 2147483647, %s8649_s23  ;;  %s118_s26 = sadd.f32 %s117_s16, %s4415_s7 }
 0x291   :  { %s4481_s21 = smul.f32 %s4376_s18, %s8656_s14  ;;  %s8657_s12 = sld [smem:[#allocation274_spill]]  ;;  %v178_v62 = vstv %s4470_s11 }
 0x292   :  { %s8658_s5 = sld [smem:[#allocation25_spill]]  ;;  %s8659_s25 = sand.u32 2147483647, %s8651_s22  ;;  %v156_v63 = vstv %s118_s26  ;;  %v179_v0 = vsel %vm175_vm10, %v178_v62, %v174_v61 }
 0x293   :  { %s2456_s17 = sadd.f32 %s2455_s24, %s8659_s25  ;;  %s8660_s8 = sand.u32 2147483647, %s8652_s6  ;;  %v183_v1 = vstv %s4481_s21  ;;  %v157_v3 = vsel %vm155_vm6, %v156_v63, %v152_v60 }
 0x294   :  { %s4493_s4 = smul.f32 %s4376_s18, %s8660_s8  ;;  %s8661_s7 = sld [smem:[#allocation26_spill]]  ;;  %v184_v4 = vsel %vm180_vm11, %v183_v1, %v179_v0 }
 0x295   :  { %s8662_s23 = sand.u32 2147483647, %s8655_s3  ;;  %s119_s24 = sadd.f32 %s118_s26, %s4425_s0 }
 0x296   :  { %s4504_s16 = smul.f32 %s4376_s18, %s8662_s23  ;;  %s8663_s8 = sld [smem:[#allocation275_spill]]  ;;  %v188_v5 = vstv %s4493_s4 }
 0x297   :  { %s8664_s6 = sld [smem:[#allocation27_spill]]  ;;  %s8665_s14 = sand.u32 2147483647, %s8657_s12  ;;  %v161_v6 = vstv %s119_s24  ;;  %v189_v7 = vsel %vm185_vm12, %v188_v5, %v184_v4 }
 0x298   :  { %s2457_s25 = sadd.f32 %s2456_s17, %s8665_s14  ;;  %s8666_s22 = sand.u32 2147483647, %s8658_s5  ;;  %v193_v8 = vstv %s4504_s16  ;;  %v162_v9 = vsel %vm7946_vm7, %v161_v6, %v157_v3 }
 0x299   :  { %s4516_s10 = smul.f32 %s4376_s18, %s8666_s22  ;;  %s120_s26 = sadd.f32 %s119_s24, %s4436_s13  ;;  %v194_v10 = vsel %vm190_vm13, %v193_v8, %v189_v7 }
 0x29a   :  { %s8667_s0 = sand.u32 2147483647, %s8661_s7  ;;  %s8668_s22 = sld [smem:[#allocation28_spill]] }
 0x29b   :  { %s4526_s3 = smul.f32 %s4376_s18, %s8667_s0  ;;  %s8671_s7 = sld [smem:[#allocation29_spill]]  ;;  %v198_v11 = vstv %s4516_s10  ;;  %v166_v12 = vstv %s120_s26 }
 0x29c   :  { %s8669_s5 = sand.u32 2147483647, %s8663_s8  ;;  %s121_s13 = sadd.f32 %s120_s26, %s4447_s9  ;;  %v199_v13 = vsel %vm195_vm14, %v198_v11, %v194_v10  ;;  %v167_v14 = vsel %vm7944_vm8, %v166_v12, %v162_v9 }
 0x29d   :  { %s2458_s17 = sadd.f32 %s2457_s25, %s8669_s5  ;;  %s8670_s23 = sand.u32 2147483647, %s8664_s6  ;;  %v203_v15 = vstv %s4526_s3 }
 0x29e   :  { %s4538_s14 = smul.f32 %s4376_s18, %s8670_s23  ;;  %s8672_s24 = sld [smem:[#allocation30_spill]]  ;;  %v171_v16 = vstv %s121_s13  ;;  %v204_v17 = vsel %vm7940_vm15, %v203_v15, %v199_v13  ;;  %vm210_vm15 = vcmp.eq.s32.totalorder %v4367_v32, 16 }
 0x29f   :  { %s4548_s25 = spop %2865  ;;  %s8673_s18 = sand.u32 2147483647, %s4336_s27  ;;  %v172_v19 = vsel %vm170_vm9, %v171_v16, %v167_v14 }
 0x2a0   :  { %s2459_s6 = sadd.f32 %s2458_s17, %s8673_s18  ;;  %s8674_s0 = sld [smem:[#allocation31_spill]]  ;;  %v208_v21 = vstv %s4538_s14 }
 0x2a1   :  { %s8675_s9 = sand.u32 2147483647, %s8668_s22  ;;  %s122_s5 = sadd.f32 %s121_s13, %s4458_s20  ;;  %v209_v24 = vsel %vm205_vm0, %v208_v21, %v204_v17 }
 0x2a2   :  { %s4558_s26 = smul.f32 %s4548_s25, %s8675_s9  ;;  %s8676_s23 = sld [smem:[#allocation32_spill]]  ;;  %v213_v28 = vsel %vm210_vm15, %v208_v21, %v209_v24 }
 0x2a3   :  { %s8677_s17 = sand.u32 2147483647, %s8671_s7  ;;  %s8678_s27 = sand.u32 2147483647, %s4340_s28  ;;  %v176_v20 = vstv %s122_s5  ;;  %v214_v47 = vmul.f32 %v213_v28, %v4612_v31 }
 0x2a4   :  { %s4567_s18 = smul.f32 %s4548_s25, %s8677_s17  ;;  %s2460_s22 = sadd.f32 %s2459_s6, %s8678_s27  ;;  %v177_v23 = vsel %vm175_vm10, %v176_v20, %v172_v19  ;;  %v303_v40 = vstv %s4558_s26 }
 0x2a5   :  { %s8679_s9 = sand.u32 2147483647, %s8672_s24  ;;  %s8680_s20 = sld [smem:[#allocation33_spill]]  ;;  %v304_v51 = vsel %vm130_vm1, %v303_v40, 0.0 }
 0x2a6   :  { %s4577_s13 = smul.f32 %s4548_s25, %s8679_s9  ;;  %s123_s7 = sadd.f32 %s122_s5, %s4470_s11  ;;  %v305_v22 = vstv %s4567_s18 }
 0x2a7   :  { %s8681_s17 = sand.u32 2147483647, %s8674_s0  ;;  %s8682_s27 = sld [smem:[#allocation34_spill]]  ;;  %v306_v25 = vsel %vm130_vm1, %v305_v22, 0.0 }
 0x2a8   :  { %s4585_s8 = smul.f32 %s4548_s25, %s8681_s17  ;;  %s8683_s6 = sand.u32 2147483647, %s4342_s15  ;;  %v309_v26 = vstv %s4577_s13  ;;  %v181_v27 = vstv %s123_s7 }
 0x2a9   :  { %s2461_s24 = sadd.f32 %s2460_s22, %s8683_s6  ;;  %s8684_s11 = sand.u32 2147483647, %s8676_s23  ;;  %v310_v29 = vsel %vm135_vm2, %v309_v26, %v306_v25  ;;  %v182_v33 = vsel %vm180_vm11, %v181_v27, %v177_v23 }
 0x2aa   :  { %s4597_s5 = smul.f32 %s4548_s25, %s8684_s11  ;;  %s8685_s0 = sld [smem:[#allocation35_spill]]  ;;  %v313_v30 = vstv %s4585_s8 }
 0x2ab   :  { %s124_s9 = sadd.f32 %s123_s7, %s4481_s21  ;;  %s8686_s22 = sand.u32 2147483647, %s8680_s20  ;;  %v314_v34 = vsel %vm140_vm3, %v313_v30, %v310_v29 }
 0x2ac   :  { %s4606_s17 = smul.f32 %s4548_s25, %s8686_s22  ;;  %s8687_s23 = sld [smem:[#allocation36_spill]]  ;;  %v317_v35 = vstv %s4597_s5 }
 0x2ad   :  { %s8688_s6 = sand.u32 2147483647, %s4346_s29  ;;  %s8689_s21 = sand.u32 2147483647, %s8682_s27  ;;  %v186_v36 = vstv %s124_s9  ;;  %v318_v37 = vsel %vm145_vm4, %v317_v35, %v314_v34 }
 0x2ae   :  { %s2462_s11 = sadd.f32 %s2461_s24, %s8688_s6  ;;  %s4621_s20 = smul.f32 %s4548_s25, %s8689_s21  ;;  %v321_v38 = vstv %s4606_s17  ;;  %v187_v39 = vsel %vm185_vm12, %v186_v36, %v182_v33 }
 0x2af   :  { %s8690_s7 = sld [smem:[#allocation37_spill]]  ;;  %s125_s22 = sadd.f32 %s124_s9, %s4493_s4  ;;  %v322_v41 = vsel %vm7947_vm5, %v321_v38, %v318_v37 }
 0x2b0   :  { %s8691_s24 = sand.u32 2147483647, %s8685_s0  ;;  %s8692_s27 = sld [smem:[#allocation38_spill]]  ;;  %v325_v42 = vstv %s4621_s20 }
 0x2b1   :  { %s4632_s6 = smul.f32 %s4548_s25, %s8691_s24  ;;  %s8693_s21 = sand.u32 2147483647, %s4348_s19  ;;  %v191_v43 = vstv %s125_s22  ;;  %v326_v44 = vsel %vm155_vm6, %v325_v42, %v322_v41 }
 0x2b2   :  { %s2463_s29 = sadd.f32 %s2462_s11, %s8693_s21  ;;  %s8694_s4 = sand.u32 2147483647, %s8687_s23  ;;  %v192_v46 = vsel %vm190_vm13, %v191_v43, %v187_v39 }
 0x2b3   :  { %s4644_s9 = smul.f32 %s4548_s25, %s8694_s4  ;;  %s8695_s0 = sld [smem:[#allocation39_spill]]  ;;  %v329_v45 = vstv %s4632_s6 }
 0x2b4   :  { %s126_s24 = sadd.f32 %s125_s22, %s4504_s16  ;;  %s8697_s23 = sld [smem:[#allocation40_spill]]  ;;  %v330_v48 = vsel %vm7946_vm7, %v329_v45, %v326_v44 }
 0x2b5   :  { %s8696_s15 = sand.u32 2147483647, %s8690_s7  ;;  %s8698_s11 = sand.u32 2147483647, %s4350_s2  ;;  %v333_v49 = vstv %s4644_s9 }
 0x2b6   :  { %s4654_s19 = smul.f32 %s4548_s25, %s8696_s15  ;;  %s2464_s21 = sadd.f32 %s2463_s29, %s8698_s11  ;;  %v196_v50 = vstv %s126_s24  ;;  %v334_v52 = vsel %vm7944_vm8, %v333_v49, %v330_v48  ;;  %vm8707_vm8 = vcmp.eq.s32.totalorder %v4367_v32, 14 }
 0x2b7   :  { %s8699_s16 = sand.u32 2147483647, %s8692_s27  ;;  %s8700_s15 = sld [smem:[#allocation41_spill]]  ;;  %v197_v55 = vsel %vm195_vm14, %v196_v50, %v192_v46 }
 0x2b8   :  { %s4667_s7 = smul.f32 %s4548_s25, %s8699_s16  ;;  %s127_s22 = sadd.f32 %s126_s24, %s4516_s10  ;;  %v337_v53 = vstv %s4654_s19  ;;  %v2465_v54 = vstv %s2464_s21 }
 0x2b9   :  { %s8701_s4 = sand.u32 2147483647, %s8695_s0  ;;  %s8702_s27 = sld [smem:[#allocation42_spill]]  ;;  %v338_v56 = vsel %vm170_vm9, %v337_v53, %v334_v52  ;;  %2930 = vrcp.f32 %v2465_v54 }
 0x2ba   :  { %s4676_s29 = smul.f32 %s4548_s25, %s8701_s4  ;;  %s8703_s10 = sand.u32 2147483647, %s8697_s23  ;;  %v341_v57 = vstv %s4667_s7  ;;  %v201_v58 = vstv %s127_s22 }
 0x2bb   :  { %s4688_s24 = smul.f32 %s4548_s25, %s8703_s10  ;;  %s287_s0 = sadd.f32 %s4567_s18, %s4558_s26  ;;  %v342_v59 = vsel %vm175_vm10, %v341_v57, %v338_v56  ;;  %v202_v61 = vsel %vm8707_vm8, %v201_v58, %v197_v55 }
 0x2bc   :  { %s8704_s11 = sld [smem:[#allocation43_spill]]  ;;  %s128_s16 = sadd.f32 %s127_s22, %s4526_s3  ;;  %v345_v60 = vstv %s4676_s29 }
 0x2bd   :  { %s8705_s4 = sand.u32 2147483647, %s8700_s15  ;;  %s8706_s23 = sld [smem:[#allocation44_spill]]  ;;  %v307_v62 = vstv %s287_s0  ;;  %v346_v63 = vsel %vm180_vm11, %v345_v60, %v342_v59  ;;  %v349_v0 = vstv %s4688_s24 }
 0x2be   :  { %s4699_s21 = smul.f32 %s4548_s25, %s8705_s4  ;;  %s288_s3 = sadd.f32 %s287_s0, %s4577_s13  ;;  %v206_v1 = vstv %s128_s16  ;;  %v308_v2 = vsel %vm135_vm2, %v307_v62, %v304_v51  ;;  %v350_v3 = vsel %vm185_vm12, %v349_v0, %v346_v63 }
 0x2bf   :  { %s8708_s26 = sand.u32 2147483647, %s8702_s27  ;;  %s129_s15 = sadd.f32 %s128_s16, %s4538_s14  ;;  %v207_v5 = vsel %vm205_vm0, %v206_v1, %v202_v61 }
 0x2c0   :  { %s4709_s18 = smul.f32 %s4548_s25, %s8708_s26  ;;  %v353_v4 = vstv %s4699_s21  ;;  %s8711_s27 = sld [smem:[#allocation45_spill]]  ;;  %v311_v6 = vstv %s288_s3 }
 0x2c1   :  { %s289_s14 = sadd.f32 %s288_s3, %s4585_s8  ;;  %v354_v7 = vsel %vm190_vm13, %v353_v4, %v350_v3  ;;  %v211_v9 = vstv %s129_s15  ;;  %v312_v10 = vsel %vm140_vm3, %v311_v6, %v308_v2  ;;  %s8713_s16 = sld [smem:[#allocation47_spill]] }
 0x2c2   :  { %s8709_s22 = sand.u32 2147483647, %s8704_s11  ;;  %s8712_s11 = sld [smem:[#allocation46_spill]]  ;;  %v357_v8 = vstv %s4709_s18  ;;  %v212_v13 = vsel %vm210_vm15, %v211_v9, %v207_v5 }
 0x2c3   :  { %s4719_s10 = smul.f32 %s4548_s25, %s8709_s22  ;;  %s8710_s13 = sand.u32 2147483647, %s8706_s23  ;;  %v358_v11 = vsel %vm195_vm14, %v357_v8, %v354_v7  ;;  %v315_v14 = vstv %s289_s14  ;;  %v215_v17 = vadd.f32 %v214_v47, %v212_v13  ;;  %v2931_v33 = vpop.eup %2930 }
 0x2c4   :  { %s4731_s0 = smul.f32 %s4548_s25, %s8710_s13  ;;  %s4742_s25 = spop %2867  ;;  %v316_v18 = vsel %vm145_vm4, %v315_v14, %v312_v10  ;;  %2893 = vpush %v2931_v33 }
 0x2c5   :  { %v361_v12 = vstv %s4719_s10  ;;  %s290_s8 = sadd.f32 %s289_s14, %s4597_s5  ;;  %s8714_s4 = sld [smem:[#allocation48_spill]]  ;;  %216 = vst [vmem:[#allocation7] sm:$0xff] %v215_v17 }
 0x2c6   :  { %v362_v15 = vsel %vm8707_vm8, %v361_v12, %v358_v11  ;;  %v365_v16 = vstv %s4731_s0  ;;  %s8715_s23 = sand.u32 2147483647, %s8711_s27  ;;  %s8717_s5 = sld [smem:[#allocation49_spill]]  ;;  %vm8732_vm8 = vcmp.eq.s32.totalorder %v4367_v32, 7 }
 0x2c7   :  { %s427_s26 = smul.f32 %s4742_s25, %s8715_s23  ;;  %v366_v19 = vsel %vm205_vm0, %v365_v16, %v362_v15  ;;  %s4760_s22 = spop %2869  ;;  %v319_v20 = vstv %s290_s8 }
 0x2c8   :  { %s8716_s3 = sand.u32 2147483647, %s8712_s11  ;;  %s291_s13 = sadd.f32 %s290_s8, %s4606_s17  ;;  %v369_v21 = vsel %vm210_vm15, %v365_v16, %v366_v19  ;;  %v320_v23 = vsel %vm7947_vm5, %v319_v20, %v316_v18 }
 0x2c9   :  { %s428_s15 = smul.f32 %s4742_s25, %s8716_s3  ;;  %s8718_s27 = sand.u32 2147483647, %s8713_s16  ;;  %v460_v22 = vstv %s427_s26  ;;  %v4777_v27 = vmul.f32 %v369_v21, %v4612_v31 }
 0x2ca   :  { %s429_s14 = smul.f32 %s4742_s25, %s8718_s27  ;;  %s8719_s23 = sld [smem:[#allocation50_spill]]  ;;  %v461_v24 = vsel %vm130_vm1, %v460_v22, 0.0  ;;  %v323_v26 = vstv %s291_s13 }
 0x2cb   :  { %s8720_s11 = sand.u32 2147483647, %s8714_s4  ;;  %s444_s2 = sadd.f32 %s428_s15, %s427_s26  ;;  %v462_v25 = vstv %s428_s15  ;;  %v324_v34 = vsel %vm155_vm6, %v323_v26, %v320_v23 }
 0x2cc   :  { %s430_s3 = smul.f32 %s4742_s25, %s8720_s11  ;;  %s292_s17 = sadd.f32 %s291_s13, %s4621_s20  ;;  %v463_v29 = vsel %vm130_vm1, %v462_v25, 0.0  ;;  %v466_v30 = vstv %s429_s14 }
 0x2cd   :  { %s8721_s8 = sld [smem:[#allocation51_spill]]  ;;  %s8722_s16 = sand.u32 2147483647, %s8717_s5  ;;  %v464_v35 = vstv %s444_s2  ;;  %v467_v36 = vsel %vm135_vm2, %v466_v30, %v463_v29 }
 0x2ce   :  { %s4782_s27 = smul.f32 %s4742_s25, %s8722_s16  ;;  %s8723_s4 = sld [smem:[#allocation52_spill]]  ;;  %v470_v28 = vstv %s430_s3  ;;  %v327_v37 = vstv %s292_s17  ;;  %v465_v38 = vsel %vm135_vm2, %v464_v35, %v461_v24 }
 0x2cf   :  { %s445_s15 = sadd.f32 %s444_s2, %s429_s14  ;;  %s8725_s5 = sld [smem:[#allocation53_spill]]  ;;  %v471_v39 = vsel %vm140_vm3, %v470_v28, %v467_v36  ;;  %v328_v41 = vsel %vm7946_vm7, %v327_v37, %v324_v34 }
 0x2d0   :  { %s8724_s20 = sand.u32 2147483647, %s8719_s23  ;;  %s293_s13 = sadd.f32 %s292_s17, %s4632_s6  ;;  %v474_v40 = vstv %s4782_s27 }
 0x2d1   :  { %s4791_s26 = smul.f32 %s4742_s25, %s8724_s20  ;;  %s8727_s2 = sld [smem:[#allocation54_spill]]  ;;  %v468_v42 = vstv %s445_s15  ;;  %v475_v43 = vsel %vm145_vm4, %v474_v40, %v471_v39 }
 0x2d2   :  { %s446_s23 = sadd.f32 %s445_s15, %s430_s3  ;;  %s8729_s17 = sld [smem:[#allocation55_spill]]  ;;  %v331_v45 = vstv %s293_s13  ;;  %v469_v46 = vsel %vm140_vm3, %v468_v42, %v465_v38 }
 0x2d3   :  { %s8726_s11 = sand.u32 2147483647, %s8721_s8  ;;  %v478_v44 = vstv %s4791_s26  ;;  %s294_s8 = sadd.f32 %s293_s13, %s4644_s9  ;;  %v332_v49 = vsel %vm8732_vm8, %v331_v45, %v328_v41 }
 0x2d4   :  { %s4799_s16 = smul.f32 %s4742_s25, %s8726_s11  ;;  %s8728_s14 = sand.u32 2147483647, %s8723_s4  ;;  %v479_v47 = vsel %vm7947_vm5, %v478_v44, %v475_v43  ;;  %v472_v50 = vstv %s446_s23 }
 0x2d5   :  { %s4811_s6 = smul.f32 %s4742_s25, %s8728_s14  ;;  %s8730_s20 = sand.u32 2147483647, %s8725_s5  ;;  %v335_v53 = vstv %s294_s8  ;;  %v473_v54 = vsel %vm145_vm4, %v472_v50, %v469_v46 }
 0x2d6   :  { %s4820_s11 = smul.f32 %s4742_s25, %s8730_s20  ;;  %s8731_s3 = sld [smem:[#allocation56_spill]]  ;;  %v482_v48 = vstv %s4799_s16  ;;  %v336_v57 = vsel %vm170_vm9, %v335_v53, %v332_v49 }
 0x2d7   :  { %s8733_s4 = sand.u32 2147483647, %s8727_s2  ;;  %s447_s15 = sadd.f32 %s446_s23, %s4782_s27  ;;  %v483_v51 = vsel %vm155_vm6, %v482_v48, %v479_v47  ;;  %v486_v52 = vstv %s4811_s6 }
 0x2d8   :  { %s4832_s9 = smul.f32 %s4742_s25, %s8733_s4  ;;  %s8734_s5 = sld [smem:[#allocation57_spill]]  ;;  %v487_v55 = vsel %vm7946_vm7, %v486_v52, %v483_v51  ;;  %v490_v56 = vstv %s4820_s11 }
 0x2d9   :  { %s295_s13 = sadd.f32 %s294_s8, %s4654_s19  ;;  %s8735_s14 = sand.u32 2147483647, %s8729_s17  ;;  %v476_v58 = vstv %s447_s15  ;;  %v491_v59 = vsel %vm8732_vm8, %v490_v56, %v487_v55 }
 0x2da   :  { %s4842_s20 = smul.f32 %s4742_s25, %s8735_s14  ;;  %s8736_s27 = sld [smem:[#allocation58_spill]]  ;;  %v494_v60 = vstv %s4832_s9  ;;  %v477_v62 = vsel %vm7947_vm5, %v476_v58, %v473_v54 }
 0x2db   :  { %s448_s23 = sadd.f32 %s447_s15, %s4791_s26  ;;  %s8738_s17 = sld [smem:[#allocation59_spill]]  ;;  %v339_v61 = vstv %s295_s13  ;;  %v495_v63 = vsel %vm170_vm9, %v494_v60, %v491_v59 }
 0x2dc   :  { %s8737_s2 = sand.u32 2147483647, %s8731_s3  ;;  %s296_s8 = sadd.f32 %s295_s13, %s4667_s7  ;;  %v498_v0 = vstv %s4842_s20  ;;  %v340_v1 = vsel %vm175_vm10, %v339_v61, %v336_v57 }
 0x2dd   :  { %s4854_s19 = smul.f32 %s4742_s25, %s8737_s2  ;;  %s8740_s26 = sld [smem:[#allocation60_spill]]  ;;  %v480_v2 = vstv %s448_s23  ;;  %v499_v3 = vsel %vm175_vm10, %v498_v0, %v495_v63 }
 0x2de   :  { %s8739_s4 = sand.u32 2147483647, %s8734_s5  ;;  %s449_s15 = sadd.f32 %s448_s23, %s4799_s16  ;;  %v343_v5 = vstv %s296_s8  ;;  %v481_v6 = vsel %vm155_vm6, %v480_v2, %v477_v62 }
 0x2df   :  { %s4864_s14 = smul.f32 %s4742_s25, %s8739_s4  ;;  %s8742_s5 = sld [smem:[#allocation61_spill]]  ;;  %v502_v4 = vstv %s4854_s19  ;;  %v344_v9 = vsel %vm180_vm11, %v343_v5, %v340_v1 }
 0x2e0   :  { %s8741_s3 = sand.u32 2147483647, %s8736_s27  ;;  %s297_s13 = sadd.f32 %s296_s8, %s4676_s29  ;;  %v503_v7 = vsel %vm180_vm11, %v502_v4, %v499_v3  ;;  %v484_v10 = vstv %s449_s15 }
 0x2e1   :  { %s4876_s7 = smul.f32 %s4742_s25, %s8741_s3  ;;  %s8743_s2 = sand.u32 2147483647, %s8738_s17  ;;  %v506_v8 = vstv %s4864_s14  ;;  %v485_v14 = vsel %vm7946_vm7, %v484_v10, %v481_v6  ;;  %vm8751_vm7 = vcmp.eq.s32.totalorder %v4367_v32, 14 }
 0x2e2   :  { %s4886_s4 = smul.f32 %s4742_s25, %s8743_s2  ;;  %s8745_s29 = sld [smem:[#allocation62_spill]]  ;;  %v507_v11 = vsel %vm185_vm12, %v506_v8, %v503_v7  ;;  %v347_v13 = vstv %s297_s13 }
 0x2e3   :  { %s8744_s16 = sand.u32 2147483647, %s8740_s26  ;;  %s450_s23 = sadd.f32 %s449_s15, %s4811_s6  ;;  %v510_v12 = vstv %s4876_s7  ;;  %v348_v17 = vsel %vm185_vm12, %v347_v13, %v344_v9 }
 0x2e4   :  { %s4898_s27 = smul.f32 %s4742_s25, %s8744_s16  ;;  %s298_s17 = sadd.f32 %s297_s13, %s4688_s24  ;;  %v511_v15 = vsel %vm190_vm13, %v510_v12, %v507_v11  ;;  %v514_v16 = vstv %s4886_s4 }
 0x2e5   :  { %s8746_s8 = sand.u32 2147483647, %s8742_s5  ;;  %s8747_s3 = sld [smem:[#allocation63_spill]]  ;;  %v488_v18 = vstv %s450_s23  ;;  %v515_v19 = vsel %vm195_vm14, %v514_v16, %v511_v15 }
 0x2e6   :  { %s4908_s2 = smul.f32 %s4742_s25, %s8746_s8  ;;  %s8748_s6 = sld [smem:[#allocation64_spill]]  ;;  %v518_v20 = vstv %s4898_s27  ;;  %v351_v21 = vstv %s298_s17  ;;  %v489_v22 = vsel %vm8732_vm8, %v488_v18, %v485_v14  ;;  %vm8773_vm8 = vcmp.eq.s32.totalorder %v4367_v32, 6 }
 0x2e7   :  { %s451_s24 = sadd.f32 %s450_s23, %s4820_s11  ;;  %s8750_s5 = sld [smem:[#allocation65_spill]]  ;;  %v519_v23 = vsel %vm8751_vm7, %v518_v20, %v515_v19  ;;  %v352_v25 = vsel %vm190_vm13, %v351_v21, %v348_v17 }
 0x2e8   :  { %s8749_s25 = sand.u32 2147483647, %s8745_s29  ;;  %s299_s15 = sadd.f32 %s298_s17, %s4699_s21  ;;  %v522_v24 = vstv %s4908_s2 }
 0x2e9   :  { %s4924_s26 = smul.f32 %s4760_s22, %s8749_s25  ;;  %s8753_s16 = sld [smem:[#allocation66_spill]]  ;;  %v492_v26 = vstv %s451_s24  ;;  %v523_v29 = vsel %vm205_vm0, %v522_v24, %v519_v23 }
 0x2ea   :  { %s452_s21 = sadd.f32 %s451_s24, %s4832_s9  ;;  %s8755_s17 = sld [smem:[#allocation67_spill]]  ;;  %v355_v33 = vstv %s299_s15  ;;  %v493_v34 = vsel %vm170_vm9, %v492_v26, %v489_v22  ;;  %v526_v35 = vsel %vm210_vm15, %v522_v24, %v523_v29 }
 0x2eb   :  { %s8752_s11 = sand.u32 2147483647, %s8747_s3  ;;  %v617_v30 = vstv %s4924_s26  ;;  %s300_s8 = sadd.f32 %s299_s15, %s4709_s18  ;;  %v356_v28 = vsel %vm195_vm14, %v355_v33, %v352_v25  ;;  %v4964_v38 = vmul.f32 %v526_v35, %v4612_v31 }
 0x2ec   :  { %s4935_s13 = smul.f32 %s4760_s22, %s8752_s11  ;;  %s8754_s29 = sand.u32 2147483647, %s8748_s6  ;;  %v618_v36 = vsel %vm130_vm1, %v617_v30, 0.0  ;;  %v496_v37 = vstv %s452_s21 }
 0x2ed   :  { %s4945_s23 = smul.f32 %s4760_s22, %s8754_s29  ;;  %s8756_s9 = sand.u32 2147483647, %s8750_s5  ;;  %v359_v40 = vstv %s300_s8  ;;  %v497_v41 = vsel %vm175_vm10, %v496_v37, %v493_v34 }
 0x2ee   :  { %s4956_s3 = smul.f32 %s4760_s22, %s8756_s9  ;;  %s8757_s6 = sld [smem:[#allocation68_spill]]  ;;  %v619_v39 = vstv %s4935_s13  ;;  %v360_v44 = vsel %vm8751_vm7, %v359_v40, %v356_v28  ;;  %vm8778_vm7 = vcmp.eq.s32.totalorder %v4367_v32, 7 }
 0x2ef   :  { %s453_s18 = sadd.f32 %s452_s21, %s4842_s20  ;;  %s8758_s24 = sand.u32 2147483647, %s8753_s16  ;;  %v620_v42 = vsel %vm130_vm1, %v619_v39, 0.0  ;;  %v623_v43 = vstv %s4945_s23 }
 0x2f0   :  { %s4969_s25 = smul.f32 %s4760_s22, %s8758_s24  ;;  %s8759_s15 = sld [smem:[#allocation69_spill]]  ;;  %v624_v46 = vsel %vm135_vm2, %v623_v43, %v620_v42  ;;  %v627_v47 = vstv %s4956_s3 }
 0x2f1   :  { %s301_s5 = sadd.f32 %s300_s8, %s4719_s10  ;;  %s8760_s11 = sand.u32 2147483647, %s8755_s17  ;;  %v500_v45 = vstv %s453_s18  ;;  %v628_v50 = vsel %vm140_vm3, %v627_v47, %v624_v46 }
 0x2f2   :  { %s4978_s20 = smul.f32 %s4760_s22, %s8760_s11  ;;  %s8761_s16 = sld [smem:[#allocation70_spill]]  ;;  %v501_v49 = vsel %vm180_vm11, %v500_v45, %v497_v41  ;;  %v631_v51 = vstv %s4969_s25 }
 0x2f3   :  { %s454_s21 = sadd.f32 %s453_s18, %s4854_s19  ;;  %s8763_s17 = sld [smem:[#allocation71_spill]]  ;;  %v363_v48 = vstv %s301_s5  ;;  %v632_v54 = vsel %vm145_vm4, %v631_v51, %v628_v50 }
 0x2f4   :  { %s8762_s10 = sand.u32 2147483647, %s8757_s6  ;;  %s302_s8 = sadd.f32 %s301_s5, %s4731_s0  ;;  %v364_v52 = vsel %vm205_vm0, %v363_v48, %v360_v44  ;;  %v635_v55 = vstv %s4978_s20 }
 0x2f5   :  { %s4989_s29 = smul.f32 %s4760_s22, %s8762_s10  ;;  %s8765_s6 = sld [smem:[#allocation72_spill]]  ;;  %v504_v53 = vstv %s454_s21  ;;  %v636_v58 = vsel %vm7947_vm5, %v635_v55, %v632_v54 }
 0x2f6   :  { %s8764_s19 = sand.u32 2147483647, %s8759_s15  ;;  %s455_s18 = sadd.f32 %s454_s21, %s4864_s14  ;;  %v367_v56 = vstv %s302_s8  ;;  %v505_v57 = vsel %vm185_vm12, %v504_v53, %v501_v49 }
 0x2f7   :  { %s5000_s9 = smul.f32 %s4760_s22, %s8764_s19  ;;  %s8767_s15 = sld [smem:[#allocation73_spill]]  ;;  %v639_v59 = vstv %s4989_s29  ;;  %v368_v60 = vsel %vm210_vm15, %v367_v56, %v364_v52 }
 0x2f8   :  { %s8766_s0 = sand.u32 2147483647, %s8761_s16  ;;  %s601_s14 = sadd.f32 %s4935_s13, %s4924_s26  ;;  %v508_v61 = vstv %s455_s18  ;;  %v640_v62 = vsel %vm155_vm6, %v639_v59, %v636_v58  ;;  %v371_v0 = vadd.f32 %v4777_v27, %v368_v60 }
 0x2f9   :  { %s5011_s24 = smul.f32 %s4760_s22, %s8766_s0  ;;  %s8768_s5 = sand.u32 2147483647, %s8763_s17  ;;  %v643_v63 = vstv %s5000_s9  ;;  %v509_v1 = vsel %vm190_vm13, %v508_v61, %v505_v57 }
 0x2fa   :  { %s5021_s11 = smul.f32 %s4760_s22, %s8768_s5  ;;  %s8769_s16 = sld [smem:[#allocation74_spill]]  ;;  %v621_v2 = vstv %s601_s14  ;;  %v644_v3 = vsel %vm8773_vm8, %v643_v63, %v640_v62  ;;  %373 = vst [vmem:[#allocation7 + $0x8] sm:$0xff] %v371_v0  ;;  %vm8781_vm8 = vcmp.eq.s32.totalorder %v4367_v32, 14 }
 0x2fb   :  { %s456_s21 = sadd.f32 %s455_s18, %s4876_s7  ;;  %s8770_s10 = sand.u32 2147483647, %s8765_s6  ;;  %v622_v27 = vsel %vm135_vm2, %v621_v2, %v618_v36  ;;  %v647_v5 = vstv %s5011_s24 }
 0x2fc   :  { %s5034_s8 = smul.f32 %s4760_s22, %s8770_s10  ;;  %s8771_s26 = sld [smem:[#allocation75_spill]]  ;;  %v651_v6 = vstv %s5021_s11  ;;  %v648_v9 = vsel %vm8778_vm7, %v647_v5, %v644_v3  ;;  %vm8791_vm7 = vmmov %vm8781_vm8 }
 0x2fd   :  { %s8772_s13 = sand.u32 2147483647, %s8767_s15  ;;  %s602_s7 = sadd.f32 %s601_s14, %s4945_s23  ;;  %v512_v4 = vstv %s456_s21  ;;  %v652_v13 = vsel %vm170_vm9, %v651_v6, %v648_v9 }
 0x2fe   :  { %s5045_s17 = smul.f32 %s4760_s22, %s8772_s13  ;;  %s8774_s19 = sld [smem:[#allocation76_spill]]  ;;  %v513_v7 = vsel %vm195_vm14, %v512_v4, %v509_v1  ;;  %v655_v10 = vstv %s5034_s8 }
 0x2ff   :  { %s457_s6 = sadd.f32 %s456_s21, %s4886_s4  ;;  %s8776_s15 = sld [smem:[#allocation77_spill]]  ;;  %v625_v8 = vstv %s602_s7  ;;  %v656_v17 = vsel %vm175_vm10, %v655_v10, %v652_v13 }
 0x300   :  { %s8775_s18 = sand.u32 2147483647, %s8769_s16  ;;  %s603_s4 = sadd.f32 %s602_s7, %s4956_s3  ;;  %v626_v12 = vsel %vm140_vm3, %v625_v8, %v622_v27  ;;  %v659_v14 = vstv %s5045_s17 }
 0x301   :  { %s5054_s0 = smul.f32 %s4760_s22, %s8775_s18  ;;  %s8779_s14 = sld [smem:[#allocation78_spill]]  ;;  %v516_v11 = vstv %s457_s6  ;;  %v660_v21 = vsel %vm180_vm11, %v659_v14, %v656_v17 }
 0x302   :  { %s8777_s23 = sand.u32 2147483647, %s8771_s26  ;;  %s458_s16 = sadd.f32 %s457_s6, %s4898_s27  ;;  %v517_v15 = vsel %vm8781_vm8, %v516_v11, %v513_v7  ;;  %v629_v16 = vstv %s603_s4  ;;  %vm8796_vm8 = vcmp.eq.s32.totalorder %v4367_v32, 6 }
 0x303   :  { %s5065_s5 = smul.f32 %s4760_s22, %s8777_s23  ;;  %s604_s27 = sadd.f32 %s603_s4, %s4969_s25  ;;  %v663_v18 = vstv %s5054_s0  ;;  %v630_v20 = vsel %vm145_vm4, %v629_v16, %v626_v12 }
 0x304   :  { %s8780_s21 = sand.u32 2147483647, %s8774_s19  ;;  %s459_s13 = sadd.f32 %s458_s16, %s4908_s2  ;;  %v520_v19 = vstv %s458_s16  ;;  %v664_v25 = vsel %vm185_vm12, %v663_v18, %v660_v21 }
 0x305   :  { %s5075_s10 = smul.f32 %s4760_s22, %s8780_s21  ;;  %s8782_s3 = sand.u32 2147483647, %s8776_s15  ;;  %v667_v22 = vstv %s5065_s5  ;;  %v521_v23 = vsel %vm205_vm0, %v520_v19, %v517_v15  ;;  %v633_v24 = vstv %s604_s27 }
 0x306   :  { %s5087_s26 = smul.f32 %s4760_s22, %s8782_s3  ;;  %s8783_s7 = sld [smem:[#allocation79_spill]]  ;;  %v524_v29 = vstv %s459_s13  ;;  %v634_v30 = vsel %vm7947_vm5, %v633_v24, %v630_v20  ;;  %v668_v33 = vsel %vm190_vm13, %v667_v22, %v664_v25 }
 0x307   :  { %s8784_s19 = sand.u32 2147483647, %s8779_s14  ;;  %s605_s25 = sadd.f32 %s604_s27, %s4978_s20  ;;  %v671_v26 = vstv %s5075_s10  ;;  %v525_v35 = vsel %vm210_vm15, %v524_v29, %v521_v23 }
 0x308   :  { %s5097_s6 = smul.f32 %s4760_s22, %s8784_s19  ;;  %s8785_s18 = sld [smem:[#allocation80_spill]]  ;;  %v675_v34 = vstv %s5087_s26  ;;  %v672_v28 = vsel %vm195_vm14, %v671_v26, %v668_v33  ;;  %v528_v39 = vadd.f32 %v4964_v38, %v525_v35 }
 0x309   :  { %s5110_s22 = spop %2871  ;;  %s8786_s2 = sld [smem:[#allocation81_spill]]  ;;  %v637_v36 = vstv %s605_s25  ;;  %v676_v41 = vsel %vm8791_vm7, %v675_v34, %v672_v28  ;;  %vm8801_vm7 = vcmp.eq.s32.totalorder %v4367_v32, 7 }
 0x30a   :  { %s5120_s23 = spop %2873  ;;  %s8788_s4 = sld [smem:[#allocation82_spill]]  ;;  %v679_v37 = vstv %s5097_s6  ;;  %v638_v40 = vsel %vm155_vm6, %v637_v36, %v634_v30  ;;  %530 = vst [vmem:[#allocation7 + $0x10] sm:$0xff] %v528_v39 }
 0x30b   :  { %s606_s14 = sadd.f32 %s605_s25, %s4989_s29  ;;  %s8790_s3 = sld [smem:[#allocation83_spill]]  ;;  %v680_v44 = vsel %vm205_vm0, %v679_v37, %v676_v41 }
 0x30c   :  { %s8787_s20 = sand.u32 2147483647, %s8783_s7  ;;  %s5139_s29 = spop %2875  ;;  %v683_v47 = vsel %vm210_vm15, %v679_v37, %v680_v44 }
 0x30d   :  { %s741_s15 = smul.f32 %s5110_s22, %s8787_s20  ;;  %s607_s7 = sadd.f32 %s606_s14, %s5000_s9  ;;  %v641_v43 = vstv %s606_s14  ;;  %v5164_v51 = vmul.f32 %v683_v47, %v4612_v31 }
 0x30e   :  { %s8789_s16 = sand.u32 2147483647, %s8785_s18  ;;  %s8793_s19 = sld [smem:[#allocation84_spill]]  ;;  %v642_v46 = vsel %vm8796_vm8, %v641_v43, %v638_v40 }
 0x30f   :  { %s742_s21 = smul.f32 %s5110_s22, %s8789_s16  ;;  %s8792_s27 = sand.u32 2147483647, %s8786_s2  ;;  %v774_v42 = vstv %s741_s15  ;;  %v645_v50 = vstv %s607_s7 }
 0x310   :  { %s743_s13 = smul.f32 %s5110_s22, %s8792_s27  ;;  %s8794_s25 = sand.u32 2147483647, %s8788_s4  ;;  %v775_v38 = vsel %vm130_vm1, %v774_v42, 0.0  ;;  %v646_v54 = vsel %vm8801_vm7, %v645_v50, %v642_v46 }
 0x311   :  { %s5147_s18 = smul.f32 %s5110_s22, %s8794_s25  ;;  %s8795_s2 = sld [smem:[#allocation85_spill]]  ;;  %v776_v45 = vstv %s742_s21 }
 0x312   :  { %s8797_s9 = sand.u32 2147483647, %s8790_s3  ;;  %s758_s4 = sadd.f32 %s742_s21, %s741_s15  ;;  %v777_v48 = vsel %vm130_vm1, %v776_v45, 0.0  ;;  %v780_v49 = vstv %s743_s13 }
 0x313   :  { %s5158_s20 = smul.f32 %s5110_s22, %s8797_s9  ;;  %s8798_s14 = sld [smem:[#allocation86_spill]]  ;;  %v781_v52 = vsel %vm135_vm2, %v780_v49, %v777_v48  ;;  %v784_v53 = vstv %s5147_s18 }
 0x314   :  { %s608_s16 = sadd.f32 %s607_s7, %s5011_s24  ;;  %s8799_s27 = sand.u32 2147483647, %s8793_s19  ;;  %v778_v55 = vstv %s758_s4  ;;  %v785_v56 = vsel %vm140_vm3, %v784_v53, %v781_v52 }
 0x315   :  { %s5169_s25 = smul.f32 %s5110_s22, %s8799_s27  ;;  %s8800_s3 = sld [smem:[#allocation87_spill]]  ;;  %v788_v57 = vstv %s5158_s20  ;;  %v779_v59 = vsel %vm135_vm2, %v778_v55, %v775_v38 }
 0x316   :  { %s759_s21 = sadd.f32 %s758_s4, %s743_s13  ;;  %s8803_s7 = sld [smem:[#allocation88_spill]]  ;;  %v649_v58 = vstv %s608_s16  ;;  %v789_v60 = vsel %vm145_vm4, %v788_v57, %v785_v56 }
 0x317   :  { %s8802_s15 = sand.u32 2147483647, %s8795_s2  ;;  %s609_s19 = sadd.f32 %s608_s16, %s5021_s11  ;;  %v792_v61 = vstv %s5169_s25  ;;  %v650_v62 = vsel %vm170_vm9, %v649_v58, %v646_v54 }
 0x318   :  { %s5179_s24 = smul.f32 %s5110_s22, %s8802_s15  ;;  %s8805_s13 = sld [smem:[#allocation89_spill]]  ;;  %v782_v63 = vstv %s759_s21  ;;  %v793_v0 = vsel %vm7947_vm5, %v792_v61, %v789_v60 }
 0x319   :  { %s8804_s9 = sand.u32 2147483647, %s8798_s14  ;;  %s760_s4 = sadd.f32 %s759_s21, %s5147_s18  ;;  %v653_v2 = vstv %s609_s19  ;;  %v783_v3 = vsel %vm140_vm3, %v782_v63, %v779_v59 }
 0x31a   :  { %s5188_s27 = smul.f32 %s5110_s22, %s8804_s9  ;;  %s8807_s14 = sld [smem:[#allocation90_spill]]  ;;  %v796_v1 = vstv %s5179_s24  ;;  %v654_v5 = vsel %vm175_vm10, %v653_v2, %v650_v62 }
 0x31b   :  { %s8806_s2 = sand.u32 2147483647, %s8800_s3  ;;  %s610_s16 = sadd.f32 %s609_s19, %s5034_s8  ;;  %v797_v4 = vsel %vm155_vm6, %v796_v1, %v793_v0  ;;  %v786_v6 = vstv %s760_s4 }
 0x31c   :  { %s5200_s11 = smul.f32 %s5110_s22, %s8806_s2  ;;  %s8808_s15 = sand.u32 2147483647, %s8803_s7  ;;  %v800_v27 = vstv %s5188_s27  ;;  %v787_v10 = vsel %vm145_vm4, %v786_v6, %v783_v3 }
 0x31d   :  { %s5210_s9 = smul.f32 %s5110_s22, %s8808_s15  ;;  %s8809_s18 = sld [smem:[#allocation91_spill]]  ;;  %v801_v7 = vsel %vm8796_vm8, %v800_v27, %v797_v4  ;;  %v657_v9 = vstv %s610_s16 }
 0x31e   :  { %s8810_s3 = sand.u32 2147483647, %s8805_s13  ;;  %s761_s21 = sadd.f32 %s760_s4, %s5158_s20  ;;  %v804_v8 = vstv %s5200_s11  ;;  %v658_v13 = vsel %vm180_vm11, %v657_v9, %v654_v5 }
 0x31f   :  { %s5222_s8 = smul.f32 %s5110_s22, %s8810_s3  ;;  %s8811_s7 = sld [smem:[#allocation92_spill]]  ;;  %v805_v11 = vsel %vm8801_vm7, %v804_v8, %v801_v7  ;;  %v808_v12 = vstv %s5210_s9  ;;  %vm8826_vm7 = vcmp.eq.s32.totalorder %v4367_v32, 14 }
 0x320   :  { %s611_s19 = sadd.f32 %s610_s16, %s5045_s17  ;;  %s8812_s2 = sand.u32 2147483647, %s8807_s14  ;;  %v790_v14 = vstv %s761_s21  ;;  %v809_v15 = vsel %vm170_vm9, %v808_v12, %v805_v11 }
 0x321   :  { %s5232_s15 = smul.f32 %s5110_s22, %s8812_s2  ;;  %s8813_s20 = sld [smem:[#allocation93_spill]]  ;;  %v812_v16 = vstv %s5222_s8  ;;  %v791_v18 = vsel %vm7947_vm5, %v790_v14, %v787_v10 }
 0x322   :  { %s762_s4 = sadd.f32 %s761_s21, %s5169_s25  ;;  %s8815_s14 = sld [smem:[#allocation94_spill]]  ;;  %v661_v17 = vstv %s611_s19  ;;  %v813_v19 = vsel %vm175_vm10, %v812_v16, %v809_v15 }
 0x323   :  { %s8814_s13 = sand.u32 2147483647, %s8809_s18  ;;  %s612_s16 = sadd.f32 %s611_s19, %s5054_s0  ;;  %v816_v20 = vstv %s5232_s15  ;;  %v662_v21 = vsel %vm185_vm12, %v661_v17, %v658_v13 }
 0x324   :  { %s5244_s17 = smul.f32 %s5110_s22, %s8814_s13  ;;  %s8817_s25 = sld [smem:[#allocation95_spill]]  ;;  %v794_v22 = vstv %s762_s4  ;;  %v817_v23 = vsel %vm180_vm11, %v816_v20, %v813_v19 }
 0x325   :  { %s8816_s3 = sand.u32 2147483647, %s8811_s7  ;;  %s763_s21 = sadd.f32 %s762_s4, %s5179_s24  ;;  %v665_v25 = vstv %s612_s16  ;;  %v795_v26 = vsel %vm155_vm6, %v794_v22, %v791_v18 }
 0x326   :  { %s5254_s2 = smul.f32 %s5110_s22, %s8816_s3  ;;  %v820_v24 = vstv %s5244_s17  ;;  %s613_s7 = sadd.f32 %s612_s16, %s5065_s5  ;;  %v666_v33 = vsel %vm190_vm13, %v665_v25, %v662_v21 }
 0x327   :  { %s8818_s18 = sand.u32 2147483647, %s8813_s20  ;;  %s8820_s13 = sld [smem:[#allocation96_spill]]  ;;  %v821_v29 = vsel %vm185_vm12, %v820_v24, %v817_v23  ;;  %v798_v34 = vstv %s763_s21 }
 0x328   :  { %s5266_s0 = smul.f32 %s5110_s22, %s8818_s18  ;;  %s8819_s19 = sand.u32 2147483647, %s8815_s14  ;;  %v824_v30 = vstv %s5254_s2  ;;  %v669_v28 = vstv %s613_s7  ;;  %v799_v37 = vsel %vm8796_vm8, %v798_v34, %v795_v26  ;;  %vm8829_vm8 = vcmp.eq.s32.totalorder %v4367_v32, 7 }
 0x329   :  { %s5276_s3 = smul.f32 %s5110_s22, %s8819_s19  ;;  %s8822_s20 = sld [smem:[#allocation97_spill]]  ;;  %v825_v35 = vsel %vm190_vm13, %v824_v30, %v821_v29  ;;  %v670_v41 = vsel %vm195_vm14, %v669_v28, %v666_v33 }
 0x32a   :  { %s8821_s24 = sand.u32 2147483647, %s8817_s25  ;;  %s764_s4 = sadd.f32 %s763_s21, %s5188_s27  ;;  %v828_v36 = vstv %s5266_s0 }
 0x32b   :  { %s5288_s5 = smul.f32 %s5110_s22, %s8821_s24  ;;  %s614_s14 = sadd.f32 %s613_s7, %s5075_s10  ;;  %v829_v39 = vsel %vm195_vm14, %v828_v36, %v825_v35  ;;  %v832_v40 = vstv %s5276_s3 }
 0x32c   :  { %s8823_s16 = sld [smem:[#allocation98_spill]]  ;;  %s8825_s25 = sld [smem:[#allocation99_spill]]  ;;  %v802_v42 = vstv %s764_s4  ;;  %v833_v43 = vsel %vm8826_vm7, %v832_v40, %v829_v39 }
 0x32d   :  { %s8824_s22 = sand.u32 2147483647, %s8820_s13  ;;  %s765_s10 = sadd.f32 %s764_s4, %s5200_s11  ;;  %v836_v44 = vstv %s5288_s5  ;;  %v673_v38 = vstv %s614_s14  ;;  %v803_v45 = vsel %vm8829_vm8, %v802_v42, %v799_v37  ;;  %vm8851_vm8 = vcmp.eq.s32.totalorder %v4367_v32, 6 }
 0x32e   :  { %s5303_s27 = smul.f32 %s5120_s23, %s8824_s22  ;;  %s615_s7 = sadd.f32 %s614_s14, %s5087_s26  ;;  %v837_v46 = vsel %vm205_vm0, %v836_v44, %v833_v43  ;;  %v674_v48 = vsel %vm8826_vm7, %v673_v38, %v670_v41  ;;  %vm8854_vm7 = vcmp.eq.s32.totalorder %v4367_v32, 7 }
 0x32f   :  { %s8827_s18 = sand.u32 2147483647, %s8822_s20  ;;  %s8828_s19 = sld [smem:[#allocation100_spill]]  ;;  %v806_v49 = vstv %s765_s10  ;;  %v840_v50 = vsel %vm210_vm15, %v836_v44, %v837_v46 }
 0x330   :  { %s899_s21 = smul.f32 %s5120_s23, %s8827_s18  ;;  %v931_v47 = vstv %s5303_s27  ;;  %s8831_s24 = sld [smem:[#allocation101_spill]]  ;;  %v677_v53 = vstv %s615_s7  ;;  %v807_v54 = vsel %vm170_vm9, %v806_v49, %v803_v45  ;;  %v5341_v55 = vmul.f32 %v840_v50, %v4612_v31 }
 0x331   :  { %s766_s26 = sadd.f32 %s765_s10, %s5210_s9  ;;  %s8833_s14 = sld [smem:[#allocation102_spill]]  ;;  %v932_v52 = vsel %vm130_vm1, %v931_v47, 0.0  ;;  %v678_v57 = vsel %vm205_vm0, %v677_v53, %v674_v48 }
 0x332   :  { %s8830_s13 = sand.u32 2147483647, %s8823_s16  ;;  %s8832_s20 = sand.u32 2147483647, %s8825_s25  ;;  %v933_v56 = vstv %s899_s21 }
 0x333   :  { %s5322_s11 = smul.f32 %s5120_s23, %s8830_s13  ;;  %s616_s16 = sadd.f32 %s615_s7, %s5097_s6  ;;  %v810_v58 = vstv %s766_s26  ;;  %v934_v59 = vsel %vm130_vm1, %v933_v56, 0.0 }
 0x334   :  { %s5333_s4 = smul.f32 %s5120_s23, %s8832_s20  ;;  %s8835_s25 = sld [smem:[#allocation103_spill]]  ;;  %v811_v62 = vsel %vm175_vm10, %v810_v58, %v807_v54 }
 0x335   :  { %s8834_s9 = sand.u32 2147483647, %s8828_s19  ;;  %s767_s10 = sadd.f32 %s766_s26, %s5222_s8  ;;  %v937_v60 = vstv %s5322_s11  ;;  %v681_v61 = vstv %s616_s16 }
 0x336   :  { %s5346_s22 = smul.f32 %s5120_s23, %s8834_s9  ;;  %s8836_s6 = sand.u32 2147483647, %s8831_s24  ;;  %v938_v63 = vsel %vm135_vm2, %v937_v60, %v934_v59  ;;  %v941_v0 = vstv %s5333_s4  ;;  %v682_v1 = vsel %vm210_vm15, %v681_v61, %v678_v57 }
 0x337   :  { %s5354_s18 = smul.f32 %s5120_s23, %s8836_s6  ;;  %s8837_s7 = sld [smem:[#allocation104_spill]]  ;;  %v814_v2 = vstv %s767_s10  ;;  %v942_v3 = vsel %vm140_vm3, %v941_v0, %v938_v63  ;;  %v685_v27 = vadd.f32 %v5164_v51, %v682_v1 }
 0x338   :  { %s8838_s19 = sand.u32 2147483647, %s8833_s14  ;;  %s915_s8 = sadd.f32 %s899_s21, %s5303_s27  ;;  %v945_v4 = vstv %s5346_s22  ;;  %v815_v5 = vsel %vm180_vm11, %v814_v2, %v811_v62 }
 0x339   :  { %s5364_s13 = smul.f32 %s5120_s23, %s8838_s19  ;;  %s8839_s24 = sld [smem:[#allocation105_spill]]  ;;  %v946_v7 = vsel %vm145_vm4, %v945_v4, %v942_v3  ;;  %v949_v9 = vstv %s5354_s18  ;;  %687 = vst [vmem:[#allocation7 + $0x18] sm:$0xff] %v685_v27 }
 0x33a   :  { %s768_s26 = sadd.f32 %s767_s10, %s5232_s15  ;;  %s8840_s20 = sand.u32 2147483647, %s8835_s25  ;;  %v935_v6 = vstv %s915_s8  ;;  %v950_v13 = vsel %vm7947_vm5, %v949_v9, %v946_v7 }
 0x33b   :  { %s5376_s16 = smul.f32 %s5120_s23, %s8840_s20  ;;  %s8841_s27 = sld [smem:[#allocation106_spill]]  ;;  %v936_v51 = vsel %vm135_vm2, %v935_v6, %v932_v52  ;;  %v953_v10 = vstv %s5364_s13 }
 0x33c   :  { %s916_s15 = sadd.f32 %s915_s8, %s5322_s11  ;;  %s8843_s9 = sld [smem:[#allocation107_spill]]  ;;  %v818_v8 = vstv %s768_s26  ;;  %v954_v17 = vsel %vm155_vm6, %v953_v10, %v950_v13 }
 0x33d   :  { %s8842_s21 = sand.u32 2147483647, %s8837_s7  ;;  %s769_s25 = sadd.f32 %s768_s26, %s5244_s17  ;;  %v819_v11 = vsel %vm185_vm12, %v818_v8, %v815_v5  ;;  %v957_v14 = vstv %s5376_s16 }
 0x33e   :  { %s5387_s14 = smul.f32 %s5120_s23, %s8842_s21  ;;  %s8845_s7 = sld [smem:[#allocation108_spill]]  ;;  %v939_v12 = vstv %s916_s15  ;;  %v958_v21 = vsel %vm8851_vm8, %v957_v14, %v954_v17  ;;  %vm8859_vm8 = vcmp.eq.s32.totalorder %v4367_v32, 14 }
 0x33f   :  { %s8844_s10 = sand.u32 2147483647, %s8839_s24  ;;  %s917_s17 = sadd.f32 %s916_s15, %s5333_s4  ;;  %v822_v15 = vstv %s769_s25  ;;  %v940_v16 = vsel %vm140_vm3, %v939_v12, %v936_v51 }
 0x340   :  { %s5396_s6 = smul.f32 %s5120_s23, %s8844_s10  ;;  %s8847_s8 = sld [smem:[#allocation109_spill]]  ;;  %v961_v18 = vstv %s5387_s14  ;;  %v823_v19 = vsel %vm190_vm13, %v822_v15, %v819_v11 }
 0x341   :  { %s8846_s11 = sand.u32 2147483647, %s8841_s27  ;;  %s770_s24 = sadd.f32 %s769_s25, %s5254_s2  ;;  %v943_v20 = vstv %s917_s17  ;;  %v962_v25 = vsel %vm8854_vm7, %v961_v18, %v958_v21  ;;  %vm8867_vm7 = vcmp.eq.s32.totalorder %v4367_v32, 6 }
 0x342   :  { %s5407_s19 = smul.f32 %s5120_s23, %s8846_s11  ;;  %s8848_s26 = sand.u32 2147483647, %s8843_s9  ;;  %v965_v22 = vstv %s5396_s6  ;;  %v944_v24 = vsel %vm145_vm4, %v943_v20, %v940_v16 }
 0x343   :  { %s5417_s20 = smul.f32 %s5120_s23, %s8848_s26  ;;  %s8849_s4 = sld [smem:[#allocation110_spill]]  ;;  %v826_v23 = vstv %s770_s24  ;;  %v966_v33 = vsel %vm170_vm9, %v965_v22, %v962_v25 }
 0x344   :  { %s8850_s27 = sand.u32 2147483647, %s8845_s7  ;;  %s918_s21 = sadd.f32 %s917_s17, %s5346_s22  ;;  %v969_v26 = vstv %s5407_s19  ;;  %v827_v29 = vsel %vm195_vm14, %v826_v23, %v823_v19 }
 0x345   :  { %s5429_s2 = smul.f32 %s5120_s23, %s8850_s27  ;;  %s8852_s15 = sld [smem:[#allocation111_spill]]  ;;  %v973_v34 = vstv %s5417_s20  ;;  %v970_v28 = vsel %vm175_vm10, %v969_v26, %v966_v33 }
 0x346   :  { %s771_s9 = sadd.f32 %s770_s24, %s5266_s0  ;;  %s8853_s25 = sand.u32 2147483647, %s8847_s8  ;;  %v947_v30 = vstv %s918_s21  ;;  %v974_v41 = vsel %vm180_vm11, %v973_v34, %v970_v28 }
 0x347   :  { %s5439_s10 = smul.f32 %s5120_s23, %s8853_s25  ;;  %s8855_s22 = sld [smem:[#allocation112_spill]]  ;;  %v948_v36 = vsel %vm7947_vm5, %v947_v30, %v944_v24  ;;  %v977_v37 = vstv %s5429_s2 }
 0x348   :  { %s919_s11 = sadd.f32 %s918_s21, %s5354_s18  ;;  %v830_v35 = vstv %s771_s9  ;;  %s8858_s24 = sld [smem:[#allocation113_spill]]  ;;  %v978_v38 = vsel %vm185_vm12, %v977_v37, %v974_v41 }
 0x349   :  { %s8856_s7 = sand.u32 2147483647, %s8849_s4  ;;  %s772_s17 = sadd.f32 %s771_s9, %s5276_s3  ;;  %v831_v39 = vsel %vm8859_vm8, %v830_v35, %v827_v29  ;;  %v981_v42 = vstv %s5439_s10 }
 0x34a   :  { %s5451_s0 = smul.f32 %s5120_s23, %s8856_s7  ;;  %s8861_s4 = sld [smem:[#allocation114_spill]]  ;;  %v951_v40 = vstv %s919_s11  ;;  %v982_v48 = vsel %vm190_vm13, %v981_v42, %v978_v38 }
 0x34b   :  { %s8857_s8 = sand.u32 2147483647, %s8852_s15  ;;  %s920_s27 = sadd.f32 %s919_s11, %s5364_s13  ;;  %v834_v43 = vstv %s772_s17  ;;  %v952_v44 = vsel %vm155_vm6, %v951_v40, %v948_v36 }
 0x34c   :  { %s5461_s26 = smul.f32 %s5120_s23, %s8857_s8  ;;  %s773_s21 = sadd.f32 %s772_s17, %s5288_s5  ;;  %v985_v45 = vstv %s5451_s0  ;;  %v835_v46 = vsel %vm205_vm0, %v834_v43, %v831_v39 }
 0x34d   :  { %s8860_s18 = sand.u32 2147483647, %s8855_s22  ;;  %s8862_s15 = sld [smem:[#allocation115_spill]]  ;;  %v955_v47 = vstv %s920_s27  ;;  %v986_v53 = vsel %vm195_vm14, %v985_v45, %v982_v48 }
 0x34e   :  { %s5473_s3 = smul.f32 %s5120_s23, %s8860_s18  ;;  %s8863_s23 = sand.u32 2147483647, %s8858_s24  ;;  %v989_v49 = vstv %s5461_s26  ;;  %v838_v50 = vstv %s773_s21  ;;  %v956_v52 = vsel %vm8867_vm7, %v955_v47, %v952_v44  ;;  %vm8872_vm7 = vcmp.eq.s32.totalorder %v4367_v32, 7 }
 0x34f   :  { %s1055_s13 = smul.f32 %s5139_s29, %s8863_s23  ;;  %s8864_s9 = sld [smem:[#allocation116_spill]]  ;;  %v839_v56 = vsel %vm210_vm15, %v838_v50, %v835_v46  ;;  %v990_v58 = vsel %vm8859_vm8, %v989_v49, %v986_v53  ;;  %vm8890_vm8 = vcmp.eq.s32.totalorder %v4367_v32, 6 }
 0x350   :  { %s921_s25 = sadd.f32 %s920_s27, %s5376_s16  ;;  %s8865_s5 = sand.u32 2147483647, %s8861_s4  ;;  %v993_v54 = vstv %s5473_s3  ;;  %v842_v60 = vadd.f32 %v5341_v55, %v839_v56 }
 0x351   :  { %s5497_s22 = smul.f32 %s5139_s29, %s8865_s5  ;;  %s8866_s7 = sld [smem:[#allocation117_spill]]  ;;  %v1088_v59 = vstv %s1055_s13  ;;  %v994_v62 = vsel %vm205_vm0, %v993_v54, %v990_v58 }
 0x352   :  { %s5509_s17 = spop %2877  ;;  %s8869_s8 = sld [smem:[#allocation118_spill]]  ;;  %v959_v57 = vstv %s921_s25  ;;  %v1089_v63 = vsel %vm130_vm1, %v1088_v59, 0.0  ;;  %v997_v55 = vsel %vm210_vm15, %v993_v54, %v994_v62  ;;  %844 = vst [vmem:[#allocation7 + $0x20] sm:$0xff] %v842_v60 }
 0x353   :  { %s8868_s16 = sand.u32 2147483647, %s8862_s15  ;;  %s922_s24 = sadd.f32 %s921_s25, %s5387_s14  ;;  %v960_v61 = vsel %vm8872_vm7, %v959_v57, %v956_v52  ;;  %v1090_v1 = vstv %s5497_s22  ;;  %v5547_v4 = vmul.f32 %v997_v55, %v4612_v31 }
 0x354   :  { %s5507_s11 = smul.f32 %s5139_s29, %s8868_s16  ;;  %s8871_s27 = sld [smem:[#allocation119_spill]]  ;;  %v1091_v27 = vsel %vm130_vm1, %v1090_v1, 0.0 }
 0x355   :  { %s8870_s18 = sand.u32 2147483647, %s8864_s9  ;;  %s1072_s15 = sadd.f32 %s5497_s22, %s1055_s13  ;;  %v963_v0 = vstv %s922_s24 }
 0x356   :  { %s5519_s4 = smul.f32 %s5139_s29, %s8870_s18  ;;  %s8874_s23 = sld [smem:[#allocation120_spill]]  ;;  %v1094_v2 = vstv %s5507_s11  ;;  %v964_v3 = vsel %vm170_vm9, %v963_v0, %v960_v61 }
 0x357   :  { %s8873_s14 = sand.u32 2147483647, %s8866_s7  ;;  %s923_s9 = sadd.f32 %s922_s24, %s5396_s6  ;;  %v1092_v5 = vstv %s1072_s15  ;;  %v1095_v8 = vsel %vm135_vm2, %v1094_v2, %v1091_v27 }
 0x358   :  { %s5529_s21 = smul.f32 %s5139_s29, %s8873_s14  ;;  %s8875_s25 = sand.u32 2147483647, %s8869_s8  ;;  %v1093_v7 = vsel %vm135_vm2, %v1092_v5, %v1089_v63  ;;  %v1098_v51 = vstv %s5519_s4 }
 0x359   :  { %s5540_s5 = smul.f32 %s5139_s29, %s8875_s25  ;;  %s8876_s7 = sld [smem:[#allocation121_spill]]  ;;  %v967_v6 = vstv %s923_s9  ;;  %v1099_v11 = vsel %vm140_vm3, %v1098_v51, %v1095_v8 }
 0x35a   :  { %s8877_s6 = sand.u32 2147483647, %s8871_s27  ;;  %s1073_s16 = sadd.f32 %s1072_s15, %s5507_s11  ;;  %v968_v9 = vsel %vm175_vm10, %v967_v6, %v964_v3  ;;  %v1102_v12 = vstv %s5529_s21 }
 0x35b   :  { %s5552_s13 = smul.f32 %s5139_s29, %s8877_s6  ;;  %s8878_s22 = sld [smem:[#allocation122_spill]]  ;;  %v1103_v15 = vsel %vm145_vm4, %v1102_v12, %v1099_v11  ;;  %v1106_v16 = vstv %s5540_s5 }
 0x35c   :  { %s924_s8 = sadd.f32 %s923_s9, %s5407_s19  ;;  %s8879_s24 = sand.u32 2147483647, %s8874_s23  ;;  %v1096_v10 = vstv %s1073_s16  ;;  %v1107_v19 = vsel %vm7947_vm5, %v1106_v16, %v1103_v15 }
 0x35d   :  { %s5561_s18 = smul.f32 %s5139_s29, %s8879_s24  ;;  %s8880_s27 = sld [smem:[#allocation123_spill]]  ;;  %v1097_v14 = vsel %vm140_vm3, %v1096_v10, %v1093_v7  ;;  %v1110_v20 = vstv %s5552_s13 }
 0x35e   :  { %s1074_s14 = sadd.f32 %s1073_s16, %s5519_s4  ;;  %s8882_s15 = sld [smem:[#allocation124_spill]]  ;;  %v971_v13 = vstv %s924_s8  ;;  %v1111_v23 = vsel %vm155_vm6, %v1110_v20, %v1107_v19 }
 0x35f   :  { %s8881_s11 = sand.u32 2147483647, %s8876_s7  ;;  %s925_s23 = sadd.f32 %s924_s8, %s5417_s20  ;;  %v972_v17 = vsel %vm180_vm11, %v971_v13, %v968_v9  ;;  %v1114_v24 = vstv %s5561_s18 }
 0x360   :  { %s5573_s19 = smul.f32 %s5139_s29, %s8881_s11  ;;  %s8884_s4 = sld [smem:[#allocation125_spill]]  ;;  %v1100_v18 = vstv %s1074_s14  ;;  %v1115_v29 = vsel %vm8890_vm8, %v1114_v24, %v1111_v23 }
 0x361   :  { %s8883_s9 = sand.u32 2147483647, %s8878_s22  ;;  %s1075_s6 = sadd.f32 %s1074_s14, %s5529_s21  ;;  %v975_v21 = vstv %s925_s23  ;;  %v1101_v22 = vsel %vm145_vm4, %v1100_v18, %v1097_v14 }
 0x362   :  { %s5583_s25 = smul.f32 %s5139_s29, %s8883_s9  ;;  %s8886_s16 = sld [smem:[#allocation126_spill]]  ;;  %v976_v25 = vsel %vm185_vm12, %v975_v21, %v972_v17  ;;  %v1118_v30 = vstv %s5573_s19 }
 0x363   :  { %s8885_s7 = sand.u32 2147483647, %s8880_s27  ;;  %s926_s22 = sadd.f32 %s925_s23, %s5429_s2  ;;  %v1104_v26 = vstv %s1075_s6  ;;  %v1119_v35 = vsel %vm8872_vm7, %v1118_v30, %v1115_v29  ;;  %vm8901_vm7 = vcmp.eq.s32.totalorder %v4367_v32, 14 }
 0x364   :  { %s5595_s20 = smul.f32 %s5139_s29, %s8885_s7  ;;  %s8887_s8 = sand.u32 2147483647, %s8882_s15  ;;  %v1105_v34 = vsel %vm7947_vm5, %v1104_v26, %v1101_v22  ;;  %v1122_v36 = vstv %s5583_s25 }
 0x365   :  { %s5605_s24 = smul.f32 %s5139_s29, %s8887_s8  ;;  %s8888_s21 = sld [smem:[#allocation127_spill]]  ;;  %v979_v33 = vstv %s926_s22  ;;  %v1123_v39 = vsel %vm170_vm9, %v1122_v36, %v1119_v35 }
 0x366   :  { %s8889_s27 = sand.u32 2147483647, %s8884_s4  ;;  %s1076_s11 = sadd.f32 %s1075_s6, %s5540_s5  ;;  %v980_v28 = vsel %vm190_vm13, %v979_v33, %v976_v25  ;;  %v1126_v40 = vstv %s5595_s20 }
 0x367   :  { %s5617_s2 = smul.f32 %s5139_s29, %s8889_s27  ;;  %s8891_s14 = sld [smem:[#allocation128_spill]]  ;;  %v1127_v43 = vsel %vm175_vm10, %v1126_v40, %v1123_v39  ;;  %v1130_v44 = vstv %s5605_s24 }
 0x368   :  { %s927_s15 = sadd.f32 %s926_s22, %s5439_s10  ;;  %s8892_s23 = sand.u32 2147483647, %s8886_s16  ;;  %v1108_v37 = vstv %s1076_s11  ;;  %v1131_v46 = vsel %vm180_vm11, %v1130_v44, %v1127_v43 }
 0x369   :  { %s5627_s9 = smul.f32 %s5139_s29, %s8892_s23  ;;  %s8893_s5 = sld [smem:[#allocation129_spill]]  ;;  %v1109_v42 = vsel %vm155_vm6, %v1108_v37, %v1105_v34  ;;  %v1134_v47 = vstv %s5617_s2 }
 0x36a   :  { %s1077_s7 = sadd.f32 %s1076_s11, %s5552_s13  ;;  %v983_v41 = vstv %s927_s15  ;;  %s8896_s22 = sld [smem:[#allocation130_spill]]  ;;  %v1135_v50 = vsel %vm185_vm12, %v1134_v47, %v1131_v46 }
 0x36b   :  { %s8894_s4 = sand.u32 2147483647, %s8888_s21  ;;  %s928_s6 = sadd.f32 %s927_s15, %s5451_s0  ;;  %v984_v38 = vsel %vm195_vm14, %v983_v41, %v980_v28  ;;  %v1138_v52 = vstv %s5627_s9 }
 0x36c   :  { %s5639_s10 = smul.f32 %s5139_s29, %s8894_s4  ;;  %s8898_s21 = sld [smem:[#allocation131_spill]]  ;;  %v1112_v45 = vstv %s1077_s7  ;;  %v1139_v56 = vsel %vm190_vm13, %v1138_v52, %v1135_v50 }
 0x36d   :  { %s8895_s16 = sand.u32 2147483647, %s8891_s14  ;;  %s1078_s27 = sadd.f32 %s1077_s7, %s5561_s18  ;;  %v987_v48 = vstv %s928_s6  ;;  %v1113_v49 = vsel %vm8890_vm8, %v1112_v45, %v1109_v42  ;;  %vm8905_vm8 = vcmp.eq.s32.totalorder %v4367_v32, 7 }
 0x36e   :  { %s5649_s8 = smul.f32 %s5139_s29, %s8895_s16  ;;  %s929_s11 = sadd.f32 %s928_s6, %s5461_s26  ;;  %v988_v53 = vsel %vm8901_vm7, %v987_v48, %v984_v38  ;;  %v1142_v57 = vstv %s5639_s10 }
 0x36f   :  { %s8897_s13 = sand.u32 2147483647, %s8893_s5  ;;  %s8899_s14 = sld [smem:[#allocation132_spill]]  ;;  %v1116_v54 = vstv %s1078_s27  ;;  %v1143_v60 = vsel %vm195_vm14, %v1142_v57, %v1139_v56 }
 0x370   :  { %s5661_s0 = smul.f32 %s5139_s29, %s8897_s13  ;;  %s8900_s29 = sand.u32 2147483647, %s8896_s22  ;;  %v991_v58 = vstv %s929_s11  ;;  %v1117_v59 = vsel %vm8905_vm8, %v1116_v54, %v1113_v49  ;;  %v1146_v61 = vstv %s5649_s8  ;;  %vm8931_vm8 = vcmp.eq.s32.totalorder %v4367_v32, 6 }
 0x371   :  { %s5676_s18 = smul.f32 %s5509_s17, %s8900_s29  ;;  %s1079_s26 = sadd.f32 %s1078_s27, %s5573_s19  ;;  %v992_v62 = vsel %vm205_vm0, %v991_v58, %v988_v53  ;;  %v1147_v0 = vsel %vm8901_vm7, %v1146_v61, %v1143_v60  ;;  %vm8933_vm7 = vcmp.eq.s32.totalorder %v4367_v32, 7 }
 0x372   :  { %s8902_s15 = sld [smem:[#allocation133_spill]]  ;;  %s8903_s23 = sand.u32 2147483647, %s8898_s21  ;;  %v1150_v55 = vstv %s5661_s0 }
 0x373   :  { %s5687_s5 = smul.f32 %s5509_s17, %s8903_s23  ;;  %s8904_s4 = sld [smem:[#allocation134_spill]]  ;;  %v1120_v63 = vstv %s1079_s26  ;;  %v1151_v3 = vsel %vm205_vm0, %v1150_v55, %v1147_v0  ;;  %v1245_v27 = vstv %s5676_s18 }
 0x374   :  { %s930_s7 = sadd.f32 %s929_s11, %s5473_s3  ;;  %s8907_s16 = sld [smem:[#allocation135_spill]]  ;;  %v1121_v2 = vsel %vm170_vm9, %v1120_v63, %v1117_v59  ;;  %v1154_v7 = vsel %vm210_vm15, %v1150_v55, %v1151_v3  ;;  %v1246_v8 = vsel %vm130_vm1, %v1245_v27, 0.0 }
 0x375   :  { %s8906_s19 = sand.u32 2147483647, %s8899_s14  ;;  %s1080_s3 = sadd.f32 %s1079_s26, %s5583_s25  ;;  %v5739_v10 = vmul.f32 %v1154_v7, %v4612_v31  ;;  %v1247_v11 = vstv %s5687_s5 }
 0x376   :  { %s5698_s6 = smul.f32 %s5509_s17, %s8906_s19  ;;  %s8909_s21 = sld [smem:[#allocation136_spill]]  ;;  %v995_v1 = vstv %s930_s7 }
 0x377   :  { %s1229_s11 = sadd.f32 %s5687_s5, %s5676_s18  ;;  %s8911_s14 = sld [smem:[#allocation137_spill]]  ;;  %v996_v5 = vsel %vm210_vm15, %v995_v1, %v992_v62  ;;  %v1124_v6 = vstv %s1080_s3 }
 0x378   :  { %s8908_s22 = sand.u32 2147483647, %s8902_s15  ;;  %s1081_s29 = sadd.f32 %s1080_s3, %s5595_s20  ;;  %v999_v51 = vadd.f32 %v5547_v4, %v996_v5  ;;  %v1125_v9 = vsel %vm175_vm10, %v1124_v6, %v1121_v2  ;;  %v1248_v4 = vsel %vm130_vm1, %v1247_v11, 0.0  ;;  %v1251_v14 = vstv %s5698_s6 }
 0x379   :  { %s5709_s13 = smul.f32 %s5509_s17, %s8908_s22  ;;  %s8910_s25 = sand.u32 2147483647, %s8904_s4  ;;  %v1249_v13 = vstv %s1229_s11  ;;  %v1252_v17 = vsel %vm135_vm2, %v1251_v14, %v1248_v4 }
 0x37a   :  { %s5718_s27 = smul.f32 %s5509_s17, %s8910_s25  ;;  %s8912_s26 = sand.u32 2147483647, %s8907_s16  ;;  %v1128_v12 = vstv %s1081_s29  ;;  %1001 = vst [vmem:[#allocation7 + $0x28] sm:$0xff] %v999_v51  ;;  %v1250_v16 = vsel %vm135_vm2, %v1249_v13, %v1246_v8 }
 0x37b   :  { %s5731_s15 = smul.f32 %s5509_s17, %s8912_s26  ;;  %s8913_s23 = sld [smem:[#allocation138_spill]]  ;;  %v1129_v15 = vsel %vm180_vm11, %v1128_v12, %v1125_v9  ;;  %v1255_v21 = vstv %s5709_s13 }
 0x37c   :  { %s8914_s20 = sand.u32 2147483647, %s8909_s21  ;;  %s1230_s4 = sadd.f32 %s1229_s11, %s5698_s6  ;;  %v1259_v22 = vstv %s5718_s27  ;;  %v1256_v24 = vsel %vm140_vm3, %v1255_v21, %v1252_v17 }
 0x37d   :  { %s5744_s18 = smul.f32 %s5509_s17, %s8914_s20  ;;  %s8915_s7 = sld [smem:[#allocation139_spill]]  ;;  %v1263_v26 = vstv %s5731_s15  ;;  %v1260_v33 = vsel %vm145_vm4, %v1259_v22, %v1256_v24 }
 0x37e   :  { %s1082_s19 = sadd.f32 %s1081_s29, %s5605_s24  ;;  %s8916_s16 = sand.u32 2147483647, %s8911_s14  ;;  %v1253_v18 = vstv %s1230_s4  ;;  %v1264_v28 = vsel %vm7947_vm5, %v1263_v26, %v1260_v33 }
 0x37f   :  { %s5752_s3 = smul.f32 %s5509_s17, %s8916_s16  ;;  %s8917_s22 = sld [smem:[#allocation140_spill]]  ;;  %v1254_v20 = vsel %vm140_vm3, %v1253_v18, %v1250_v16  ;;  %v1267_v34 = vstv %s5744_s18 }
 0x380   :  { %s1231_s21 = sadd.f32 %s1230_s4, %s5709_s13  ;;  %s8919_s25 = sld [smem:[#allocation141_spill]]  ;;  %v1132_v19 = vstv %s1082_s19  ;;  %v1268_v41 = vsel %vm155_vm6, %v1267_v34, %v1264_v28 }
 0x381   :  { %s8918_s5 = sand.u32 2147483647, %s8913_s23  ;;  %s1083_s6 = sadd.f32 %s1082_s19, %s5617_s2  ;;  %v1133_v23 = vsel %vm185_vm12, %v1132_v19, %v1129_v15  ;;  %v1271_v37 = vstv %s5752_s3 }
 0x382   :  { %s5762_s24 = smul.f32 %s5509_s17, %s8918_s5  ;;  %s8921_s29 = sld [smem:[#allocation142_spill]]  ;;  %v1257_v25 = vstv %s1231_s21  ;;  %v1272_v38 = vsel %vm8931_vm8, %v1271_v37, %v1268_v41 }
 0x383   :  { %s8920_s11 = sand.u32 2147483647, %s8915_s7  ;;  %s1232_s2 = sadd.f32 %s1231_s21, %s5718_s27  ;;  %v1136_v29 = vstv %s1083_s6  ;;  %v1258_v30 = vsel %vm145_vm4, %v1257_v25, %v1254_v20 }
 0x384   :  { %s5773_s14 = smul.f32 %s5509_s17, %s8920_s11  ;;  %s8923_s20 = sld [smem:[#allocation143_spill]]  ;;  %v1137_v35 = vsel %vm190_vm13, %v1136_v29, %v1133_v23  ;;  %v1275_v42 = vstv %s5762_s24 }
 0x385   :  { %s8922_s26 = sand.u32 2147483647, %s8917_s22  ;;  %s1084_s4 = sadd.f32 %s1083_s6, %s5627_s9  ;;  %v1261_v36 = vstv %s1232_s2  ;;  %v1276_v48 = vsel %vm8933_vm7, %v1275_v42, %v1272_v38 }
 0x386   :  { %s5784_s23 = smul.f32 %s5509_s17, %s8922_s26  ;;  %s8924_s13 = sand.u32 2147483647, %s8919_s25  ;;  %v1262_v40 = vsel %vm7947_vm5, %v1261_v36, %v1258_v30  ;;  %v1279_v45 = vstv %s5773_s14  ;;  %vm8934_vm5 = vcmp.eq.s32.totalorder %v4367_v32, 14 }
 0x387   :  { %s5794_s7 = smul.f32 %s5509_s17, %s8924_s13  ;;  %s8925_s27 = sld [smem:[#allocation144_spill]]  ;;  %v1140_v39 = vstv %s1084_s4  ;;  %v1280_v53 = vsel %vm170_vm9, %v1279_v45, %v1276_v48 }
 0x388   :  { %s8926_s19 = sand.u32 2147483647, %s8921_s29  ;;  %s1233_s16 = sadd.f32 %s1232_s2, %s5731_s15  ;;  %v1141_v43 = vsel %vm195_vm14, %v1140_v39, %v1137_v35  ;;  %v1283_v49 = vstv %s5784_s23 }
 0x389   :  { %s5806_s9 = smul.f32 %s5509_s17, %s8926_s19  ;;  %s8927_s22 = sld [smem:[#allocation145_spill]]  ;;  %v1287_v54 = vstv %s5794_s7  ;;  %v1284_v58 = vsel %vm175_vm10, %v1283_v49, %v1280_v53 }
 0x38a   :  { %s1085_s5 = sadd.f32 %s1084_s4, %s5639_s10  ;;  %s8928_s21 = sand.u32 2147483647, %s8923_s20  ;;  %v1265_v44 = vstv %s1233_s16  ;;  %v1288_v62 = vsel %vm180_vm11, %v1287_v54, %v1284_v58 }
 0x38b   :  { %s5816_s25 = smul.f32 %s5509_s17, %s8928_s21  ;;  %s8929_s15 = sld [smem:[#allocation146_spill]]  ;;  %v1266_v47 = vsel %vm155_vm6, %v1265_v44, %v1262_v40  ;;  %v1291_v59 = vstv %s5806_s9 }
 0x38c   :  { %s1234_s11 = sadd.f32 %s1233_s16, %s5744_s18  ;;  %v1144_v46 = vstv %s1085_s5  ;;  %v1292_v1 = vsel %vm185_vm12, %v1291_v59, %v1288_v62 }
 0x38d   :  { %s8930_s6 = sand.u32 2147483647, %s8925_s27  ;;  %s1086_s29 = sadd.f32 %s1085_s5, %s5649_s8  ;;  %v1145_v50 = vsel %vm8934_vm5, %v1144_v46, %v1141_v43  ;;  %v1295_v63 = vstv %s5816_s25  ;;  %vm8940_vm5 = vmmov %vm8933_vm7  ;;  %vm8948_vm7 = vcmp.eq.s32.totalorder %v4367_v32, 14 }
 0x38e   :  { %s5828_s10 = smul.f32 %s5509_s17, %s8930_s6  ;;  %s8936_s8 = sld [smem:[#allocation147_spill]]  ;;  %v1269_v52 = vstv %s1234_s11  ;;  %v1296_v5 = vsel %vm190_vm13, %v1295_v63, %v1292_v1 }
 0x38f   :  { %s8932_s26 = sand.u32 2147483647, %s8927_s22  ;;  %s1235_s4 = sadd.f32 %s1234_s11, %s5752_s3  ;;  %v1148_v56 = vstv %s1086_s29  ;;  %v1270_v57 = vsel %vm8931_vm8, %v1269_v52, %v1266_v47  ;;  %vm8964_vm8 = vcmp.eq.s32.totalorder %v4367_v32, 4 }
 0x390   :  { %s5838_s2 = smul.f32 %s5509_s17, %s8932_s26  ;;  %s1087_s13 = sadd.f32 %s1086_s29, %s5661_s0  ;;  %v1149_v60 = vsel %vm205_vm0, %v1148_v56, %v1145_v50  ;;  %v1299_v2 = vstv %s5828_s10 }
 0x391   :  { %s8935_s18 = sand.u32 2147483647, %s8929_s15  ;;  %s8937_s27 = sld [smem:[#allocation148_spill]]  ;;  %v1273_v61 = vstv %s1235_s4  ;;  %v1300_v51 = vsel %vm195_vm14, %v1299_v2, %v1296_v5 }
 0x392   :  { %s5850_s20 = smul.f32 %s5509_s17, %s8935_s18  ;;  %s5862_s17 = spop %2879  ;;  %v1152_v0 = vstv %s1087_s13  ;;  %v1274_v55 = vsel %vm8940_vm5, %v1273_v61, %v1270_v57  ;;  %v1303_v6 = vstv %s5838_s2  ;;  %vm8967_vm5 = vmmov %vm8964_vm8 }
 0x393   :  { %s1236_s3 = sadd.f32 %s1235_s4, %s5762_s24  ;;  %s8938_s0 = sld [smem:[#allocation149_spill]]  ;;  %v1153_v3 = vsel %vm210_vm15, %v1152_v0, %v1149_v60 }
 0x394   :  { %s8939_s19 = sand.u32 2147483647, %s8936_s8  ;;  %s8941_s22 = sld [smem:[#allocation150_spill]]  ;;  %v1156_v7 = vadd.f32 %v5739_v10, %v1153_v3  ;;  %v1307_v9 = vstv %s5850_s20  ;;  %v1304_v10 = vsel %vm8948_vm7, %v1303_v6, %v1300_v51  ;;  %vm8970_vm7 = vcmp.eq.s32.totalorder %v4367_v32, 6 }
 0x395   :  { %s5873_s16 = smul.f32 %s5862_s17, %s8939_s19  ;;  %s5883_s21 = spop %2881  ;;  %v1277_v27 = vstv %s1236_s3  ;;  %v1308_v14 = vsel %vm205_vm0, %v1307_v9, %v1304_v10 }
 0x396   :  { %s8943_s15 = sld [smem:[#allocation151_spill]]  ;;  %s1237_s6 = sadd.f32 %s1236_s3, %s5773_s14  ;;  %v1278_v8 = vsel %vm170_vm9, %v1277_v27, %v1274_v55  ;;  %1158 = vst [vmem:[#allocation7 + $0x30] sm:$0xff] %v1156_v7  ;;  %v1311_v18 = vsel %vm210_vm15, %v1307_v9, %v1308_v14 }
 0x397   :  { %s8942_s24 = sand.u32 2147483647, %s8937_s27  ;;  %s8945_s26 = sld [smem:[#allocation152_spill]]  ;;  %v1402_v12 = vstv %s5873_s16  ;;  %v5943_v22 = vmul.f32 %v1311_v18, %v4612_v31 }
 0x398   :  { %s1370_s5 = smul.f32 %s5862_s17, %s8942_s24  ;;  %s1238_s4 = sadd.f32 %s1237_s6, %s5784_s23  ;;  %v1281_v11 = vstv %s1237_s6  ;;  %v1403_v15 = vsel %vm130_vm1, %v1402_v12, 0.0 }
 0x399   :  { %s8944_s11 = sand.u32 2147483647, %s8938_s0  ;;  %s8947_s13 = sld [smem:[#allocation153_spill]]  ;;  %v1282_v13 = vsel %vm175_vm10, %v1281_v11, %v1278_v8 }
 0x39a   :  { %s5894_s29 = smul.f32 %s5862_s17, %s8944_s11  ;;  %s8946_s14 = sand.u32 2147483647, %s8941_s22  ;;  %v1404_v4 = vstv %s1370_s5  ;;  %v1285_v17 = vstv %s1238_s4 }
 0x39b   :  { %s5905_s18 = smul.f32 %s5862_s17, %s8946_s14  ;;  %s1386_s8 = sadd.f32 %s1370_s5, %s5873_s16  ;;  %v1405_v16 = vsel %vm130_vm1, %v1404_v4, 0.0  ;;  %v1286_v21 = vsel %vm180_vm11, %v1285_v17, %v1282_v13 }
 0x39c   :  { %s8949_s27 = sand.u32 2147483647, %s8943_s15  ;;  %s8950_s0 = sld [smem:[#allocation154_spill]]  ;;  %v1408_v20 = vstv %s5894_s29 }
 0x39d   :  { %s5914_s3 = smul.f32 %s5862_s17, %s8949_s27  ;;  %s8951_s23 = sand.u32 2147483647, %s8945_s26  ;;  %v1406_v19 = vstv %s1386_s8  ;;  %v1409_v24 = vsel %vm135_vm2, %v1408_v20, %v1405_v16  ;;  %v1412_v29 = vstv %s5905_s18 }
 0x39e   :  { %s5924_s19 = smul.f32 %s5862_s17, %s8951_s23  ;;  %s1387_s22 = sadd.f32 %s1386_s8, %s5894_s29  ;;  %v1407_v23 = vsel %vm135_vm2, %v1406_v19, %v1403_v15  ;;  %v1413_v35 = vsel %vm140_vm3, %v1412_v29, %v1409_v24 }
 0x39f   :  { %s8952_s16 = sld [smem:[#allocation155_spill]]  ;;  %s1239_s24 = sadd.f32 %s1238_s4, %s5794_s7  ;;  %v1416_v30 = vstv %s5914_s3 }
 0x3a0   :  { %s8953_s5 = sand.u32 2147483647, %s8947_s13  ;;  %s8954_s6 = sld [smem:[#allocation156_spill]]  ;;  %v1410_v26 = vstv %s1387_s22  ;;  %v1417_v39 = vsel %vm145_vm4, %v1416_v30, %v1413_v35  ;;  %v1420_v40 = vstv %s5924_s19 }
 0x3a1   :  { %s5937_s15 = smul.f32 %s5862_s17, %s8953_s5  ;;  %s1388_s26 = sadd.f32 %s1387_s22, %s5905_s18  ;;  %v1289_v25 = vstv %s1239_s24  ;;  %v1411_v34 = vsel %vm140_vm3, %v1410_v26, %v1407_v23  ;;  %v1421_v43 = vsel %vm8964_vm8, %v1420_v40, %v1417_v39  ;;  %vm8973_vm8 = vcmp.eq.s32.totalorder %v4367_v32, 7 }
 0x3a2   :  { %s8955_s7 = sand.u32 2147483647, %s8950_s0  ;;  %s8956_s14 = sld [smem:[#allocation157_spill]]  ;;  %v1290_v33 = vsel %vm185_vm12, %v1289_v25, %v1286_v21 }
 0x3a3   :  { %s5948_s11 = smul.f32 %s5862_s17, %s8955_s7  ;;  %s1240_s29 = sadd.f32 %s1239_s24, %s5806_s9  ;;  %v1414_v36 = vstv %s1388_s26  ;;  %v1424_v44 = vstv %s5937_s15 }
 0x3a4   :  { %s8958_s13 = sld [smem:[#allocation158_spill]]  ;;  %s1389_s23 = sadd.f32 %s1388_s26, %s5914_s3  ;;  %v1415_v37 = vsel %vm145_vm4, %v1414_v36, %v1411_v34  ;;  %v1425_v46 = vsel %vm155_vm6, %v1424_v44, %v1421_v43 }
 0x3a5   :  { %s8957_s8 = sand.u32 2147483647, %s8952_s16  ;;  %s8960_s9 = sld [smem:[#allocation159_spill]]  ;;  %v1293_v28 = vstv %s1240_s29  ;;  %v1428_v47 = vstv %s5948_s11 }
 0x3a6   :  { %s5959_s4 = smul.f32 %s5862_s17, %s8957_s8  ;;  %s8959_s27 = sand.u32 2147483647, %s8954_s6  ;;  %v1294_v41 = vsel %vm190_vm13, %v1293_v28, %v1290_v33  ;;  %v1418_v42 = vstv %s1389_s23  ;;  %v1429_v50 = vsel %vm8970_vm7, %v1428_v47, %v1425_v46 }
 0x3a7   :  { %s5968_s0 = smul.f32 %s5862_s17, %s8959_s27  ;;  %s1241_s18 = sadd.f32 %s1240_s29, %s5816_s25  ;;  %v1419_v45 = vsel %vm8967_vm5, %v1418_v42, %v1415_v37  ;;  %vm8974_vm5 = vcmp.eq.s32.totalorder %v4367_v32, 14 }
 0x3a8   :  { %s8961_s22 = sand.u32 2147483647, %s8956_s14  ;;  %s8962_s3 = sld [smem:[#allocation160_spill]]  ;;  %v1432_v52 = vstv %s5959_s4 }
 0x3a9   :  { %s5979_s16 = smul.f32 %s5862_s17, %s8961_s22  ;;  %s1390_s5 = sadd.f32 %s1389_s23, %s5924_s19  ;;  %v1297_v38 = vstv %s1241_s18  ;;  %v1433_v56 = vsel %vm8973_vm8, %v1432_v52, %v1429_v50  ;;  %v1436_v57 = vstv %s5968_s0 }
 0x3aa   :  { %s8963_s24 = sand.u32 2147483647, %s8958_s13  ;;  %s8965_s6 = sld [smem:[#allocation161_spill]]  ;;  %v1298_v48 = vsel %vm195_vm14, %v1297_v38, %v1294_v41  ;;  %v1437_v60 = vsel %vm170_vm9, %v1436_v57, %v1433_v56 }
 0x3ab   :  { %s5991_s25 = smul.f32 %s5862_s17, %s8963_s24  ;;  %s1242_s7 = sadd.f32 %s1241_s18, %s5828_s10  ;;  %v1422_v49 = vstv %s1390_s5  ;;  %v1440_v61 = vstv %s5979_s16 }
 0x3ac   :  { %s8966_s26 = sand.u32 2147483647, %s8960_s9  ;;  %s8968_s19 = sld [smem:[#allocation162_spill]]  ;;  %v1423_v54 = vsel %vm155_vm6, %v1422_v49, %v1419_v45  ;;  %v1441_v0 = vsel %vm175_vm10, %v1440_v61, %v1437_v60 }
 0x3ad   :  { %s6001_s14 = smul.f32 %s5862_s17, %s8966_s26  ;;  %s1391_s8 = sadd.f32 %s1390_s5, %s5937_s15  ;;  %v1301_v53 = vstv %s1242_s7  ;;  %v1444_v55 = vstv %s5991_s25 }
 0x3ae   :  { %s8969_s29 = sand.u32 2147483647, %s8962_s3  ;;  %s8971_s13 = sld [smem:[#allocation163_spill]]  ;;  %v1302_v58 = vsel %vm8974_vm5, %v1301_v53, %v1298_v48  ;;  %v1445_v3 = vsel %vm180_vm11, %v1444_v55, %v1441_v0 }
 0x3af   :  { %s6013_s10 = smul.f32 %s5862_s17, %s8969_s29  ;;  %s1243_s27 = sadd.f32 %s1242_s7, %s5838_s2  ;;  %v1426_v59 = vstv %s1391_s8  ;;  %v1448_v27 = vstv %s6001_s14 }
 0x3b0   :  { %s8972_s23 = sand.u32 2147483647, %s8965_s6  ;;  %s8976_s2 = sld [smem:[#allocation164_spill]]  ;;  %v1427_v63 = vsel %vm8970_vm7, %v1426_v59, %v1423_v54  ;;  %v1449_v7 = vsel %vm185_vm12, %v1448_v27, %v1445_v3  ;;  %vm9005_vm7 = vcmp.eq.s32.totalorder %v4367_v32, 4 }
 0x3b1   :  { %s6023_s9 = smul.f32 %s5862_s17, %s8972_s23  ;;  %s1392_s22 = sadd.f32 %s1391_s8, %s5948_s11  ;;  %v1305_v62 = vstv %s1243_s27  ;;  %v1452_v8 = vstv %s6013_s10 }
 0x3b2   :  { %s8975_s15 = sand.u32 2147483647, %s8968_s19  ;;  %s1244_s3 = sadd.f32 %s1243_s27, %s5850_s20  ;;  %v1306_v1 = vsel %vm205_vm0, %v1305_v62, %v1302_v58  ;;  %v1453_v11 = vsel %vm190_vm13, %v1452_v8, %v1449_v7 }
 0x3b3   :  { %s6035_s18 = smul.f32 %s5862_s17, %s8975_s15  ;;  %s8977_s24 = sld [smem:[#allocation165_spill]]  ;;  %v1430_v2 = vstv %s1392_s22  ;;  %v1456_v10 = vstv %s6023_s9 }
 0x3b4   :  { %s8978_s5 = sand.u32 2147483647, %s8971_s13  ;;  %s1393_s11 = sadd.f32 %s1392_s22, %s5959_s4  ;;  %v1309_v5 = vstv %s1244_s3  ;;  %v1431_v6 = vsel %vm8973_vm8, %v1430_v2, %v1427_v63  ;;  %v1457_v13 = vsel %vm195_vm14, %v1456_v10, %v1453_v11  ;;  %vm9006_vm8 = vmmov %vm9005_vm7 }
 0x3b5   :  { %s6045_s6 = smul.f32 %s5862_s17, %s8978_s5  ;;  %s8979_s20 = sld [smem:[#allocation166_spill]]  ;;  %v1310_v51 = vsel %vm210_vm15, %v1309_v5, %v1306_v1  ;;  %v1460_v14 = vstv %s6035_s18 }
 0x3b6   :  { %s8980_s17 = sand.u32 2147483647, %s8976_s2  ;;  %s8981_s26 = sld [smem:[#allocation167_spill]]  ;;  %v1434_v9 = vstv %s1393_s11  ;;  %v1313_v12 = vadd.f32 %v5943_v22, %v1310_v51  ;;  %v1461_v16 = vsel %vm8974_vm5, %v1460_v14, %v1457_v13  ;;  %vm9011_vm5 = vcmp.eq.s32.totalorder %v4367_v32, 6 }
 0x3b7   :  { %s6061_s7 = smul.f32 %s5883_s21, %s8980_s17  ;;  %s6073_s29 = spop %2883  ;;  %v1435_v4 = vsel %vm170_vm9, %v1434_v9, %v1431_v6  ;;  %v1464_v17 = vstv %s6045_s6 }
 0x3b8   :  { %s8983_s8 = sld [smem:[#allocation168_spill]]  ;;  %s1394_s13 = sadd.f32 %s1393_s11, %s5968_s0  ;;  %1315 = vst [vmem:[#allocation7 + $0x38] sm:$0xff] %v1313_v12  ;;  %v1465_v20 = vsel %vm205_vm0, %v1464_v17, %v1461_v16 }
 0x3b9   :  { %s8982_s4 = sand.u32 2147483647, %s8977_s24  ;;  %s8985_s15 = sld [smem:[#allocation169_spill]]  ;;  %v1559_v18 = vstv %s6061_s7  ;;  %v1468_v24 = vsel %vm210_vm15, %v1464_v17, %v1465_v20 }
 0x3ba   :  { %s6071_s19 = smul.f32 %s5883_s21, %s8982_s4  ;;  %s1395_s3 = sadd.f32 %s1394_s13, %s5979_s16  ;;  %v1438_v15 = vstv %s1394_s13  ;;  %v1560_v21 = vsel %vm130_vm1, %v1559_v18, 0.0  ;;  %v6135_v30 = vmul.f32 %v1468_v24, %v4612_v31 }
 0x3bb   :  { %s8984_s27 = sand.u32 2147483647, %s8979_s20  ;;  %s8987_s24 = sld [smem:[#allocation170_spill]]  ;;  %v1439_v19 = vsel %vm175_vm10, %v1438_v15, %v1435_v4 }
 0x3bc   :  { %s6084_s23 = smul.f32 %s5883_s21, %s8984_s27  ;;  %s8986_s0 = sand.u32 2147483647, %s8981_s26  ;;  %v1561_v22 = vstv %s6071_s19  ;;  %v1442_v23 = vstv %s1395_s3 }
 0x3bd   :  { %s6095_s2 = smul.f32 %s5883_s21, %s8986_s0  ;;  %s1543_s22 = sadd.f32 %s6071_s19, %s6061_s7  ;;  %v1562_v25 = vsel %vm130_vm1, %v1561_v22, 0.0  ;;  %v1443_v29 = vsel %vm180_vm11, %v1442_v23, %v1439_v19 }
 0x3be   :  { %s8988_s5 = sand.u32 2147483647, %s8983_s8  ;;  %s8989_s20 = sld [smem:[#allocation171_spill]]  ;;  %v1565_v34 = vstv %s6084_s23 }
 0x3bf   :  { %s6106_s11 = smul.f32 %s5883_s21, %s8988_s5  ;;  %s8990_s16 = sand.u32 2147483647, %s8985_s15  ;;  %v1563_v26 = vstv %s1543_s22  ;;  %v1566_v36 = vsel %vm135_vm2, %v1565_v34, %v1562_v25  ;;  %v1569_v37 = vstv %s6095_s2 }
 0x3c0   :  { %s6116_s17 = smul.f32 %s5883_s21, %s8990_s16  ;;  %s1544_s26 = sadd.f32 %s1543_s22, %s6084_s23  ;;  %v1564_v33 = vsel %vm135_vm2, %v1563_v26, %v1560_v21  ;;  %v1570_v41 = vsel %vm140_vm3, %v1569_v37, %v1566_v36 }
 0x3c1   :  { %s8991_s7 = sld [smem:[#allocation172_spill]]  ;;  %s1396_s4 = sadd.f32 %s1395_s3, %s5991_s25  ;;  %v1573_v38 = vstv %s6106_s11 }
 0x3c2   :  { %s8992_s8 = sand.u32 2147483647, %s8987_s24  ;;  %s8993_s27 = sld [smem:[#allocation173_spill]]  ;;  %v1567_v28 = vstv %s1544_s26  ;;  %v1577_v45 = vstv %s6116_s17  ;;  %v1574_v47 = vsel %vm145_vm4, %v1573_v38, %v1570_v41 }
 0x3c3   :  { %s6128_s13 = smul.f32 %s5883_s21, %s8992_s8  ;;  %s1545_s15 = sadd.f32 %s1544_s26, %s6095_s2  ;;  %v1446_v35 = vstv %s1396_s4  ;;  %v1568_v40 = vsel %vm140_vm3, %v1567_v28, %v1564_v33  ;;  %v1578_v53 = vsel %vm9006_vm8, %v1577_v45, %v1574_v47  ;;  %vm9015_vm8 = vcmp.eq.s32.totalorder %v4367_v32, 7 }
 0x3c4   :  { %s8994_s25 = sand.u32 2147483647, %s8989_s20  ;;  %s8995_s0 = sld [smem:[#allocation174_spill]]  ;;  %v1447_v39 = vsel %vm185_vm12, %v1446_v35, %v1443_v29 }
 0x3c5   :  { %s6140_s19 = smul.f32 %s5883_s21, %s8994_s25  ;;  %s1397_s3 = sadd.f32 %s1396_s4, %s6001_s14  ;;  %v1571_v42 = vstv %s1545_s15  ;;  %v1581_v49 = vstv %s6128_s13 }
 0x3c6   :  { %s8997_s5 = sld [smem:[#allocation175_spill]]  ;;  %s1546_s14 = sadd.f32 %s1545_s15, %s6106_s11  ;;  %v1572_v44 = vsel %vm145_vm4, %v1571_v42, %v1568_v40  ;;  %v1582_v58 = vsel %vm155_vm6, %v1581_v49, %v1578_v53 }
 0x3c7   :  { %s8996_s22 = sand.u32 2147483647, %s8991_s7  ;;  %s8999_s16 = sld [smem:[#allocation176_spill]]  ;;  %v1450_v43 = vstv %s1397_s3  ;;  %v1585_v54 = vstv %s6140_s19 }
 0x3c8   :  { %s6150_s24 = smul.f32 %s5883_s21, %s8996_s22  ;;  %s8998_s20 = sand.u32 2147483647, %s8993_s27  ;;  %v1451_v46 = vsel %vm190_vm13, %v1450_v43, %v1447_v39  ;;  %v1575_v48 = vstv %s1546_s14  ;;  %v1586_v62 = vsel %vm9011_vm5, %v1585_v54, %v1582_v58 }
 0x3c9   :  { %s6160_s23 = smul.f32 %s5883_s21, %s8998_s20  ;;  %s1398_s26 = sadd.f32 %s1397_s3, %s6013_s10  ;;  %v1576_v52 = vsel %vm9005_vm7, %v1575_v48, %v1572_v44  ;;  %vm9012_vm7 = vcmp.eq.s32.totalorder %v4367_v32, 14 }
 0x3ca   :  { %s9000_s2 = sand.u32 2147483647, %s8995_s0  ;;  %s9001_s4 = sld [smem:[#allocation177_spill]]  ;;  %v1589_v59 = vstv %s6150_s24 }
 0x3cb   :  { %s6171_s7 = smul.f32 %s5883_s21, %s9000_s2  ;;  %s1547_s10 = sadd.f32 %s1546_s14, %s6116_s17  ;;  %v1454_v50 = vstv %s1398_s26  ;;  %v1593_v63 = vstv %s6160_s23  ;;  %v1590_v1 = vsel %vm9015_vm8, %v1589_v59, %v1586_v62 }
 0x3cc   :  { %s9002_s8 = sand.u32 2147483647, %s8997_s5  ;;  %s9003_s25 = sld [smem:[#allocation178_spill]]  ;;  %v1455_v56 = vsel %vm195_vm14, %v1454_v50, %v1451_v46  ;;  %v1594_v5 = vsel %vm170_vm9, %v1593_v63, %v1590_v1 }
 0x3cd   :  { %s6182_s27 = smul.f32 %s5883_s21, %s9002_s8  ;;  %s1399_s15 = sadd.f32 %s1398_s26, %s6023_s9  ;;  %v1579_v57 = vstv %s1547_s10  ;;  %v1597_v2 = vstv %s6171_s7 }
 0x3ce   :  { %s9004_s11 = sand.u32 2147483647, %s8999_s16  ;;  %s9007_s17 = sld [smem:[#allocation179_spill]]  ;;  %v1580_v61 = vsel %vm155_vm6, %v1579_v57, %v1576_v52  ;;  %v1598_v51 = vsel %vm175_vm10, %v1597_v2, %v1594_v5 }
 0x3cf   :  { %s6192_s0 = smul.f32 %s5883_s21, %s9004_s11  ;;  %s1548_s22 = sadd.f32 %s1547_s10, %s6128_s13  ;;  %v1458_v60 = vstv %s1399_s15  ;;  %v1601_v6 = vstv %s6182_s27 }
 0x3d0   :  { %s9008_s3 = sand.u32 2147483647, %s9001_s4  ;;  %s9009_s5 = sld [smem:[#allocation180_spill]]  ;;  %v1459_v0 = vsel %vm9012_vm7, %v1458_v60, %v1455_v56  ;;  %vm9020_vm7 = vmmov %vm9015_vm8  ;;  %v1602_v12 = vsel %vm180_vm11, %v1601_v6, %v1598_v51  ;;  %vm9030_vm8 = vcmp.eq.s32.totalorder %v4367_v32, 14 }
 0x3d1   :  { %s6204_s9 = smul.f32 %s5883_s21, %s9008_s3  ;;  %s1400_s20 = sadd.f32 %s1399_s15, %s6035_s18  ;;  %v1583_v55 = vstv %s1548_s22  ;;  %v1605_v9 = vstv %s6192_s0 }
 0x3d2   :  { %s9010_s14 = sand.u32 2147483647, %s9003_s25  ;;  %s9014_s18 = sld [smem:[#allocation181_spill]]  ;;  %v1584_v27 = vsel %vm9011_vm5, %v1583_v55, %v1580_v61  ;;  %v1606_v15 = vsel %vm185_vm12, %v1605_v9, %v1602_v12  ;;  %vm9046_vm5 = vcmp.eq.s32.totalorder %v4367_v32, 4 }
 0x3d3   :  { %s6214_s16 = smul.f32 %s5883_s21, %s9010_s14  ;;  %s1549_s2 = sadd.f32 %s1548_s22, %s6140_s19  ;;  %v1462_v3 = vstv %s1400_s20  ;;  %v1609_v4 = vstv %s6204_s9 }
 0x3d4   :  { %s9013_s13 = sand.u32 2147483647, %s9007_s17  ;;  %s1401_s4 = sadd.f32 %s1400_s20, %s6045_s6  ;;  %v1463_v7 = vsel %vm205_vm0, %v1462_v3, %v1459_v0  ;;  %v1610_v19 = vsel %vm190_vm13, %v1609_v4, %v1606_v15 }
 0x3d5   :  { %s6226_s26 = smul.f32 %s5883_s21, %s9013_s13  ;;  %s9016_s8 = sld [smem:[#allocation182_spill]]  ;;  %v1587_v8 = vstv %s1549_s2  ;;  %v1613_v16 = vstv %s6214_s16 }
 0x3d6   :  { %s9017_s10 = sand.u32 2147483647, %s9009_s5  ;;  %s1550_s19 = sadd.f32 %s1549_s2, %s6150_s24  ;;  %v1466_v11 = vstv %s1401_s4  ;;  %v1588_v10 = vsel %vm9020_vm7, %v1587_v8, %v1584_v27  ;;  %v1614_v22 = vsel %vm195_vm14, %v1613_v16, %v1610_v19  ;;  %vm9047_vm7 = vmmov %vm9046_vm5 }
 0x3d7   :  { %s6236_s25 = smul.f32 %s5883_s21, %s9017_s10  ;;  %s9018_s6 = sld [smem:[#allocation183_spill]]  ;;  %v1467_v13 = vsel %vm210_vm15, %v1466_v11, %v1463_v7  ;;  %v1617_v20 = vstv %s6226_s26 }
 0x3d8   :  { %s9019_s21 = sand.u32 2147483647, %s9014_s18  ;;  %s9021_s11 = sld [smem:[#allocation184_spill]]  ;;  %v1591_v14 = vstv %s1550_s19  ;;  %v1470_v17 = vadd.f32 %v6135_v30, %v1467_v13  ;;  %v1618_v26 = vsel %vm9030_vm8, %v1617_v20, %v1614_v22  ;;  %vm9052_vm8 = vcmp.eq.s32.totalorder %v4367_v32, 6 }
 0x3d9   :  { %s6252_s15 = smul.f32 %s6073_s29, %s9019_s21  ;;  %s6264_s3 = spop %2885  ;;  %v1592_v18 = vsel %vm170_vm9, %v1591_v14, %v1588_v10  ;;  %v1621_v23 = vstv %s6236_s25 }
 0x3da   :  { %s9023_s22 = sld [smem:[#allocation185_spill]]  ;;  %s1551_s5 = sadd.f32 %s1550_s19, %s6160_s23  ;;  %1472 = vst [vmem:[#allocation7 + $0x40] sm:$0xff] %v1470_v17  ;;  %v1622_v34 = vsel %vm205_vm0, %v1621_v23, %v1618_v26 }
 0x3db   :  { %s9022_s24 = sand.u32 2147483647, %s9016_s8  ;;  %s9025_s13 = sld [smem:[#allocation186_spill]]  ;;  %v1716_v24 = vstv %s6252_s15  ;;  %v1625_v37 = vsel %vm210_vm15, %v1621_v23, %v1622_v34 }
 0x3dc   :  { %s6262_s17 = smul.f32 %s6073_s29, %s9022_s24  ;;  %s1552_s4 = sadd.f32 %s1551_s5, %s6171_s7  ;;  %v1595_v21 = vstv %s1551_s5  ;;  %v1717_v29 = vsel %vm130_vm1, %v1716_v24, 0.0  ;;  %v6338_v42 = vmul.f32 %v1625_v37, %v4612_v31 }
 0x3dd   :  { %s9024_s20 = sand.u32 2147483647, %s9018_s6  ;;  %s9027_s8 = sld [smem:[#allocation187_spill]]  ;;  %v1596_v25 = vsel %vm175_vm10, %v1595_v21, %v1592_v18 }
 0x3de   :  { %s6275_s14 = smul.f32 %s6073_s29, %s9024_s20  ;;  %s9026_s23 = sand.u32 2147483647, %s9021_s11  ;;  %v1718_v30 = vstv %s6262_s17  ;;  %v1599_v33 = vstv %s1552_s4 }
 0x3df   :  { %s6286_s18 = smul.f32 %s6073_s29, %s9026_s23  ;;  %s1700_s2 = sadd.f32 %s6262_s17, %s6252_s15  ;;  %v1719_v35 = vsel %vm130_vm1, %v1718_v30, 0.0  ;;  %v1600_v28 = vsel %vm180_vm11, %v1599_v33, %v1596_v25 }
 0x3e0   :  { %s9028_s10 = sand.u32 2147483647, %s9023_s22  ;;  %s9029_s6 = sld [smem:[#allocation188_spill]]  ;;  %v1722_v40 = vstv %s6275_s14 }
 0x3e1   :  { %s6297_s19 = smul.f32 %s6073_s29, %s9028_s10  ;;  %s9031_s7 = sand.u32 2147483647, %s9025_s13  ;;  %v1720_v36 = vstv %s1700_s2  ;;  %v1723_v43 = vsel %vm135_vm2, %v1722_v40, %v1719_v35  ;;  %v1726_v46 = vstv %s6286_s18 }
 0x3e2   :  { %s6307_s21 = smul.f32 %s6073_s29, %s9031_s7  ;;  %s1701_s11 = sadd.f32 %s1700_s2, %s6275_s14  ;;  %v1721_v39 = vsel %vm135_vm2, %v1720_v36, %v1717_v29  ;;  %v1727_v49 = vsel %vm140_vm3, %v1726_v46, %v1723_v43 }
 0x3e3   :  { %s9032_s15 = sld [smem:[#allocation189_spill]]  ;;  %s1553_s24 = sadd.f32 %s1552_s4, %s6182_s27  ;;  %v1730_v52 = vstv %s6297_s19 }
 0x3e4   :  { %s9033_s22 = sand.u32 2147483647, %s9027_s8  ;;  %s9034_s20 = sld [smem:[#allocation190_spill]]  ;;  %v1724_v44 = vstv %s1701_s11  ;;  %v1731_v54 = vsel %vm145_vm4, %v1730_v52, %v1727_v49  ;;  %v1734_v57 = vstv %s6307_s21 }
 0x3e5   :  { %s6319_s5 = smul.f32 %s6073_s29, %s9033_s22  ;;  %s1702_s13 = sadd.f32 %s1701_s11, %s6286_s18  ;;  %v1603_v41 = vstv %s1553_s24  ;;  %v1725_v45 = vsel %vm140_vm3, %v1724_v44, %v1721_v39  ;;  %v1735_v60 = vsel %vm9047_vm7, %v1734_v57, %v1731_v54  ;;  %vm9056_vm7 = vcmp.eq.s32.totalorder %v4367_v32, 7 }
 0x3e6   :  { %s9035_s27 = sand.u32 2147483647, %s9029_s6  ;;  %s9036_s23 = sld [smem:[#allocation191_spill]]  ;;  %v1604_v38 = vsel %vm185_vm12, %v1603_v41, %v1600_v28 }
 0x3e7   :  { %s6330_s17 = smul.f32 %s6073_s29, %s9035_s27  ;;  %s1554_s4 = sadd.f32 %s1553_s24, %s6192_s0  ;;  %v1728_v47 = vstv %s1702_s13  ;;  %v1738_v61 = vstv %s6319_s5 }
 0x3e8   :  { %s9038_s10 = sld [smem:[#allocation192_spill]]  ;;  %s1703_s6 = sadd.f32 %s1702_s13, %s6297_s19  ;;  %v1729_v50 = vsel %vm145_vm4, %v1728_v47, %v1725_v45  ;;  %v1739_v0 = vsel %vm155_vm6, %v1738_v61, %v1735_v60 }
 0x3e9   :  { %s9037_s2 = sand.u32 2147483647, %s9032_s15  ;;  %s9040_s7 = sld [smem:[#allocation193_spill]]  ;;  %v1607_v48 = vstv %s1554_s4  ;;  %v1742_v55 = vstv %s6330_s17 }
 0x3ea   :  { %s6343_s8 = smul.f32 %s6073_s29, %s9037_s2  ;;  %s9039_s14 = sand.u32 2147483647, %s9034_s20  ;;  %v1608_v53 = vsel %vm190_vm13, %v1607_v48, %v1604_v38  ;;  %v1732_v56 = vstv %s1703_s6  ;;  %v1743_v3 = vsel %vm9052_vm8, %v1742_v55, %v1739_v0 }
 0x3eb   :  { %s6352_s0 = smul.f32 %s6073_s29, %s9039_s14  ;;  %s1555_s15 = sadd.f32 %s1554_s4, %s6204_s9  ;;  %v1733_v59 = vsel %vm9046_vm5, %v1732_v56, %v1729_v50  ;;  %vm9053_vm5 = vcmp.eq.s32.totalorder %v4367_v32, 14 }
 0x3ec   :  { %s9041_s24 = sand.u32 2147483647, %s9036_s23  ;;  %s9042_s22 = sld [smem:[#allocation194_spill]]  ;;  %v1746_v27 = vstv %s6343_s8 }
 0x3ed   :  { %s6362_s11 = smul.f32 %s6073_s29, %s9041_s24  ;;  %s1704_s20 = sadd.f32 %s1703_s6, %s6307_s21  ;;  %v1611_v58 = vstv %s1555_s15  ;;  %v1747_v7 = vsel %vm9056_vm7, %v1746_v27, %v1743_v3  ;;  %v1750_v8 = vstv %s6352_s0 }
 0x3ee   :  { %s9043_s18 = sand.u32 2147483647, %s9038_s10  ;;  %s9044_s27 = sld [smem:[#allocation195_spill]]  ;;  %v1612_v62 = vsel %vm195_vm14, %v1611_v58, %v1608_v53  ;;  %v1751_v11 = vsel %vm170_vm9, %v1750_v8, %v1747_v7 }
 0x3ef   :  { %s6374_s9 = smul.f32 %s6073_s29, %s9043_s18  ;;  %s1556_s13 = sadd.f32 %s1555_s15, %s6214_s16  ;;  %v1736_v63 = vstv %s1704_s20  ;;  %v1754_v10 = vstv %s6362_s11 }
 0x3f0   :  { %s9045_s23 = sand.u32 2147483647, %s9040_s7  ;;  %s9048_s4 = sld [smem:[#allocation196_spill]]  ;;  %v1737_v2 = vsel %vm155_vm6, %v1736_v63, %v1733_v59  ;;  %v1755_v13 = vsel %vm175_vm10, %v1754_v10, %v1751_v11 }
 0x3f1   :  { %s6384_s19 = smul.f32 %s6073_s29, %s9045_s23  ;;  %s1705_s2 = sadd.f32 %s1704_s20, %s6319_s5  ;;  %v1615_v1 = vstv %s1556_s13  ;;  %v1758_v14 = vstv %s6374_s9 }
 0x3f2   :  { %s9049_s21 = sand.u32 2147483647, %s9042_s22  ;;  %s9050_s10 = sld [smem:[#allocation197_spill]]  ;;  %v1616_v5 = vsel %vm9053_vm5, %v1615_v1, %v1612_v62  ;;  %vm9061_vm5 = vmmov %vm9056_vm7  ;;  %v1759_v17 = vsel %vm180_vm11, %v1758_v14, %v1755_v13  ;;  %vm9071_vm7 = vcmp.eq.s32.totalorder %v4367_v32, 14 }
 0x3f3   :  { %s6396_s16 = smul.f32 %s6073_s29, %s9049_s21  ;;  %s1557_s14 = sadd.f32 %s1556_s13, %s6226_s26  ;;  %v1740_v6 = vstv %s1705_s2  ;;  %v1762_v18 = vstv %s6384_s19 }
 0x3f4   :  { %s9051_s6 = sand.u32 2147483647, %s9044_s27  ;;  %s9055_s26 = sld [smem:[#allocation198_spill]]  ;;  %v1741_v9 = vsel %vm9052_vm8, %v1740_v6, %v1737_v2  ;;  %v1763_v21 = vsel %vm185_vm12, %v1762_v18, %v1759_v17  ;;  %vm9087_vm8 = vcmp.eq.s32.totalorder %v4367_v32, 4 }
 0x3f5   :  { %s6406_s7 = smul.f32 %s6073_s29, %s9051_s6  ;;  %s1706_s24 = sadd.f32 %s1705_s2, %s6330_s17  ;;  %v1619_v51 = vstv %s1557_s14  ;;  %v1766_v22 = vstv %s6396_s16 }
 0x3f6   :  { %s9054_s5 = sand.u32 2147483647, %s9048_s4  ;;  %s1558_s22 = sadd.f32 %s1557_s14, %s6236_s25  ;;  %v1620_v12 = vsel %vm205_vm0, %v1619_v51, %v1616_v5  ;;  %v1767_v25 = vsel %vm190_vm13, %v1766_v22, %v1763_v21 }
 0x3f7   :  { %s6418_s15 = smul.f32 %s6073_s29, %s9054_s5  ;;  %s9057_s18 = sld [smem:[#allocation199_spill]]  ;;  %v1744_v4 = vstv %s1706_s24  ;;  %v1770_v26 = vstv %s6406_s7 }
 0x3f8   :  { %s9058_s20 = sand.u32 2147483647, %s9050_s10  ;;  %s1707_s17 = sadd.f32 %s1706_s24, %s6343_s8  ;;  %v1623_v15 = vstv %s1558_s22  ;;  %v1745_v16 = vsel %vm9061_vm5, %v1744_v4, %v1741_v9  ;;  %v1771_v30 = vsel %vm195_vm14, %v1770_v26, %v1767_v25  ;;  %vm9090_vm5 = vmmov %vm9087_vm8 }
 0x3f9   :  { %s6428_s27 = smul.f32 %s6073_s29, %s9058_s20  ;;  %s9059_s25 = sld [smem:[#allocation200_spill]]  ;;  %v1624_v19 = vsel %vm210_vm15, %v1623_v15, %v1620_v12  ;;  %v1774_v33 = vstv %s6418_s15 }
 0x3fa   :  { %s9060_s29 = sand.u32 2147483647, %s9055_s26  ;;  %s9062_s23 = sld [smem:[#allocation201_spill]]  ;;  %v1748_v20 = vstv %s1707_s17  ;;  %v1627_v23 = vadd.f32 %v6338_v42, %v1624_v19  ;;  %v1775_v36 = vsel %vm9071_vm7, %v1774_v33, %v1771_v30 }
 0x3fb   :  { %s6444_s13 = smul.f32 %s6264_s3, %s9060_s29  ;;  %s6456_s21 = spop %2887  ;;  %v1749_v24 = vsel %vm170_vm9, %v1748_v20, %v1745_v16  ;;  %v1778_v34 = vstv %s6428_s27 }
 0x3fc   :  { %s1708_s2 = sadd.f32 %s1707_s17, %s6352_s0  ;;  %s9064_s10 = sld [smem:[#allocation202_spill]]  ;;  %1629 = vst [vmem:[#allocation7 + $0x48] sm:$0xff] %v1627_v23  ;;  %v1779_v40 = vsel %vm205_vm0, %v1778_v34, %v1775_v36 }
 0x3fd   :  { %s9063_s8 = sand.u32 2147483647, %s9057_s18  ;;  %s9066_s5 = sld [smem:[#allocation203_spill]]  ;;  %v1873_v28 = vstv %s6444_s13  ;;  %v1782_v44 = vsel %vm210_vm15, %v1778_v34, %v1779_v40 }
 0x3fe   :  { %s6454_s4 = smul.f32 %s6264_s3, %s9063_s8  ;;  %s1709_s22 = sadd.f32 %s1708_s2, %s6362_s11  ;;  %v1752_v29 = vstv %s1708_s2  ;;  %v1874_v41 = vsel %vm130_vm1, %v1873_v28, 0.0  ;;  %v6536_v47 = vmul.f32 %v1782_v44, %v4612_v31 }
 0x3ff   :  { %s9065_s14 = sand.u32 2147483647, %s9059_s25  ;;  %s9068_s18 = sld [smem:[#allocation204_spill]]  ;;  %v1753_v35 = vsel %vm175_vm10, %v1752_v29, %v1749_v24 }
 0x400   :  { %s6467_s6 = smul.f32 %s6264_s3, %s9065_s14  ;;  %s9067_s0 = sand.u32 2147483647, %s9062_s23  ;;  %v1875_v37 = vstv %s6454_s4  ;;  %v1756_v39 = vstv %s1709_s22 }
 0x401   :  { %s6478_s26 = smul.f32 %s6264_s3, %s9067_s0  ;;  %s6482_s24 = sadd.f32 %s6454_s4, %s6444_s13  ;;  %v1876_v42 = vsel %vm130_vm1, %v1875_v37, 0.0  ;;  %v1757_v43 = vsel %vm180_vm11, %v1756_v39, %v1753_v35 }
 0x402   :  { %s9069_s20 = sand.u32 2147483647, %s9064_s10  ;;  %s9070_s25 = sld [smem:[#allocation205_spill]]  ;;  %v1879_v45 = vstv %s6467_s6 }
 0x403   :  { %s6492_s17 = smul.f32 %s6264_s3, %s9069_s20  ;;  %s9072_s11 = sand.u32 2147483647, %s9066_s5  ;;  %v1877_v38 = vstv %s6482_s24  ;;  %v1880_v49 = vsel %vm135_vm2, %v1879_v45, %v1876_v42  ;;  %v1883_v53 = vstv %s6478_s26 }
 0x404   :  { %s6501_s29 = smul.f32 %s6264_s3, %s9072_s11  ;;  %s6505_s23 = sadd.f32 %s6482_s24, %s6467_s6  ;;  %v1878_v48 = vsel %vm135_vm2, %v1877_v38, %v1874_v41  ;;  %v1884_v58 = vsel %vm140_vm3, %v1883_v53, %v1880_v49 }
 0x405   :  { %s9073_s8 = sld [smem:[#allocation206_spill]]  ;;  %s1710_s2 = sadd.f32 %s1709_s22, %s6374_s9  ;;  %v1887_v59 = vstv %s6492_s17 }
 0x406   :  { %s9074_s10 = sand.u32 2147483647, %s9068_s18  ;;  %s9075_s5 = sld [smem:[#allocation207_spill]]  ;;  %v1881_v52 = vstv %s6505_s23  ;;  %v1888_v62 = vsel %vm145_vm4, %v1887_v59, %v1884_v58  ;;  %v1891_v1 = vstv %s6501_s29 }
 0x407   :  { %s6515_s14 = smul.f32 %s6264_s3, %s9074_s10  ;;  %s1859_s4 = sadd.f32 %s6505_s23, %s6478_s26  ;;  %v1760_v46 = vstv %s1710_s2  ;;  %v1882_v57 = vsel %vm140_vm3, %v1881_v52, %v1878_v48  ;;  %v1892_v27 = vsel %vm9090_vm5, %v1891_v1, %v1888_v62 }
 0x408   :  { %s9076_s9 = sand.u32 2147483647, %s9070_s25  ;;  %s9077_s0 = sld [smem:[#allocation208_spill]]  ;;  %v1761_v50 = vsel %vm185_vm12, %v1760_v46, %v1757_v43 }
 0x409   :  { %s6528_s13 = smul.f32 %s6264_s3, %s9076_s9  ;;  %s1711_s22 = sadd.f32 %s1710_s2, %s6384_s19  ;;  %v1885_v54 = vstv %s1859_s4  ;;  %v1895_v2 = vstv %s6515_s14 }
 0x40a   :  { %s9079_s25 = sld [smem:[#allocation209_spill]]  ;;  %s1860_s24 = sadd.f32 %s1859_s4, %s6492_s17  ;;  %v1886_v61 = vsel %vm145_vm4, %v1885_v54, %v1882_v57  ;;  %v1896_v51 = vsel %vm155_vm6, %v1895_v2, %v1892_v27 }
 0x40b   :  { %s9078_s18 = sand.u32 2147483647, %s9073_s8  ;;  %s9081_s11 = sld [smem:[#allocation210_spill]]  ;;  %v1764_v56 = vstv %s1711_s22  ;;  %v1899_v6 = vstv %s6528_s13 }
 0x40c   :  { %s6541_s20 = smul.f32 %s6264_s3, %s9078_s18  ;;  %s9080_s19 = sand.u32 2147483647, %s9075_s5  ;;  %v1765_v60 = vsel %vm190_vm13, %v1764_v56, %v1761_v50  ;;  %v1889_v63 = vstv %s1860_s24 }
 0x40d   :  { %s6552_s6 = smul.f32 %s6264_s3, %s9080_s19  ;;  %s1712_s8 = sadd.f32 %s1711_s22, %s6396_s16  ;;  %v1890_v55 = vsel %vm9087_vm8, %v1889_v63, %v1886_v61  ;;  %vm9095_vm8 = vcmp.eq.s32.totalorder %v4367_v32, 6 }
 0x40e   :  { %s9082_s2 = sand.u32 2147483647, %s9077_s0  ;;  %s9083_s5 = sld [smem:[#allocation211_spill]]  ;;  %v1903_v9 = vstv %s6541_s20  ;;  %v1900_v12 = vsel %vm9095_vm8, %v1899_v6, %v1896_v51  ;;  %vm9098_vm5 = vmmov %vm9095_vm8 }
 0x40f   :  { %s6561_s10 = smul.f32 %s6264_s3, %s9082_s2  ;;  %s1861_s23 = sadd.f32 %s1860_s24, %s6501_s29  ;;  %v1768_v0 = vstv %s1712_s8  ;;  %v1907_v4 = vstv %s6552_s6 }
 0x410   :  { %s9084_s16 = sand.u32 2147483647, %s9079_s25  ;;  %s9085_s9 = sld [smem:[#allocation212_spill]]  ;;  %v1769_v3 = vsel %vm195_vm14, %v1768_v0, %v1765_v60 }
 0x411   :  { %s6573_s26 = smul.f32 %s6264_s3, %s9084_s16  ;;  %s1713_s4 = sadd.f32 %s1712_s8, %s6406_s7  ;;  %v1893_v5 = vstv %s1861_s23  ;;  %v1911_v16 = vstv %s6561_s10 }
 0x412   :  { %s9086_s17 = sand.u32 2147483647, %s9081_s11  ;;  %s9088_s22 = sld [smem:[#allocation213_spill]]  ;;  %v1894_v8 = vsel %vm155_vm6, %v1893_v5, %v1890_v55 }
 0x413   :  { %s6584_s0 = smul.f32 %s6264_s3, %s9086_s17  ;;  %s1862_s7 = sadd.f32 %s1861_s23, %s6515_s14  ;;  %v1772_v7 = vstv %s1713_s4  ;;  %v1915_v20 = vstv %s6573_s26 }
 0x414   :  { %s9089_s18 = sand.u32 2147483647, %s9083_s5  ;;  %s9091_s19 = sld [smem:[#allocation214_spill]]  ;;  %v1773_v11 = vsel %vm9071_vm7, %v1772_v7, %v1769_v3  ;;  %vm9099_vm7 = vcmp.eq.s32.totalorder %v4367_v32, 7 }
 0x415   :  { %s6595_s25 = smul.f32 %s6264_s3, %s9089_s18  ;;  %s1714_s24 = sadd.f32 %s1713_s4, %s6418_s15  ;;  %v1897_v10 = vstv %s1862_s7  ;;  %v1904_v15 = vsel %vm9099_vm7, %v1903_v9, %v1900_v12  ;;  %vm9102_vm8 = vmmov %vm9099_vm7  ;;  %v1919_v24 = vstv %s6584_s0  ;;  %vm9128_vm7 = vcmp.eq.s32.totalorder %v4367_v32, 4 }
 0x416   :  { %s9092_s29 = sand.u32 2147483647, %s9085_s9  ;;  %s9094_s15 = sld [smem:[#allocation215_spill]]  ;;  %v1898_v14 = vsel %vm9098_vm5, %v1897_v10, %v1894_v8  ;;  %v1908_v19 = vsel %vm170_vm9, %v1907_v4, %v1904_v15  ;;  %vm9114_vm5 = vcmp.eq.s32.totalorder %v4367_v32, 14 }
 0x417   :  { %s6605_s11 = smul.f32 %s6264_s3, %s9092_s29  ;;  %s1863_s2 = sadd.f32 %s1862_s7, %s6528_s13  ;;  %v1776_v13 = vstv %s1714_s24  ;;  %v1912_v23 = vsel %vm175_vm10, %v1911_v16, %v1908_v19  ;;  %v1923_v30 = vstv %s6595_s25 }
 0x418   :  { %s9093_s14 = sand.u32 2147483647, %s9088_s22  ;;  %s1715_s5 = sadd.f32 %s1714_s24, %s6428_s27  ;;  %v1777_v17 = vsel %vm205_vm0, %v1776_v13, %v1773_v11  ;;  %v1916_v29 = vsel %vm180_vm11, %v1915_v20, %v1912_v23 }
 0x419   :  { %s6617_s8 = smul.f32 %s6264_s3, %s9093_s14  ;;  %s9096_s16 = sld [smem:[#allocation216_spill]]  ;;  %v1901_v18 = vstv %s1863_s2  ;;  %v1920_v35 = vsel %vm185_vm12, %v1919_v24, %v1916_v29  ;;  %v1927_v36 = vstv %s6605_s11 }
 0x41a   :  { %s9097_s23 = sand.u32 2147483647, %s9091_s19  ;;  %s1864_s13 = sadd.f32 %s1863_s2, %s6541_s20  ;;  %v1780_v21 = vstv %s1715_s5  ;;  %v1902_v22 = vsel %vm9102_vm8, %v1901_v18, %v1898_v14  ;;  %v1924_v37 = vsel %vm190_vm13, %v1923_v30, %v1920_v35  ;;  %vm9131_vm8 = vmmov %vm9128_vm7 }
 0x41b   :  { %s6627_s9 = smul.f32 %s6264_s3, %s9097_s23  ;;  %s9100_s27 = sld [smem:[#allocation217_spill]]  ;;  %v1781_v25 = vsel %vm210_vm15, %v1780_v21, %v1777_v17  ;;  %v1931_v39 = vstv %s6617_s8  ;;  %v1928_v42 = vsel %vm195_vm14, %v1927_v36, %v1924_v37 }
 0x41c   :  { %s9101_s3 = sand.u32 2147483647, %s9094_s15  ;;  %s9103_s17 = sld [smem:[#allocation218_spill]]  ;;  %v1905_v26 = vstv %s1864_s13  ;;  %v1784_v33 = vadd.f32 %v6536_v47, %v1781_v25  ;;  %v1932_v45 = vsel %vm9114_vm5, %v1931_v39, %v1928_v42 }
 0x41d   :  { %s6643_s4 = smul.f32 %s6456_s21, %s9101_s3  ;;  %s6655_s18 = spop %2889  ;;  %v1906_v34 = vsel %vm170_vm9, %v1905_v26, %v1902_v22  ;;  %v1935_v40 = vstv %s6627_s9 }
 0x41e   :  { %s1865_s7 = sadd.f32 %s1864_s13, %s6552_s6  ;;  %s9105_s19 = sld [smem:[#allocation219_spill]]  ;;  %1786 = vst [vmem:[#allocation7 + $0x50] sm:$0xff] %v1784_v33  ;;  %v1936_v49 = vsel %vm205_vm0, %v1935_v40, %v1932_v45 }
 0x41f   :  { %s9104_s20 = sand.u32 2147483647, %s9096_s16  ;;  %s9107_s14 = sld [smem:[#allocation220_spill]]  ;;  %v2030_v43 = vstv %s6643_s4  ;;  %v1939_v54 = vsel %vm210_vm15, %v1935_v40, %v1936_v49 }
 0x420   :  { %s6653_s22 = smul.f32 %s6456_s21, %s9104_s20  ;;  %s1866_s5 = sadd.f32 %s1865_s7, %s6561_s10  ;;  %v1909_v28 = vstv %s1865_s7  ;;  %v2031_v46 = vsel %vm130_vm1, %v2030_v43, 0.0  ;;  %v6748_v59 = vmul.f32 %v1939_v54, %v4612_v31 }
 0x421   :  { %s9106_s24 = sand.u32 2147483647, %s9100_s27  ;;  %s9109_s16 = sld [smem:[#allocation221_spill]]  ;;  %v1910_v41 = vsel %vm175_vm10, %v1909_v28, %v1906_v34 }
 0x422   :  { %s6666_s29 = smul.f32 %s6456_s21, %s9106_s24  ;;  %s9108_s6 = sand.u32 2147483647, %s9103_s17  ;;  %v2032_v44 = vstv %s6653_s22  ;;  %v1913_v38 = vstv %s1866_s5 }
 0x423   :  { %s6677_s15 = smul.f32 %s6456_s21, %s9108_s6  ;;  %s6681_s2 = sadd.f32 %s6653_s22, %s6643_s4  ;;  %v2033_v47 = vsel %vm130_vm1, %v2032_v44, 0.0  ;;  %v1914_v48 = vsel %vm180_vm11, %v1913_v38, %v1910_v41 }
 0x424   :  { %s9110_s23 = sand.u32 2147483647, %s9105_s19  ;;  %s9111_s27 = sld [smem:[#allocation222_spill]]  ;;  %v2036_v52 = vstv %s6666_s29 }
 0x425   :  { %s6691_s13 = smul.f32 %s6456_s21, %s9110_s23  ;;  %s9112_s10 = sand.u32 2147483647, %s9107_s14  ;;  %v2034_v50 = vstv %s6681_s2  ;;  %v2037_v57 = vsel %vm135_vm2, %v2036_v52, %v2033_v47  ;;  %v2040_v61 = vstv %s6677_s15 }
 0x426   :  { %s6700_s3 = smul.f32 %s6456_s21, %s9112_s10  ;;  %s6704_s17 = sadd.f32 %s6681_s2, %s6666_s29  ;;  %v2035_v56 = vsel %vm135_vm2, %v2034_v50, %v2031_v46  ;;  %v2041_v0 = vsel %vm140_vm3, %v2040_v61, %v2037_v57 }
 0x427   :  { %s9113_s20 = sld [smem:[#allocation223_spill]]  ;;  %s1867_s7 = sadd.f32 %s1866_s5, %s6573_s26  ;;  %v2044_v3 = vstv %s6691_s13 }
 0x428   :  { %s9115_s19 = sand.u32 2147483647, %s9109_s16  ;;  %s9116_s14 = sld [smem:[#allocation224_spill]]  ;;  %v2038_v60 = vstv %s6704_s17  ;;  %v2045_v6 = vsel %vm145_vm4, %v2044_v3, %v2041_v0  ;;  %v2048_v8 = vstv %s6700_s3 }
 0x429   :  { %s6714_s24 = smul.f32 %s6456_s21, %s9115_s19  ;;  %s2016_s22 = sadd.f32 %s6704_s17, %s6677_s15  ;;  %v1917_v53 = vstv %s1867_s7  ;;  %v2039_v63 = vsel %vm140_vm3, %v2038_v60, %v2035_v56  ;;  %v2049_v9 = vsel %vm9131_vm8, %v2048_v8, %v2045_v6 }
 0x42a   :  { %s9117_s26 = sand.u32 2147483647, %s9111_s27  ;;  %s9118_s6 = sld [smem:[#allocation225_spill]]  ;;  %v1918_v58 = vsel %vm185_vm12, %v1917_v53, %v1914_v48 }
 0x42b   :  { %s6727_s4 = smul.f32 %s6456_s21, %s9117_s26  ;;  %s1868_s5 = sadd.f32 %s1867_s7, %s6584_s0  ;;  %v2042_v55 = vstv %s2016_s22  ;;  %v2052_v10 = vstv %s6714_s24 }
 0x42c   :  { %s9120_s27 = sld [smem:[#allocation226_spill]]  ;;  %s2017_s2 = sadd.f32 %s2016_s22, %s6691_s13  ;;  %v2043_v2 = vsel %vm145_vm4, %v2042_v55, %v2039_v63  ;;  %v2053_v13 = vsel %vm155_vm6, %v2052_v10, %v2049_v9 }
 0x42d   :  { %s9119_s16 = sand.u32 2147483647, %s9113_s20  ;;  %s9122_s10 = sld [smem:[#allocation227_spill]]  ;;  %v1921_v62 = vstv %s1868_s5  ;;  %v2056_v14 = vstv %s6727_s4 }
 0x42e   :  { %s6739_s23 = smul.f32 %s6456_s21, %s9119_s16  ;;  %s9121_s0 = sand.u32 2147483647, %s9116_s14  ;;  %v1922_v1 = vsel %vm190_vm13, %v1921_v62, %v1918_v58  ;;  %v2046_v27 = vstv %s2017_s2 }
 0x42f   :  { %s6753_s29 = smul.f32 %s6456_s21, %s9121_s0  ;;  %s1869_s20 = sadd.f32 %s1868_s5, %s6595_s25  ;;  %v2047_v7 = vsel %vm9128_vm7, %v2046_v27, %v2043_v2  ;;  %vm9136_vm7 = vcmp.eq.s32.totalorder %v4367_v32, 6 }
 0x430   :  { %s9123_s7 = sand.u32 2147483647, %s9118_s6  ;;  %s9124_s14 = sld [smem:[#allocation228_spill]]  ;;  %v2057_v17 = vsel %vm9136_vm7, %v2056_v14, %v2053_v13  ;;  %v2060_v18 = vstv %s6739_s23  ;;  %vm9139_vm8 = vmmov %vm9136_vm7 }
 0x431   :  { %s6762_s19 = smul.f32 %s6456_s21, %s9123_s7  ;;  %s2018_s17 = sadd.f32 %s2017_s2, %s6700_s3  ;;  %v1925_v5 = vstv %s1869_s20  ;;  %v2064_v22 = vstv %s6753_s29 }
 0x432   :  { %s9125_s15 = sand.u32 2147483647, %s9120_s27  ;;  %s9126_s26 = sld [smem:[#allocation229_spill]]  ;;  %v1926_v51 = vsel %vm195_vm14, %v1925_v5, %v1922_v1 }
 0x433   :  { %s6773_s25 = smul.f32 %s6456_s21, %s9125_s15  ;;  %s1870_s6 = sadd.f32 %s1869_s20, %s6605_s11  ;;  %v2050_v11 = vstv %s2018_s17  ;;  %v2068_v26 = vstv %s6762_s19 }
 0x434   :  { %s9127_s5 = sand.u32 2147483647, %s9122_s10  ;;  %s9129_s16 = sld [smem:[#allocation230_spill]]  ;;  %v2051_v4 = vsel %vm155_vm6, %v2050_v11, %v2047_v7 }
 0x435   :  { %s6783_s22 = smul.f32 %s6456_s21, %s9127_s5  ;;  %s2019_s27 = sadd.f32 %s2018_s17, %s6714_s24  ;;  %v1929_v12 = vstv %s1870_s6  ;;  %v2072_v34 = vstv %s6773_s25 }
 0x436   :  { %s9130_s13 = sand.u32 2147483647, %s9124_s14  ;;  %s9132_s0 = sld [smem:[#allocation231_spill]]  ;;  %v1930_v15 = vsel %vm9114_vm5, %v1929_v12, %v1926_v51  ;;  %vm9140_vm5 = vcmp.eq.s32.totalorder %v4367_v32, 7 }
 0x437   :  { %s6795_s11 = smul.f32 %s6456_s21, %s9130_s13  ;;  %s1871_s2 = sadd.f32 %s1870_s6, %s6617_s8  ;;  %v2054_v16 = vstv %s2019_s27  ;;  %v2061_v21 = vsel %vm9140_vm5, %v2060_v18, %v2057_v17  ;;  %vm9143_vm7 = vmmov %vm9140_vm5  ;;  %v2076_v37 = vstv %s6783_s22  ;;  %vm9171_vm5 = vcmp.eq.s32.totalorder %v4367_v32, 4 }
 0x438   :  { %s9133_s10 = sand.u32 2147483647, %s9126_s26  ;;  %s9135_s8 = sld [smem:[#allocation232_spill]]  ;;  %v2055_v20 = vsel %vm9139_vm8, %v2054_v16, %v2051_v4  ;;  %v2065_v25 = vsel %vm170_vm9, %v2064_v22, %v2061_v21  ;;  %vm9155_vm8 = vcmp.eq.s32.totalorder %v4367_v32, 14 }
 0x439   :  { %s6805_s3 = smul.f32 %s6456_s21, %s9133_s10  ;;  %s2020_s7 = sadd.f32 %s2019_s27, %s6727_s4  ;;  %v1933_v19 = vstv %s1871_s2  ;;  %v2069_v33 = vsel %vm175_vm10, %v2068_v26, %v2065_v25  ;;  %v2080_v42 = vstv %s6795_s11 }
 0x43a   :  { %s9134_s20 = sand.u32 2147483647, %s9129_s16  ;;  %s1872_s14 = sadd.f32 %s1871_s2, %s6627_s9  ;;  %v1934_v23 = vsel %vm205_vm0, %v1933_v19, %v1930_v15  ;;  %v2073_v28 = vsel %vm180_vm11, %v2072_v34, %v2069_v33 }
 0x43b   :  { %s6817_s24 = smul.f32 %s6456_s21, %s9134_s20  ;;  %s9137_s15 = sld [smem:[#allocation233_spill]]  ;;  %v2058_v24 = vstv %s2020_s7  ;;  %v2077_v41 = vsel %vm185_vm12, %v2076_v37, %v2073_v28  ;;  %v2084_v38 = vstv %s6805_s3 }
 0x43c   :  { %s9138_s17 = sand.u32 2147483647, %s9132_s0  ;;  %s2021_s4 = sadd.f32 %s2020_s7, %s6739_s23  ;;  %v1937_v29 = vstv %s1872_s14  ;;  %v2059_v30 = vsel %vm9143_vm7, %v2058_v24, %v2055_v20  ;;  %v2081_v44 = vsel %vm190_vm13, %v2080_v42, %v2077_v41  ;;  %vm9172_vm7 = vmmov %vm9171_vm5 }
 0x43d   :  { %s6827_s26 = smul.f32 %s6456_s21, %s9138_s17  ;;  %s9141_s9 = sld [smem:[#allocation234_spill]]  ;;  %v1938_v35 = vsel %vm210_vm15, %v1937_v29, %v1934_v23  ;;  %v2088_v45 = vstv %s6817_s24  ;;  %v2085_v47 = vsel %vm195_vm14, %v2084_v38, %v2081_v44 }
 0x43e   :  { %s9142_s21 = sand.u32 2147483647, %s9135_s8  ;;  %s9144_s5 = sld [smem:[#allocation235_spill]]  ;;  %v2062_v36 = vstv %s2021_s4  ;;  %v1941_v39 = vadd.f32 %v6748_v59, %v1938_v35  ;;  %v2089_v52 = vsel %vm9155_vm8, %v2088_v45, %v2085_v47 }
 0x43f   :  { %s6843_s6 = smul.f32 %s6655_s18, %s9142_s21  ;;  %s6855_s13 = spop %2891  ;;  %v2063_v40 = vsel %vm170_vm9, %v2062_v36, %v2059_v30  ;;  %v2092_v48 = vstv %s6827_s26 }
 0x440   :  { %s2022_s27 = sadd.f32 %s2021_s4, %s6753_s29  ;;  %s9146_s0 = sld [smem:[#allocation236_spill]]  ;;  %1943 = vst [vmem:[#allocation7 + $0x58] sm:$0xff] %v1941_v39  ;;  %v2093_v57 = vsel %vm205_vm0, %v2092_v48, %v2089_v52 }
 0x441   :  { %s9145_s23 = sand.u32 2147483647, %s9137_s15  ;;  %s9148_s20 = sld [smem:[#allocation237_spill]]  ;;  %v2187_v49 = vstv %s6843_s6  ;;  %v2096_v61 = vsel %vm210_vm15, %v2092_v48, %v2093_v57 }
 0x442   :  { %s6853_s16 = smul.f32 %s6655_s18, %s9145_s23  ;;  %s2023_s14 = sadd.f32 %s2022_s27, %s6762_s19  ;;  %v2066_v43 = vstv %s2022_s27  ;;  %v2188_v53 = vsel %vm130_vm1, %v2187_v49, 0.0  ;;  %v6947_v55 = vmul.f32 %v2096_v61, %v4612_v31 }
 0x443   :  { %s9147_s2 = sand.u32 2147483647, %s9141_s9  ;;  %s9150_s15 = sld [smem:[#allocation238_spill]]  ;;  %v2067_v46 = vsel %vm175_vm10, %v2066_v43, %v2063_v40 }
 0x444   :  { %s6866_s10 = smul.f32 %s6655_s18, %s9147_s2  ;;  %s9149_s29 = sand.u32 2147483647, %s9144_s5  ;;  %v2070_v50 = vstv %s2023_s14  ;;  %v2189_v54 = vstv %s6853_s16 }
 0x445   :  { %s6877_s8 = smul.f32 %s6655_s18, %s9149_s29  ;;  %s6881_s7 = sadd.f32 %s6853_s16, %s6843_s6  ;;  %v2071_v56 = vsel %vm180_vm11, %v2070_v50, %v2067_v46  ;;  %v2190_v58 = vsel %vm130_vm1, %v2189_v54, 0.0 }
 0x446   :  { %s9151_s17 = sand.u32 2147483647, %s9146_s0  ;;  %s9152_s9 = sld [smem:[#allocation239_spill]]  ;;  %v2193_v63 = vstv %s6866_s10 }
 0x447   :  { %s6891_s4 = smul.f32 %s6655_s18, %s9151_s17  ;;  %s9153_s19 = sand.u32 2147483647, %s9148_s20  ;;  %v2191_v59 = vstv %s6881_s7  ;;  %v2194_v1 = vsel %vm135_vm2, %v2193_v63, %v2190_v58  ;;  %v2197_v5 = vstv %s6877_s8 }
 0x448   :  { %s6901_s21 = smul.f32 %s6655_s18, %s9153_s19  ;;  %s6905_s5 = sadd.f32 %s6881_s7, %s6866_s10  ;;  %v2192_v62 = vsel %vm135_vm2, %v2191_v59, %v2188_v53  ;;  %v2198_v8 = vsel %vm140_vm3, %v2197_v5, %v2194_v1 }
 0x449   :  { %s9154_s23 = sld [smem:[#allocation240_spill]]  ;;  %s2024_s27 = sadd.f32 %s2023_s14, %s6773_s25  ;;  %v2201_v9 = vstv %s6891_s4 }
 0x44a   :  { %s9156_s0 = sand.u32 2147483647, %s9150_s15  ;;  %s9157_s20 = sld [smem:[#allocation241_spill]]  ;;  %v2195_v2 = vstv %s6905_s5  ;;  %v2202_v10 = vsel %vm145_vm4, %v2201_v9, %v2198_v8  ;;  %v2205_v4 = vstv %s6901_s21 }
 0x44b   :  { %s6914_s2 = smul.f32 %s6655_s18, %s9156_s0  ;;  %s2173_s29 = sadd.f32 %s6905_s5, %s6877_s8  ;;  %v2074_v60 = vstv %s2024_s27  ;;  %v2196_v27 = vsel %vm140_vm3, %v2195_v2, %v2192_v62  ;;  %v2206_v15 = vsel %vm9172_vm7, %v2205_v4, %v2202_v10 }
 0x44c   :  { %s9158_s25 = sand.u32 2147483647, %s9152_s9  ;;  %s9159_s14 = sld [smem:[#allocation242_spill]]  ;;  %v2075_v0 = vsel %vm185_vm12, %v2074_v60, %v2071_v56 }
 0x44d   :  { %s6926_s6 = smul.f32 %s6655_s18, %s9158_s25  ;;  %s2025_s16 = sadd.f32 %s2024_s27, %s6783_s22  ;;  %v2199_v6 = vstv %s2173_s29  ;;  %v2209_v19 = vstv %s6914_s2 }
 0x44e   :  { %s9161_s9 = sld [smem:[#allocation243_spill]]  ;;  %s2174_s19 = sadd.f32 %s2173_s29, %s6891_s4  ;;  %v2200_v51 = vsel %vm145_vm4, %v2199_v6, %v2196_v27  ;;  %v2210_v22 = vsel %vm155_vm6, %v2209_v19, %v2206_v15 }
 0x44f   :  { %s9160_s15 = sand.u32 2147483647, %s9154_s23  ;;  %s9163_s23 = sld [smem:[#allocation244_spill]]  ;;  %v2078_v3 = vstv %s2025_s16  ;;  %v2213_v20 = vstv %s6926_s6 }
 0x450   :  { %s6939_s17 = smul.f32 %s6655_s18, %s9160_s15  ;;  %s9162_s22 = sand.u32 2147483647, %s9157_s20  ;;  %v2079_v7 = vsel %vm190_vm13, %v2078_v3, %v2075_v0  ;;  %v2203_v12 = vstv %s2174_s19 }
 0x451   :  { %s6952_s7 = smul.f32 %s6655_s18, %s9162_s22  ;;  %s2026_s27 = sadd.f32 %s2025_s16, %s6795_s11  ;;  %v2204_v14 = vsel %vm9171_vm5, %v2203_v12, %v2200_v51  ;;  %vm9179_vm5 = vcmp.eq.s32.totalorder %v4367_v32, 6 }
 0x452   :  { %s9164_s10 = sand.u32 2147483647, %s9159_s14  ;;  %s9165_s20 = sld [smem:[#allocation245_spill]]  ;;  %v2217_v24 = vstv %s6939_s17  ;;  %vm9180_vm7 = vmmov %vm9179_vm5 }
 0x453   :  { %s6962_s0 = smul.f32 %s6655_s18, %s9164_s10  ;;  %s2175_s11 = sadd.f32 %s2174_s19, %s6901_s21  ;;  %v2082_v11 = vstv %s2026_s27  ;;  %v2214_v29 = vsel %vm9180_vm7, %v2213_v20, %v2210_v22  ;;  %v2221_v30 = vstv %s6952_s7  ;;  %vm9198_vm7 = vcmp.eq.s32.totalorder %v4367_v32, 14 }
 0x454   :  { %s9166_s25 = sand.u32 2147483647, %s9161_s9  ;;  %s9167_s5 = sld [smem:[#allocation246_spill]]  ;;  %v2083_v13 = vsel %vm195_vm14, %v2082_v11, %v2079_v7 }
 0x455   :  { %s6972_s15 = smul.f32 %s6655_s18, %s9166_s25  ;;  %s2027_s8 = sadd.f32 %s2026_s27, %s6805_s3  ;;  %v2207_v16 = vstv %s2175_s11  ;;  %v2225_v36 = vstv %s6962_s0 }
 0x456   :  { %s9168_s29 = sand.u32 2147483647, %s9163_s23  ;;  %s9169_s16 = sld [smem:[#allocation247_spill]]  ;;  %v2208_v18 = vsel %vm155_vm6, %v2207_v16, %v2204_v14 }
 0x457   :  { %s6984_s14 = smul.f32 %s6655_s18, %s9168_s29  ;;  %s2176_s3 = sadd.f32 %s2175_s11, %s6914_s2  ;;  %v2086_v17 = vstv %s2027_s8  ;;  %v2229_v40 = vstv %s6972_s15 }
 0x458   :  { %s9170_s9 = sand.u32 2147483647, %s9165_s20  ;;  %s9173_s22 = sld [smem:[#allocation248_spill]]  ;;  %v2087_v21 = vsel %vm9155_vm8, %v2086_v17, %v2083_v13  ;;  %vm9182_vm8 = vcmp.eq.s32.totalorder %v4367_v32, 7 }
 0x459   :  { %s6994_s4 = smul.f32 %s6655_s18, %s9170_s9  ;;  %s2028_s19 = sadd.f32 %s2027_s8, %s6817_s24  ;;  %v2211_v23 = vstv %s2176_s3  ;;  %v2218_v35 = vsel %vm9182_vm8, %v2217_v24, %v2214_v29  ;;  %v2233_v44 = vstv %s6984_s14 }
 0x45a   :  { %s9174_s21 = sand.u32 2147483647, %s9167_s5  ;;  %s9176_s20 = sld [smem:[#allocation249_spill]]  ;;  %v2212_v26 = vsel %vm9179_vm5, %v2211_v23, %v2208_v18  ;;  %vm9184_vm5 = vmmov %vm9182_vm8  ;;  %v2222_v39 = vsel %vm170_vm9, %v2221_v30, %v2218_v35  ;;  %vm9212_vm8 = vcmp.eq.s32.totalorder %v4367_v32, 4 }
 0x45b   :  { %s7005_s23 = smul.f32 %s6655_s18, %s9174_s21  ;;  %s2177_s24 = sadd.f32 %s2176_s3, %s6926_s6  ;;  %v2090_v25 = vstv %s2028_s19  ;;  %v2226_v43 = vsel %vm175_vm10, %v2225_v36, %v2222_v39  ;;  %v2237_v47 = vstv %s6994_s4 }
 0x45c   :  { %s9175_s27 = sand.u32 2147483647, %s9169_s16  ;;  %s2029_s25 = sadd.f32 %s2028_s19, %s6827_s26  ;;  %v2091_v33 = vsel %vm205_vm0, %v2090_v25, %v2087_v21  ;;  %v2230_v46 = vsel %vm180_vm11, %v2229_v40, %v2226_v43 }
 0x45d   :  { %s7016_s10 = smul.f32 %s6655_s18, %s9175_s27  ;;  %s9177_s11 = sld [smem:[#allocation250_spill]]  ;;  %v2215_v34 = vstv %s2177_s24  ;;  %v2234_v49 = vsel %vm185_vm12, %v2233_v44, %v2230_v46  ;;  %v2241_v50 = vstv %s7005_s23 }
 0x45e   :  { %s9178_s2 = sand.u32 2147483647, %s9173_s22  ;;  %s2178_s6 = sadd.f32 %s2177_s24, %s6939_s17  ;;  %v2094_v28 = vstv %s2029_s25  ;;  %v2216_v37 = vsel %vm9184_vm5, %v2215_v34, %v2212_v26  ;;  %v2238_v54 = vsel %vm190_vm13, %v2237_v47, %v2234_v49  ;;  %vm9214_vm5 = vmmov %vm9212_vm8 }
 0x45f   :  { %s7026_s5 = smul.f32 %s6655_s18, %s9178_s2  ;;  %s9181_s26 = sld [smem:[#allocation251_spill]]  ;;  %v2095_v41 = vsel %vm210_vm15, %v2094_v28, %v2091_v33  ;;  %v2245_v52 = vstv %s7016_s10  ;;  %v2242_v59 = vsel %vm195_vm14, %v2241_v50, %v2238_v54 }
 0x460   :  { %s9183_s18 = sand.u32 2147483647, %s9176_s20  ;;  %s9185_s29 = sld [smem:[#allocation252_spill]]  ;;  %v2219_v42 = vstv %s2178_s6  ;;  %v2098_v38 = vadd.f32 %v6947_v55, %v2095_v41  ;;  %v2246_v63 = vsel %vm9198_vm7, %v2245_v52, %v2242_v59 }
 0x461   :  { %s7042_s8 = smul.f32 %s6855_s13, %s9183_s18  ;;  %s7054_s9 = spop %2893  ;;  %v2220_v45 = vsel %vm170_vm9, %v2219_v42, %v2216_v37  ;;  %v2249_v56 = vstv %s7026_s5 }
 0x462   :  { %s2179_s3 = sadd.f32 %s2178_s6, %s6952_s7  ;;  %s9187_s22 = sld [smem:[#allocation253_spill]]  ;;  %2100 = vst [vmem:[#allocation7 + $0x60] sm:$0xff] %v2098_v38  ;;  %v2250_v2 = vsel %vm205_vm0, %v2249_v56, %v2246_v63 }
 0x463   :  { %s9186_s17 = sand.u32 2147483647, %s9177_s11  ;;  %s9189_s27 = sld [smem:[#allocation254_spill]]  ;;  %v2344_v57 = vstv %s7042_s8  ;;  %v2253_v6 = vsel %vm210_vm15, %v2249_v56, %v2250_v2 }
 0x464   :  { %s7052_s16 = smul.f32 %s6855_s13, %s9186_s17  ;;  %s2180_s25 = sadd.f32 %s2179_s3, %s6962_s0  ;;  %v2223_v48 = vstv %s2179_s3  ;;  %v2345_v60 = vsel %vm130_vm1, %v2344_v57, 0.0  ;;  %v2254_v9 = vmul.f32 %v2253_v6, %v4612_v31 }
 0x465   :  { %s9188_s19 = sand.u32 2147483647, %s9181_s26  ;;  %s9191_s11 = sld [smem:[#allocation255_spill]]  ;;  %v2224_v53 = vsel %vm175_vm10, %v2223_v48, %v2220_v45 }
 0x466   :  { %s7065_s21 = smul.f32 %s6855_s13, %s9188_s19  ;;  %s9190_s7 = sand.u32 2147483647, %s9185_s29  ;;  %v2227_v58 = vstv %s2180_s25  ;;  %v2346_v61 = vstv %s7052_s16 }
 0x467   :  { %s7076_s20 = smul.f32 %s6855_s13, %s9190_s7  ;;  %s7080_s24 = sadd.f32 %s7052_s16, %s7042_s8  ;;  %v2228_v62 = vsel %vm180_vm11, %v2227_v58, %v2224_v53  ;;  %v2347_v0 = vsel %vm130_vm1, %v2346_v61, 0.0 }
 0x468   :  { %s9192_s2 = sand.u32 2147483647, %s9187_s22  ;;  %s9193_s26 = sld [smem:[#allocation256_spill]]  ;;  %v2350_v27 = vstv %s7065_s21 }
 0x469   :  { %s7090_s6 = smul.f32 %s6855_s13, %s9192_s2  ;;  %s9194_s0 = sand.u32 2147483647, %s9189_s27  ;;  %v2348_v55 = vstv %s7080_s24  ;;  %v2351_v7 = vsel %vm135_vm2, %v2350_v27, %v2347_v0  ;;  %v2354_v10 = vstv %s7076_s20 }
 0x46a   :  { %s7100_s18 = smul.f32 %s6855_s13, %s9194_s0  ;;  %s7104_s29 = sadd.f32 %s7080_s24, %s7065_s21  ;;  %v2349_v3 = vsel %vm135_vm2, %v2348_v55, %v2345_v60  ;;  %v2355_v4 = vsel %vm140_vm3, %v2354_v10, %v2351_v7 }
 0x46b   :  { %s9195_s17 = sld [smem:[#allocation257_spill]]  ;;  %s2181_s3 = sadd.f32 %s2180_s25, %s6972_s15  ;;  %v2358_v14 = vstv %s7090_s6 }
 0x46c   :  { %s9196_s22 = sand.u32 2147483647, %s9191_s11  ;;  %s9197_s27 = sld [smem:[#allocation258_spill]]  ;;  %v2352_v8 = vstv %s7104_s29  ;;  %v2359_v17 = vsel %vm145_vm4, %v2358_v14, %v2355_v4  ;;  %v2362_v21 = vstv %s7100_s18 }
 0x46d   :  { %s7113_s19 = smul.f32 %s6855_s13, %s9196_s22  ;;  %s7129_s7 = sadd.f32 %s7104_s29, %s7076_s20  ;;  %v2231_v1 = vstv %s2181_s3  ;;  %v2353_v11 = vsel %vm140_vm3, %v2352_v8, %v2349_v3  ;;  %v2363_v24 = vsel %vm9214_vm5, %v2362_v21, %v2359_v17 }
 0x46e   :  { %s9199_s15 = sand.u32 2147483647, %s9193_s26  ;;  %s9200_s16 = sld [smem:[#allocation259_spill]]  ;;  %v2232_v5 = vsel %vm185_vm12, %v2231_v1, %v2228_v62 }
 0x46f   :  { %s7125_s8 = smul.f32 %s6855_s13, %s9199_s15  ;;  %s2182_s25 = sadd.f32 %s2181_s3, %s6984_s14  ;;  %v2356_v13 = vstv %s7129_s7  ;;  %v2366_v26 = vstv %s7113_s19 }
 0x470   :  { %s9202_s26 = sld [smem:[#allocation260_spill]]  ;;  %s2331_s0 = sadd.f32 %s7129_s7, %s7090_s6  ;;  %v2357_v16 = vsel %vm145_vm4, %v2356_v13, %v2353_v11  ;;  %v2367_v30 = vsel %vm155_vm6, %v2366_v26, %v2363_v24 }
 0x471   :  { %s9201_s11 = sand.u32 2147483647, %s9195_s17  ;;  %s9204_s17 = sld [smem:[#allocation261_spill]]  ;;  %v2235_v51 = vstv %s2182_s25  ;;  %v2370_v34 = vstv %s7125_s8 }
 0x472   :  { %s7140_s2 = smul.f32 %s6855_s13, %s9201_s11  ;;  %s9203_s14 = sand.u32 2147483647, %s9197_s27  ;;  %v2236_v12 = vsel %vm190_vm13, %v2235_v51, %v2232_v5  ;;  %v2360_v18 = vstv %s2331_s0 }
 0x473   :  { %s7152_s24 = smul.f32 %s6855_s13, %s9203_s14  ;;  %s2183_s21 = sadd.f32 %s2182_s25, %s6994_s4  ;;  %v2361_v20 = vsel %vm9212_vm8, %v2360_v18, %v2357_v16  ;;  %vm9219_vm8 = vcmp.eq.s32.totalorder %v4367_v32, 6 }
 0x474   :  { %s9205_s3 = sand.u32 2147483647, %s9200_s16  ;;  %s9206_s27 = sld [smem:[#allocation262_spill]]  ;;  %vm9220_vm5 = vmmov %vm9219_vm8  ;;  %v2374_v37 = vstv %s7140_s2 }
 0x475   :  { %s7164_s22 = smul.f32 %s6855_s13, %s9205_s3  ;;  %s2332_s4 = sadd.f32 %s2331_s0, %s7100_s18  ;;  %v2239_v15 = vstv %s2183_s21  ;;  %v2371_v28 = vsel %vm9220_vm5, %v2370_v34, %v2367_v30  ;;  %v2378_v42 = vstv %s7152_s24  ;;  %vm9230_vm5 = vcmp.eq.s32.totalorder %v4367_v32, 14 }
 0x476   :  { %s9207_s15 = sand.u32 2147483647, %s9202_s26  ;;  %s9208_s16 = sld [smem:[#allocation263_spill]]  ;;  %v2240_v19 = vsel %vm195_vm14, %v2239_v15, %v2236_v12 }
 0x477   :  { %s7174_s29 = smul.f32 %s6855_s13, %s9207_s15  ;;  %s2184_s25 = sadd.f32 %s2183_s21, %s7005_s23  ;;  %v2364_v22 = vstv %s2332_s4  ;;  %v2382_v45 = vstv %s7164_s22 }
 0x478   :  { %s9209_s11 = sand.u32 2147483647, %s9204_s17  ;;  %s9210_s26 = sld [smem:[#allocation264_spill]]  ;;  %v2365_v25 = vsel %vm155_vm6, %v2364_v22, %v2361_v20 }
 0x479   :  { %s7185_s20 = smul.f32 %s6855_s13, %s9209_s11  ;;  %s2333_s7 = sadd.f32 %s2332_s4, %s7113_s19  ;;  %v2243_v23 = vstv %s2184_s25  ;;  %v2386_v49 = vstv %s7174_s29 }
 0x47a   :  { %s9211_s6 = sand.u32 2147483647, %s9206_s27  ;;  %s2185_s14 = sadd.f32 %s2184_s25, %s7016_s10  ;;  %v2244_v29 = vsel %vm9198_vm7, %v2243_v23, %v2240_v19  ;;  %vm9221_vm7 = vcmp.eq.s32.totalorder %v4367_v32, 7 }
 0x47b   :  { %s7196_s23 = smul.f32 %s6855_s13, %s9211_s6  ;;  %s9216_s10 = sld [smem:[#allocation266_spill]]  ;;  %v2368_v33 = vstv %s2333_s7  ;;  %v2375_v41 = vsel %vm9221_vm7, %v2374_v37, %v2371_v28  ;;  %v2390_v54 = vstv %s7185_s20 }
 0x47c   :  { %s9213_s17 = sand.u32 2147483647, %s9208_s16  ;;  %s2334_s3 = sadd.f32 %s2333_s7, %s7125_s8  ;;  %v2247_v35 = vstv %s2185_s14  ;;  %v2369_v36 = vsel %vm9219_vm8, %v2368_v33, %v2365_v25  ;;  %vm9223_vm8 = vmmov %vm9221_vm7  ;;  %v2379_v38 = vsel %vm170_vm9, %v2378_v42, %v2375_v41 }
 0x47d   :  { %s7206_s0 = smul.f32 %s6855_s13, %s9213_s17  ;;  %s2186_s27 = sadd.f32 %s2185_s14, %s7026_s5  ;;  %v2248_v39 = vsel %vm205_vm0, %v2247_v35, %v2244_v29  ;;  %v2383_v48 = vsel %vm175_vm10, %v2382_v45, %v2379_v38  ;;  %v2394_v58 = vstv %s7196_s23 }
 0x47e   :  { %s9215_s18 = sand.u32 2147483647, %s9210_s26  ;;  %s9217_s15 = sld [smem:[#allocation267_spill]]  ;;  %v2372_v40 = vstv %s2334_s3  ;;  %v2387_v53 = vsel %vm180_vm11, %v2386_v49, %v2383_v48 }
 0x47f   :  { %s7218_s21 = smul.f32 %s6855_s13, %s9215_s18  ;;  %s9218_s19 = sand.u32 2147483647, %s8617_s1  ;;  %v2251_v43 = vstv %s2186_s27  ;;  %v2373_v44 = vsel %vm9223_vm8, %v2372_v40, %v2369_v36  ;;  %v2391_v57 = vsel %vm185_vm12, %v2390_v54, %v2387_v53  ;;  %v2398_v59 = vstv %s7206_s0  ;;  %vm9254_vm8 = vmmov %vm9221_vm7 }
 0x480   :  { %s7228_s4 = smul.f32 %s6855_s13, %s9218_s19  ;;  %s2335_s8 = sadd.f32 %s2334_s3, %s7140_s2  ;;  %v2252_v46 = vsel %vm210_vm15, %v2251_v43, %v2248_v39  ;;  %v2395_v61 = vsel %vm190_vm13, %v2394_v58, %v2391_v57 }
 0x481   :  { %s9222_s1 = sand.u32 2147483647, %s9216_s10  ;;  %v2255_v50 = vadd.f32 %v2254_v9, %v2252_v46  ;;  %s9225_s25 = sld [smem:[#allocation268_spill]]  ;;  %v2402_v62 = vstv %s7218_s21  ;;  %v2399_v55 = vsel %vm195_vm14, %v2398_v59, %v2395_v61 }
 0x482   :  { %s7244_s13 = smul.f32 %s7054_s9, %s9222_s1  ;;  %s2336_s16 = sadd.f32 %s2335_s8, %s7152_s24  ;;  %v2376_v47 = vstv %s2335_s8  ;;  %v2406_v63 = vstv %s7228_s4  ;;  %v2403_v27 = vsel %vm9230_vm5, %v2402_v62, %v2399_v55 }
 0x483   :  { %v2377_v52 = vsel %vm170_vm9, %v2376_v47, %v2373_v44  ;;  %s9226_s11 = sand.u32 2147483647, %s4294_s30  ;;  %s9227_s7 = sld [smem:[#allocation269_spill]]  ;;  %2257 = vst [vmem:[#allocation7 + $0x68] sm:$0xff] %v2255_v50  ;;  %v2407_v8 = vsel %vm205_vm0, %v2406_v63, %v2403_v27 }
 0x484   :  { %s9224_s5 = sand.u32 2147483647, %s9217_s15  ;;  %s7270_s24 = smul.f32 %s7054_s9, %s9226_s11  ;;  %v2380_v56 = vstv %s2336_s16  ;;  %v2501_v1 = vstv %s7244_s13  ;;  %v2410_v13 = vsel %vm210_vm15, %v2406_v63, %v2407_v8 }
 0x485   :  { %s7254_s2 = smul.f32 %s7054_s9, %s9224_s5  ;;  %s2337_s6 = sadd.f32 %s2336_s16, %s7164_s22  ;;  %v2381_v60 = vsel %vm175_vm10, %v2380_v56, %v2377_v52  ;;  %v2502_v5 = vsel %vm130_vm1, %v2501_v1, 0.0  ;;  %v2411_v41 = vmul.f32 %v2410_v13, %v4612_v31 }
 0x486   :  { %s9229_s18 = sld [smem:[#allocation270_spill]]  ;;  %s9232_s27 = sld [smem:[#allocation271_spill]]  ;;  %v2507_v9 = vstv %s7270_s24 }
 0x487   :  { %s7274_s26 = sadd.f32 %s7254_s2, %s7244_s13  ;;  %s9228_s30 = sand.u32 2147483647, %s9225_s25  ;;  %v2384_v0 = vstv %s2337_s6  ;;  %v2503_v2 = vstv %s7254_s2 }
 0x488   :  { %s7290_s22 = smul.f32 %s7054_s9, %s9228_s30  ;;  %s2338_s17 = sadd.f32 %s2337_s6, %s7174_s29  ;;  %v2385_v3 = vsel %vm180_vm11, %v2384_v0, %v2381_v60  ;;  %v2504_v6 = vsel %vm130_vm1, %v2503_v2, 0.0  ;;  %vm9240_vm1 = vcmp.eq.s32.totalorder %v4367_v32, 4 }
 0x489   :  { %s7294_s14 = sadd.f32 %s7274_s26, %s7270_s24  ;;  %s9231_s10 = sand.u32 2147483647, %s9227_s7  ;;  %v2505_v51 = vstv %s7274_s26  ;;  %v2508_v12 = vsel %vm135_vm2, %v2507_v9, %v2504_v6 }
 0x48a   :  { %s7308_s3 = smul.f32 %s7054_s9, %s9231_s10  ;;  %s2339_s15 = sadd.f32 %s2338_s17, %s7185_s20  ;;  %v2388_v7 = vstv %s2338_s17  ;;  %v2506_v10 = vsel %vm135_vm2, %v2505_v51, %v2502_v5  ;;  %v2511_v15 = vstv %s7290_s22  ;;  %vm9243_vm2 = vmmov %vm9240_vm1 }
 0x48b   :  { %s2487_s29 = sadd.f32 %s7294_s14, %s7290_s22  ;;  %v2389_v11 = vsel %vm185_vm12, %v2388_v7, %v2385_v3  ;;  %s9234_s13 = sld [smem:[#allocation272_spill]]  ;;  %v2509_v14 = vstv %s7294_s14  ;;  %v2512_v18 = vsel %vm140_vm3, %v2511_v15, %v2508_v12 }
 0x48c   :  { %s9233_s19 = sand.u32 2147483647, %s9229_s18  ;;  %s2340_s20 = sadd.f32 %s2339_s15, %s7196_s23  ;;  %v2392_v4 = vstv %s2339_s15  ;;  %v2510_v17 = vsel %vm140_vm3, %v2509_v14, %v2506_v10  ;;  %v2515_v22 = vstv %s7308_s3  ;;  %vm9244_vm3 = vmmov %vm9230_vm5 }
 0x48d   :  { %s7326_s8 = smul.f32 %s7054_s9, %s9233_s19  ;;  %s2488_s1 = sadd.f32 %s2487_s29, %s7308_s3  ;;  %v2393_v16 = vsel %vm190_vm13, %v2392_v4, %v2389_v11  ;;  %v2513_v19 = vstv %s2487_s29  ;;  %v2516_v25 = vsel %vm145_vm4, %v2515_v22, %v2512_v18 }
 0x48e   :  { %s9235_s5 = sand.u32 2147483647, %s9232_s27  ;;  %s9236_s2 = sld [smem:[#allocation273_spill]]  ;;  %v2396_v20 = vstv %s2340_s20  ;;  %v2514_v21 = vsel %vm145_vm4, %v2513_v19, %v2510_v17  ;;  %vm9249_vm4 = vcmp.eq.s32.totalorder %v4367_v32, 6 }
 0x48f   :  { %s7339_s16 = smul.f32 %s7054_s9, %s9235_s5  ;;  %s2489_s25 = sadd.f32 %s2488_s1, %s7326_s8  ;;  %v2517_v23 = vstv %s2488_s1  ;;  %v2397_v24 = vsel %vm195_vm14, %v2396_v20, %v2393_v16  ;;  %v2519_v29 = vstv %s7326_s8 }
 0x490   :  { %s2341_s23 = sadd.f32 %s2340_s20, %s7206_s0  ;;  %s9238_s26 = sld [smem:[#allocation275_spill]]  ;;  %v2518_v26 = vsel %vm9240_vm1, %v2517_v23, %v2514_v21  ;;  %v2520_v33 = vsel %vm9243_vm2, %v2519_v29, %v2516_v25 }
 0x491   :  { %s9237_s11 = sand.u32 2147483647, %s9234_s13  ;;  %s2490_s0 = sadd.f32 %s2489_s25, %s7339_s16  ;;  %v2521_v34 = vstv %s2489_s25  ;;  %v2523_v35 = vstv %s7339_s16 }
 0x492   :  { %s7354_s24 = smul.f32 %s7054_s9, %s9237_s11  ;;  %s9241_s30 = sld [smem:[#allocation276_spill]]  ;;  %v2400_v30 = vstv %s2341_s23  ;;  %v2522_v28 = vsel %vm155_vm6, %v2521_v34, %v2518_v26  ;;  %v2524_v37 = vsel %vm155_vm6, %v2523_v35, %v2520_v33  ;;  %vm9251_vm6 = vmmov %vm9249_vm4 }
 0x493   :  { %s2342_s22 = sadd.f32 %s2341_s23, %s7218_s21  ;;  %s9242_s14 = sand.u32 2147483647, %s8657_s12  ;;  %v2401_v36 = vsel %vm9244_vm3, %v2400_v30, %v2397_v24  ;;  %v2525_v39 = vstv %s2490_s0 }
 0x494   :  { %s9239_s6 = sand.u32 2147483647, %s9236_s2  ;;  %s7376_s17 = smul.f32 %s7054_s9, %s9242_s14  ;;  %v2526_v42 = vsel %vm9249_vm4, %v2525_v39, %v2522_v28  ;;  %v2527_v43 = vstv %s7354_s24 }
 0x495   :  { %s7364_s7 = smul.f32 %s7054_s9, %s9239_s6  ;;  %s2491_s21 = sadd.f32 %s2490_s0, %s7354_s24  ;;  %v2404_v40 = vstv %s2342_s22  ;;  %v2528_v38 = vsel %vm9251_vm6, %v2527_v43, %v2524_v37 }
 0x496   :  { %s9245_s18 = sand.u32 2147483647, %s9238_s26  ;;  %s9246_s12 = sld [smem:[#allocation277_spill]]  ;;  %v2405_v44 = vsel %vm205_vm0, %v2404_v40, %v2401_v36  ;;  %v2535_v50 = vstv %s7376_s17 }
 0x497   :  { %s7386_s10 = smul.f32 %s7054_s9, %s9245_s18  ;;  %s2343_s3 = sadd.f32 %s2342_s22, %s7228_s4  ;;  %v2529_v45 = vstv %s2491_s21  ;;  %v2531_v46 = vstv %s7364_s7 }
 0x498   :  { %s9247_s29 = sand.u32 2147483647, %s9241_s30  ;;  %s9248_s27 = sld [smem:[#allocation278_spill]]  ;;  %v2530_v48 = vsel %vm9221_vm7, %v2529_v45, %v2526_v42  ;;  %v2532_v49 = vsel %vm9254_vm8, %v2531_v46, %v2528_v38 }
 0x499   :  { %s7398_s15 = smul.f32 %s7054_s9, %s9247_s29  ;;  %s9250_s19 = sand.u32 2147483647, %s4340_s28  ;;  %v2408_v47 = vstv %s2343_s3  ;;  %v2536_v54 = vsel %vm170_vm9, %v2535_v50, %v2532_v49  ;;  %v2539_v56 = vstv %s7386_s10 }
 0x49a   :  { %s7408_s4 = smul.f32 %s7054_s9, %s9250_s19  ;;  %s2492_s8 = sadd.f32 %s2491_s21, %s7364_s7  ;;  %v2409_v52 = vsel %vm210_vm15, %v2408_v47, %v2405_v44  ;;  %v2540_v59 = vsel %vm175_vm10, %v2539_v56, %v2536_v54 }
 0x49b   :  { %s9252_s1 = sld [smem:[#allocation279_spill]]  ;;  %v2412_v57 = vadd.f32 %v2411_v41, %v2409_v52  ;;  %s9256_s16 = sld [smem:[#allocation280_spill]]  ;;  %v2543_v60 = vstv %s7398_s15 }
 0x49c   :  { %s9253_s13 = sand.u32 2147483647, %s9246_s12  ;;  %s2493_s2 = sadd.f32 %s2492_s8, %s7376_s17  ;;  %v2533_v53 = vstv %s2492_s8  ;;  %v2544_v62 = vsel %vm180_vm11, %v2543_v60, %v2540_v59  ;;  %v2547_v63 = vstv %s7408_s4 }
 0x49d   :  { %s7417_s20 = smul.f32 %s7054_s9, %s9253_s13  ;;  %v2534_v58 = vsel %vm170_vm9, %v2533_v53, %v2530_v48  ;;  %2414 = vst [vmem:[#allocation7 + $0x70] sm:$0xff] %v2412_v57  ;;  %v2548_v55 = vsel %vm185_vm12, %v2547_v63, %v2544_v62  ;;  %vm9259_vm9 = vmmov %vm9244_vm3  ;;  %s2996_s14 = smov [#allocation7]  }
 0x49e   :  { %s9255_s28 = sand.u32 2147483647, %s9248_s27  ;;  %s2494_s11 = sadd.f32 %s2493_s2, %s7386_s10  ;;  %v2537_v61 = vstv %s2493_s2 }
 0x49f   :  { %s7429_s5 = smul.f32 %s7054_s9, %s9255_s28  ;;  %v2538_v0 = vsel %vm175_vm10, %v2537_v61, %v2534_v58  ;;  %v2551_v1 = vstv %s7417_s20  ;;  %vm9260_vm10 = vmmov %vm9244_vm3  ;;  %s2577_s17 = sshll.u32 %s2996_s14, 4  ;;  %s2578_s17 = int_to_ptr.vmem [resolvable:$true] %s2577_s17 }
 0x4a0   :  { %s2495_s24 = sadd.f32 %s2494_s11, %s7398_s15  ;;  %v2541_v2 = vstv %s2494_s11  ;;  %v2552_v3 = vsel %vm190_vm13, %v2551_v1, %v2548_v55  ;;  %s2964_s18 = scalar_lea.vmem %s2578_s17, 2048 }
 0x4a1   :  { %s9257_s25 = sand.u32 2147483647, %s9252_s1  ;;  %v2555_v27 = vstv %s7429_s5  ;;  %s9258_s26 = sand.u32 2147483647, %s9256_s16  ;;  %v2542_v5 = vsel %vm180_vm11, %v2541_v2, %v2538_v0 }
 0x4a2   :  { %s7443_s23 = smul.f32 %s7054_s9, %s9257_s25  ;;  %v2556_v6 = vsel %vm195_vm14, %v2555_v27, %v2552_v3  ;;  %s2496_s7 = sadd.f32 %s2495_s24, %s7408_s4  ;;  %v2545_v7 = vstv %s2495_s24 }
 0x4a3   :  { %s2484_s6 = smul.f32 %s7054_s9, %s9258_s26  ;;  %v2546_v51 = vsel %vm185_vm12, %v2545_v7, %v2542_v5  ;;  %p2965_p11 = scmp.ne.s32.totalorder %s2578_s17, %s2964_s18 }
 0x4a4   :  { %v2559_v8 = vstv %s7443_s23  ;;  %s2497_s0 = sadd.f32 %s2496_s7, %s7417_s20  ;;  %v2549_v11 = vstv %s2496_s7  ;;  %p2969_p12 = scmp.lt.s32.totalorder %s2578_s17, %s2578_s17 }
 0x4a5   :  { %v2560_v9 = vsel %vm9259_vm9, %v2559_v8, %v2556_v6  ;;  %v2550_v10 = vsel %vm190_vm13, %v2549_v11, %v2546_v51  ;;  %v2563_v12 = vstv %s2484_s6  ;;  %p2970_p13 = scmp.lt.s32.totalorder %s2964_s18, %s2964_s18 }
 0x4a6   :  { %s2498_s9 = sadd.f32 %s2497_s0, %s7429_s5  ;;  %v2553_v4 = vstv %s2497_s0  ;;  %v2564_v13 = vsel %vm205_vm0, %v2563_v12, %v2560_v9 }
 0x4a7   :  { %v2554_v14 = vsel %vm195_vm14, %v2553_v4, %v2550_v10  ;;  %v2567_v17 = vsel %vm210_vm15, %v2563_v12, %v2564_v13  ;;  %p2971_p0 = por %p2970_p13, %p2969_p12 }
 0x4a8   :  { %s2499_s30 = sadd.f32 %s2498_s9, %s7443_s23  ;;  %v2557_v15 = vstv %s2498_s9  ;;  %v2568_v21 = vmul.f32 %v2567_v17, %v4612_v31 }
 0x4a9   :  { %v2558_v16 = vsel %vm9260_vm10, %v2557_v15, %v2554_v14  ;;  %p2972_p1 = pnand %p2971_p0, %p2965_p11 }
 0x4aa   :  { %s2500_s22 = sadd.f32 %s2499_s30, %s2484_s6  ;;  %v2561_v18 = vstv %s2499_s30 }
 0x4ab   :  { %v2562_v19 = vsel %vm205_vm0, %v2561_v18, %v2558_v16 }
 0x4ac   :  { %v2565_v20 = vstv %s2500_s22 }
 0x4ad   :  { %v2566_v22 = vsel %vm210_vm15, %v2565_v20, %v2562_v19 }
 0x4ae   :  { %v2569_v23 = vadd.f32 %v2568_v21, %v2566_v22 }
 0x4b0   :  { %2571 = vst [vmem:[#allocation7 + $0x78] sm:$0xff] %v2569_v23 }
 0x4b1   :  { %2975 = shalt.err (!%p2972_p1)
}
 0x4b2   :  { %s9261_s12 = sld [smem:[#allocation281_spill]] }
 0x4b8   :  { %s2976_s3 = scalar_lea.hbm %s9261_s12, 2048 }
 0x4b9   :  { %p2977_p2 = scmp.ne.s32.totalorder %s9261_s12, %s2976_s3  ;;  %p2980_p3 = scmp.lt.u32.totalorder %s2976_s3, %s9261_s12 }
 0x4bb   :  { %p2982_p4 = pnand %p2980_p3, %p2977_p2 }
 0x4bd   :  { %2985 = shalt.err (!%p2982_p4)
}
 0x4be   :  { %s9262_s4 = smov 8   ;;  %s9263_s8 = smov 128  }
 0x4bf   :  { %2583 = dma.vmem_to_hbm [thread:$0]  %s2578_s17, 2048, %s9261_s12, [#allocation4], %s9263_s8, %s9263_s8, %s9262_s4  }
 0x4c0   :  { %2990 = dma.done.wait [#allocation4], 2048  }
 0x4c1   :  { %2991 = vsyncadd [#allocation4], 4294965248 }
 0x4c2   :  { %2587 = vsyncpa [#allocation3], 1 }
 0x4c3   :  { %2588 = vsyncpa [#allocation4], 1 }
 0x4c4   :  { %2589 = vsyncpa [#allocation5], 1 }

</bundles_post_ra>
